<compile_context>
chip_gen: v5e
topology: v5e:2x2
jax: 0.10.0
libtpu: 0.0.40
codegen_flags: <defaults>
</compile_context>

<pallas_src>
import functools

import numpy as np
import jax
import jax.numpy as jnp
from jax.experimental import pallas as pl
from jax.experimental.pallas import tpu as pltpu


# ----------------------------- network config --------------------------------
# (name, cin, cout, kernel, stride, pad) in forward order.
LAYER_CFG = (
    ("a1", 5, 16, 3, 1, 1),
    ("a2", 16, 16, 3, 1, 1),
    ("a3", 16, 32, 3, 2, 0),
    ("b1", 32, 32, 3, 1, 1),
    ("b2", 32, 32, 3, 1, 1),
    ("b3", 32, 64, 3, 2, 0),
    ("c1", 64, 64, 2, 1, 1),
    ("c2", 64, 64, 2, 1, 1),
    ("c3", 64, 128, 2, 2, 0),
    ("d1", 128, 128, 1, 1, 0),
    ("d2", 128, 128, 1, 1, 0),
    ("d3", 128, 128, 1, 1, 0),
)

_CIN0 = LAYER_CFG[0][1]       # 5 input planes
_CIN0_PAD = 8                 # pad the 5-channel input to 8 lanes


# ------------------------------ Pallas kernel ---------------------------------

def _fused_net_kernel(*refs, plan):
    """Whole-network forward for one batch tile.

    refs = (x_ref, <per-layer refs per `plan`>, w_last_ref, b_last_ref, out_ref).
    plan[i] = (num_taps, has_selector).  Selector layers carry (S, W_packed, b)
    with S (taps, rows_out, rows_in) bf16 and W_packed (taps*Cin, Cout) bf16;
    1x1 layers carry (W, b).  All matmul operands are bf16; accumulation, bias
    add, ReLU and tanh run in f32.
    """
    out_ref = refs[-1]
    in_refs = refs[:-1]
    idx = 0
    x = in_refs[idx][...]                      # (TB*H*W, C) bf16 activations
    idx += 1

    for taps, with_s in plan:
        if with_s:
            s_ref = in_refs[idx]
            w_ref = in_refs[idx + 1]
            b_ref = in_refs[idx + 2]
            idx += 3
            # im2col gather: one 0/1-selector matmul per tap (exact selection,
            # zero padding included), concatenated along lanes.
            gathers = []
            for t in range(taps):
                g = jnp.dot(s_ref[t], x, preferred_element_type=jnp.float32)
                gathers.append(g.astype(jnp.bfloat16))
            x_cat = gathers[0] if taps == 1 else jnp.concatenate(gathers, axis=-1)
            # Single packed weight matmul, contraction = taps*Cin.
            y = jnp.dot(x_cat, w_ref[...], preferred_element_type=jnp.float32)
        else:                                   # 1x1 stride-1 conv == matmul
            w_ref = in_refs[idx]
            b_ref = in_refs[idx + 1]
            idx += 2
            y = jnp.dot(x, w_ref[...], preferred_element_type=jnp.float32)
        x = jnp.maximum(y + b_ref[...], 0.0).astype(jnp.bfloat16)   # f32 ReLU

    w_last_ref, b_last_ref = in_refs[idx], in_refs[idx + 1]
    logits = jnp.dot(x, w_last_ref[...], preferred_element_type=jnp.float32)
    out_ref[...] = jnp.tanh(logits + b_last_ref[...])


# --------------------------- build-time layout --------------------------------

def _selector_matrices(tb, h, w, k, stride, pad):
    """Per-TILE 0/1 gather matrices S_t (one per kernel tap).

    Rows are ordered (image-in-tile, y, x) row-major; out-of-bounds source
    positions leave the row all-zero, reproducing zero padding exactly.
    """
    ho = (h + 2 * pad - k) // stride + 1
    wo = (w + 2 * pad - k) // stride + 1
    s = np.zeros((k * k, tb * ho * wo, tb * h * w), np.float32)
    for b in range(tb):
        for oy in range(ho):
            for ox in range(wo):
                r_out = (b * ho + oy) * wo + ox
                for i in range(k):
                    for j in range(k):
                        iy = oy * stride + i - pad
                        ix = ox * stride + j - pad
                        if 0 <= iy < h and 0 <= ix < w:
                            s[i * k + j, r_out, (b * h + iy) * w + ix] = 1.0
    return s, ho, wo


def build_fused_forward(params, batch, height, width, tile_batch=None):
    """Lays out weights/selectors ONCE and returns a jitted batch-tiled forward."""
    if tile_batch is None:
        tile_batch = batch if batch <= 8 else 8
    assert batch % tile_batch == 0, (batch, tile_batch)
    tb = tile_batch
    num_tiles = batch // tb

    plan = []
    const_args = []
    flops = 0
    h, w = height, width
    for name, cin, cout, k, stride, pad in LAYER_CFG:
        w_oihw, b = params[name]
        cin_p = _CIN0_PAD if cin == _CIN0 else cin
        w_khwc = jnp.transpose(w_oihw, (2, 3, 1, 0))          # (kh, kw, cin, cout)
        if cin_p != cin:
            w_khwc = jnp.pad(w_khwc, ((0, 0), (0, 0), (0, cin_p - cin), (0, 0)))
        b_row = jnp.asarray(b).reshape(1, cout).astype(jnp.float32)
        if k == 1 and stride == 1 and pad == 0:               # plain matmul layer
            plan.append((1, False))
            const_args += [w_khwc.reshape(cin_p, cout).astype(jnp.bfloat16), b_row]
            flops += 2 * (tb * h * w) * cin_p * cout * num_tiles
        else:
            s_np, ho, wo = _selector_matrices(tb, h, w, k, stride, pad)
            plan.append((k * k, True))
            const_args += [
                jnp.asarray(s_np, jnp.bfloat16),                       # (t, ro, ri)
                w_khwc.reshape(k * k * cin_p, cout).astype(jnp.bfloat16),
                b_row,
            ]
            flops += 2 * k * k * (tb * ho * wo) * (tb * h * w) * cin_p * num_tiles
            flops += 2 * (tb * ho * wo) * (k * k * cin_p) * cout * num_tiles
            h, w = ho, wo
    assert (h, w) == (1, 1), (h, w)   # final spatial 1x1 => view(-1,128) is a no-op

    w_last, b_last = params["last"]
    const_args += [jnp.asarray(w_last).T.astype(jnp.bfloat16),         # (128, 1)
                   jnp.asarray(b_last).reshape(1, 1).astype(jnp.float32)]
    flops += 2 * tb * 128 * num_tiles

    def _const_spec(a):
        zeros = (0,) * a.ndim                 # VMEM-resident across grid steps
        return pl.BlockSpec(a.shape, lambda i, _z=zeros: _z)

    x_rows = tb * height * width
    in_specs = [pl.BlockSpec((x_rows, _CIN0_PAD), lambda i: (i, 0))]
    in_specs += [_const_spec(a) for a in const_args]
    out_specs = pl.BlockSpec((tb, 1), lambda i: (i, 0))

    const_bytes = sum(int(a.size) * a.dtype.itemsize for a in const_args)
    cost = pl.CostEstimate(
        flops=int(flops),
        transcendentals=int(batch),
        bytes_accessed=int(batch * height * width * _CIN0_PAD * 2
                           + const_bytes + batch * 4),
    )

    fused = pl.pallas_call(
        functools.partial(_fused_net_kernel, plan=tuple(plan)),
        out_shape=jax.ShapeDtypeStruct((batch, 1), jnp.float32),
        grid_spec=pltpu.PrefetchScalarGridSpec(
            num_scalar_prefetch=0,
            grid=(num_tiles,),
            in_specs=in_specs,
            out_specs=out_specs),
        compiler_params=pltpu.CompilerParams(
            dimension_semantics=("parallel",),          # megacore on v7x
            vmem_limit_bytes=64 * 1024 * 1024),
        cost_estimate=cost,
    )

    @jax.jit
    def forward(x_nchw):
        # NCHW -> NHWC -> zero-pad channels 5->8 -> (N*H*W, 8) bf16 matrix.
        xb = jnp.transpose(x_nchw, (0, 2, 3, 1))
        xb = jnp.pad(xb, ((0, 0), (0, 0), (0, 0), (0, _CIN0_PAD - _CIN0)))
        xb = xb.reshape(batch * height * width, _CIN0_PAD).astype(jnp.bfloat16)
        return fused(xb, *const_args)

    return forward


# --------------------------- Parameters (synthetic) ---------------------------

def init_params(key):
    def conv_p(k, cout, cin, kh, kw):
        k1, k2 = jax.random.split(k)
        fan_in = cin * kh * kw
        bound = 1.0 / (fan_in ** 0.5)
        w = jax.random.uniform(k1, (cout, cin, kh, kw), jnp.float32, -bound, bound)
        b = jax.random.uniform(k2, (cout,), jnp.float32, -bound, bound)
        return w, b

    keys = jax.random.split(key, len(LAYER_CFG) + 1)
    params = {}
    for (name, cin, cout, k, _, _), kk in zip(LAYER_CFG, keys[:-1]):
        params[name] = conv_p(kk, cout, cin, k, k)
    # nn.Linear(128, 1): weight (1, 128), bias (1,)
    k1, k2 = jax.random.split(keys[-1])
    bound = 1.0 / (128.0 ** 0.5)
    params["last"] = (
        jax.random.uniform(k1, (1, 128), jnp.float32, -bound, bound),
        jax.random.uniform(k2, (1,), jnp.float32, -bound, bound),
    )
    return params


# ------------------------------ reference paths --------------------------------

def ref_forward_f32(params, x_nchw):
    """Pure-f32 XLA conv reference (semantic gold; loose check vs bf16 kernel)."""
    def conv(x, w, b, stride, pad):
        y = jax.lax.conv_general_dilated(
            x, w, (stride, stride), [(pad, pad), (pad, pad)],
            dimension_numbers=("NCHW", "OIHW", "NCHW"))
        return jax.nn.relu(y + b.reshape(1, -1, 1, 1))

    x = x_nchw
    for name, _, _, _, s, p in LAYER_CFG:
        x = conv(x, *params[name], s, p)
    x = x.reshape(-1, 128)
    w_last, b_last = params["last"]
    return jnp.tanh(x @ w_last.T + b_last)


def ref_forward_bf16(params, x_nchw):
    """Numerics-matched reference: bf16 matmul operands, f32 accumulate."""
    def conv(x, w, b, stride, pad):
        y = jax.lax.conv_general_dilated(
            x.astype(jnp.bfloat16), w.astype(jnp.bfloat16),
            (stride, stride), [(pad, pad), (pad, pad)],
            dimension_numbers=("NCHW", "OIHW", "NCHW"),
            preferred_element_type=jnp.float32)
        return jax.nn.relu(y + b.reshape(1, -1, 1, 1)).astype(jnp.bfloat16)

    x = x_nchw.astype(jnp.bfloat16)
    for name, _, _, _, s, p in LAYER_CFG:
        x = conv(x, *params[name], s, p)
    x = x.reshape(-1, 128)
    w_last, b_last = params["last"]
    logits = jnp.dot(x, w_last.T.astype(jnp.bfloat16),
                     preferred_element_type=jnp.float32) + b_last
    return jnp.tanh(logits)


# ---------------------------------- main --------------------------------------

if __name__ == "__main__":
    key = jax.random.PRNGKey(0)
    kp, kx = jax.random.split(key)
    params = init_params(kp)

    # Input implied by the module: 5 feature planes on an 8x8 board.
    x = jax.random.normal(kx, (2, 5, 8, 8), jnp.float32)

    forward = build_fused_forward(params, batch=2, height=8, width=8)
    out = jax.block_until_ready(forward(x))
    assert out.shape == (2, 1), out.shape
    assert bool(jnp.all(jnp.isfinite(out)))

    # Tight check against a reference with identical bf16/f32 numerics.
    ref_b = jax.block_until_ready(jax.jit(ref_forward_bf16)(params, x))
    assert jnp.allclose(out, ref_b, atol=3e-3, rtol=0.0), (out, ref_b)
    # Loose check against the pure-f32 XLA reference (bf16 operand rounding).
    ref_f = jax.block_until_ready(jax.jit(ref_forward_f32)(params, x))
    assert jnp.allclose(out, ref_f, atol=0.25, rtol=0.0), (out, ref_f)

    print("KERNEL_OK")
</pallas_src>

<mosaic_0001>
module attributes {stable_mosaic.version = 11 : i64} {
  func.func @_fused_net_kernel(%arg0: i32, %arg1: memref<128x8xbf16, #tpu.memory_space<vmem>>, %arg2: memref<9x128x128xbf16, #tpu.memory_space<vmem>>, %arg3: memref<72x16xbf16, #tpu.memory_space<vmem>>, %arg4: memref<1x16xf32, #tpu.memory_space<vmem>>, %arg5: memref<9x128x128xbf16, #tpu.memory_space<vmem>>, %arg6: memref<144x16xbf16, #tpu.memory_space<vmem>>, %arg7: memref<1x16xf32, #tpu.memory_space<vmem>>, %arg8: memref<9x18x128xbf16, #tpu.memory_space<vmem>>, %arg9: memref<144x32xbf16, #tpu.memory_space<vmem>>, %arg10: memref<1x32xf32, #tpu.memory_space<vmem>>, %arg11: memref<9x18x18xbf16, #tpu.memory_space<vmem>>, %arg12: memref<288x32xbf16, #tpu.memory_space<vmem>>, %arg13: memref<1x32xf32, #tpu.memory_space<vmem>>, %arg14: memref<9x18x18xbf16, #tpu.memory_space<vmem>>, %arg15: memref<288x32xbf16, #tpu.memory_space<vmem>>, %arg16: memref<1x32xf32, #tpu.memory_space<vmem>>, %arg17: memref<9x2x18xbf16, #tpu.memory_space<vmem>>, %arg18: memref<288x64xbf16, #tpu.memory_space<vmem>>, %arg19: memref<1x64xf32, #tpu.memory_space<vmem>>, %arg20: memref<4x8x2xbf16, #tpu.memory_space<vmem>>, %arg21: memref<256x64xbf16, #tpu.memory_space<vmem>>, %arg22: memref<1x64xf32, #tpu.memory_space<vmem>>, %arg23: memref<4x18x8xbf16, #tpu.memory_space<vmem>>, %arg24: memref<256x64xbf16, #tpu.memory_space<vmem>>, %arg25: memref<1x64xf32, #tpu.memory_space<vmem>>, %arg26: memref<4x2x18xbf16, #tpu.memory_space<vmem>>, %arg27: memref<256x128xbf16, #tpu.memory_space<vmem>>, %arg28: memref<1x128xf32, #tpu.memory_space<vmem>>, %arg29: memref<128x128xbf16, #tpu.memory_space<vmem>>, %arg30: memref<1x128xf32, #tpu.memory_space<vmem>>, %arg31: memref<128x128xbf16, #tpu.memory_space<vmem>>, %arg32: memref<1x128xf32, #tpu.memory_space<vmem>>, %arg33: memref<128x128xbf16, #tpu.memory_space<vmem>>, %arg34: memref<1x128xf32, #tpu.memory_space<vmem>>, %arg35: memref<128x1xbf16, #tpu.memory_space<vmem>>, %arg36: memref<1x1xf32, #tpu.memory_space<vmem>>, %arg37: memref<2x1xf32, #tpu.memory_space<vmem>>) attributes {dimension_semantics = [#tpu.dimension_semantics<parallel>], iteration_bounds = array<i64: 1>, scalar_prefetch = 0 : i64, scratch_operands = 0 : i64, tpu.core_type = #tpu.core_type<tc>, window_params = [{transform_indices = @transform_0, window_bounds = array<i64: 128, 8>}, {pipeline_mode = #tpu.pipeline_mode<synchronous>, transform_indices = @transform_1, window_bounds = array<i64: 9, 128, 128>}, {pipeline_mode = #tpu.pipeline_mode<synchronous>, transform_indices = @transform_2, window_bounds = array<i64: 72, 16>}, {pipeline_mode = #tpu.pipeline_mode<synchronous>, transform_indices = @transform_3, window_bounds = array<i64: 1, 16>}, {pipeline_mode = #tpu.pipeline_mode<synchronous>, transform_indices = @transform_4, window_bounds = array<i64: 9, 128, 128>}, {pipeline_mode = #tpu.pipeline_mode<synchronous>, transform_indices = @transform_5, window_bounds = array<i64: 144, 16>}, {pipeline_mode = #tpu.pipeline_mode<synchronous>, transform_indices = @transform_6, window_bounds = array<i64: 1, 16>}, {pipeline_mode = #tpu.pipeline_mode<synchronous>, transform_indices = @transform_7, window_bounds = array<i64: 9, 18, 128>}, {pipeline_mode = #tpu.pipeline_mode<synchronous>, transform_indices = @transform_8, window_bounds = array<i64: 144, 32>}, {pipeline_mode = #tpu.pipeline_mode<synchronous>, transform_indices = @transform_9, window_bounds = array<i64: 1, 32>}, {pipeline_mode = #tpu.pipeline_mode<synchronous>, transform_indices = @transform_10, window_bounds = array<i64: 9, 18, 18>}, {pipeline_mode = #tpu.pipeline_mode<synchronous>, transform_indices = @transform_11, window_bounds = array<i64: 288, 32>}, {pipeline_mode = #tpu.pipeline_mode<synchronous>, transform_indices = @transform_12, window_bounds = array<i64: 1, 32>}, {pipeline_mode = #tpu.pipeline_mode<synchronous>, transform_indices = @transform_13, window_bounds = array<i64: 9, 18, 18>}, {pipeline_mode = #tpu.pipeline_mode<synchronous>, transform_indices = @transform_14, window_bounds = array<i64: 288, 32>}, {pipeline_mode = #tpu.pipeline_mode<synchronous>, transform_indices = @transform_15, window_bounds = array<i64: 1, 32>}, {pipeline_mode = #tpu.pipeline_mode<synchronous>, transform_indices = @transform_16, window_bounds = array<i64: 9, 2, 18>}, {pipeline_mode = #tpu.pipeline_mode<synchronous>, transform_indices = @transform_17, window_bounds = array<i64: 288, 64>}, {pipeline_mode = #tpu.pipeline_mode<synchronous>, transform_indices = @transform_18, window_bounds = array<i64: 1, 64>}, {pipeline_mode = #tpu.pipeline_mode<synchronous>, transform_indices = @transform_19, window_bounds = array<i64: 4, 8, 2>}, {pipeline_mode = #tpu.pipeline_mode<synchronous>, transform_indices = @transform_20, window_bounds = array<i64: 256, 64>}, {pipeline_mode = #tpu.pipeline_mode<synchronous>, transform_indices = @transform_21, window_bounds = array<i64: 1, 64>}, {pipeline_mode = #tpu.pipeline_mode<synchronous>, transform_indices = @transform_22, window_bounds = array<i64: 4, 18, 8>}, {pipeline_mode = #tpu.pipeline_mode<synchronous>, transform_indices = @transform_23, window_bounds = array<i64: 256, 64>}, {pipeline_mode = #tpu.pipeline_mode<synchronous>, transform_indices = @transform_24, window_bounds = array<i64: 1, 64>}, {pipeline_mode = #tpu.pipeline_mode<synchronous>, transform_indices = @transform_25, window_bounds = array<i64: 4, 2, 18>}, {pipeline_mode = #tpu.pipeline_mode<synchronous>, transform_indices = @transform_26, window_bounds = array<i64: 256, 128>}, {pipeline_mode = #tpu.pipeline_mode<synchronous>, transform_indices = @transform_27, window_bounds = array<i64: 1, 128>}, {pipeline_mode = #tpu.pipeline_mode<synchronous>, transform_indices = @transform_28, window_bounds = array<i64: 128, 128>}, {pipeline_mode = #tpu.pipeline_mode<synchronous>, transform_indices = @transform_29, window_bounds = array<i64: 1, 128>}, {pipeline_mode = #tpu.pipeline_mode<synchronous>, transform_indices = @transform_30, window_bounds = array<i64: 128, 128>}, {pipeline_mode = #tpu.pipeline_mode<synchronous>, transform_indices = @transform_31, window_bounds = array<i64: 1, 128>}, {pipeline_mode = #tpu.pipeline_mode<synchronous>, transform_indices = @transform_32, window_bounds = array<i64: 128, 128>}, {pipeline_mode = #tpu.pipeline_mode<synchronous>, transform_indices = @transform_33, window_bounds = array<i64: 1, 128>}, {pipeline_mode = #tpu.pipeline_mode<synchronous>, transform_indices = @transform_34, window_bounds = array<i64: 128, 1>}, {pipeline_mode = #tpu.pipeline_mode<synchronous>, transform_indices = @transform_35, window_bounds = array<i64: 1, 1>}, {transform_indices = @transform_36, window_bounds = array<i64: 2, 1>}]} {
    %c0 = arith.constant 0 : index
    %c0_0 = arith.constant 0 : index
    %0 = vector.load %arg1[%c0, %c0_0] : memref<128x8xbf16, #tpu.memory_space<vmem>>, vector<128x8xbf16>
    %c0_1 = arith.constant 0 : index
    %c0_2 = arith.constant 0 : index
    %c0_3 = arith.constant 0 : index
    %1 = vector.load %arg2[%c0_1, %c0_2, %c0_3] : memref<9x128x128xbf16, #tpu.memory_space<vmem>>, vector<1x128x128xbf16>
    %2 = vector.shape_cast %1 : vector<1x128x128xbf16> to vector<128x128xbf16>
    %cst = arith.constant dense<0.000000e+00> : vector<128x8xf32>
    %3 = tpu.matmul %2, %0, %cst {dimension_numbers = #tpu.dot_dimension_numbers<[1], [0], [0], [1], [0, 0, 1, 1], [], []>} : vector<128x128xbf16>, vector<128x8xbf16>, vector<128x8xf32> -> vector<128x8xf32>
    %4 = arith.truncf %3 : vector<128x8xf32> to vector<128x8xbf16>
    %c1 = arith.constant 1 : index
    %c0_4 = arith.constant 0 : index
    %c0_5 = arith.constant 0 : index
    %5 = vector.load %arg2[%c1, %c0_4, %c0_5] : memref<9x128x128xbf16, #tpu.memory_space<vmem>>, vector<1x128x128xbf16>
    %6 = vector.shape_cast %5 : vector<1x128x128xbf16> to vector<128x128xbf16>
    %cst_6 = arith.constant dense<0.000000e+00> : vector<128x8xf32>
    %7 = tpu.matmul %6, %0, %cst_6 {dimension_numbers = #tpu.dot_dimension_numbers<[1], [0], [0], [1], [0, 0, 1, 1], [], []>} : vector<128x128xbf16>, vector<128x8xbf16>, vector<128x8xf32> -> vector<128x8xf32>
    %8 = arith.truncf %7 : vector<128x8xf32> to vector<128x8xbf16>
    %c2 = arith.constant 2 : index
    %c0_7 = arith.constant 0 : index
    %c0_8 = arith.constant 0 : index
    %9 = vector.load %arg2[%c2, %c0_7, %c0_8] : memref<9x128x128xbf16, #tpu.memory_space<vmem>>, vector<1x128x128xbf16>
    %10 = vector.shape_cast %9 : vector<1x128x128xbf16> to vector<128x128xbf16>
    %cst_9 = arith.constant dense<0.000000e+00> : vector<128x8xf32>
    %11 = tpu.matmul %10, %0, %cst_9 {dimension_numbers = #tpu.dot_dimension_numbers<[1], [0], [0], [1], [0, 0, 1, 1], [], []>} : vector<128x128xbf16>, vector<128x8xbf16>, vector<128x8xf32> -> vector<128x8xf32>
    %12 = arith.truncf %11 : vector<128x8xf32> to vector<128x8xbf16>
    %c3 = arith.constant 3 : index
    %c0_10 = arith.constant 0 : index
    %c0_11 = arith.constant 0 : index
    %13 = vector.load %arg2[%c3, %c0_10, %c0_11] : memref<9x128x128xbf16, #tpu.memory_space<vmem>>, vector<1x128x128xbf16>
    %14 = vector.shape_cast %13 : vector<1x128x128xbf16> to vector<128x128xbf16>
    %cst_12 = arith.constant dense<0.000000e+00> : vector<128x8xf32>
    %15 = tpu.matmul %14, %0, %cst_12 {dimension_numbers = #tpu.dot_dimension_numbers<[1], [0], [0], [1], [0, 0, 1, 1], [], []>} : vector<128x128xbf16>, vector<128x8xbf16>, vector<128x8xf32> -> vector<128x8xf32>
    %16 = arith.truncf %15 : vector<128x8xf32> to vector<128x8xbf16>
    %c4 = arith.constant 4 : index
    %c0_13 = arith.constant 0 : index
    %c0_14 = arith.constant 0 : index
    %17 = vector.load %arg2[%c4, %c0_13, %c0_14] : memref<9x128x128xbf16, #tpu.memory_space<vmem>>, vector<1x128x128xbf16>
    %18 = vector.shape_cast %17 : vector<1x128x128xbf16> to vector<128x128xbf16>
    %cst_15 = arith.constant dense<0.000000e+00> : vector<128x8xf32>
    %19 = tpu.matmul %18, %0, %cst_15 {dimension_numbers = #tpu.dot_dimension_numbers<[1], [0], [0], [1], [0, 0, 1, 1], [], []>} : vector<128x128xbf16>, vector<128x8xbf16>, vector<128x8xf32> -> vector<128x8xf32>
    %20 = arith.truncf %19 : vector<128x8xf32> to vector<128x8xbf16>
    %c5 = arith.constant 5 : index
    %c0_16 = arith.constant 0 : index
    %c0_17 = arith.constant 0 : index
    %21 = vector.load %arg2[%c5, %c0_16, %c0_17] : memref<9x128x128xbf16, #tpu.memory_space<vmem>>, vector<1x128x128xbf16>
    %22 = vector.shape_cast %21 : vector<1x128x128xbf16> to vector<128x128xbf16>
    %cst_18 = arith.constant dense<0.000000e+00> : vector<128x8xf32>
    %23 = tpu.matmul %22, %0, %cst_18 {dimension_numbers = #tpu.dot_dimension_numbers<[1], [0], [0], [1], [0, 0, 1, 1], [], []>} : vector<128x128xbf16>, vector<128x8xbf16>, vector<128x8xf32> -> vector<128x8xf32>
    %24 = arith.truncf %23 : vector<128x8xf32> to vector<128x8xbf16>
    %c6 = arith.constant 6 : index
    %c0_19 = arith.constant 0 : index
    %c0_20 = arith.constant 0 : index
    %25 = vector.load %arg2[%c6, %c0_19, %c0_20] : memref<9x128x128xbf16, #tpu.memory_space<vmem>>, vector<1x128x128xbf16>
    %26 = vector.shape_cast %25 : vector<1x128x128xbf16> to vector<128x128xbf16>
    %cst_21 = arith.constant dense<0.000000e+00> : vector<128x8xf32>
    %27 = tpu.matmul %26, %0, %cst_21 {dimension_numbers = #tpu.dot_dimension_numbers<[1], [0], [0], [1], [0, 0, 1, 1], [], []>} : vector<128x128xbf16>, vector<128x8xbf16>, vector<128x8xf32> -> vector<128x8xf32>
    %28 = arith.truncf %27 : vector<128x8xf32> to vector<128x8xbf16>
    %c7 = arith.constant 7 : index
    %c0_22 = arith.constant 0 : index
    %c0_23 = arith.constant 0 : index
    %29 = vector.load %arg2[%c7, %c0_22, %c0_23] : memref<9x128x128xbf16, #tpu.memory_space<vmem>>, vector<1x128x128xbf16>
    %30 = vector.shape_cast %29 : vector<1x128x128xbf16> to vector<128x128xbf16>
    %cst_24 = arith.constant dense<0.000000e+00> : vector<128x8xf32>
    %31 = tpu.matmul %30, %0, %cst_24 {dimension_numbers = #tpu.dot_dimension_numbers<[1], [0], [0], [1], [0, 0, 1, 1], [], []>} : vector<128x128xbf16>, vector<128x8xbf16>, vector<128x8xf32> -> vector<128x8xf32>
    %32 = arith.truncf %31 : vector<128x8xf32> to vector<128x8xbf16>
    %c8 = arith.constant 8 : index
    %c0_25 = arith.constant 0 : index
    %c0_26 = arith.constant 0 : index
    %33 = vector.load %arg2[%c8, %c0_25, %c0_26] : memref<9x128x128xbf16, #tpu.memory_space<vmem>>, vector<1x128x128xbf16>
    %34 = vector.shape_cast %33 : vector<1x128x128xbf16> to vector<128x128xbf16>
    %cst_27 = arith.constant dense<0.000000e+00> : vector<128x8xf32>
    %35 = tpu.matmul %34, %0, %cst_27 {dimension_numbers = #tpu.dot_dimension_numbers<[1], [0], [0], [1], [0, 0, 1, 1], [], []>} : vector<128x128xbf16>, vector<128x8xbf16>, vector<128x8xf32> -> vector<128x8xf32>
    %36 = arith.truncf %35 : vector<128x8xf32> to vector<128x8xbf16>
    %37 = tpu.concatenate %4, %8, %12, %16, %20, %24, %28, %32, %36 in 1 : vector<128x8xbf16>, vector<128x8xbf16>, vector<128x8xbf16>, vector<128x8xbf16>, vector<128x8xbf16>, vector<128x8xbf16>, vector<128x8xbf16>, vector<128x8xbf16>, vector<128x8xbf16> -> vector<128x72xbf16>
    %c0_28 = arith.constant 0 : index
    %c0_29 = arith.constant 0 : index
    %38 = vector.load %arg3[%c0_28, %c0_29] : memref<72x16xbf16, #tpu.memory_space<vmem>>, vector<72x16xbf16>
    %cst_30 = arith.constant dense<0.000000e+00> : vector<128x16xf32>
    %39 = tpu.matmul %37, %38, %cst_30 {dimension_numbers = #tpu.dot_dimension_numbers<[1], [0], [0], [1], [0, 0, 1, 1], [], []>} : vector<128x72xbf16>, vector<72x16xbf16>, vector<128x16xf32> -> vector<128x16xf32>
    %c0_31 = arith.constant 0 : index
    %c0_32 = arith.constant 0 : index
    %40 = vector.load %arg4[%c0_31, %c0_32] : memref<1x16xf32, #tpu.memory_space<vmem>>, vector<1x16xf32>
    %41 = vector.broadcast %40 : vector<1x16xf32> to vector<128x16xf32>
    %42 = arith.addf %39, %41 : vector<128x16xf32>
    %cst_33 = arith.constant 0.000000e+00 : f32
    %43 = vector.broadcast %cst_33 : f32 to vector<128x16xf32>
    %44 = arith.maximumf %42, %43 : vector<128x16xf32>
    %45 = arith.truncf %44 : vector<128x16xf32> to vector<128x16xbf16>
    %c0_34 = arith.constant 0 : index
    %c0_35 = arith.constant 0 : index
    %c0_36 = arith.constant 0 : index
    %46 = vector.load %arg5[%c0_34, %c0_35, %c0_36] : memref<9x128x128xbf16, #tpu.memory_space<vmem>>, vector<1x128x128xbf16>
    %47 = vector.shape_cast %46 : vector<1x128x128xbf16> to vector<128x128xbf16>
    %cst_37 = arith.constant dense<0.000000e+00> : vector<128x16xf32>
    %48 = tpu.matmul %47, %45, %cst_37 {dimension_numbers = #tpu.dot_dimension_numbers<[1], [0], [0], [1], [0, 0, 1, 1], [], []>} : vector<128x128xbf16>, vector<128x16xbf16>, vector<128x16xf32> -> vector<128x16xf32>
    %49 = arith.truncf %48 : vector<128x16xf32> to vector<128x16xbf16>
    %c1_38 = arith.constant 1 : index
    %c0_39 = arith.constant 0 : index
    %c0_40 = arith.constant 0 : index
    %50 = vector.load %arg5[%c1_38, %c0_39, %c0_40] : memref<9x128x128xbf16, #tpu.memory_space<vmem>>, vector<1x128x128xbf16>
    %51 = vector.shape_cast %50 : vector<1x128x128xbf16> to vector<128x128xbf16>
    %cst_41 = arith.constant dense<0.000000e+00> : vector<128x16xf32>
    %52 = tpu.matmul %51, %45, %cst_41 {dimension_numbers = #tpu.dot_dimension_numbers<[1], [0], [0], [1], [0, 0, 1, 1], [], []>} : vector<128x128xbf16>, vector<128x16xbf16>, vector<128x16xf32> -> vector<128x16xf32>
    %53 = arith.truncf %52 : vector<128x16xf32> to vector<128x16xbf16>
    %c2_42 = arith.constant 2 : index
    %c0_43 = arith.constant 0 : index
    %c0_44 = arith.constant 0 : index
    %54 = vector.load %arg5[%c2_42, %c0_43, %c0_44] : memref<9x128x128xbf16, #tpu.memory_space<vmem>>, vector<1x128x128xbf16>
    %55 = vector.shape_cast %54 : vector<1x128x128xbf16> to vector<128x128xbf16>
    %cst_45 = arith.constant dense<0.000000e+00> : vector<128x16xf32>
    %56 = tpu.matmul %55, %45, %cst_45 {dimension_numbers = #tpu.dot_dimension_numbers<[1], [0], [0], [1], [0, 0, 1, 1], [], []>} : vector<128x128xbf16>, vector<128x16xbf16>, vector<128x16xf32> -> vector<128x16xf32>
    %57 = arith.truncf %56 : vector<128x16xf32> to vector<128x16xbf16>
    %c3_46 = arith.constant 3 : index
    %c0_47 = arith.constant 0 : index
    %c0_48 = arith.constant 0 : index
    %58 = vector.load %arg5[%c3_46, %c0_47, %c0_48] : memref<9x128x128xbf16, #tpu.memory_space<vmem>>, vector<1x128x128xbf16>
    %59 = vector.shape_cast %58 : vector<1x128x128xbf16> to vector<128x128xbf16>
    %cst_49 = arith.constant dense<0.000000e+00> : vector<128x16xf32>
    %60 = tpu.matmul %59, %45, %cst_49 {dimension_numbers = #tpu.dot_dimension_numbers<[1], [0], [0], [1], [0, 0, 1, 1], [], []>} : vector<128x128xbf16>, vector<128x16xbf16>, vector<128x16xf32> -> vector<128x16xf32>
    %61 = arith.truncf %60 : vector<128x16xf32> to vector<128x16xbf16>
    %c4_50 = arith.constant 4 : index
    %c0_51 = arith.constant 0 : index
    %c0_52 = arith.constant 0 : index
    %62 = vector.load %arg5[%c4_50, %c0_51, %c0_52] : memref<9x128x128xbf16, #tpu.memory_space<vmem>>, vector<1x128x128xbf16>
    %63 = vector.shape_cast %62 : vector<1x128x128xbf16> to vector<128x128xbf16>
    %cst_53 = arith.constant dense<0.000000e+00> : vector<128x16xf32>
    %64 = tpu.matmul %63, %45, %cst_53 {dimension_numbers = #tpu.dot_dimension_numbers<[1], [0], [0], [1], [0, 0, 1, 1], [], []>} : vector<128x128xbf16>, vector<128x16xbf16>, vector<128x16xf32> -> vector<128x16xf32>
    %65 = arith.truncf %64 : vector<128x16xf32> to vector<128x16xbf16>
    %c5_54 = arith.constant 5 : index
    %c0_55 = arith.constant 0 : index
    %c0_56 = arith.constant 0 : index
    %66 = vector.load %arg5[%c5_54, %c0_55, %c0_56] : memref<9x128x128xbf16, #tpu.memory_space<vmem>>, vector<1x128x128xbf16>
    %67 = vector.shape_cast %66 : vector<1x128x128xbf16> to vector<128x128xbf16>
    %cst_57 = arith.constant dense<0.000000e+00> : vector<128x16xf32>
    %68 = tpu.matmul %67, %45, %cst_57 {dimension_numbers = #tpu.dot_dimension_numbers<[1], [0], [0], [1], [0, 0, 1, 1], [], []>} : vector<128x128xbf16>, vector<128x16xbf16>, vector<128x16xf32> -> vector<128x16xf32>
    %69 = arith.truncf %68 : vector<128x16xf32> to vector<128x16xbf16>
    %c6_58 = arith.constant 6 : index
    %c0_59 = arith.constant 0 : index
    %c0_60 = arith.constant 0 : index
    %70 = vector.load %arg5[%c6_58, %c0_59, %c0_60] : memref<9x128x128xbf16, #tpu.memory_space<vmem>>, vector<1x128x128xbf16>
    %71 = vector.shape_cast %70 : vector<1x128x128xbf16> to vector<128x128xbf16>
    %cst_61 = arith.constant dense<0.000000e+00> : vector<128x16xf32>
    %72 = tpu.matmul %71, %45, %cst_61 {dimension_numbers = #tpu.dot_dimension_numbers<[1], [0], [0], [1], [0, 0, 1, 1], [], []>} : vector<128x128xbf16>, vector<128x16xbf16>, vector<128x16xf32> -> vector<128x16xf32>
    %73 = arith.truncf %72 : vector<128x16xf32> to vector<128x16xbf16>
    %c7_62 = arith.constant 7 : index
    %c0_63 = arith.constant 0 : index
    %c0_64 = arith.constant 0 : index
    %74 = vector.load %arg5[%c7_62, %c0_63, %c0_64] : memref<9x128x128xbf16, #tpu.memory_space<vmem>>, vector<1x128x128xbf16>
    %75 = vector.shape_cast %74 : vector<1x128x128xbf16> to vector<128x128xbf16>
    %cst_65 = arith.constant dense<0.000000e+00> : vector<128x16xf32>
    %76 = tpu.matmul %75, %45, %cst_65 {dimension_numbers = #tpu.dot_dimension_numbers<[1], [0], [0], [1], [0, 0, 1, 1], [], []>} : vector<128x128xbf16>, vector<128x16xbf16>, vector<128x16xf32> -> vector<128x16xf32>
    %77 = arith.truncf %76 : vector<128x16xf32> to vector<128x16xbf16>
    %c8_66 = arith.constant 8 : index
    %c0_67 = arith.constant 0 : index
    %c0_68 = arith.constant 0 : index
    %78 = vector.load %arg5[%c8_66, %c0_67, %c0_68] : memref<9x128x128xbf16, #tpu.memory_space<vmem>>, vector<1x128x128xbf16>
    %79 = vector.shape_cast %78 : vector<1x128x128xbf16> to vector<128x128xbf16>
    %cst_69 = arith.constant dense<0.000000e+00> : vector<128x16xf32>
    %80 = tpu.matmul %79, %45, %cst_69 {dimension_numbers = #tpu.dot_dimension_numbers<[1], [0], [0], [1], [0, 0, 1, 1], [], []>} : vector<128x128xbf16>, vector<128x16xbf16>, vector<128x16xf32> -> vector<128x16xf32>
    %81 = arith.truncf %80 : vector<128x16xf32> to vector<128x16xbf16>
    %82 = tpu.concatenate %49, %53, %57, %61, %65, %69, %73, %77, %81 in 1 : vector<128x16xbf16>, vector<128x16xbf16>, vector<128x16xbf16>, vector<128x16xbf16>, vector<128x16xbf16>, vector<128x16xbf16>, vector<128x16xbf16>, vector<128x16xbf16>, vector<128x16xbf16> -> vector<128x144xbf16>
    %c0_70 = arith.constant 0 : index
    %c0_71 = arith.constant 0 : index
    %83 = vector.load %arg6[%c0_70, %c0_71] : memref<144x16xbf16, #tpu.memory_space<vmem>>, vector<144x16xbf16>
    %cst_72 = arith.constant dense<0.000000e+00> : vector<128x16xf32>
    %84 = tpu.matmul %82, %83, %cst_72 {dimension_numbers = #tpu.dot_dimension_numbers<[1], [0], [0], [1], [0, 0, 1, 1], [], []>} : vector<128x144xbf16>, vector<144x16xbf16>, vector<128x16xf32> -> vector<128x16xf32>
    %c0_73 = arith.constant 0 : index
    %c0_74 = arith.constant 0 : index
    %85 = vector.load %arg7[%c0_73, %c0_74] : memref<1x16xf32, #tpu.memory_space<vmem>>, vector<1x16xf32>
    %86 = vector.broadcast %85 : vector<1x16xf32> to vector<128x16xf32>
    %87 = arith.addf %84, %86 : vector<128x16xf32>
    %cst_75 = arith.constant 0.000000e+00 : f32
    %88 = vector.broadcast %cst_75 : f32 to vector<128x16xf32>
    %89 = arith.maximumf %87, %88 : vector<128x16xf32>
    %90 = arith.truncf %89 : vector<128x16xf32> to vector<128x16xbf16>
    %c0_76 = arith.constant 0 : index
    %c0_77 = arith.constant 0 : index
    %c0_78 = arith.constant 0 : index
    %91 = vector.load %arg8[%c0_76, %c0_77, %c0_78] : memref<9x18x128xbf16, #tpu.memory_space<vmem>>, vector<1x18x128xbf16>
    %92 = vector.shape_cast %91 : vector<1x18x128xbf16> to vector<18x128xbf16>
    %cst_79 = arith.constant dense<0.000000e+00> : vector<18x16xf32>
    %93 = tpu.matmul %92, %90, %cst_79 {dimension_numbers = #tpu.dot_dimension_numbers<[1], [0], [0], [1], [0, 0, 1, 1], [], []>} : vector<18x128xbf16>, vector<128x16xbf16>, vector<18x16xf32> -> vector<18x16xf32>
    %94 = arith.truncf %93 : vector<18x16xf32> to vector<18x16xbf16>
    %c1_80 = arith.constant 1 : index
    %c0_81 = arith.constant 0 : index
    %c0_82 = arith.constant 0 : index
    %95 = vector.load %arg8[%c1_80, %c0_81, %c0_82] : memref<9x18x128xbf16, #tpu.memory_space<vmem>>, vector<1x18x128xbf16>
    %96 = vector.shape_cast %95 : vector<1x18x128xbf16> to vector<18x128xbf16>
    %cst_83 = arith.constant dense<0.000000e+00> : vector<18x16xf32>
    %97 = tpu.matmul %96, %90, %cst_83 {dimension_numbers = #tpu.dot_dimension_numbers<[1], [0], [0], [1], [0, 0, 1, 1], [], []>} : vector<18x128xbf16>, vector<128x16xbf16>, vector<18x16xf32> -> vector<18x16xf32>
    %98 = arith.truncf %97 : vector<18x16xf32> to vector<18x16xbf16>
    %c2_84 = arith.constant 2 : index
    %c0_85 = arith.constant 0 : index
    %c0_86 = arith.constant 0 : index
    %99 = vector.load %arg8[%c2_84, %c0_85, %c0_86] : memref<9x18x128xbf16, #tpu.memory_space<vmem>>, vector<1x18x128xbf16>
    %100 = vector.shape_cast %99 : vector<1x18x128xbf16> to vector<18x128xbf16>
    %cst_87 = arith.constant dense<0.000000e+00> : vector<18x16xf32>
    %101 = tpu.matmul %100, %90, %cst_87 {dimension_numbers = #tpu.dot_dimension_numbers<[1], [0], [0], [1], [0, 0, 1, 1], [], []>} : vector<18x128xbf16>, vector<128x16xbf16>, vector<18x16xf32> -> vector<18x16xf32>
    %102 = arith.truncf %101 : vector<18x16xf32> to vector<18x16xbf16>
    %c3_88 = arith.constant 3 : index
    %c0_89 = arith.constant 0 : index
    %c0_90 = arith.constant 0 : index
    %103 = vector.load %arg8[%c3_88, %c0_89, %c0_90] : memref<9x18x128xbf16, #tpu.memory_space<vmem>>, vector<1x18x128xbf16>
    %104 = vector.shape_cast %103 : vector<1x18x128xbf16> to vector<18x128xbf16>
    %cst_91 = arith.constant dense<0.000000e+00> : vector<18x16xf32>
    %105 = tpu.matmul %104, %90, %cst_91 {dimension_numbers = #tpu.dot_dimension_numbers<[1], [0], [0], [1], [0, 0, 1, 1], [], []>} : vector<18x128xbf16>, vector<128x16xbf16>, vector<18x16xf32> -> vector<18x16xf32>
    %106 = arith.truncf %105 : vector<18x16xf32> to vector<18x16xbf16>
    %c4_92 = arith.constant 4 : index
    %c0_93 = arith.constant 0 : index
    %c0_94 = arith.constant 0 : index
    %107 = vector.load %arg8[%c4_92, %c0_93, %c0_94] : memref<9x18x128xbf16, #tpu.memory_space<vmem>>, vector<1x18x128xbf16>
    %108 = vector.shape_cast %107 : vector<1x18x128xbf16> to vector<18x128xbf16>
    %cst_95 = arith.constant dense<0.000000e+00> : vector<18x16xf32>
    %109 = tpu.matmul %108, %90, %cst_95 {dimension_numbers = #tpu.dot_dimension_numbers<[1], [0], [0], [1], [0, 0, 1, 1], [], []>} : vector<18x128xbf16>, vector<128x16xbf16>, vector<18x16xf32> -> vector<18x16xf32>
    %110 = arith.truncf %109 : vector<18x16xf32> to vector<18x16xbf16>
    %c5_96 = arith.constant 5 : index
    %c0_97 = arith.constant 0 : index
    %c0_98 = arith.constant 0 : index
    %111 = vector.load %arg8[%c5_96, %c0_97, %c0_98] : memref<9x18x128xbf16, #tpu.memory_space<vmem>>, vector<1x18x128xbf16>
    %112 = vector.shape_cast %111 : vector<1x18x128xbf16> to vector<18x128xbf16>
    %cst_99 = arith.constant dense<0.000000e+00> : vector<18x16xf32>
    %113 = tpu.matmul %112, %90, %cst_99 {dimension_numbers = #tpu.dot_dimension_numbers<[1], [0], [0], [1], [0, 0, 1, 1], [], []>} : vector<18x128xbf16>, vector<128x16xbf16>, vector<18x16xf32> -> vector<18x16xf32>
    %114 = arith.truncf %113 : vector<18x16xf32> to vector<18x16xbf16>
    %c6_100 = arith.constant 6 : index
    %c0_101 = arith.constant 0 : index
    %c0_102 = arith.constant 0 : index
    %115 = vector.load %arg8[%c6_100, %c0_101, %c0_102] : memref<9x18x128xbf16, #tpu.memory_space<vmem>>, vector<1x18x128xbf16>
    %116 = vector.shape_cast %115 : vector<1x18x128xbf16> to vector<18x128xbf16>
    %cst_103 = arith.constant dense<0.000000e+00> : vector<18x16xf32>
    %117 = tpu.matmul %116, %90, %cst_103 {dimension_numbers = #tpu.dot_dimension_numbers<[1], [0], [0], [1], [0, 0, 1, 1], [], []>} : vector<18x128xbf16>, vector<128x16xbf16>, vector<18x16xf32> -> vector<18x16xf32>
    %118 = arith.truncf %117 : vector<18x16xf32> to vector<18x16xbf16>
    %c7_104 = arith.constant 7 : index
    %c0_105 = arith.constant 0 : index
    %c0_106 = arith.constant 0 : index
    %119 = vector.load %arg8[%c7_104, %c0_105, %c0_106] : memref<9x18x128xbf16, #tpu.memory_space<vmem>>, vector<1x18x128xbf16>
    %120 = vector.shape_cast %119 : vector<1x18x128xbf16> to vector<18x128xbf16>
    %cst_107 = arith.constant dense<0.000000e+00> : vector<18x16xf32>
    %121 = tpu.matmul %120, %90, %cst_107 {dimension_numbers = #tpu.dot_dimension_numbers<[1], [0], [0], [1], [0, 0, 1, 1], [], []>} : vector<18x128xbf16>, vector<128x16xbf16>, vector<18x16xf32> -> vector<18x16xf32>
    %122 = arith.truncf %121 : vector<18x16xf32> to vector<18x16xbf16>
    %c8_108 = arith.constant 8 : index
    %c0_109 = arith.constant 0 : index
    %c0_110 = arith.constant 0 : index
    %123 = vector.load %arg8[%c8_108, %c0_109, %c0_110] : memref<9x18x128xbf16, #tpu.memory_space<vmem>>, vector<1x18x128xbf16>
    %124 = vector.shape_cast %123 : vector<1x18x128xbf16> to vector<18x128xbf16>
    %cst_111 = arith.constant dense<0.000000e+00> : vector<18x16xf32>
    %125 = tpu.matmul %124, %90, %cst_111 {dimension_numbers = #tpu.dot_dimension_numbers<[1], [0], [0], [1], [0, 0, 1, 1], [], []>} : vector<18x128xbf16>, vector<128x16xbf16>, vector<18x16xf32> -> vector<18x16xf32>
    %126 = arith.truncf %125 : vector<18x16xf32> to vector<18x16xbf16>
    %127 = tpu.concatenate %94, %98, %102, %106, %110, %114, %118, %122, %126 in 1 : vector<18x16xbf16>, vector<18x16xbf16>, vector<18x16xbf16>, vector<18x16xbf16>, vector<18x16xbf16>, vector<18x16xbf16>, vector<18x16xbf16>, vector<18x16xbf16>, vector<18x16xbf16> -> vector<18x144xbf16>
    %c0_112 = arith.constant 0 : index
    %c0_113 = arith.constant 0 : index
    %128 = vector.load %arg9[%c0_112, %c0_113] : memref<144x32xbf16, #tpu.memory_space<vmem>>, vector<144x32xbf16>
    %cst_114 = arith.constant dense<0.000000e+00> : vector<18x32xf32>
    %129 = tpu.matmul %127, %128, %cst_114 {dimension_numbers = #tpu.dot_dimension_numbers<[1], [0], [0], [1], [0, 0, 1, 1], [], []>} : vector<18x144xbf16>, vector<144x32xbf16>, vector<18x32xf32> -> vector<18x32xf32>
    %c0_115 = arith.constant 0 : index
    %c0_116 = arith.constant 0 : index
    %130 = vector.load %arg10[%c0_115, %c0_116] : memref<1x32xf32, #tpu.memory_space<vmem>>, vector<1x32xf32>
    %131 = vector.broadcast %130 : vector<1x32xf32> to vector<18x32xf32>
    %132 = arith.addf %129, %131 : vector<18x32xf32>
    %cst_117 = arith.constant 0.000000e+00 : f32
    %133 = vector.broadcast %cst_117 : f32 to vector<18x32xf32>
    %134 = arith.maximumf %132, %133 : vector<18x32xf32>
    %135 = arith.truncf %134 : vector<18x32xf32> to vector<18x32xbf16>
    %c0_118 = arith.constant 0 : index
    %c0_119 = arith.constant 0 : index
    %c0_120 = arith.constant 0 : index
    %136 = vector.load %arg11[%c0_118, %c0_119, %c0_120] : memref<9x18x18xbf16, #tpu.memory_space<vmem>>, vector<1x18x18xbf16>
    %137 = vector.shape_cast %136 : vector<1x18x18xbf16> to vector<18x18xbf16>
    %cst_121 = arith.constant dense<0.000000e+00> : vector<18x32xf32>
    %138 = tpu.matmul %137, %135, %cst_121 {dimension_numbers = #tpu.dot_dimension_numbers<[1], [0], [0], [1], [0, 0, 1, 1], [], []>} : vector<18x18xbf16>, vector<18x32xbf16>, vector<18x32xf32> -> vector<18x32xf32>
    %139 = arith.truncf %138 : vector<18x32xf32> to vector<18x32xbf16>
    %c1_122 = arith.constant 1 : index
    %c0_123 = arith.constant 0 : index
    %c0_124 = arith.constant 0 : index
    %140 = vector.load %arg11[%c1_122, %c0_123, %c0_124] : memref<9x18x18xbf16, #tpu.memory_space<vmem>>, vector<1x18x18xbf16>
    %141 = vector.shape_cast %140 : vector<1x18x18xbf16> to vector<18x18xbf16>
    %cst_125 = arith.constant dense<0.000000e+00> : vector<18x32xf32>
    %142 = tpu.matmul %141, %135, %cst_125 {dimension_numbers = #tpu.dot_dimension_numbers<[1], [0], [0], [1], [0, 0, 1, 1], [], []>} : vector<18x18xbf16>, vector<18x32xbf16>, vector<18x32xf32> -> vector<18x32xf32>
    %143 = arith.truncf %142 : vector<18x32xf32> to vector<18x32xbf16>
    %c2_126 = arith.constant 2 : index
    %c0_127 = arith.constant 0 : index
    %c0_128 = arith.constant 0 : index
    %144 = vector.load %arg11[%c2_126, %c0_127, %c0_128] : memref<9x18x18xbf16, #tpu.memory_space<vmem>>, vector<1x18x18xbf16>
    %145 = vector.shape_cast %144 : vector<1x18x18xbf16> to vector<18x18xbf16>
    %cst_129 = arith.constant dense<0.000000e+00> : vector<18x32xf32>
    %146 = tpu.matmul %145, %135, %cst_129 {dimension_numbers = #tpu.dot_dimension_numbers<[1], [0], [0], [1], [0, 0, 1, 1], [], []>} : vector<18x18xbf16>, vector<18x32xbf16>, vector<18x32xf32> -> vector<18x32xf32>
    %147 = arith.truncf %146 : vector<18x32xf32> to vector<18x32xbf16>
    %c3_130 = arith.constant 3 : index
    %c0_131 = arith.constant 0 : index
    %c0_132 = arith.constant 0 : index
    %148 = vector.load %arg11[%c3_130, %c0_131, %c0_132] : memref<9x18x18xbf16, #tpu.memory_space<vmem>>, vector<1x18x18xbf16>
    %149 = vector.shape_cast %148 : vector<1x18x18xbf16> to vector<18x18xbf16>
    %cst_133 = arith.constant dense<0.000000e+00> : vector<18x32xf32>
    %150 = tpu.matmul %149, %135, %cst_133 {dimension_numbers = #tpu.dot_dimension_numbers<[1], [0], [0], [1], [0, 0, 1, 1], [], []>} : vector<18x18xbf16>, vector<18x32xbf16>, vector<18x32xf32> -> vector<18x32xf32>
    %151 = arith.truncf %150 : vector<18x32xf32> to vector<18x32xbf16>
    %c4_134 = arith.constant 4 : index
    %c0_135 = arith.constant 0 : index
    %c0_136 = arith.constant 0 : index
    %152 = vector.load %arg11[%c4_134, %c0_135, %c0_136] : memref<9x18x18xbf16, #tpu.memory_space<vmem>>, vector<1x18x18xbf16>
    %153 = vector.shape_cast %152 : vector<1x18x18xbf16> to vector<18x18xbf16>
    %cst_137 = arith.constant dense<0.000000e+00> : vector<18x32xf32>
    %154 = tpu.matmul %153, %135, %cst_137 {dimension_numbers = #tpu.dot_dimension_numbers<[1], [0], [0], [1], [0, 0, 1, 1], [], []>} : vector<18x18xbf16>, vector<18x32xbf16>, vector<18x32xf32> -> vector<18x32xf32>
    %155 = arith.truncf %154 : vector<18x32xf32> to vector<18x32xbf16>
    %c5_138 = arith.constant 5 : index
    %c0_139 = arith.constant 0 : index
    %c0_140 = arith.constant 0 : index
    %156 = vector.load %arg11[%c5_138, %c0_139, %c0_140] : memref<9x18x18xbf16, #tpu.memory_space<vmem>>, vector<1x18x18xbf16>
    %157 = vector.shape_cast %156 : vector<1x18x18xbf16> to vector<18x18xbf16>
    %cst_141 = arith.constant dense<0.000000e+00> : vector<18x32xf32>
    %158 = tpu.matmul %157, %135, %cst_141 {dimension_numbers = #tpu.dot_dimension_numbers<[1], [0], [0], [1], [0, 0, 1, 1], [], []>} : vector<18x18xbf16>, vector<18x32xbf16>, vector<18x32xf32> -> vector<18x32xf32>
    %159 = arith.truncf %158 : vector<18x32xf32> to vector<18x32xbf16>
    %c6_142 = arith.constant 6 : index
    %c0_143 = arith.constant 0 : index
    %c0_144 = arith.constant 0 : index
    %160 = vector.load %arg11[%c6_142, %c0_143, %c0_144] : memref<9x18x18xbf16, #tpu.memory_space<vmem>>, vector<1x18x18xbf16>
    %161 = vector.shape_cast %160 : vector<1x18x18xbf16> to vector<18x18xbf16>
    %cst_145 = arith.constant dense<0.000000e+00> : vector<18x32xf32>
    %162 = tpu.matmul %161, %135, %cst_145 {dimension_numbers = #tpu.dot_dimension_numbers<[1], [0], [0], [1], [0, 0, 1, 1], [], []>} : vector<18x18xbf16>, vector<18x32xbf16>, vector<18x32xf32> -> vector<18x32xf32>
    %163 = arith.truncf %162 : vector<18x32xf32> to vector<18x32xbf16>
    %c7_146 = arith.constant 7 : index
    %c0_147 = arith.constant 0 : index
    %c0_148 = arith.constant 0 : index
    %164 = vector.load %arg11[%c7_146, %c0_147, %c0_148] : memref<9x18x18xbf16, #tpu.memory_space<vmem>>, vector<1x18x18xbf16>
    %165 = vector.shape_cast %164 : vector<1x18x18xbf16> to vector<18x18xbf16>
    %cst_149 = arith.constant dense<0.000000e+00> : vector<18x32xf32>
    %166 = tpu.matmul %165, %135, %cst_149 {dimension_numbers = #tpu.dot_dimension_numbers<[1], [0], [0], [1], [0, 0, 1, 1], [], []>} : vector<18x18xbf16>, vector<18x32xbf16>, vector<18x32xf32> -> vector<18x32xf32>
    %167 = arith.truncf %166 : vector<18x32xf32> to vector<18x32xbf16>
    %c8_150 = arith.constant 8 : index
    %c0_151 = arith.constant 0 : index
    %c0_152 = arith.constant 0 : index
    %168 = vector.load %arg11[%c8_150, %c0_151, %c0_152] : memref<9x18x18xbf16, #tpu.memory_space<vmem>>, vector<1x18x18xbf16>
    %169 = vector.shape_cast %168 : vector<1x18x18xbf16> to vector<18x18xbf16>
    %cst_153 = arith.constant dense<0.000000e+00> : vector<18x32xf32>
    %170 = tpu.matmul %169, %135, %cst_153 {dimension_numbers = #tpu.dot_dimension_numbers<[1], [0], [0], [1], [0, 0, 1, 1], [], []>} : vector<18x18xbf16>, vector<18x32xbf16>, vector<18x32xf32> -> vector<18x32xf32>
    %171 = arith.truncf %170 : vector<18x32xf32> to vector<18x32xbf16>
    %172 = tpu.concatenate %139, %143, %147, %151, %155, %159, %163, %167, %171 in 1 : vector<18x32xbf16>, vector<18x32xbf16>, vector<18x32xbf16>, vector<18x32xbf16>, vector<18x32xbf16>, vector<18x32xbf16>, vector<18x32xbf16>, vector<18x32xbf16>, vector<18x32xbf16> -> vector<18x288xbf16>
    %c0_154 = arith.constant 0 : index
    %c0_155 = arith.constant 0 : index
    %173 = vector.load %arg12[%c0_154, %c0_155] : memref<288x32xbf16, #tpu.memory_space<vmem>>, vector<288x32xbf16>
    %cst_156 = arith.constant dense<0.000000e+00> : vector<18x32xf32>
    %174 = tpu.matmul %172, %173, %cst_156 {dimension_numbers = #tpu.dot_dimension_numbers<[1], [0], [0], [1], [0, 0, 1, 1], [], []>} : vector<18x288xbf16>, vector<288x32xbf16>, vector<18x32xf32> -> vector<18x32xf32>
    %c0_157 = arith.constant 0 : index
    %c0_158 = arith.constant 0 : index
    %175 = vector.load %arg13[%c0_157, %c0_158] : memref<1x32xf32, #tpu.memory_space<vmem>>, vector<1x32xf32>
    %176 = vector.broadcast %175 : vector<1x32xf32> to vector<18x32xf32>
    %177 = arith.addf %174, %176 : vector<18x32xf32>
    %cst_159 = arith.constant 0.000000e+00 : f32
    %178 = vector.broadcast %cst_159 : f32 to vector<18x32xf32>
    %179 = arith.maximumf %177, %178 : vector<18x32xf32>
    %180 = arith.truncf %179 : vector<18x32xf32> to vector<18x32xbf16>
    %c0_160 = arith.constant 0 : index
    %c0_161 = arith.constant 0 : index
    %c0_162 = arith.constant 0 : index
    %181 = vector.load %arg14[%c0_160, %c0_161, %c0_162] : memref<9x18x18xbf16, #tpu.memory_space<vmem>>, vector<1x18x18xbf16>
    %182 = vector.shape_cast %181 : vector<1x18x18xbf16> to vector<18x18xbf16>
    %cst_163 = arith.constant dense<0.000000e+00> : vector<18x32xf32>
    %183 = tpu.matmul %182, %180, %cst_163 {dimension_numbers = #tpu.dot_dimension_numbers<[1], [0], [0], [1], [0, 0, 1, 1], [], []>} : vector<18x18xbf16>, vector<18x32xbf16>, vector<18x32xf32> -> vector<18x32xf32>
    %184 = arith.truncf %183 : vector<18x32xf32> to vector<18x32xbf16>
    %c1_164 = arith.constant 1 : index
    %c0_165 = arith.constant 0 : index
    %c0_166 = arith.constant 0 : index
    %185 = vector.load %arg14[%c1_164, %c0_165, %c0_166] : memref<9x18x18xbf16, #tpu.memory_space<vmem>>, vector<1x18x18xbf16>
    %186 = vector.shape_cast %185 : vector<1x18x18xbf16> to vector<18x18xbf16>
    %cst_167 = arith.constant dense<0.000000e+00> : vector<18x32xf32>
    %187 = tpu.matmul %186, %180, %cst_167 {dimension_numbers = #tpu.dot_dimension_numbers<[1], [0], [0], [1], [0, 0, 1, 1], [], []>} : vector<18x18xbf16>, vector<18x32xbf16>, vector<18x32xf32> -> vector<18x32xf32>
    %188 = arith.truncf %187 : vector<18x32xf32> to vector<18x32xbf16>
    %c2_168 = arith.constant 2 : index
    %c0_169 = arith.constant 0 : index
    %c0_170 = arith.constant 0 : index
    %189 = vector.load %arg14[%c2_168, %c0_169, %c0_170] : memref<9x18x18xbf16, #tpu.memory_space<vmem>>, vector<1x18x18xbf16>
    %190 = vector.shape_cast %189 : vector<1x18x18xbf16> to vector<18x18xbf16>
    %cst_171 = arith.constant dense<0.000000e+00> : vector<18x32xf32>
    %191 = tpu.matmul %190, %180, %cst_171 {dimension_numbers = #tpu.dot_dimension_numbers<[1], [0], [0], [1], [0, 0, 1, 1], [], []>} : vector<18x18xbf16>, vector<18x32xbf16>, vector<18x32xf32> -> vector<18x32xf32>
    %192 = arith.truncf %191 : vector<18x32xf32> to vector<18x32xbf16>
    %c3_172 = arith.constant 3 : index
    %c0_173 = arith.constant 0 : index
    %c0_174 = arith.constant 0 : index
    %193 = vector.load %arg14[%c3_172, %c0_173, %c0_174] : memref<9x18x18xbf16, #tpu.memory_space<vmem>>, vector<1x18x18xbf16>
    %194 = vector.shape_cast %193 : vector<1x18x18xbf16> to vector<18x18xbf16>
    %cst_175 = arith.constant dense<0.000000e+00> : vector<18x32xf32>
    %195 = tpu.matmul %194, %180, %cst_175 {dimension_numbers = #tpu.dot_dimension_numbers<[1], [0], [0], [1], [0, 0, 1, 1], [], []>} : vector<18x18xbf16>, vector<18x32xbf16>, vector<18x32xf32> -> vector<18x32xf32>
    %196 = arith.truncf %195 : vector<18x32xf32> to vector<18x32xbf16>
    %c4_176 = arith.constant 4 : index
    %c0_177 = arith.constant 0 : index
    %c0_178 = arith.constant 0 : index
    %197 = vector.load %arg14[%c4_176, %c0_177, %c0_178] : memref<9x18x18xbf16, #tpu.memory_space<vmem>>, vector<1x18x18xbf16>
    %198 = vector.shape_cast %197 : vector<1x18x18xbf16> to vector<18x18xbf16>
    %cst_179 = arith.constant dense<0.000000e+00> : vector<18x32xf32>
    %199 = tpu.matmul %198, %180, %cst_179 {dimension_numbers = #tpu.dot_dimension_numbers<[1], [0], [0], [1], [0, 0, 1, 1], [], []>} : vector<18x18xbf16>, vector<18x32xbf16>, vector<18x32xf32> -> vector<18x32xf32>
    %200 = arith.truncf %199 : vector<18x32xf32> to vector<18x32xbf16>
    %c5_180 = arith.constant 5 : index
    %c0_181 = arith.constant 0 : index
    %c0_182 = arith.constant 0 : index
    %201 = vector.load %arg14[%c5_180, %c0_181, %c0_182] : memref<9x18x18xbf16, #tpu.memory_space<vmem>>, vector<1x18x18xbf16>
    %202 = vector.shape_cast %201 : vector<1x18x18xbf16> to vector<18x18xbf16>
    %cst_183 = arith.constant dense<0.000000e+00> : vector<18x32xf32>
    %203 = tpu.matmul %202, %180, %cst_183 {dimension_numbers = #tpu.dot_dimension_numbers<[1], [0], [0], [1], [0, 0, 1, 1], [], []>} : vector<18x18xbf16>, vector<18x32xbf16>, vector<18x32xf32> -> vector<18x32xf32>
    %204 = arith.truncf %203 : vector<18x32xf32> to vector<18x32xbf16>
    %c6_184 = arith.constant 6 : index
    %c0_185 = arith.constant 0 : index
    %c0_186 = arith.constant 0 : index
    %205 = vector.load %arg14[%c6_184, %c0_185, %c0_186] : memref<9x18x18xbf16, #tpu.memory_space<vmem>>, vector<1x18x18xbf16>
    %206 = vector.shape_cast %205 : vector<1x18x18xbf16> to vector<18x18xbf16>
    %cst_187 = arith.constant dense<0.000000e+00> : vector<18x32xf32>
    %207 = tpu.matmul %206, %180, %cst_187 {dimension_numbers = #tpu.dot_dimension_numbers<[1], [0], [0], [1], [0, 0, 1, 1], [], []>} : vector<18x18xbf16>, vector<18x32xbf16>, vector<18x32xf32> -> vector<18x32xf32>
    %208 = arith.truncf %207 : vector<18x32xf32> to vector<18x32xbf16>
    %c7_188 = arith.constant 7 : index
    %c0_189 = arith.constant 0 : index
    %c0_190 = arith.constant 0 : index
    %209 = vector.load %arg14[%c7_188, %c0_189, %c0_190] : memref<9x18x18xbf16, #tpu.memory_space<vmem>>, vector<1x18x18xbf16>
    %210 = vector.shape_cast %209 : vector<1x18x18xbf16> to vector<18x18xbf16>
    %cst_191 = arith.constant dense<0.000000e+00> : vector<18x32xf32>
    %211 = tpu.matmul %210, %180, %cst_191 {dimension_numbers = #tpu.dot_dimension_numbers<[1], [0], [0], [1], [0, 0, 1, 1], [], []>} : vector<18x18xbf16>, vector<18x32xbf16>, vector<18x32xf32> -> vector<18x32xf32>
    %212 = arith.truncf %211 : vector<18x32xf32> to vector<18x32xbf16>
    %c8_192 = arith.constant 8 : index
    %c0_193 = arith.constant 0 : index
    %c0_194 = arith.constant 0 : index
    %213 = vector.load %arg14[%c8_192, %c0_193, %c0_194] : memref<9x18x18xbf16, #tpu.memory_space<vmem>>, vector<1x18x18xbf16>
    %214 = vector.shape_cast %213 : vector<1x18x18xbf16> to vector<18x18xbf16>
    %cst_195 = arith.constant dense<0.000000e+00> : vector<18x32xf32>
    %215 = tpu.matmul %214, %180, %cst_195 {dimension_numbers = #tpu.dot_dimension_numbers<[1], [0], [0], [1], [0, 0, 1, 1], [], []>} : vector<18x18xbf16>, vector<18x32xbf16>, vector<18x32xf32> -> vector<18x32xf32>
    %216 = arith.truncf %215 : vector<18x32xf32> to vector<18x32xbf16>
    %217 = tpu.concatenate %184, %188, %192, %196, %200, %204, %208, %212, %216 in 1 : vector<18x32xbf16>, vector<18x32xbf16>, vector<18x32xbf16>, vector<18x32xbf16>, vector<18x32xbf16>, vector<18x32xbf16>, vector<18x32xbf16>, vector<18x32xbf16>, vector<18x32xbf16> -> vector<18x288xbf16>
    %c0_196 = arith.constant 0 : index
    %c0_197 = arith.constant 0 : index
    %218 = vector.load %arg15[%c0_196, %c0_197] : memref<288x32xbf16, #tpu.memory_space<vmem>>, vector<288x32xbf16>
    %cst_198 = arith.constant dense<0.000000e+00> : vector<18x32xf32>
    %219 = tpu.matmul %217, %218, %cst_198 {dimension_numbers = #tpu.dot_dimension_numbers<[1], [0], [0], [1], [0, 0, 1, 1], [], []>} : vector<18x288xbf16>, vector<288x32xbf16>, vector<18x32xf32> -> vector<18x32xf32>
    %c0_199 = arith.constant 0 : index
    %c0_200 = arith.constant 0 : index
    %220 = vector.load %arg16[%c0_199, %c0_200] : memref<1x32xf32, #tpu.memory_space<vmem>>, vector<1x32xf32>
    %221 = vector.broadcast %220 : vector<1x32xf32> to vector<18x32xf32>
    %222 = arith.addf %219, %221 : vector<18x32xf32>
    %cst_201 = arith.constant 0.000000e+00 : f32
    %223 = vector.broadcast %cst_201 : f32 to vector<18x32xf32>
    %224 = arith.maximumf %222, %223 : vector<18x32xf32>
    %225 = arith.truncf %224 : vector<18x32xf32> to vector<18x32xbf16>
    %c0_202 = arith.constant 0 : index
    %c0_203 = arith.constant 0 : index
    %c0_204 = arith.constant 0 : index
    %226 = vector.load %arg17[%c0_202, %c0_203, %c0_204] : memref<9x2x18xbf16, #tpu.memory_space<vmem>>, vector<1x2x18xbf16>
    %227 = vector.shape_cast %226 : vector<1x2x18xbf16> to vector<2x18xbf16>
    %cst_205 = arith.constant dense<0.000000e+00> : vector<2x32xf32>
    %228 = tpu.matmul %227, %225, %cst_205 {dimension_numbers = #tpu.dot_dimension_numbers<[1], [0], [0], [1], [0, 0, 1, 1], [], []>} : vector<2x18xbf16>, vector<18x32xbf16>, vector<2x32xf32> -> vector<2x32xf32>
    %229 = arith.truncf %228 : vector<2x32xf32> to vector<2x32xbf16>
    %c1_206 = arith.constant 1 : index
    %c0_207 = arith.constant 0 : index
    %c0_208 = arith.constant 0 : index
    %230 = vector.load %arg17[%c1_206, %c0_207, %c0_208] : memref<9x2x18xbf16, #tpu.memory_space<vmem>>, vector<1x2x18xbf16>
    %231 = vector.shape_cast %230 : vector<1x2x18xbf16> to vector<2x18xbf16>
    %cst_209 = arith.constant dense<0.000000e+00> : vector<2x32xf32>
    %232 = tpu.matmul %231, %225, %cst_209 {dimension_numbers = #tpu.dot_dimension_numbers<[1], [0], [0], [1], [0, 0, 1, 1], [], []>} : vector<2x18xbf16>, vector<18x32xbf16>, vector<2x32xf32> -> vector<2x32xf32>
    %233 = arith.truncf %232 : vector<2x32xf32> to vector<2x32xbf16>
    %c2_210 = arith.constant 2 : index
    %c0_211 = arith.constant 0 : index
    %c0_212 = arith.constant 0 : index
    %234 = vector.load %arg17[%c2_210, %c0_211, %c0_212] : memref<9x2x18xbf16, #tpu.memory_space<vmem>>, vector<1x2x18xbf16>
    %235 = vector.shape_cast %234 : vector<1x2x18xbf16> to vector<2x18xbf16>
    %cst_213 = arith.constant dense<0.000000e+00> : vector<2x32xf32>
    %236 = tpu.matmul %235, %225, %cst_213 {dimension_numbers = #tpu.dot_dimension_numbers<[1], [0], [0], [1], [0, 0, 1, 1], [], []>} : vector<2x18xbf16>, vector<18x32xbf16>, vector<2x32xf32> -> vector<2x32xf32>
    %237 = arith.truncf %236 : vector<2x32xf32> to vector<2x32xbf16>
    %c3_214 = arith.constant 3 : index
    %c0_215 = arith.constant 0 : index
    %c0_216 = arith.constant 0 : index
    %238 = vector.load %arg17[%c3_214, %c0_215, %c0_216] : memref<9x2x18xbf16, #tpu.memory_space<vmem>>, vector<1x2x18xbf16>
    %239 = vector.shape_cast %238 : vector<1x2x18xbf16> to vector<2x18xbf16>
    %cst_217 = arith.constant dense<0.000000e+00> : vector<2x32xf32>
    %240 = tpu.matmul %239, %225, %cst_217 {dimension_numbers = #tpu.dot_dimension_numbers<[1], [0], [0], [1], [0, 0, 1, 1], [], []>} : vector<2x18xbf16>, vector<18x32xbf16>, vector<2x32xf32> -> vector<2x32xf32>
    %241 = arith.truncf %240 : vector<2x32xf32> to vector<2x32xbf16>
    %c4_218 = arith.constant 4 : index
    %c0_219 = arith.constant 0 : index
    %c0_220 = arith.constant 0 : index
    %242 = vector.load %arg17[%c4_218, %c0_219, %c0_220] : memref<9x2x18xbf16, #tpu.memory_space<vmem>>, vector<1x2x18xbf16>
    %243 = vector.shape_cast %242 : vector<1x2x18xbf16> to vector<2x18xbf16>
    %cst_221 = arith.constant dense<0.000000e+00> : vector<2x32xf32>
    %244 = tpu.matmul %243, %225, %cst_221 {dimension_numbers = #tpu.dot_dimension_numbers<[1], [0], [0], [1], [0, 0, 1, 1], [], []>} : vector<2x18xbf16>, vector<18x32xbf16>, vector<2x32xf32> -> vector<2x32xf32>
    %245 = arith.truncf %244 : vector<2x32xf32> to vector<2x32xbf16>
    %c5_222 = arith.constant 5 : index
    %c0_223 = arith.constant 0 : index
    %c0_224 = arith.constant 0 : index
    %246 = vector.load %arg17[%c5_222, %c0_223, %c0_224] : memref<9x2x18xbf16, #tpu.memory_space<vmem>>, vector<1x2x18xbf16>
    %247 = vector.shape_cast %246 : vector<1x2x18xbf16> to vector<2x18xbf16>
    %cst_225 = arith.constant dense<0.000000e+00> : vector<2x32xf32>
    %248 = tpu.matmul %247, %225, %cst_225 {dimension_numbers = #tpu.dot_dimension_numbers<[1], [0], [0], [1], [0, 0, 1, 1], [], []>} : vector<2x18xbf16>, vector<18x32xbf16>, vector<2x32xf32> -> vector<2x32xf32>
    %249 = arith.truncf %248 : vector<2x32xf32> to vector<2x32xbf16>
    %c6_226 = arith.constant 6 : index
    %c0_227 = arith.constant 0 : index
    %c0_228 = arith.constant 0 : index
    %250 = vector.load %arg17[%c6_226, %c0_227, %c0_228] : memref<9x2x18xbf16, #tpu.memory_space<vmem>>, vector<1x2x18xbf16>
    %251 = vector.shape_cast %250 : vector<1x2x18xbf16> to vector<2x18xbf16>
    %cst_229 = arith.constant dense<0.000000e+00> : vector<2x32xf32>
    %252 = tpu.matmul %251, %225, %cst_229 {dimension_numbers = #tpu.dot_dimension_numbers<[1], [0], [0], [1], [0, 0, 1, 1], [], []>} : vector<2x18xbf16>, vector<18x32xbf16>, vector<2x32xf32> -> vector<2x32xf32>
    %253 = arith.truncf %252 : vector<2x32xf32> to vector<2x32xbf16>
    %c7_230 = arith.constant 7 : index
    %c0_231 = arith.constant 0 : index
    %c0_232 = arith.constant 0 : index
    %254 = vector.load %arg17[%c7_230, %c0_231, %c0_232] : memref<9x2x18xbf16, #tpu.memory_space<vmem>>, vector<1x2x18xbf16>
    %255 = vector.shape_cast %254 : vector<1x2x18xbf16> to vector<2x18xbf16>
    %cst_233 = arith.constant dense<0.000000e+00> : vector<2x32xf32>
    %256 = tpu.matmul %255, %225, %cst_233 {dimension_numbers = #tpu.dot_dimension_numbers<[1], [0], [0], [1], [0, 0, 1, 1], [], []>} : vector<2x18xbf16>, vector<18x32xbf16>, vector<2x32xf32> -> vector<2x32xf32>
    %257 = arith.truncf %256 : vector<2x32xf32> to vector<2x32xbf16>
    %c8_234 = arith.constant 8 : index
    %c0_235 = arith.constant 0 : index
    %c0_236 = arith.constant 0 : index
    %258 = vector.load %arg17[%c8_234, %c0_235, %c0_236] : memref<9x2x18xbf16, #tpu.memory_space<vmem>>, vector<1x2x18xbf16>
    %259 = vector.shape_cast %258 : vector<1x2x18xbf16> to vector<2x18xbf16>
    %cst_237 = arith.constant dense<0.000000e+00> : vector<2x32xf32>
    %260 = tpu.matmul %259, %225, %cst_237 {dimension_numbers = #tpu.dot_dimension_numbers<[1], [0], [0], [1], [0, 0, 1, 1], [], []>} : vector<2x18xbf16>, vector<18x32xbf16>, vector<2x32xf32> -> vector<2x32xf32>
    %261 = arith.truncf %260 : vector<2x32xf32> to vector<2x32xbf16>
    %262 = tpu.concatenate %229, %233, %237, %241, %245, %249, %253, %257, %261 in 1 : vector<2x32xbf16>, vector<2x32xbf16>, vector<2x32xbf16>, vector<2x32xbf16>, vector<2x32xbf16>, vector<2x32xbf16>, vector<2x32xbf16>, vector<2x32xbf16>, vector<2x32xbf16> -> vector<2x288xbf16>
    %c0_238 = arith.constant 0 : index
    %c0_239 = arith.constant 0 : index
    %263 = vector.load %arg18[%c0_238, %c0_239] : memref<288x64xbf16, #tpu.memory_space<vmem>>, vector<288x64xbf16>
    %cst_240 = arith.constant dense<0.000000e+00> : vector<2x64xf32>
    %264 = tpu.matmul %262, %263, %cst_240 {dimension_numbers = #tpu.dot_dimension_numbers<[1], [0], [0], [1], [0, 0, 1, 1], [], []>} : vector<2x288xbf16>, vector<288x64xbf16>, vector<2x64xf32> -> vector<2x64xf32>
    %c0_241 = arith.constant 0 : index
    %c0_242 = arith.constant 0 : index
    %265 = vector.load %arg19[%c0_241, %c0_242] : memref<1x64xf32, #tpu.memory_space<vmem>>, vector<1x64xf32>
    %266 = vector.broadcast %265 : vector<1x64xf32> to vector<2x64xf32>
    %267 = arith.addf %264, %266 : vector<2x64xf32>
    %cst_243 = arith.constant 0.000000e+00 : f32
    %268 = vector.broadcast %cst_243 : f32 to vector<2x64xf32>
    %269 = arith.maximumf %267, %268 : vector<2x64xf32>
    %270 = arith.truncf %269 : vector<2x64xf32> to vector<2x64xbf16>
    %c0_244 = arith.constant 0 : index
    %c0_245 = arith.constant 0 : index
    %c0_246 = arith.constant 0 : index
    %271 = vector.load %arg20[%c0_244, %c0_245, %c0_246] : memref<4x8x2xbf16, #tpu.memory_space<vmem>>, vector<1x8x2xbf16>
    %272 = vector.shape_cast %271 : vector<1x8x2xbf16> to vector<8x2xbf16>
    %cst_247 = arith.constant dense<0.000000e+00> : vector<8x64xf32>
    %273 = tpu.matmul %272, %270, %cst_247 {dimension_numbers = #tpu.dot_dimension_numbers<[1], [0], [0], [1], [0, 0, 1, 1], [], []>} : vector<8x2xbf16>, vector<2x64xbf16>, vector<8x64xf32> -> vector<8x64xf32>
    %274 = arith.truncf %273 : vector<8x64xf32> to vector<8x64xbf16>
    %c1_248 = arith.constant 1 : index
    %c0_249 = arith.constant 0 : index
    %c0_250 = arith.constant 0 : index
    %275 = vector.load %arg20[%c1_248, %c0_249, %c0_250] : memref<4x8x2xbf16, #tpu.memory_space<vmem>>, vector<1x8x2xbf16>
    %276 = vector.shape_cast %275 : vector<1x8x2xbf16> to vector<8x2xbf16>
    %cst_251 = arith.constant dense<0.000000e+00> : vector<8x64xf32>
    %277 = tpu.matmul %276, %270, %cst_251 {dimension_numbers = #tpu.dot_dimension_numbers<[1], [0], [0], [1], [0, 0, 1, 1], [], []>} : vector<8x2xbf16>, vector<2x64xbf16>, vector<8x64xf32> -> vector<8x64xf32>
    %278 = arith.truncf %277 : vector<8x64xf32> to vector<8x64xbf16>
    %c2_252 = arith.constant 2 : index
    %c0_253 = arith.constant 0 : index
    %c0_254 = arith.constant 0 : index
    %279 = vector.load %arg20[%c2_252, %c0_253, %c0_254] : memref<4x8x2xbf16, #tpu.memory_space<vmem>>, vector<1x8x2xbf16>
    %280 = vector.shape_cast %279 : vector<1x8x2xbf16> to vector<8x2xbf16>
    %cst_255 = arith.constant dense<0.000000e+00> : vector<8x64xf32>
    %281 = tpu.matmul %280, %270, %cst_255 {dimension_numbers = #tpu.dot_dimension_numbers<[1], [0], [0], [1], [0, 0, 1, 1], [], []>} : vector<8x2xbf16>, vector<2x64xbf16>, vector<8x64xf32> -> vector<8x64xf32>
    %282 = arith.truncf %281 : vector<8x64xf32> to vector<8x64xbf16>
    %c3_256 = arith.constant 3 : index
    %c0_257 = arith.constant 0 : index
    %c0_258 = arith.constant 0 : index
    %283 = vector.load %arg20[%c3_256, %c0_257, %c0_258] : memref<4x8x2xbf16, #tpu.memory_space<vmem>>, vector<1x8x2xbf16>
    %284 = vector.shape_cast %283 : vector<1x8x2xbf16> to vector<8x2xbf16>
    %cst_259 = arith.constant dense<0.000000e+00> : vector<8x64xf32>
    %285 = tpu.matmul %284, %270, %cst_259 {dimension_numbers = #tpu.dot_dimension_numbers<[1], [0], [0], [1], [0, 0, 1, 1], [], []>} : vector<8x2xbf16>, vector<2x64xbf16>, vector<8x64xf32> -> vector<8x64xf32>
    %286 = arith.truncf %285 : vector<8x64xf32> to vector<8x64xbf16>
    %287 = tpu.concatenate %274, %278, %282, %286 in 1 : vector<8x64xbf16>, vector<8x64xbf16>, vector<8x64xbf16>, vector<8x64xbf16> -> vector<8x256xbf16>
    %c0_260 = arith.constant 0 : index
    %c0_261 = arith.constant 0 : index
    %288 = vector.load %arg21[%c0_260, %c0_261] : memref<256x64xbf16, #tpu.memory_space<vmem>>, vector<256x64xbf16>
    %cst_262 = arith.constant dense<0.000000e+00> : vector<8x64xf32>
    %289 = tpu.matmul %287, %288, %cst_262 {dimension_numbers = #tpu.dot_dimension_numbers<[1], [0], [0], [1], [0, 0, 1, 1], [], []>} : vector<8x256xbf16>, vector<256x64xbf16>, vector<8x64xf32> -> vector<8x64xf32>
    %c0_263 = arith.constant 0 : index
    %c0_264 = arith.constant 0 : index
    %290 = vector.load %arg22[%c0_263, %c0_264] : memref<1x64xf32, #tpu.memory_space<vmem>>, vector<1x64xf32>
    %291 = vector.broadcast %290 : vector<1x64xf32> to vector<8x64xf32>
    %292 = arith.addf %289, %291 : vector<8x64xf32>
    %cst_265 = arith.constant 0.000000e+00 : f32
    %293 = vector.broadcast %cst_265 : f32 to vector<8x64xf32>
    %294 = arith.maximumf %292, %293 : vector<8x64xf32>
    %295 = arith.truncf %294 : vector<8x64xf32> to vector<8x64xbf16>
    %c0_266 = arith.constant 0 : index
    %c0_267 = arith.constant 0 : index
    %c0_268 = arith.constant 0 : index
    %296 = vector.load %arg23[%c0_266, %c0_267, %c0_268] : memref<4x18x8xbf16, #tpu.memory_space<vmem>>, vector<1x18x8xbf16>
    %297 = vector.shape_cast %296 : vector<1x18x8xbf16> to vector<18x8xbf16>
    %cst_269 = arith.constant dense<0.000000e+00> : vector<18x64xf32>
    %298 = tpu.matmul %297, %295, %cst_269 {dimension_numbers = #tpu.dot_dimension_numbers<[1], [0], [0], [1], [0, 0, 1, 1], [], []>} : vector<18x8xbf16>, vector<8x64xbf16>, vector<18x64xf32> -> vector<18x64xf32>
    %299 = arith.truncf %298 : vector<18x64xf32> to vector<18x64xbf16>
    %c1_270 = arith.constant 1 : index
    %c0_271 = arith.constant 0 : index
    %c0_272 = arith.constant 0 : index
    %300 = vector.load %arg23[%c1_270, %c0_271, %c0_272] : memref<4x18x8xbf16, #tpu.memory_space<vmem>>, vector<1x18x8xbf16>
    %301 = vector.shape_cast %300 : vector<1x18x8xbf16> to vector<18x8xbf16>
    %cst_273 = arith.constant dense<0.000000e+00> : vector<18x64xf32>
    %302 = tpu.matmul %301, %295, %cst_273 {dimension_numbers = #tpu.dot_dimension_numbers<[1], [0], [0], [1], [0, 0, 1, 1], [], []>} : vector<18x8xbf16>, vector<8x64xbf16>, vector<18x64xf32> -> vector<18x64xf32>
    %303 = arith.truncf %302 : vector<18x64xf32> to vector<18x64xbf16>
    %c2_274 = arith.constant 2 : index
    %c0_275 = arith.constant 0 : index
    %c0_276 = arith.constant 0 : index
    %304 = vector.load %arg23[%c2_274, %c0_275, %c0_276] : memref<4x18x8xbf16, #tpu.memory_space<vmem>>, vector<1x18x8xbf16>
    %305 = vector.shape_cast %304 : vector<1x18x8xbf16> to vector<18x8xbf16>
    %cst_277 = arith.constant dense<0.000000e+00> : vector<18x64xf32>
    %306 = tpu.matmul %305, %295, %cst_277 {dimension_numbers = #tpu.dot_dimension_numbers<[1], [0], [0], [1], [0, 0, 1, 1], [], []>} : vector<18x8xbf16>, vector<8x64xbf16>, vector<18x64xf32> -> vector<18x64xf32>
    %307 = arith.truncf %306 : vector<18x64xf32> to vector<18x64xbf16>
    %c3_278 = arith.constant 3 : index
    %c0_279 = arith.constant 0 : index
    %c0_280 = arith.constant 0 : index
    %308 = vector.load %arg23[%c3_278, %c0_279, %c0_280] : memref<4x18x8xbf16, #tpu.memory_space<vmem>>, vector<1x18x8xbf16>
    %309 = vector.shape_cast %308 : vector<1x18x8xbf16> to vector<18x8xbf16>
    %cst_281 = arith.constant dense<0.000000e+00> : vector<18x64xf32>
    %310 = tpu.matmul %309, %295, %cst_281 {dimension_numbers = #tpu.dot_dimension_numbers<[1], [0], [0], [1], [0, 0, 1, 1], [], []>} : vector<18x8xbf16>, vector<8x64xbf16>, vector<18x64xf32> -> vector<18x64xf32>
    %311 = arith.truncf %310 : vector<18x64xf32> to vector<18x64xbf16>
    %312 = tpu.concatenate %299, %303, %307, %311 in 1 : vector<18x64xbf16>, vector<18x64xbf16>, vector<18x64xbf16>, vector<18x64xbf16> -> vector<18x256xbf16>
    %c0_282 = arith.constant 0 : index
    %c0_283 = arith.constant 0 : index
    %313 = vector.load %arg24[%c0_282, %c0_283] : memref<256x64xbf16, #tpu.memory_space<vmem>>, vector<256x64xbf16>
    %cst_284 = arith.constant dense<0.000000e+00> : vector<18x64xf32>
    %314 = tpu.matmul %312, %313, %cst_284 {dimension_numbers = #tpu.dot_dimension_numbers<[1], [0], [0], [1], [0, 0, 1, 1], [], []>} : vector<18x256xbf16>, vector<256x64xbf16>, vector<18x64xf32> -> vector<18x64xf32>
    %c0_285 = arith.constant 0 : index
    %c0_286 = arith.constant 0 : index
    %315 = vector.load %arg25[%c0_285, %c0_286] : memref<1x64xf32, #tpu.memory_space<vmem>>, vector<1x64xf32>
    %316 = vector.broadcast %315 : vector<1x64xf32> to vector<18x64xf32>
    %317 = arith.addf %314, %316 : vector<18x64xf32>
    %cst_287 = arith.constant 0.000000e+00 : f32
    %318 = vector.broadcast %cst_287 : f32 to vector<18x64xf32>
    %319 = arith.maximumf %317, %318 : vector<18x64xf32>
    %320 = arith.truncf %319 : vector<18x64xf32> to vector<18x64xbf16>
    %c0_288 = arith.constant 0 : index
    %c0_289 = arith.constant 0 : index
    %c0_290 = arith.constant 0 : index
    %321 = vector.load %arg26[%c0_288, %c0_289, %c0_290] : memref<4x2x18xbf16, #tpu.memory_space<vmem>>, vector<1x2x18xbf16>
    %322 = vector.shape_cast %321 : vector<1x2x18xbf16> to vector<2x18xbf16>
    %cst_291 = arith.constant dense<0.000000e+00> : vector<2x64xf32>
    %323 = tpu.matmul %322, %320, %cst_291 {dimension_numbers = #tpu.dot_dimension_numbers<[1], [0], [0], [1], [0, 0, 1, 1], [], []>} : vector<2x18xbf16>, vector<18x64xbf16>, vector<2x64xf32> -> vector<2x64xf32>
    %324 = arith.truncf %323 : vector<2x64xf32> to vector<2x64xbf16>
    %c1_292 = arith.constant 1 : index
    %c0_293 = arith.constant 0 : index
    %c0_294 = arith.constant 0 : index
    %325 = vector.load %arg26[%c1_292, %c0_293, %c0_294] : memref<4x2x18xbf16, #tpu.memory_space<vmem>>, vector<1x2x18xbf16>
    %326 = vector.shape_cast %325 : vector<1x2x18xbf16> to vector<2x18xbf16>
    %cst_295 = arith.constant dense<0.000000e+00> : vector<2x64xf32>
    %327 = tpu.matmul %326, %320, %cst_295 {dimension_numbers = #tpu.dot_dimension_numbers<[1], [0], [0], [1], [0, 0, 1, 1], [], []>} : vector<2x18xbf16>, vector<18x64xbf16>, vector<2x64xf32> -> vector<2x64xf32>
    %328 = arith.truncf %327 : vector<2x64xf32> to vector<2x64xbf16>
    %c2_296 = arith.constant 2 : index
    %c0_297 = arith.constant 0 : index
    %c0_298 = arith.constant 0 : index
    %329 = vector.load %arg26[%c2_296, %c0_297, %c0_298] : memref<4x2x18xbf16, #tpu.memory_space<vmem>>, vector<1x2x18xbf16>
    %330 = vector.shape_cast %329 : vector<1x2x18xbf16> to vector<2x18xbf16>
    %cst_299 = arith.constant dense<0.000000e+00> : vector<2x64xf32>
    %331 = tpu.matmul %330, %320, %cst_299 {dimension_numbers = #tpu.dot_dimension_numbers<[1], [0], [0], [1], [0, 0, 1, 1], [], []>} : vector<2x18xbf16>, vector<18x64xbf16>, vector<2x64xf32> -> vector<2x64xf32>
    %332 = arith.truncf %331 : vector<2x64xf32> to vector<2x64xbf16>
    %c3_300 = arith.constant 3 : index
    %c0_301 = arith.constant 0 : index
    %c0_302 = arith.constant 0 : index
    %333 = vector.load %arg26[%c3_300, %c0_301, %c0_302] : memref<4x2x18xbf16, #tpu.memory_space<vmem>>, vector<1x2x18xbf16>
    %334 = vector.shape_cast %333 : vector<1x2x18xbf16> to vector<2x18xbf16>
    %cst_303 = arith.constant dense<0.000000e+00> : vector<2x64xf32>
    %335 = tpu.matmul %334, %320, %cst_303 {dimension_numbers = #tpu.dot_dimension_numbers<[1], [0], [0], [1], [0, 0, 1, 1], [], []>} : vector<2x18xbf16>, vector<18x64xbf16>, vector<2x64xf32> -> vector<2x64xf32>
    %336 = arith.truncf %335 : vector<2x64xf32> to vector<2x64xbf16>
    %337 = tpu.concatenate %324, %328, %332, %336 in 1 : vector<2x64xbf16>, vector<2x64xbf16>, vector<2x64xbf16>, vector<2x64xbf16> -> vector<2x256xbf16>
    %c0_304 = arith.constant 0 : index
    %c0_305 = arith.constant 0 : index
    %338 = vector.load %arg27[%c0_304, %c0_305] : memref<256x128xbf16, #tpu.memory_space<vmem>>, vector<256x128xbf16>
    %cst_306 = arith.constant dense<0.000000e+00> : vector<2x128xf32>
    %339 = tpu.matmul %337, %338, %cst_306 {dimension_numbers = #tpu.dot_dimension_numbers<[1], [0], [0], [1], [0, 0, 1, 1], [], []>} : vector<2x256xbf16>, vector<256x128xbf16>, vector<2x128xf32> -> vector<2x128xf32>
    %c0_307 = arith.constant 0 : index
    %c0_308 = arith.constant 0 : index
    %340 = vector.load %arg28[%c0_307, %c0_308] : memref<1x128xf32, #tpu.memory_space<vmem>>, vector<1x128xf32>
    %341 = vector.broadcast %340 : vector<1x128xf32> to vector<2x128xf32>
    %342 = arith.addf %339, %341 : vector<2x128xf32>
    %cst_309 = arith.constant 0.000000e+00 : f32
    %343 = vector.broadcast %cst_309 : f32 to vector<2x128xf32>
    %344 = arith.maximumf %342, %343 : vector<2x128xf32>
    %345 = arith.truncf %344 : vector<2x128xf32> to vector<2x128xbf16>
    %c0_310 = arith.constant 0 : index
    %c0_311 = arith.constant 0 : index
    %346 = vector.load %arg29[%c0_310, %c0_311] : memref<128x128xbf16, #tpu.memory_space<vmem>>, vector<128x128xbf16>
    %cst_312 = arith.constant dense<0.000000e+00> : vector<2x128xf32>
    %347 = tpu.matmul %345, %346, %cst_312 {dimension_numbers = #tpu.dot_dimension_numbers<[1], [0], [0], [1], [0, 0, 1, 1], [], []>} : vector<2x128xbf16>, vector<128x128xbf16>, vector<2x128xf32> -> vector<2x128xf32>
    %c0_313 = arith.constant 0 : index
    %c0_314 = arith.constant 0 : index
    %348 = vector.load %arg30[%c0_313, %c0_314] : memref<1x128xf32, #tpu.memory_space<vmem>>, vector<1x128xf32>
    %349 = vector.broadcast %348 : vector<1x128xf32> to vector<2x128xf32>
    %350 = arith.addf %347, %349 : vector<2x128xf32>
    %cst_315 = arith.constant 0.000000e+00 : f32
    %351 = vector.broadcast %cst_315 : f32 to vector<2x128xf32>
    %352 = arith.maximumf %350, %351 : vector<2x128xf32>
    %353 = arith.truncf %352 : vector<2x128xf32> to vector<2x128xbf16>
    %c0_316 = arith.constant 0 : index
    %c0_317 = arith.constant 0 : index
    %354 = vector.load %arg31[%c0_316, %c0_317] : memref<128x128xbf16, #tpu.memory_space<vmem>>, vector<128x128xbf16>
    %cst_318 = arith.constant dense<0.000000e+00> : vector<2x128xf32>
    %355 = tpu.matmul %353, %354, %cst_318 {dimension_numbers = #tpu.dot_dimension_numbers<[1], [0], [0], [1], [0, 0, 1, 1], [], []>} : vector<2x128xbf16>, vector<128x128xbf16>, vector<2x128xf32> -> vector<2x128xf32>
    %c0_319 = arith.constant 0 : index
    %c0_320 = arith.constant 0 : index
    %356 = vector.load %arg32[%c0_319, %c0_320] : memref<1x128xf32, #tpu.memory_space<vmem>>, vector<1x128xf32>
    %357 = vector.broadcast %356 : vector<1x128xf32> to vector<2x128xf32>
    %358 = arith.addf %355, %357 : vector<2x128xf32>
    %cst_321 = arith.constant 0.000000e+00 : f32
    %359 = vector.broadcast %cst_321 : f32 to vector<2x128xf32>
    %360 = arith.maximumf %358, %359 : vector<2x128xf32>
    %361 = arith.truncf %360 : vector<2x128xf32> to vector<2x128xbf16>
    %c0_322 = arith.constant 0 : index
    %c0_323 = arith.constant 0 : index
    %362 = vector.load %arg33[%c0_322, %c0_323] : memref<128x128xbf16, #tpu.memory_space<vmem>>, vector<128x128xbf16>
    %cst_324 = arith.constant dense<0.000000e+00> : vector<2x128xf32>
    %363 = tpu.matmul %361, %362, %cst_324 {dimension_numbers = #tpu.dot_dimension_numbers<[1], [0], [0], [1], [0, 0, 1, 1], [], []>} : vector<2x128xbf16>, vector<128x128xbf16>, vector<2x128xf32> -> vector<2x128xf32>
    %c0_325 = arith.constant 0 : index
    %c0_326 = arith.constant 0 : index
    %364 = vector.load %arg34[%c0_325, %c0_326] : memref<1x128xf32, #tpu.memory_space<vmem>>, vector<1x128xf32>
    %365 = vector.broadcast %364 : vector<1x128xf32> to vector<2x128xf32>
    %366 = arith.addf %363, %365 : vector<2x128xf32>
    %cst_327 = arith.constant 0.000000e+00 : f32
    %367 = vector.broadcast %cst_327 : f32 to vector<2x128xf32>
    %368 = arith.maximumf %366, %367 : vector<2x128xf32>
    %369 = arith.truncf %368 : vector<2x128xf32> to vector<2x128xbf16>
    %c0_328 = arith.constant 0 : index
    %c0_329 = arith.constant 0 : index
    %370 = vector.load %arg35[%c0_328, %c0_329] : memref<128x1xbf16, #tpu.memory_space<vmem>>, vector<128x1xbf16>
    %cst_330 = arith.constant dense<0.000000e+00> : vector<2x1xf32>
    %371 = tpu.matmul %369, %370, %cst_330 {dimension_numbers = #tpu.dot_dimension_numbers<[1], [0], [0], [1], [0, 0, 1, 1], [], []>} : vector<2x128xbf16>, vector<128x1xbf16>, vector<2x1xf32> -> vector<2x1xf32>
    %c0_331 = arith.constant 0 : index
    %c0_332 = arith.constant 0 : index
    %372 = vector.load %arg36[%c0_331, %c0_332] : memref<1x1xf32, #tpu.memory_space<vmem>>, vector<1x1xf32>
    %373 = vector.broadcast %372 : vector<1x1xf32> to vector<2x1xf32>
    %374 = arith.addf %371, %373 : vector<2x1xf32>
    %375 = math.tanh %374 : vector<2x1xf32>
    %c0_333 = arith.constant 0 : index
    %c0_334 = arith.constant 0 : index
    %376 = vector.load %arg37[%c0_333, %c0_334] : memref<2x1xf32, #tpu.memory_space<vmem>>, vector<2x1xf32>
    tpu.vector_store %arg37[%c0_333, %c0_334], %375 {strides = array<i32>} : memref<2x1xf32, #tpu.memory_space<vmem>>, vector<2x1xf32>,
    return
  }
  func.func @transform_0(%arg0: i32) -> (i32, i32) {
    %c0_i32 = arith.constant 0 : i32
    %c0_i32_0 = arith.constant 0 : i32
    return %arg0, %c0_i32 : i32, i32
  }
  func.func @transform_1(%arg0: i32) -> (i32, i32, i32) {
    %c0_i32 = arith.constant 0 : i32
    %c0_i32_0 = arith.constant 0 : i32
    %c0_i32_1 = arith.constant 0 : i32
    %c0_i32_2 = arith.constant 0 : i32
    return %c0_i32, %c0_i32_0, %c0_i32_1 : i32, i32, i32
  }
  func.func @transform_2(%arg0: i32) -> (i32, i32) {
    %c0_i32 = arith.constant 0 : i32
    %c0_i32_0 = arith.constant 0 : i32
    %c0_i32_1 = arith.constant 0 : i32
    return %c0_i32, %c0_i32_0 : i32, i32
  }
  func.func @transform_3(%arg0: i32) -> (i32, i32) {
    %c0_i32 = arith.constant 0 : i32
    %c0_i32_0 = arith.constant 0 : i32
    %c0_i32_1 = arith.constant 0 : i32
    return %c0_i32, %c0_i32_0 : i32, i32
  }
  func.func @transform_4(%arg0: i32) -> (i32, i32, i32) {
    %c0_i32 = arith.constant 0 : i32
    %c0_i32_0 = arith.constant 0 : i32
    %c0_i32_1 = arith.constant 0 : i32
    %c0_i32_2 = arith.constant 0 : i32
    return %c0_i32, %c0_i32_0, %c0_i32_1 : i32, i32, i32
  }
  func.func @transform_5(%arg0: i32) -> (i32, i32) {
    %c0_i32 = arith.constant 0 : i32
    %c0_i32_0 = arith.constant 0 : i32
    %c0_i32_1 = arith.constant 0 : i32
    return %c0_i32, %c0_i32_0 : i32, i32
  }
  func.func @transform_6(%arg0: i32) -> (i32, i32) {
    %c0_i32 = arith.constant 0 : i32
    %c0_i32_0 = arith.constant 0 : i32
    %c0_i32_1 = arith.constant 0 : i32
    return %c0_i32, %c0_i32_0 : i32, i32
  }
  func.func @transform_7(%arg0: i32) -> (i32, i32, i32) {
    %c0_i32 = arith.constant 0 : i32
    %c0_i32_0 = arith.constant 0 : i32
    %c0_i32_1 = arith.constant 0 : i32
    %c0_i32_2 = arith.constant 0 : i32
    return %c0_i32, %c0_i32_0, %c0_i32_1 : i32, i32, i32
  }
  func.func @transform_8(%arg0: i32) -> (i32, i32) {
    %c0_i32 = arith.constant 0 : i32
    %c0_i32_0 = arith.constant 0 : i32
    %c0_i32_1 = arith.constant 0 : i32
    return %c0_i32, %c0_i32_0 : i32, i32
  }
  func.func @transform_9(%arg0: i32) -> (i32, i32) {
    %c0_i32 = arith.constant 0 : i32
    %c0_i32_0 = arith.constant 0 : i32
    %c0_i32_1 = arith.constant 0 : i32
    return %c0_i32, %c0_i32_0 : i32, i32
  }
  func.func @transform_10(%arg0: i32) -> (i32, i32, i32) {
    %c0_i32 = arith.constant 0 : i32
    %c0_i32_0 = arith.constant 0 : i32
    %c0_i32_1 = arith.constant 0 : i32
    %c0_i32_2 = arith.constant 0 : i32
    return %c0_i32, %c0_i32_0, %c0_i32_1 : i32, i32, i32
  }
  func.func @transform_11(%arg0: i32) -> (i32, i32) {
    %c0_i32 = arith.constant 0 : i32
    %c0_i32_0 = arith.constant 0 : i32
    %c0_i32_1 = arith.constant 0 : i32
    return %c0_i32, %c0_i32_0 : i32, i32
  }
  func.func @transform_12(%arg0: i32) -> (i32, i32) {
    %c0_i32 = arith.constant 0 : i32
    %c0_i32_0 = arith.constant 0 : i32
    %c0_i32_1 = arith.constant 0 : i32
    return %c0_i32, %c0_i32_0 : i32, i32
  }
  func.func @transform_13(%arg0: i32) -> (i32, i32, i32) {
    %c0_i32 = arith.constant 0 : i32
    %c0_i32_0 = arith.constant 0 : i32
    %c0_i32_1 = arith.constant 0 : i32
    %c0_i32_2 = arith.constant 0 : i32
    return %c0_i32, %c0_i32_0, %c0_i32_1 : i32, i32, i32
  }
  func.func @transform_14(%arg0: i32) -> (i32, i32) {
    %c0_i32 = arith.constant 0 : i32
    %c0_i32_0 = arith.constant 0 : i32
    %c0_i32_1 = arith.constant 0 : i32
    return %c0_i32, %c0_i32_0 : i32, i32
  }
  func.func @transform_15(%arg0: i32) -> (i32, i32) {
    %c0_i32 = arith.constant 0 : i32
    %c0_i32_0 = arith.constant 0 : i32
    %c0_i32_1 = arith.constant 0 : i32
    return %c0_i32, %c0_i32_0 : i32, i32
  }
  func.func @transform_16(%arg0: i32) -> (i32, i32, i32) {
    %c0_i32 = arith.constant 0 : i32
    %c0_i32_0 = arith.constant 0 : i32
    %c0_i32_1 = arith.constant 0 : i32
    %c0_i32_2 = arith.constant 0 : i32
    return %c0_i32, %c0_i32_0, %c0_i32_1 : i32, i32, i32
  }
  func.func @transform_17(%arg0: i32) -> (i32, i32) {
    %c0_i32 = arith.constant 0 : i32
    %c0_i32_0 = arith.constant 0 : i32
    %c0_i32_1 = arith.constant 0 : i32
    return %c0_i32, %c0_i32_0 : i32, i32
  }
  func.func @transform_18(%arg0: i32) -> (i32, i32) {
    %c0_i32 = arith.constant 0 : i32
    %c0_i32_0 = arith.constant 0 : i32
    %c0_i32_1 = arith.constant 0 : i32
    return %c0_i32, %c0_i32_0 : i32, i32
  }
  func.func @transform_19(%arg0: i32) -> (i32, i32, i32) {
    %c0_i32 = arith.constant 0 : i32
    %c0_i32_0 = arith.constant 0 : i32
    %c0_i32_1 = arith.constant 0 : i32
    %c0_i32_2 = arith.constant 0 : i32
    return %c0_i32, %c0_i32_0, %c0_i32_1 : i32, i32, i32
  }
  func.func @transform_20(%arg0: i32) -> (i32, i32) {
    %c0_i32 = arith.constant 0 : i32
    %c0_i32_0 = arith.constant 0 : i32
    %c0_i32_1 = arith.constant 0 : i32
    return %c0_i32, %c0_i32_0 : i32, i32
  }
  func.func @transform_21(%arg0: i32) -> (i32, i32) {
    %c0_i32 = arith.constant 0 : i32
    %c0_i32_0 = arith.constant 0 : i32
    %c0_i32_1 = arith.constant 0 : i32
    return %c0_i32, %c0_i32_0 : i32, i32
  }
  func.func @transform_22(%arg0: i32) -> (i32, i32, i32) {
    %c0_i32 = arith.constant 0 : i32
    %c0_i32_0 = arith.constant 0 : i32
    %c0_i32_1 = arith.constant 0 : i32
    %c0_i32_2 = arith.constant 0 : i32
    return %c0_i32, %c0_i32_0, %c0_i32_1 : i32, i32, i32
  }
  func.func @transform_23(%arg0: i32) -> (i32, i32) {
    %c0_i32 = arith.constant 0 : i32
    %c0_i32_0 = arith.constant 0 : i32
    %c0_i32_1 = arith.constant 0 : i32
    return %c0_i32, %c0_i32_0 : i32, i32
  }
  func.func @transform_24(%arg0: i32) -> (i32, i32) {
    %c0_i32 = arith.constant 0 : i32
    %c0_i32_0 = arith.constant 0 : i32
    %c0_i32_1 = arith.constant 0 : i32
    return %c0_i32, %c0_i32_0 : i32, i32
  }
  func.func @transform_25(%arg0: i32) -> (i32, i32, i32) {
    %c0_i32 = arith.constant 0 : i32
    %c0_i32_0 = arith.constant 0 : i32
    %c0_i32_1 = arith.constant 0 : i32
    %c0_i32_2 = arith.constant 0 : i32
    return %c0_i32, %c0_i32_0, %c0_i32_1 : i32, i32, i32
  }
  func.func @transform_26(%arg0: i32) -> (i32, i32) {
    %c0_i32 = arith.constant 0 : i32
    %c0_i32_0 = arith.constant 0 : i32
    %c0_i32_1 = arith.constant 0 : i32
    return %c0_i32, %c0_i32_0 : i32, i32
  }
  func.func @transform_27(%arg0: i32) -> (i32, i32) {
    %c0_i32 = arith.constant 0 : i32
    %c0_i32_0 = arith.constant 0 : i32
    %c0_i32_1 = arith.constant 0 : i32
    return %c0_i32, %c0_i32_0 : i32, i32
  }
  func.func @transform_28(%arg0: i32) -> (i32, i32) {
    %c0_i32 = arith.constant 0 : i32
    %c0_i32_0 = arith.constant 0 : i32
    %c0_i32_1 = arith.constant 0 : i32
    return %c0_i32, %c0_i32_0 : i32, i32
  }
  func.func @transform_29(%arg0: i32) -> (i32, i32) {
    %c0_i32 = arith.constant 0 : i32
    %c0_i32_0 = arith.constant 0 : i32
    %c0_i32_1 = arith.constant 0 : i32
    return %c0_i32, %c0_i32_0 : i32, i32
  }
  func.func @transform_30(%arg0: i32) -> (i32, i32) {
    %c0_i32 = arith.constant 0 : i32
    %c0_i32_0 = arith.constant 0 : i32
    %c0_i32_1 = arith.constant 0 : i32
    return %c0_i32, %c0_i32_0 : i32, i32
  }
  func.func @transform_31(%arg0: i32) -> (i32, i32) {
    %c0_i32 = arith.constant 0 : i32
    %c0_i32_0 = arith.constant 0 : i32
    %c0_i32_1 = arith.constant 0 : i32
    return %c0_i32, %c0_i32_0 : i32, i32
  }
  func.func @transform_32(%arg0: i32) -> (i32, i32) {
    %c0_i32 = arith.constant 0 : i32
    %c0_i32_0 = arith.constant 0 : i32
    %c0_i32_1 = arith.constant 0 : i32
    return %c0_i32, %c0_i32_0 : i32, i32
  }
  func.func @transform_33(%arg0: i32) -> (i32, i32) {
    %c0_i32 = arith.constant 0 : i32
    %c0_i32_0 = arith.constant 0 : i32
    %c0_i32_1 = arith.constant 0 : i32
    return %c0_i32, %c0_i32_0 : i32, i32
  }
  func.func @transform_34(%arg0: i32) -> (i32, i32) {
    %c0_i32 = arith.constant 0 : i32
    %c0_i32_0 = arith.constant 0 : i32
    %c0_i32_1 = arith.constant 0 : i32
    return %c0_i32, %c0_i32_0 : i32, i32
  }
  func.func @transform_35(%arg0: i32) -> (i32, i32) {
    %c0_i32 = arith.constant 0 : i32
    %c0_i32_0 = arith.constant 0 : i32
    %c0_i32_1 = arith.constant 0 : i32
    return %c0_i32, %c0_i32_0 : i32, i32
  }
  func.func @transform_36(%arg0: i32) -> (i32, i32) {
    %c0_i32 = arith.constant 0 : i32
    %c0_i32_0 = arith.constant 0 : i32
    return %arg0, %c0_i32 : i32, i32
  }
}

</mosaic_0001>

<bundles_post_ra>
// kernel: forward.1
= control target key start
LH: loop header
LB: loop body
LE: loop exit
PB: predicated region body
PF: predicated region fallthrough
CT: control target
= control target key end

     0   :  { %s10735_s6 = smov 1   ;;  %s10736_s10 = smov 2   ;;  %s12588_s0 = inlined_call_operand.smem [shape: u32[37], index: -1, kind: input, shape index: {}] }
   0x1   :  { %s10817_s5 = sld [smem:[%s12588_s0]]   ;;  %s10737_s14 = smov 3  }
   0x2   :  { %s10822_s9 = sld [smem:[%s12588_s0 + %s10735_s6]]   ;;  %s10738_s18 = smov 4  }
   0x3   :  { %s10827_s13 = sld [smem:[%s12588_s0 + %s10736_s10]]   ;;  %s10739_s22 = smov 5  }
   0x4   :  { %s10832_s17 = sld [smem:[%s12588_s0 + %s10737_s14]]   ;;  %s10740_s26 = smov 6  }
   0x5   :  { %s10837_s21 = sld [smem:[%s12588_s0 + %s10738_s18]]   ;;  %s10741_s30 = smov 7  }
   0x6   :  { %s10842_s25 = sld [smem:[%s12588_s0 + %s10739_s22]]   ;;  %s10742_s4 = smov 8  }
   0x7   :  { %12619 = sst [smem:[#allocation54_spill]] %s10817_s5  ;;  %s10743_s10 = smov 9  }
   0x8   :  { %s10847_s29 = sld [smem:[%s12588_s0 + %s10740_s26]]   ;;  %s10744_s15 = smov 10  }
   0x9   :  { %s10852_s3 = sld [smem:[%s12588_s0 + %s10741_s30]]   ;;  %s10745_s20 = smov 11  }
   0xa   :  { %s10857_s8 = sld [smem:[%s12588_s0 + %s10742_s4]]   ;;  %s10746_s26 = smov 12  }
   0xb   :  { %s10862_s14 = sld [smem:[%s12588_s0 + %s10743_s10]]   ;;  %s10747_s1 = smov 13  }
   0xc   :  { %12620 = sst [smem:[#allocation55_spill]] %s10842_s25  ;;  %s10748_s7 = smov 14  }
   0xd   :  { %s10867_s19 = sld [smem:[%s12588_s0 + %s10744_s15]]   ;;  %s10749_s15 = smov 15  }
   0xe   :  { %s10872_s24 = sld [smem:[%s12588_s0 + %s10745_s20]]   ;;  %s10750_s22 = smov 16  }
   0xf   :  { %12621 = sst [smem:[#allocation56_spill]] %s10852_s3  ;;  %s10751_s28 = smov 17  }
  0x10   :  { %12622 = sst [smem:[#allocation57_spill]] %s10857_s8  ;;  %s10770_s23 = smov 36  }
  0x11   :  { %s10877_s30 = sld [smem:[%s12588_s0 + %s10746_s26]]  }
  0x12   :  { %s10882_s6 = sld [smem:[%s12588_s0 + %s10747_s1]]  }
  0x13   :  { %12623 = sst [smem:[#allocation58_spill]] %s10867_s19 }
  0x14   :  { %12624 = sst [smem:[#allocation59_spill]] %s10872_s24 }
  0x15   :  { %s10887_s12 = sld [smem:[%s12588_s0 + %s10748_s7]]   ;;  %s10752_s7 = smov 18  }
  0x16   :  { %s10892_s20 = sld [smem:[%s12588_s0 + %s10749_s15]]   ;;  %s10753_s15 = smov 19  }
  0x17   :  { %s10897_s27 = sld [smem:[%s12588_s0 + %s10750_s22]]   ;;  %s10754_s22 = smov 20  }
  0x18   :  { %12625 = sst [smem:[#allocation60_spill]] %s10882_s6 }
  0x19   :  { %s10902_s4 = sld [smem:[%s12588_s0 + %s10751_s28]]   ;;  %s10755_s28 = smov 21  }
  0x1a   :  { %s10907_s6 = sld [smem:[%s12588_s0 + %s10752_s7]]   ;;  %s10756_s7 = smov 22  }
  0x1b   :  { %12626 = sst [smem:[#allocation61_spill]] %s10887_s12 }
  0x1c   :  { %s10912_s19 = sld [smem:[%s12588_s0 + %s10753_s15]]   ;;  %s10757_s15 = smov 23  }
  0x1d   :  { %12627 = sst [smem:[#allocation62_spill]] %s10897_s27 }
  0x1e   :  { %s10917_s8 = sld [smem:[%s12588_s0 + %s10754_s22]]   ;;  %s10758_s22 = smov 24  }
  0x1f   :  { %12628 = sst [smem:[#allocation63_spill]] %s10902_s4 }
  0x20   :  { %s10922_s4 = sld [smem:[%s12588_s0 + %s10755_s28]]   ;;  %s10759_s28 = smov 25  }
  0x21   :  { %s10927_s5 = sld [smem:[%s12588_s0 + %s10756_s7]]   ;;  %s10760_s7 = smov 26  }
  0x22   :  { %12629 = sst [smem:[#allocation64_spill]] %s10912_s19 }
  0x23   :  { %s10932_s19 = sld [smem:[%s12588_s0 + %s10757_s15]]   ;;  %s10761_s15 = smov 27  }
  0x24   :  { %s10937_s27 = sld [smem:[%s12588_s0 + %s10758_s22]]   ;;  %s10762_s22 = smov 28  }
  0x25   :  { %s10952_s12 = sld [smem:[%s12588_s0 + %s10761_s15]]   ;;  %s10765_s15 = smov 31  }
  0x26   :  { %12630 = sst [smem:[#allocation65_spill]] %s10922_s4 }
  0x27   :  { %12631 = sst [smem:[#allocation66_spill]] %s10927_s5 }
  0x28   :  { %s10942_s4 = sld [smem:[%s12588_s0 + %s10759_s28]]   ;;  %s10763_s28 = smov 29  }
  0x29   :  { %s10947_s5 = sld [smem:[%s12588_s0 + %s10760_s7]]   ;;  %s10764_s7 = smov 30  }
  0x2a   :  { %12632 = sst [smem:[#allocation67_spill]] %s10937_s27 }
  0x2b   :  { %12634 = sst [smem:[#allocation69_spill]] %s10952_s12 }
  0x2c   :  { %s10957_s27 = sld [smem:[%s12588_s0 + %s10762_s22]]   ;;  %s10766_s22 = smov 32  }
  0x2d   :  { %s10962_s24 = sld [smem:[%s12588_s0 + %s10763_s28]]   ;;  %s10767_s28 = smov 33  }
  0x2e   :  { %s10972_s12 = sld [smem:[%s12588_s0 + %s10765_s15]]   ;;  %s10769_s15 = smov 35  }
  0x2f   :  { %12633 = sst [smem:[#allocation68_spill]] %s10947_s5 }
  0x30   :  { %s10967_s5 = sld [smem:[%s12588_s0 + %s10764_s7]]   ;;  %s10768_s7 = smov 34  }
  0x31   :  { %s10977_s3 = sld [smem:[%s12588_s0 + %s10766_s22]]  }
  0x32   :  { %s10995_s25 = sld [smem:[%s12588_s0 + %s10770_s23]]  }
  0x33   :  { %12635 = sst [smem:[#allocation70_spill]] %s10962_s24 }
  0x34   :  { %12637 = sst [smem:[#allocation72_spill]] %s10972_s12 }
  0x35   :  { %s10982_s24 = sld [smem:[%s12588_s0 + %s10767_s28]]  }
  0x36   :  { %12636 = sst [smem:[#allocation71_spill]] %s10967_s5 }
  0x37   :  { %s10987_s5 = sld [smem:[%s12588_s0 + %s10768_s7]]  }
  0x38   :  { %s8172_s12 = sld [smem:[%s12588_s0 + %s10769_s15]]  }
  0x3e   :  { %v78_v0 = vstv %s8172_s12 }
  0x3f   :  { %79 = vst [vmem:[#allocation2] sm:$0x1] %v78_v0 }
  0x40   :  { %80 = vsyncpa [#allocation4], 0 }
  0x41   :  { %81 = vsyncpa [#allocation6], 0 }
  0x42   :  { %82 = vsyncpa [#allocation9], 0 }
  0x43   :  { %83 = vsyncpa [#allocation12], 0 }
  0x44   :  { %84 = vsyncpa [#allocation15], 0 }
  0x45   :  { %85 = vsyncpa [#allocation18], 0 }
  0x46   :  { %86 = vsyncpa [#allocation21], 0 }
  0x47   :  { %87 = vsyncpa [#allocation24], 0 }
  0x48   :  { %88 = vsyncpa [#allocation27], 0 }
  0x49   :  { %89 = vsyncpa [#allocation30], 0 }
  0x4a   :  { %90 = vsyncpa [#allocation33], 0 }
  0x4b   :  { %91 = vsyncpa [#allocation36], 0 }
  0x4c   :  { %92 = vsyncpa [#allocation39], 0  ;;  %s112_s0 = sshll.u32 %s10827_s13, 4  ;;  %s10771_s12 = smov [#allocation5]   ;;  %s113_s0 = int_to_ptr.hbm [resolvable:$true] %s112_s0 }
  0x4d   :  { %s114_s28 = sshll.u32 %s10771_s12, 4  ;;  %s136_s1 = sshll.u32 %s10837_s21, 4  ;;  %s115_s28 = int_to_ptr.vmem [resolvable:$true] %s114_s28  ;;  %s137_s1 = int_to_ptr.hbm [resolvable:$true] %s136_s1 }
  0x4e   :  { %s10109_s2 = sshra.s32 %s113_s0, 4  ;;  %s10113_s10 = scalar_lea.hbm %s10827_s13, 36  ;;  %s10110_s2 = int_to_ptr.hbm [resolvable:$true] %s10109_s2 }
  0x4f   :  { %s10111_s7 = scalar_lea.hbm %s10110_s2, 36  ;;  %p10114_p1 = scmp.lt.s32.totalorder %s10110_s2, %s10827_s13 }
  0x50   :  { %p10112_p0 = scmp.ne.s32.totalorder %s10110_s2, %s10111_s7  ;;  %p10115_p2 = scmp.lt.s32.totalorder %s10113_s10, %s10111_s7 }
  0x52   :  { %p10116_p3 = por %p10115_p2, %p10114_p1 }
  0x54   :  { %p10117_p4 = pnand %p10116_p3, %p10112_p0 }
  0x56   :  { %10120 = shalt.err (!%p10117_p4)
}
  0x57   :  { %s10772_s11 = smov 64   ;;  %s10773_s15 = smov 4  }
  0x58   :  { %120 = dma.hbm_to_vmem [thread:$0]  %s113_s0, 576, %s115_s28, [#allocation6], %s10772_s11, %s10772_s11, %s10773_s15  }
  0x59   :  { %s10774_s16 = smov [#allocation8]   ;;  %s163_s23 = sshll.u32 %s10847_s29, 4  ;;  %s164_s23 = int_to_ptr.hbm [resolvable:$true] %s163_s23 }
  0x5a   :  { %s138_s18 = sshll.u32 %s10774_s16, 4  ;;  %s10133_s13 = sshra.s32 %s137_s1, 4  ;;  %s139_s18 = int_to_ptr.vmem [resolvable:$true] %s138_s18  ;;  %s10134_s13 = int_to_ptr.hbm [resolvable:$true] %s10133_s13 }
  0x5b   :  { %s10135_s22 = scalar_lea.hbm %s10134_s13, 576  ;;  %s10137_s26 = scalar_lea.hbm %s10837_s21, 576 }
  0x5c   :  { %p10136_p5 = scmp.ne.s32.totalorder %s10134_s13, %s10135_s22  ;;  %p10138_p6 = scmp.lt.s32.totalorder %s10134_s13, %s10837_s21 }
  0x5d   :  { %p10139_p7 = scmp.lt.s32.totalorder %s10137_s26, %s10135_s22 }
  0x5f   :  { %p10140_p8 = por %p10139_p7, %p10138_p6 }
  0x61   :  { %p10141_p9 = pnand %p10140_p8, %p10136_p5 }
  0x63   :  { %10144 = shalt.err (!%p10141_p9)
}
  0x64   :  { %144 = dma.hbm_to_vmem [thread:$0]  %s137_s1, 9216, %s139_s18, [#allocation9], %s10772_s11, %s10772_s11, %s10773_s15  }
  0x65   :  { %s189_s0 = sshll.u32 %s10862_s14, 4  ;;  %s10775_s12 = smov [#allocation11]   ;;  %s190_s0 = int_to_ptr.hbm [resolvable:$true] %s189_s0 }
  0x66   :  { %s165_s28 = sshll.u32 %s10775_s12, 4  ;;  %s10157_s2 = sshra.s32 %s164_s23, 4  ;;  %s166_s28 = int_to_ptr.vmem [resolvable:$true] %s165_s28  ;;  %s10158_s2 = int_to_ptr.hbm [resolvable:$true] %s10157_s2 }
  0x67   :  { %s10159_s7 = scalar_lea.hbm %s10158_s2, 1  ;;  %s10161_s21 = scalar_lea.hbm %s10847_s29, 1 }
  0x68   :  { %p10160_p10 = scmp.ne.s32.totalorder %s10158_s2, %s10159_s7  ;;  %p10162_p11 = scmp.lt.s32.totalorder %s10158_s2, %s10847_s29 }
  0x69   :  { %p10163_p12 = scmp.lt.s32.totalorder %s10161_s21, %s10159_s7 }
  0x6b   :  { %p10164_p13 = por %p10163_p12, %p10162_p11 }
  0x6d   :  { %p10165_p0 = pnand %p10164_p13, %p10160_p10 }
  0x6f   :  { %10168 = shalt.err (!%p10165_p0)
}
  0x70   :  { %168 = dma.hbm_to_vmem [thread:$0]  %s164_s23, 16, %s166_s28, [#allocation12]  }
  0x71   :  { %s10776_s1 = smov [#allocation14]   ;;  %s215_s16 = sshll.u32 %s10877_s30, 4  ;;  %s216_s16 = int_to_ptr.hbm [resolvable:$true] %s215_s16 }
  0x72   :  { %s191_s10 = sshll.u32 %s10776_s1, 4  ;;  %s10181_s18 = sshra.s32 %s190_s0, 4  ;;  %s192_s10 = int_to_ptr.vmem [resolvable:$true] %s191_s10  ;;  %s10182_s18 = int_to_ptr.hbm [resolvable:$true] %s10181_s18 }
  0x73   :  { %s10183_s13 = scalar_lea.hbm %s10182_s18, 1  ;;  %s10185_s22 = scalar_lea.hbm %s10862_s14, 1 }
  0x74   :  { %p10184_p1 = scmp.ne.s32.totalorder %s10182_s18, %s10183_s13  ;;  %p10186_p2 = scmp.lt.s32.totalorder %s10182_s18, %s10862_s14 }
  0x75   :  { %p10187_p3 = scmp.lt.s32.totalorder %s10185_s22, %s10183_s13 }
  0x77   :  { %p10188_p4 = por %p10187_p3, %p10186_p2 }
  0x79   :  { %p10189_p5 = pnand %p10188_p4, %p10184_p1 }
  0x7b   :  { %10192 = shalt.err (!%p10189_p5)
}
  0x7c   :  { %194 = dma.hbm_to_vmem [thread:$0]  %s190_s0, 16, %s192_s10, [#allocation15]  }
  0x7d   :  { %s241_s29 = sshll.u32 %s10892_s20, 4  ;;  %s10777_s23 = smov [#allocation17]   ;;  %s242_s29 = int_to_ptr.hbm [resolvable:$true] %s241_s29 }
  0x7e   :  { %s217_s26 = sshll.u32 %s10777_s23, 4  ;;  %s10205_s12 = sshra.s32 %s216_s16, 4  ;;  %s218_s26 = int_to_ptr.vmem [resolvable:$true] %s217_s26  ;;  %s10206_s12 = int_to_ptr.hbm [resolvable:$true] %s10205_s12 }
  0x7f   :  { %s10207_s28 = scalar_lea.hbm %s10206_s12, 1  ;;  %s10209_s2 = scalar_lea.hbm %s10877_s30, 1 }
  0x80   :  { %p10208_p6 = scmp.ne.s32.totalorder %s10206_s12, %s10207_s28  ;;  %p10210_p7 = scmp.lt.s32.totalorder %s10206_s12, %s10877_s30 }
  0x81   :  { %p10211_p8 = scmp.lt.s32.totalorder %s10209_s2, %s10207_s28 }
  0x83   :  { %p10212_p9 = por %p10211_p8, %p10210_p7 }
  0x85   :  { %p10213_p10 = pnand %p10212_p9, %p10208_p6 }
  0x87   :  { %10216 = shalt.err (!%p10213_p10)
}
  0x88   :  { %220 = dma.hbm_to_vmem [thread:$0]  %s216_s16, 16, %s218_s26, [#allocation18]  }
  0x89   :  { %s10778_s14 = smov [#allocation20]   ;;  %s267_s7 = sshll.u32 %s10907_s6, 4  ;;  %s268_s7 = int_to_ptr.hbm [resolvable:$true] %s267_s7 }
  0x8a   :  { %s243_s0 = sshll.u32 %s10778_s14, 4  ;;  %s10229_s21 = sshra.s32 %s242_s29, 4  ;;  %s244_s0 = int_to_ptr.vmem [resolvable:$true] %s243_s0  ;;  %s10230_s21 = int_to_ptr.hbm [resolvable:$true] %s10229_s21 }
  0x8b   :  { %s10231_s1 = scalar_lea.hbm %s10230_s21, 1  ;;  %s10233_s10 = scalar_lea.hbm %s10892_s20, 1 }
  0x8c   :  { %p10232_p11 = scmp.ne.s32.totalorder %s10230_s21, %s10231_s1  ;;  %p10234_p12 = scmp.lt.s32.totalorder %s10230_s21, %s10892_s20 }
  0x8d   :  { %p10235_p13 = scmp.lt.s32.totalorder %s10233_s10, %s10231_s1 }
  0x8f   :  { %p10236_p0 = por %p10235_p13, %p10234_p12 }
  0x91   :  { %p10237_p1 = pnand %p10236_p0, %p10232_p11 }
  0x93   :  { %10240 = shalt.err (!%p10237_p1)
}
  0x94   :  { %246 = dma.hbm_to_vmem [thread:$0]  %s242_s29, 16, %s244_s0, [#allocation21]  }
  0x95   :  { %s290_s30 = sshll.u32 %s10917_s8, 4  ;;  %s10779_s16 = smov [#allocation23]   ;;  %s11023_s30 = int_to_ptr.hbm [resolvable:$true] %s290_s30 }
  0x96   :  { %s269_s18 = sshll.u32 %s10779_s16, 4  ;;  %s10253_s13 = sshra.s32 %s268_s7, 4  ;;  %s270_s18 = int_to_ptr.vmem [resolvable:$true] %s269_s18  ;;  %s10254_s13 = int_to_ptr.hbm [resolvable:$true] %s10253_s13 }
  0x97   :  { %s10255_s22 = scalar_lea.hbm %s10254_s13, 1  ;;  %s10257_s23 = scalar_lea.hbm %s10907_s6, 1 }
  0x98   :  { %p10256_p2 = scmp.ne.s32.totalorder %s10254_s13, %s10255_s22  ;;  %p10258_p3 = scmp.lt.s32.totalorder %s10254_s13, %s10907_s6 }
  0x99   :  { %p10259_p4 = scmp.lt.s32.totalorder %s10257_s23, %s10255_s22 }
  0x9b   :  { %p10260_p5 = por %p10259_p4, %p10258_p3 }
  0x9d   :  { %p10261_p6 = pnand %p10260_p5, %p10256_p2 }
  0x9f   :  { %10264 = shalt.err (!%p10261_p6)
}
  0xa0   :  { %272 = dma.hbm_to_vmem [thread:$0]  %s268_s7, 16, %s270_s18, [#allocation24]  }
  0xa1   :  { %s10780_s20 = smov [#allocation26]   ;;  %s316_s26 = sshll.u32 %s10932_s19, 4  ;;  %s11028_s26 = int_to_ptr.hbm [resolvable:$true] %s316_s26 }
  0xa2   :  { %s292_s29 = sshll.u32 %s10780_s20, 4  ;;  %s10277_s12 = sshra.s32 %s11023_s30, 4  ;;  %s293_s29 = int_to_ptr.vmem [resolvable:$true] %s292_s29  ;;  %s10278_s12 = int_to_ptr.hbm [resolvable:$true] %s10277_s12 }
  0xa3   :  { %s10279_s28 = scalar_lea.hbm %s10278_s12, 128  ;;  %s10281_s6 = scalar_lea.hbm %s10917_s8, 128 }
  0xa4   :  { %p10280_p7 = scmp.ne.s32.totalorder %s10278_s12, %s10279_s28  ;;  %p10282_p8 = scmp.lt.s32.totalorder %s10278_s12, %s10917_s8 }
  0xa5   :  { %p10283_p9 = scmp.lt.s32.totalorder %s10281_s6, %s10279_s28 }
  0xa7   :  { %p10284_p10 = por %p10283_p9, %p10282_p8 }
  0xa9   :  { %p10285_p11 = pnand %p10284_p10, %p10280_p7 }
  0xab   :  { %10288 = shalt.err (!%p10285_p11)
}
  0xac   :  { %298 = dma.hbm_to_vmem [thread:$0]  %s11023_s30, 2048, %s293_s29, [#allocation27], %s10772_s11, %s10772_s11, %s10773_s15  }
  0xad   :  { %s10781_s2 = smov [#allocation29]   ;;  %s340_s0 = sshll.u32 %s10942_s4, 4  ;;  %s341_s0 = int_to_ptr.hbm [resolvable:$true] %s340_s0 }
  0xae   :  { %s318_s14 = sshll.u32 %s10781_s2, 4  ;;  %s10301_s7 = sshra.s32 %s11028_s26, 4  ;;  %s319_s14 = int_to_ptr.vmem [resolvable:$true] %s318_s14  ;;  %s10302_s7 = int_to_ptr.hbm [resolvable:$true] %s10301_s7 }
  0xaf   :  { %s10303_s8 = scalar_lea.hbm %s10302_s7, 128  ;;  %s10305_s21 = scalar_lea.hbm %s10932_s19, 128 }
  0xb0   :  { %p10304_p12 = scmp.ne.s32.totalorder %s10302_s7, %s10303_s8  ;;  %p10306_p13 = scmp.lt.s32.totalorder %s10302_s7, %s10932_s19 }
  0xb1   :  { %p10307_p0 = scmp.lt.s32.totalorder %s10305_s21, %s10303_s8 }
  0xb3   :  { %p10308_p1 = por %p10307_p0, %p10306_p13 }
  0xb5   :  { %p10309_p2 = pnand %p10308_p1, %p10304_p12 }
  0xb7   :  { %10312 = shalt.err (!%p10309_p2)
}
  0xb8   :  { %324 = dma.hbm_to_vmem [thread:$0]  %s11028_s26, 2048, %s319_s14, [#allocation30], %s10772_s11, %s10772_s11, %s10773_s15  }
  0xb9   :  { %s10782_s1 = smov [#allocation32]   ;;  %s368_s30 = sshll.u32 %s10957_s27, 4  ;;  %s11046_s30 = int_to_ptr.hbm [resolvable:$true] %s368_s30 }
  0xba   :  { %s342_s10 = sshll.u32 %s10782_s1, 4  ;;  %s10325_s19 = sshra.s32 %s341_s0, 4  ;;  %s343_s10 = int_to_ptr.vmem [resolvable:$true] %s342_s10  ;;  %s10326_s19 = int_to_ptr.hbm [resolvable:$true] %s10325_s19 }
  0xbb   :  { %s10327_s16 = scalar_lea.hbm %s10326_s19, 4  ;;  %s10329_s18 = scalar_lea.hbm %s10942_s4, 4 }
  0xbc   :  { %p10328_p3 = scmp.ne.s32.totalorder %s10326_s19, %s10327_s16  ;;  %p10330_p4 = scmp.lt.s32.totalorder %s10326_s19, %s10942_s4 }
  0xbd   :  { %p10331_p5 = scmp.lt.s32.totalorder %s10329_s18, %s10327_s16 }
  0xbf   :  { %p10332_p6 = por %p10331_p5, %p10330_p4 }
  0xc1   :  { %p10333_p7 = pnand %p10332_p6, %p10328_p3 }
  0xc3   :  { %10336 = shalt.err (!%p10333_p7)
}
  0xc4   :  { %s10783_s13 = smov 16   ;;  %s10784_s22 = smov 1  }
  0xc5   :  { %348 = dma.hbm_to_vmem [thread:$0]  %s341_s0, 64, %s343_s10, [#allocation33], %s10783_s13, %s10783_s13, %s10784_s22  }
  0xc6   :  { %s398_s23 = sshll.u32 %s10977_s3, 4  ;;  %s10785_s20 = smov [#allocation35]   ;;  %s11054_s23 = int_to_ptr.hbm [resolvable:$true] %s398_s23 }
  0xc7   :  { %s370_s29 = sshll.u32 %s10785_s20, 4  ;;  %s10349_s4 = sshra.s32 %s11046_s30, 4  ;;  %s371_s29 = int_to_ptr.vmem [resolvable:$true] %s370_s29  ;;  %s10350_s4 = int_to_ptr.hbm [resolvable:$true] %s10349_s4 }
  0xc8   :  { %s10351_s26 = scalar_lea.hbm %s10350_s4, 64  ;;  %s10353_s12 = scalar_lea.hbm %s10957_s27, 64 }
  0xc9   :  { %p10352_p8 = scmp.ne.s32.totalorder %s10350_s4, %s10351_s26  ;;  %p10354_p9 = scmp.lt.s32.totalorder %s10350_s4, %s10957_s27 }
  0xca   :  { %p10355_p10 = scmp.lt.s32.totalorder %s10353_s12, %s10351_s26 }
  0xcc   :  { %p10356_p11 = por %p10355_p10, %p10354_p9 }
  0xce   :  { %p10357_p12 = pnand %p10356_p11, %p10352_p8 }
  0xd0   :  { %10360 = shalt.err (!%p10357_p12)
}
  0xd1   :  { %376 = dma.hbm_to_vmem [thread:$0]  %s11046_s30, 1024, %s371_s29, [#allocation36], %s10772_s11, %s10772_s11, %s10773_s15  }
  0xd2   :  { %s10786_s28 = smov [#allocation38]   ;;  %s99_s2 = sshll.u32 %s10822_s9, 4  ;;  %s11064_s2 = int_to_ptr.hbm [resolvable:$true] %s99_s2 }
  0xd3   :  { %s400_s6 = sshll.u32 %s10786_s28, 4  ;;  %s10373_s27 = sshra.s32 %s11054_s23, 4  ;;  %s401_s6 = int_to_ptr.vmem [resolvable:$true] %s400_s6  ;;  %s10374_s27 = int_to_ptr.hbm [resolvable:$true] %s10373_s27 }
  0xd4   :  { %s10375_s14 = scalar_lea.hbm %s10374_s27, 64  ;;  %s10377_s0 = scalar_lea.hbm %s10977_s3, 64 }
  0xd5   :  { %p10376_p13 = scmp.ne.s32.totalorder %s10374_s27, %s10375_s14  ;;  %p10378_p0 = scmp.lt.s32.totalorder %s10374_s27, %s10977_s3 }
  0xd6   :  { %p10379_p1 = scmp.lt.s32.totalorder %s10377_s0, %s10375_s14 }
  0xd8   :  { %p10380_p2 = por %p10379_p1, %p10378_p0 }
  0xda   :  { %p10381_p3 = pnand %p10380_p2, %p10376_p13 }
  0xdc   :  { %10384 = shalt.err (!%p10381_p3)
}
  0xdd   :  { %406 = dma.hbm_to_vmem [thread:$0]  %s11054_s23, 1024, %s401_s6, [#allocation39], %s10772_s11, %s10772_s11, %s10773_s15  }
  0xde   :  { %s126_s7 = sshll.u32 %s10832_s17, 4  ;;  %s10787_s8 = smov [#allocation3]   ;;  %s127_s7 = int_to_ptr.hbm [resolvable:$true] %s126_s7 }
  0xdf   :  { %s101_s21 = sshll.u32 %s10787_s8, 4  ;;  %s10397_s1 = sshra.s32 %s11064_s2, 4  ;;  %s102_s21 = int_to_ptr.vmem [resolvable:$true] %s101_s21  ;;  %s10398_s1 = int_to_ptr.hbm [resolvable:$true] %s10397_s1 }
  0xe0   :  { %s10399_s3 = scalar_lea.hbm %s10398_s1, 576  ;;  %s10401_s10 = scalar_lea.hbm %s10822_s9, 576 }
  0xe1   :  { %p10400_p4 = scmp.ne.s32.totalorder %s10398_s1, %s10399_s3  ;;  %p10402_p5 = scmp.lt.s32.totalorder %s10398_s1, %s10822_s9 }
  0xe2   :  { %p10403_p6 = scmp.lt.s32.totalorder %s10401_s10, %s10399_s3 }
  0xe4   :  { %p10404_p7 = por %p10403_p6, %p10402_p5 }
  0xe6   :  { %p10405_p8 = pnand %p10404_p7, %p10400_p4 }
  0xe8   :  { %10408 = shalt.err (!%p10405_p8)
}
  0xe9   :  { %s12638_s30 = sld [smem:[#allocation55_spill]]  ;;  %s10788_s19 = smov [#allocation7]  }
  0xea   :  { %107 = dma.hbm_to_vmem [thread:$0]  %s11064_s2, 9216, %s102_s21, [#allocation4], %s10772_s11, %s10772_s11, %s10773_s15  }
  0xeb   :  { %s128_s16 = sshll.u32 %s10788_s19, 4  ;;  %s10421_s23 = sshra.s32 %s127_s7, 4  ;;  %s129_s16 = int_to_ptr.vmem [resolvable:$true] %s128_s16  ;;  %s10422_s23 = int_to_ptr.hbm [resolvable:$true] %s10421_s23 }
  0xec   :  { %s10423_s9 = scalar_lea.hbm %s10422_s23, 1  ;;  %s10425_s20 = scalar_lea.hbm %s10832_s17, 1 }
  0xed   :  { %p10424_p9 = scmp.ne.s32.totalorder %s10422_s23, %s10423_s9  ;;  %p10426_p10 = scmp.lt.s32.totalorder %s10422_s23, %s10832_s17 }
  0xee   :  { %p10427_p11 = scmp.lt.s32.totalorder %s10425_s20, %s10423_s9 }
  0xef   :  { %s149_s18 = sshll.u32 %s12638_s30, 4  ;;  %s11082_s18 = int_to_ptr.hbm [resolvable:$true] %s149_s18 }
  0xf0   :  { %p10428_p12 = por %p10427_p11, %p10426_p10 }
  0xf2   :  { %p10429_p13 = pnand %p10428_p12, %p10424_p9 }
  0xf4   :  { %10432 = shalt.err (!%p10429_p13)
}
  0xf5   :  { %131 = dma.hbm_to_vmem [thread:$0]  %s127_s7, 16, %s129_s16, [#allocation6]  }
  0xf6   :  { %s12639_s29 = sld [smem:[#allocation56_spill]]  ;;  %s10789_s26 = smov [#allocation10]  }
  0xf7   :  { %s151_s12 = sshll.u32 %s10789_s26, 4  ;;  %s10445_s28 = sshra.s32 %s11082_s18, 4  ;;  %s152_s12 = int_to_ptr.vmem [resolvable:$true] %s151_s12  ;;  %s10446_s28 = int_to_ptr.hbm [resolvable:$true] %s10445_s28 }
  0xf8   :  { %s10447_s6 = scalar_lea.hbm %s10446_s28, 72  ;;  %s10449_s17 = scalar_lea.hbm %s12638_s30, 72 }
  0xf9   :  { %p10448_p0 = scmp.ne.s32.totalorder %s10446_s28, %s10447_s6  ;;  %p10450_p1 = scmp.lt.s32.totalorder %s10446_s28, %s12638_s30 }
  0xfa   :  { %p10451_p2 = scmp.lt.s32.totalorder %s10449_s17, %s10447_s6 }
  0xfc   :  { %s173_s4 = sshll.u32 %s12639_s29, 4  ;;  %p10452_p3 = por %p10451_p2, %p10450_p1  ;;  %s11087_s4 = int_to_ptr.hbm [resolvable:$true] %s173_s4 }
  0xfe   :  { %p10453_p4 = pnand %p10452_p3, %p10448_p0 }
 0x100   :  { %10456 = shalt.err (!%p10453_p4)
}
 0x101   :  { %s12640_s2 = sld [smem:[#allocation59_spill]]  ;;  %s10790_s27 = smov [#allocation13]  }
 0x102   :  { %157 = dma.hbm_to_vmem [thread:$0]  %s11082_s18, 1152, %s152_s12, [#allocation9], %s10772_s11, %s10772_s11, %s10773_s15  }
 0x103   :  { %s175_s14 = sshll.u32 %s10790_s27, 4  ;;  %s10469_s7 = sshra.s32 %s11087_s4, 4  ;;  %s176_s14 = int_to_ptr.vmem [resolvable:$true] %s175_s14  ;;  %s10470_s7 = int_to_ptr.hbm [resolvable:$true] %s10469_s7 }
 0x104   :  { %s10471_s8 = scalar_lea.hbm %s10470_s7, 108  ;;  %s10473_s21 = scalar_lea.hbm %s12639_s29, 108 }
 0x105   :  { %p10472_p5 = scmp.ne.s32.totalorder %s10470_s7, %s10471_s8  ;;  %p10474_p6 = scmp.lt.s32.totalorder %s10470_s7, %s12639_s29 }
 0x106   :  { %p10475_p7 = scmp.lt.s32.totalorder %s10473_s21, %s10471_s8 }
 0x107   :  { %s201_s0 = sshll.u32 %s12640_s2, 4  ;;  %s11097_s0 = int_to_ptr.hbm [resolvable:$true] %s201_s0 }
 0x108   :  { %p10476_p8 = por %p10475_p7, %p10474_p6 }
 0x10a   :  { %p10477_p9 = pnand %p10476_p8, %p10472_p5 }
 0x10c   :  { %10480 = shalt.err (!%p10477_p9)
}
 0x10d   :  { %s12641_s1 = sld [smem:[#allocation61_spill]]  ;;  %s10791_s10 = smov [#allocation16]  }
 0x10e   :  { %181 = dma.hbm_to_vmem [thread:$0]  %s11087_s4, 1728, %s176_s14, [#allocation12], %s10772_s11, %s10772_s11, %s10773_s15  }
 0x10f   :  { %s203_s30 = sshll.u32 %s10791_s10, 4  ;;  %s10493_s19 = sshra.s32 %s11097_s0, 4  ;;  %s204_s30 = int_to_ptr.vmem [resolvable:$true] %s203_s30  ;;  %s10494_s19 = int_to_ptr.hbm [resolvable:$true] %s10493_s19 }
 0x110   :  { %s10495_s16 = scalar_lea.hbm %s10494_s19, 144  ;;  %s10497_s18 = scalar_lea.hbm %s12640_s2, 144 }
 0x111   :  { %p10496_p10 = scmp.ne.s32.totalorder %s10494_s19, %s10495_s16  ;;  %p10498_p11 = scmp.lt.s32.totalorder %s10494_s19, %s12640_s2 }
 0x112   :  { %p10499_p12 = scmp.lt.s32.totalorder %s10497_s18, %s10495_s16 }
 0x113   :  { %s227_s3 = sshll.u32 %s12641_s1, 4  ;;  %s11107_s3 = int_to_ptr.hbm [resolvable:$true] %s227_s3 }
 0x114   :  { %p10500_p13 = por %p10499_p12, %p10498_p11 }
 0x116   :  { %p10501_p0 = pnand %p10500_p13, %p10496_p10 }
 0x118   :  { %10504 = shalt.err (!%p10501_p0)
}
 0x119   :  { %s12642_s23 = sld [smem:[#allocation62_spill]]  ;;  %s10792_s9 = smov [#allocation19]  }
 0x11a   :  { %209 = dma.hbm_to_vmem [thread:$0]  %s11097_s0, 2304, %s204_s30, [#allocation15], %s10772_s11, %s10772_s11, %s10773_s15  }
 0x11b   :  { %s229_s20 = sshll.u32 %s10792_s9, 4  ;;  %s10517_s4 = sshra.s32 %s11107_s3, 4  ;;  %s230_s20 = int_to_ptr.vmem [resolvable:$true] %s229_s20  ;;  %s10518_s4 = int_to_ptr.hbm [resolvable:$true] %s10517_s4 }
 0x11c   :  { %s10519_s26 = scalar_lea.hbm %s10518_s4, 144  ;;  %s10521_s12 = scalar_lea.hbm %s12641_s1, 144 }
 0x11d   :  { %p10520_p1 = scmp.ne.s32.totalorder %s10518_s4, %s10519_s26  ;;  %p10522_p2 = scmp.lt.s32.totalorder %s10518_s4, %s12641_s1 }
 0x11e   :  { %p10523_p3 = scmp.lt.s32.totalorder %s10521_s12, %s10519_s26 }
 0x11f   :  { %s251_s29 = sshll.u32 %s12642_s23, 4  ;;  %s11117_s29 = int_to_ptr.hbm [resolvable:$true] %s251_s29 }
 0x120   :  { %p10524_p4 = por %p10523_p3, %p10522_p2 }
 0x122   :  { %p10525_p5 = pnand %p10524_p4, %p10520_p1 }
 0x124   :  { %10528 = shalt.err (!%p10525_p5)
}
 0x125   :  { %s12643_s28 = sld [smem:[#allocation64_spill]]  ;;  %s10793_s17 = smov [#allocation22]  }
 0x126   :  { %235 = dma.hbm_to_vmem [thread:$0]  %s11107_s3, 2304, %s230_s20, [#allocation18], %s10772_s11, %s10772_s11, %s10773_s15  }
 0x127   :  { %s253_s2 = sshll.u32 %s10793_s17, 4  ;;  %s10541_s27 = sshra.s32 %s11117_s29, 4  ;;  %s254_s2 = int_to_ptr.vmem [resolvable:$true] %s253_s2  ;;  %s10542_s27 = int_to_ptr.hbm [resolvable:$true] %s10541_s27 }
 0x128   :  { %s10543_s14 = scalar_lea.hbm %s10542_s27, 9  ;;  %s10545_s0 = scalar_lea.hbm %s12642_s23, 9 }
 0x129   :  { %p10544_p6 = scmp.ne.s32.totalorder %s10542_s27, %s10543_s14  ;;  %p10546_p7 = scmp.lt.s32.totalorder %s10542_s27, %s12642_s23 }
 0x12a   :  { %p10547_p8 = scmp.lt.s32.totalorder %s10545_s0, %s10543_s14 }
 0x12b   :  { %s277_s6 = sshll.u32 %s12643_s28, 4  ;;  %s11127_s6 = int_to_ptr.hbm [resolvable:$true] %s277_s6 }
 0x12c   :  { %p10548_p9 = por %p10547_p8, %p10546_p7 }
 0x12e   :  { %p10549_p10 = pnand %p10548_p9, %p10544_p6 }
 0x130   :  { %10552 = shalt.err (!%p10549_p10)
}
 0x131   :  { %s12644_s7 = sld [smem:[#allocation65_spill]]  ;;  %s10794_s8 = smov [#allocation25]  }
 0x132   :  { %259 = dma.hbm_to_vmem [thread:$0]  %s11117_s29, 144, %s254_s2, [#allocation21], %s10783_s13, %s10783_s13, %s10784_s22  }
 0x133   :  { %s279_s21 = sshll.u32 %s10794_s8, 4  ;;  %s10565_s3 = sshra.s32 %s11127_s6, 4  ;;  %s280_s21 = int_to_ptr.vmem [resolvable:$true] %s279_s21  ;;  %s10566_s3 = int_to_ptr.hbm [resolvable:$true] %s10565_s3 }
 0x134   :  { %s10567_s10 = scalar_lea.hbm %s10566_s3, 16  ;;  %s10569_s30 = scalar_lea.hbm %s12643_s28, 16 }
 0x135   :  { %p10568_p11 = scmp.ne.s32.totalorder %s10566_s3, %s10567_s10  ;;  %p10570_p12 = scmp.lt.s32.totalorder %s10566_s3, %s12643_s28 }
 0x136   :  { %p10571_p13 = scmp.lt.s32.totalorder %s10569_s30, %s10567_s10 }
 0x137   :  { %s304_s1 = sshll.u32 %s12644_s7, 4  ;;  %s305_s1 = int_to_ptr.hbm [resolvable:$true] %s304_s1 }
 0x138   :  { %p10572_p0 = por %p10571_p13, %p10570_p12 }
 0x13a   :  { %p10573_p1 = pnand %p10572_p0, %p10568_p11 }
 0x13c   :  { %10576 = shalt.err (!%p10573_p1)
}
 0x13d   :  { %s12645_s22 = sld [smem:[#allocation67_spill]]  ;;  %s10795_s16 = smov [#allocation28]  }
 0x13e   :  { %285 = dma.hbm_to_vmem [thread:$0]  %s11127_s6, 256, %s280_s21, [#allocation24], %s10772_s11, %s10772_s11, %s10773_s15  }
 0x13f   :  { %s306_s18 = sshll.u32 %s10795_s16, 4  ;;  %s10589_s23 = sshra.s32 %s305_s1, 4  ;;  %s307_s18 = int_to_ptr.vmem [resolvable:$true] %s306_s18  ;;  %s10590_s23 = int_to_ptr.hbm [resolvable:$true] %s10589_s23 }
 0x140   :  { %s10591_s9 = scalar_lea.hbm %s10590_s23, 1  ;;  %s10593_s20 = scalar_lea.hbm %s12644_s7, 1 }
 0x141   :  { %p10592_p2 = scmp.ne.s32.totalorder %s10590_s23, %s10591_s9  ;;  %p10594_p3 = scmp.lt.s32.totalorder %s10590_s23, %s12644_s7 }
 0x142   :  { %p10595_p4 = scmp.lt.s32.totalorder %s10593_s20, %s10591_s9 }
 0x143   :  { %s330_s19 = sshll.u32 %s12645_s22, 4  ;;  %s331_s19 = int_to_ptr.hbm [resolvable:$true] %s330_s19 }
 0x144   :  { %p10596_p5 = por %p10595_p4, %p10594_p3 }
 0x146   :  { %p10597_p6 = pnand %p10596_p5, %p10592_p2 }
 0x148   :  { %10600 = shalt.err (!%p10597_p6)
}
 0x149   :  { %309 = dma.hbm_to_vmem [thread:$0]  %s305_s1, 16, %s307_s18, [#allocation27]  }
 0x14a   :  { %s12646_s29 = sld [smem:[#allocation68_spill]]  ;;  %s10796_s4 = smov [#allocation31]  }
 0x14b   :  { %s332_s26 = sshll.u32 %s10796_s4, 4  ;;  %s10613_s28 = sshra.s32 %s331_s19, 4  ;;  %s333_s26 = int_to_ptr.vmem [resolvable:$true] %s332_s26  ;;  %s10614_s28 = int_to_ptr.hbm [resolvable:$true] %s10613_s28 }
 0x14c   :  { %s10615_s6 = scalar_lea.hbm %s10614_s28, 1  ;;  %s10617_s17 = scalar_lea.hbm %s12645_s22, 1 }
 0x14d   :  { %p10616_p7 = scmp.ne.s32.totalorder %s10614_s28, %s10615_s6  ;;  %p10618_p8 = scmp.lt.s32.totalorder %s10614_s28, %s12645_s22 }
 0x14e   :  { %p10619_p9 = scmp.lt.s32.totalorder %s10617_s17, %s10615_s6 }
 0x150   :  { %s353_s12 = sshll.u32 %s12646_s29, 4  ;;  %p10620_p10 = por %p10619_p9, %p10618_p8  ;;  %s11148_s12 = int_to_ptr.hbm [resolvable:$true] %s353_s12 }
 0x152   :  { %p10621_p11 = pnand %p10620_p10, %p10616_p7 }
 0x154   :  { %10624 = shalt.err (!%p10621_p11)
}
 0x155   :  { %335 = dma.hbm_to_vmem [thread:$0]  %s331_s19, 16, %s333_s26, [#allocation30]  }
 0x156   :  { %s12647_s2 = sld [smem:[#allocation71_spill]]  ;;  %s10797_s14 = smov [#allocation34]  }
 0x157   :  { %s355_s0 = sshll.u32 %s10797_s14, 4  ;;  %s10637_s7 = sshra.s32 %s11148_s12, 4  ;;  %s356_s0 = int_to_ptr.vmem [resolvable:$true] %s355_s0  ;;  %s10638_s7 = int_to_ptr.hbm [resolvable:$true] %s10637_s7 }
 0x158   :  { %s10639_s8 = scalar_lea.hbm %s10638_s7, 128  ;;  %s10641_s21 = scalar_lea.hbm %s12646_s29, 128 }
 0x159   :  { %p10640_p12 = scmp.ne.s32.totalorder %s10638_s7, %s10639_s8  ;;  %p10642_p13 = scmp.lt.s32.totalorder %s10638_s7, %s12646_s29 }
 0x15a   :  { %p10643_p0 = scmp.lt.s32.totalorder %s10641_s21, %s10639_s8 }
 0x15c   :  { %s383_s27 = sshll.u32 %s12647_s2, 4  ;;  %p10644_p1 = por %p10643_p0, %p10642_p13  ;;  %s11153_s27 = int_to_ptr.hbm [resolvable:$true] %s383_s27 }
 0x15e   :  { %p10645_p2 = pnand %p10644_p1, %p10640_p12 }
 0x160   :  { %10648 = shalt.err (!%p10645_p2)
}
 0x161   :  { %361 = dma.hbm_to_vmem [thread:$0]  %s11148_s12, 2048, %s356_s0, [#allocation33], %s10772_s11, %s10772_s11, %s10773_s15  }
 0x162   :  { %s10798_s1 = smov [#allocation37]   ;;  %s413_s10 = sshll.u32 %s10987_s5, 4  ;;  %s414_s10 = int_to_ptr.hbm [resolvable:$true] %s413_s10 }
 0x163   :  { %s385_s3 = sshll.u32 %s10798_s1, 4  ;;  %s10661_s30 = sshra.s32 %s11153_s27, 4  ;;  %s386_s3 = int_to_ptr.vmem [resolvable:$true] %s385_s3  ;;  %s10662_s30 = int_to_ptr.hbm [resolvable:$true] %s10661_s30 }
 0x164   :  { %s10663_s22 = scalar_lea.hbm %s10662_s30, 64  ;;  %s10665_s19 = scalar_lea.hbm %s12647_s2, 64 }
 0x165   :  { %p10664_p3 = scmp.ne.s32.totalorder %s10662_s30, %s10663_s22  ;;  %p10666_p4 = scmp.lt.s32.totalorder %s10662_s30, %s12647_s2 }
 0x166   :  { %p10667_p5 = scmp.lt.s32.totalorder %s10665_s19, %s10663_s22 }
 0x168   :  { %p10668_p6 = por %p10667_p5, %p10666_p4 }
 0x16a   :  { %p10669_p7 = pnand %p10668_p6, %p10664_p3 }
 0x16c   :  { %10672 = shalt.err (!%p10669_p7)
}
 0x16d   :  { %391 = dma.hbm_to_vmem [thread:$0]  %s11153_s27, 1024, %s386_s3, [#allocation36], %s10772_s11, %s10772_s11, %s10773_s15  }
 0x16e   :  { %s10799_s16 = smov [#allocation40]   ;;  %s10685_s23 = sshra.s32 %s414_s10, 4  ;;  %s10686_s23 = int_to_ptr.hbm [resolvable:$true] %s10685_s23 }
 0x16f   :  { %s415_s18 = sshll.u32 %s10799_s16, 4  ;;  %s10687_s9 = scalar_lea.hbm %s10686_s23, 64  ;;  %s416_s18 = int_to_ptr.vmem [resolvable:$true] %s415_s18 }
 0x170   :  { %p10688_p8 = scmp.ne.s32.totalorder %s10686_s23, %s10687_s9  ;;  %s10689_s20 = scalar_lea.hbm %s10987_s5, 64 }
 0x171   :  { %p10690_p9 = scmp.lt.s32.totalorder %s10686_s23, %s10987_s5  ;;  %p10691_p10 = scmp.lt.s32.totalorder %s10689_s20, %s10687_s9 }
 0x173   :  { %p10692_p11 = por %p10691_p10, %p10690_p9 }
 0x175   :  { %p10693_p12 = pnand %p10692_p11, %p10688_p8 }
 0x177   :  { %10696 = shalt.err (!%p10693_p12)
}
 0x178   :  { %421 = dma.hbm_to_vmem [thread:$0]  %s414_s10, 1024, %s416_s18, [#allocation39], %s10772_s11, %s10772_s11, %s10773_s15  }
 0x179   :  { %10709 = dma.done.wait [#allocation4], 9216  }
 0x17a   :  { %10710 = vsyncadd [#allocation4], 4294958080 }
 0x17b   :  { %10711 = dma.done.wait [#allocation6], 592  }
 0x17c   :  { %10712 = vsyncadd [#allocation6], 4294966704 }
 0x17d   :  { %10713 = dma.done.wait [#allocation9], 10368  }
 0x17e   :  { %10714 = vsyncadd [#allocation9], 4294956928 }
 0x17f   :  { %10715 = dma.done.wait [#allocation12], 1744  }
 0x180   :  { %10716 = vsyncadd [#allocation12], 4294965552 }
 0x181   :  { %10717 = dma.done.wait [#allocation15], 2320  }
 0x182   :  { %10718 = vsyncadd [#allocation15], 4294964976 }
 0x183   :  { %10719 = dma.done.wait [#allocation18], 2320  }
 0x184   :  { %10720 = vsyncadd [#allocation18], 4294964976 }
 0x185   :  { %10721 = dma.done.wait [#allocation21], 160  }
 0x186   :  { %10722 = vsyncadd [#allocation21], 4294967136 }
 0x187   :  { %10723 = dma.done.wait [#allocation24], 272  }
 0x188   :  { %10724 = vsyncadd [#allocation24], 4294967024 }
 0x189   :  { %10725 = dma.done.wait [#allocation27], 2064  }
 0x18a   :  { %10726 = vsyncadd [#allocation27], 4294965232 }
 0x18b   :  { %10727 = dma.done.wait [#allocation30], 2064  }
 0x18c   :  { %10728 = vsyncadd [#allocation30], 4294965232 }
 0x18d   :  { %10729 = dma.done.wait [#allocation33], 2112  }
 0x18e   :  { %10730 = vsyncadd [#allocation33], 4294965184 }
 0x18f   :  { %10731 = dma.done.wait [#allocation36], 2048  }
 0x190   :  { %10732 = vsyncadd [#allocation36], 4294965248 }
 0x191   :  { %10733 = dma.done.wait [#allocation39], 2048  }
 0x192   :  { %10734 = vsyncadd [#allocation39], 4294965248  ;;  %s12648_s5 = sld [smem:[#allocation54_spill]]  ;;  %v9679_v9 = vld [vmem:[#allocation3] sm:$0xff]  ;;  %v9680_v13 = vld [vmem:[#allocation3 + $0x8] sm:$0xff]  ;;  %s10800_s15 = smov 8  }
 0x193   :  { %v9687_v10 = vld [vmem:[#allocation3 + $0x40] sm:$0xff]  ;;  %v9688_v14 = vld [vmem:[#allocation3 + $0x48] sm:$0xff]  ;;  %v9681_v17 = vld [vmem:[#allocation3 + $0x10] sm:$0xff]  ;;  %s10801_s29 = smov 24   ;;  %s10802_s4 = smov 40   ;;  %vm2447_vm0 = vcmask 1043456  }
 0x194   :  { %v9695_v11 = vld [vmem:[#allocation3 + $0x80] sm:$0xff]  ;;  %v9696_v15 = vld [vmem:[#allocation3 + $0x88] sm:$0xff]  ;;  %v9689_v18 = vld [vmem:[#allocation3 + $0x50] sm:$0xff]  ;;  %s10803_s26 = smov 32   ;;  %s10804_s12 = smov 56   ;;  %vm2271_vm1 = vcmask 130048  }
 0x195   :  { %v9703_v12 = vld [vmem:[#allocation3 + $0xc0] sm:$0xff]  ;;  %v9704_v16 = vld [vmem:[#allocation3 + $0xc8] sm:$0xff]  ;;  %v9697_v19 = vld [vmem:[#allocation3 + $0x90] sm:$0xff]  ;;  %s10805_s28 = smov 48   ;;  %vm2246_vm2 = vcmask 64512   ;;  %vm2288_vm3 = vcmask 195584  }
 0x196   :  { %v9705_v20 = vld [vmem:[#allocation3 + $0xd0] sm:$0xff]  ;;  %v9682_v21 = vld [vmem:[#allocation3 + $0x18] sm:$0xff]  ;;  %v9683_v25 = vld [vmem:[#allocation3 + $0x20] sm:$0xff]  ;;  %vm2305_vm4 = vcmask 261120   ;;  %vm2322_vm5 = vcmask 326656   ;;  %vm2339_vm6 = vcmask 392192  }
 0x197   :  { %v9690_v22 = vld [vmem:[#allocation3 + $0x58] sm:$0xff]  ;;  %v9691_v26 = vld [vmem:[#allocation3 + $0x60] sm:$0xff]  ;;  %v9684_v29 = vld [vmem:[#allocation3 + $0x28] sm:$0xff]  ;;  %vm2356_vm7 = vcmask 457728   ;;  %vm2373_vm8 = vcmask 523264   ;;  %vm2430_vm9 = vcmask 588800  }
 0x198   :  { %v11176_v1 = vld [vmem:[%s12648_s5 + $0x38] sm:$0xff]  ;;  %v11181_v2 = vld [vmem:[%s12648_s5 + $0x30] sm:$0xff]  ;;  %v11186_v3 = vld [vmem:[%s12648_s5 + $0x28] sm:$0xff]  ;;  %s10806_s6 = smov 112   ;;  %s10807_s17 = smov 96   ;;  %vm4237_vm10 = vcmask 654336  }
 0x199   :  { %653 = vmatpush.bf16.msra.mxu0 %v11176_v1  ;;  %783 = vmatpush.bf16.msra.mxu1 %v11176_v1  ;;  %v11195_v4 = vld [vmem:[%s12648_s5 + $0x20] sm:$0xff]  ;;  %v11202_v5 = vld [vmem:[%s12648_s5 + $0x18] sm:$0xff]  ;;  %v11209_v6 = vld [vmem:[%s12648_s5 + $0x10] sm:$0xff]  ;;  %s10808_s2 = smov 80   ;;  %vm4254_vm11 = vcmask 785408   ;;  %vm4271_vm12 = vcmask 916480  }
 0x19a   :  { %913 = vmatpush.bf16.msra.mxu2 %v11176_v1  ;;  %1043 = vmatpush.bf16.msra.mxu3 %v11176_v1  ;;  %v11216_v7 = vld [vmem:[%s12648_s5 + $0x8] sm:$0xff]  ;;  %v11223_v8 = vld [vmem:[%s12648_s5] sm:$0xff]  ;;  %v9685_v33 = vld [vmem:[#allocation3 + $0x30] sm:$0xff]  ;;  %s12698_s27 = sld [smem:[#allocation58_spill]]  ;;  %vm5105_vm13 = vcmask 1040384   ;;  %vm5098_vm14 = vcmask 146432  }
 0x19b   :  { %v9698_v23 = vld [vmem:[#allocation3 + $0x98] sm:$0xff]  ;;  %v9699_v27 = vld [vmem:[#allocation3 + $0xa0] sm:$0xff]  ;;  %v9692_v30 = vld [vmem:[#allocation3 + $0x68] sm:$0xff]  ;;  %s12699_s14 = sld [smem:[#allocation60_spill]]  ;;  %vm6889_vm15 = vcmask 15360  }
 0x19c   :  { %v9706_v24 = vld [vmem:[#allocation3 + $0xd8] sm:$0xff]  ;;  %v9707_v28 = vld [vmem:[#allocation3 + $0xe0] sm:$0xff]  ;;  %v9700_v31 = vld [vmem:[#allocation3 + $0xa8] sm:$0xff]  ;;  %s12700_s0 = sld [smem:[#allocation63_spill]] }
 0x19d   :  { %654 = vmatpush.bf16.msra.mxu0 %v11181_v2  ;;  %784 = vmatpush.bf16.msra.mxu1 %v11181_v2  ;;  %v9708_v32 = vld [vmem:[#allocation3 + $0xe8] sm:$0xff]  ;;  %v9693_v34 = vld [vmem:[#allocation3 + $0x70] sm:$0xff]  ;;  %v9686_v37 = vld [vmem:[#allocation3 + $0x38] sm:$0xff]  ;;  %s12701_s7 = sld [smem:[#allocation66_spill]] }
 0x19e   :  { %914 = vmatpush.bf16.msra.mxu2 %v11181_v2  ;;  %1044 = vmatpush.bf16.msra.mxu3 %v11181_v2  ;;  %v9701_v35 = vld [vmem:[#allocation3 + $0xb0] sm:$0xff]  ;;  %v9694_v38 = vld [vmem:[#allocation3 + $0x78] sm:$0xff]  ;;  %v9711_v41 = vld [vmem:[#allocation3 + $0x100] sm:$0xff]  ;;  %s12703_s8 = sld [smem:[#allocation70_spill]] }
 0x19f   :  { %v9709_v36 = vld [vmem:[#allocation3 + $0xf0] sm:$0xff]  ;;  %v9702_v39 = vld [vmem:[#allocation3 + $0xb8] sm:$0xff]  ;;  %v9719_v42 = vld [vmem:[#allocation3 + $0x140] sm:$0xff]  ;;  %s12704_s21 = sld [smem:[#allocation72_spill]] }
 0x1a0   :  { %v9710_v40 = vld [vmem:[#allocation3 + $0xf8] sm:$0xff]  ;;  %v9727_v45 = vld [vmem:[#allocation3 + $0x180] sm:$0xff] }
 0x1a1   :  { %655 = vmatpush.bf16.msra.mxu0 %v11186_v3  ;;  %785 = vmatpush.bf16.msra.mxu1 %v11186_v3  ;;  %v9735_v46 = vld [vmem:[#allocation3 + $0x1c0] sm:$0xff] }
 0x1a2   :  { %915 = vmatpush.bf16.msra.mxu2 %v11186_v3  ;;  %1045 = vmatpush.bf16.msra.mxu3 %v11186_v3 }
 0x1a5   :  { %656 = vmatpush.bf16.msra.mxu0 %v11195_v4  ;;  %786 = vmatpush.bf16.msra.mxu1 %v11195_v4 }
 0x1a6   :  { %916 = vmatpush.bf16.msra.mxu2 %v11195_v4  ;;  %1046 = vmatpush.bf16.msra.mxu3 %v11195_v4 }
 0x1a9   :  { %657 = vmatpush.bf16.msra.mxu0 %v11202_v5  ;;  %787 = vmatpush.bf16.msra.mxu1 %v11202_v5 }
 0x1aa   :  { %917 = vmatpush.bf16.msra.mxu2 %v11202_v5  ;;  %1047 = vmatpush.bf16.msra.mxu3 %v11202_v5 }
 0x1ad   :  { %658 = vmatpush.bf16.msra.mxu0 %v11209_v6  ;;  %788 = vmatpush.bf16.msra.mxu1 %v11209_v6 }
 0x1ae   :  { %918 = vmatpush.bf16.msra.mxu2 %v11209_v6  ;;  %1048 = vmatpush.bf16.msra.mxu3 %v11209_v6 }
 0x1b1   :  { %659 = vmatpush.bf16.msra.mxu0 %v11216_v7  ;;  %789 = vmatpush.bf16.msra.mxu1 %v11216_v7 }
 0x1b2   :  { %919 = vmatpush.bf16.msra.mxu2 %v11216_v7  ;;  %1049 = vmatpush.bf16.msra.mxu3 %v11216_v7 }
 0x1b5   :  { %660 = vmatpush.bf16.msra.mxu0 %v11223_v8  ;;  %790 = vmatpush.bf16.msra.mxu1 %v11223_v8 }
 0x1b6   :  { %920 = vmatpush.bf16.msra.mxu2 %v11223_v8  ;;  %1050 = vmatpush.bf16.msra.mxu3 %v11223_v8 }
 0x1b8   :  { %661 = vmatmul.bf16.vlgmr.msra.gmra.mxu0 %v9679_v9  ;;  %791 = vmatmul.bf16.vlgmr.msra.gmra.mxu1 %v9687_v10  ;;  %v9728_v9 = vld [vmem:[#allocation3 + $0x188] sm:$0xff] }
 0x1b9   :  { %1173 = vmatpush.bf16.msrb.mxu0 %v11176_v1  ;;  %1303 = vmatpush.bf16.msrb.mxu1 %v11176_v1  ;;  %v9736_v10 = vld [vmem:[#allocation3 + $0x1c8] sm:$0xff] }
 0x1ba   :  { %921 = vmatmul.bf16.vlgmr.msra.gmra.mxu2 %v9695_v11  ;;  %1051 = vmatmul.bf16.vlgmr.msra.gmra.mxu3 %v9703_v12 }
 0x1bb   :  { %1433 = vmatpush.bf16.msrb.mxu2 %v11176_v1  ;;  %1563 = vmatpush.bf16.msrb.mxu3 %v11176_v1 }
 0x1bd   :  { %1174 = vmatpush.bf16.msrb.mxu0 %v11181_v2  ;;  %1304 = vmatpush.bf16.msrb.mxu1 %v11181_v2 }
 0x1bf   :  { %1434 = vmatpush.bf16.msrb.mxu2 %v11181_v2  ;;  %1564 = vmatpush.bf16.msrb.mxu3 %v11181_v2 }
 0x1c1   :  { %1175 = vmatpush.bf16.msrb.mxu0 %v11186_v3  ;;  %1305 = vmatpush.bf16.msrb.mxu1 %v11186_v3 }
 0x1c3   :  { %1435 = vmatpush.bf16.msrb.mxu2 %v11186_v3  ;;  %1565 = vmatpush.bf16.msrb.mxu3 %v11186_v3 }
 0x1c5   :  { %1176 = vmatpush.bf16.msrb.mxu0 %v11195_v4  ;;  %1306 = vmatpush.bf16.msrb.mxu1 %v11195_v4 }
 0x1c7   :  { %1436 = vmatpush.bf16.msrb.mxu2 %v11195_v4  ;;  %1566 = vmatpush.bf16.msrb.mxu3 %v11195_v4 }
 0x1c8   :  { %666 = vmatmul.bf16.gmra.mxu0 %v9680_v13  ;;  %796 = vmatmul.bf16.gmra.mxu1 %v9688_v14 }
 0x1c9   :  { %1177 = vmatpush.bf16.msrb.mxu0 %v11202_v5  ;;  %1307 = vmatpush.bf16.msrb.mxu1 %v11202_v5 }
 0x1ca   :  { %926 = vmatmul.bf16.gmra.mxu2 %v9696_v15  ;;  %1056 = vmatmul.bf16.gmra.mxu3 %v9704_v16 }
 0x1cb   :  { %1437 = vmatpush.bf16.msrb.mxu2 %v11202_v5  ;;  %1567 = vmatpush.bf16.msrb.mxu3 %v11202_v5 }
 0x1cd   :  { %1178 = vmatpush.bf16.msrb.mxu0 %v11209_v6  ;;  %1308 = vmatpush.bf16.msrb.mxu1 %v11209_v6 }
 0x1cf   :  { %1438 = vmatpush.bf16.msrb.mxu2 %v11209_v6  ;;  %1568 = vmatpush.bf16.msrb.mxu3 %v11209_v6 }
 0x1d1   :  { %1179 = vmatpush.bf16.msrb.mxu0 %v11216_v7  ;;  %1309 = vmatpush.bf16.msrb.mxu1 %v11216_v7 }
 0x1d3   :  { %1439 = vmatpush.bf16.msrb.mxu2 %v11216_v7  ;;  %1569 = vmatpush.bf16.msrb.mxu3 %v11216_v7 }
 0x1d5   :  { %1180 = vmatpush.bf16.msrb.mxu0 %v11223_v8  ;;  %1310 = vmatpush.bf16.msrb.mxu1 %v11223_v8 }
 0x1d7   :  { %1440 = vmatpush.bf16.msrb.mxu2 %v11223_v8  ;;  %1570 = vmatpush.bf16.msrb.mxu3 %v11223_v8 }
 0x1d8   :  { %671 = vmatmul.bf16.gmra.mxu0 %v9681_v17  ;;  %801 = vmatmul.bf16.gmra.mxu1 %v9689_v18 }
 0x1d9   :  { %1693 = vmatpush.bf16.msra.mxu0 %v11176_v1  ;;  %v9712_v1 = vld [vmem:[#allocation3 + $0x108] sm:$0xff] }
 0x1da   :  { %931 = vmatmul.bf16.gmra.mxu2 %v9697_v19  ;;  %1061 = vmatmul.bf16.gmra.mxu3 %v9705_v20 }
 0x1dd   :  { %1694 = vmatpush.bf16.msra.mxu0 %v11181_v2  ;;  %v9720_v2 = vld [vmem:[#allocation3 + $0x148] sm:$0xff] }
 0x1e1   :  { %1695 = vmatpush.bf16.msra.mxu0 %v11186_v3 }
 0x1e5   :  { %1696 = vmatpush.bf16.msra.mxu0 %v11195_v4 }
 0x1e8   :  { %676 = vmatmul.bf16.gmra.mxu0 %v9682_v21  ;;  %806 = vmatmul.bf16.gmra.mxu1 %v9690_v22 }
 0x1e9   :  { %1697 = vmatpush.bf16.msra.mxu0 %v11202_v5 }
 0x1ea   :  { %936 = vmatmul.bf16.gmra.mxu2 %v9698_v23  ;;  %1066 = vmatmul.bf16.gmra.mxu3 %v9706_v24 }
 0x1ed   :  { %1698 = vmatpush.bf16.msra.mxu0 %v11209_v6 }
 0x1f1   :  { %1699 = vmatpush.bf16.msra.mxu0 %v11216_v7 }
 0x1f5   :  { %1700 = vmatpush.bf16.msra.mxu0 %v11223_v8 }
 0x1f8   :  { %681 = vmatmul.bf16.gmra.mxu0 %v9683_v25  ;;  %811 = vmatmul.bf16.gmra.mxu1 %v9691_v26 }
 0x1fa   :  { %941 = vmatmul.bf16.gmra.mxu2 %v9699_v27  ;;  %1071 = vmatmul.bf16.gmra.mxu3 %v9707_v28 }
 0x208   :  { %686 = vmatmul.bf16.gmra.mxu0 %v9684_v29  ;;  %816 = vmatmul.bf16.gmra.mxu1 %v9692_v30 }
 0x20a   :  { %946 = vmatmul.bf16.gmra.mxu2 %v9700_v31  ;;  %1076 = vmatmul.bf16.gmra.mxu3 %v9708_v32 }
 0x218   :  { %691 = vmatmul.bf16.gmra.mxu0 %v9685_v33  ;;  %821 = vmatmul.bf16.gmra.mxu1 %v9693_v34  ;;  %v9713_v33 = vld [vmem:[#allocation3 + $0x110] sm:$0xff] }
 0x219   :  { %v9721_v34 = vld [vmem:[#allocation3 + $0x150] sm:$0xff] }
 0x21a   :  { %951 = vmatmul.bf16.gmra.mxu2 %v9701_v35  ;;  %1081 = vmatmul.bf16.gmra.mxu3 %v9709_v36 }
 0x228   :  { %696 = vmatmul.bf16.gmra.mxu0 %v9686_v37  ;;  %826 = vmatmul.bf16.gmra.mxu1 %v9694_v38 }
 0x22a   :  { %956 = vmatmul.bf16.gmra.mxu2 %v9702_v39  ;;  %1086 = vmatmul.bf16.gmra.mxu3 %v9710_v40 }
 0x235   :  { %v662_v43 = vpop.f32.mrf.mxu0  ;;  %v792_v44 = vpop.f32.mrf.mxu1 }
 0x236   :  { %v832_v47 = vpack.c.bf16 %v792_v44, %v792_v44  ;;  %v702_v48 = vpack.c.bf16 %v662_v43, %v662_v43 }
 0x238   :  { %1181 = vmatmul.bf16.vlgmr.msrb.gmra.mxu0 %v9711_v41  ;;  %1311 = vmatmul.bf16.vlgmr.msrb.gmra.mxu1 %v9719_v42  ;;  %v1814_v53 = vunpack.c.l.b16 %v832_v47  ;;  %v11271_v56 = vunpack.c.l.b16 %v702_v48  ;;  %v9729_v41 = vld [vmem:[#allocation3 + $0x190] sm:$0xff] }
 0x23a   :  { %1441 = vmatmul.bf16.vlgmr.msrb.gmra.mxu2 %v9727_v45  ;;  %1571 = vmatmul.bf16.vlgmr.msrb.gmra.mxu3 %v9735_v46 }
 0x23d   :  { %v922_v49 = vpop.f32.mrf.mxu2  ;;  %v1052_v50 = vpop.f32.mrf.mxu3 }
 0x23e   :  { %v664_v51 = vpop.f32.mrf.mxu0  ;;  %v794_v52 = vpop.f32.mrf.mxu1  ;;  %v962_v59 = vpack.c.bf16 %v922_v49, %v922_v49  ;;  %v1092_v60 = vpack.c.bf16 %v1052_v50, %v1052_v50 }
 0x23f   :  { %v703_v54 = vpack.c.bf16 %v664_v51, %v664_v51  ;;  %v833_v55 = vpack.c.bf16 %v794_v52, %v794_v52 }
 0x240   :  { %v1870_v3 = vunpack.c.l.b16 %v962_v59  ;;  %v1926_v4 = vunpack.c.l.b16 %v1092_v60 }
 0x241   :  { %v11273_v57 = vunpack.c.l.b16 %v703_v54  ;;  %v1815_v58 = vunpack.c.l.b16 %v833_v55 }
 0x243   :  { %v1830_v62 = vpack.c.b16 %v1815_v58, %v1814_v53 }
 0x245   :  { %v924_v63 = vpop.f32.mrf.mxu2  ;;  %v1054_v0 = vpop.f32.mrf.mxu3  ;;  %1838 = vrot.lane.b32.xlu0 %v1830_v62, %s10800_s15 }
 0x246   :  { %v963_v5 = vpack.c.bf16 %v924_v63, %v924_v63  ;;  %v1093_v6 = vpack.c.bf16 %v1054_v0, %v1054_v0  ;;  %v667_v7 = vpop.f32.mrf.mxu0  ;;  %v797_v8 = vpop.f32.mrf.mxu1 }
 0x247   :  { %v834_v15 = vpack.c.bf16 %v797_v8, %v797_v8  ;;  %v704_v16 = vpack.c.bf16 %v667_v7, %v667_v7 }
 0x248   :  { %v1871_v11 = vunpack.c.l.b16 %v963_v5  ;;  %v1927_v12 = vunpack.c.l.b16 %v1093_v6  ;;  %1186 = vmatmul.bf16.gmra.mxu0 %v9712_v1  ;;  %1316 = vmatmul.bf16.gmra.mxu1 %v9720_v2 }
 0x249   :  { %v1816_v21 = vunpack.c.l.b16 %v834_v15  ;;  %v11280_v24 = vunpack.c.l.b16 %v704_v16 }
 0x24a   :  { %1446 = vmatmul.bf16.gmra.mxu2 %v9728_v9  ;;  %1576 = vmatmul.bf16.gmra.mxu3 %v9736_v10  ;;  %v1886_v13 = vpack.c.b16 %v1871_v11, %v1870_v3  ;;  %v1942_v14 = vpack.c.b16 %v1927_v12, %v1926_v4  ;;  %v9714_v3 = vld [vmem:[#allocation3 + $0x118] sm:$0xff] }
 0x24b   :  { %v9730_v10 = vld [vmem:[#allocation3 + $0x198] sm:$0xff] }
 0x24c   :  { %1950 = vrot.lane.b32.xlu1 %v1942_v14, %s10801_s29 }
 0x24d   :  { %v927_v17 = vpop.f32.mrf.mxu2  ;;  %v1057_v18 = vpop.f32.mrf.mxu3  ;;  %1894 = vrot.lane.b32.xlu0 %v1886_v13, %s10783_s13 }
 0x24e   :  { %v669_v19 = vpop.f32.mrf.mxu0  ;;  %v799_v20 = vpop.f32.mrf.mxu1  ;;  %v964_v27 = vpack.c.bf16 %v927_v17, %v927_v17  ;;  %v1094_v28 = vpack.c.bf16 %v1057_v18, %v1057_v18 }
 0x24f   :  { %v705_v22 = vpack.c.bf16 %v669_v19, %v669_v19  ;;  %v835_v23 = vpack.c.bf16 %v799_v20, %v799_v20 }
 0x250   :  { %v1872_v35 = vunpack.c.l.b16 %v964_v27  ;;  %v1928_v36 = vunpack.c.l.b16 %v1094_v28  ;;  %v9715_v28 = vld [vmem:[#allocation3 + $0x120] sm:$0xff] }
 0x251   :  { %v11282_v25 = vunpack.c.l.b16 %v705_v22  ;;  %v1817_v26 = vunpack.c.l.b16 %v835_v23 }
 0x253   :  { %v1831_v30 = vpack.c.b16 %v1817_v26, %v1816_v21 }
 0x255   :  { %v929_v31 = vpop.f32.mrf.mxu2  ;;  %v1059_v32 = vpop.f32.mrf.mxu3  ;;  %1840 = vrot.lane.b32.xlu2 %v1831_v30, %s10800_s15 }
 0x256   :  { %v965_v37 = vpack.c.bf16 %v929_v31, %v929_v31  ;;  %v1095_v38 = vpack.c.bf16 %v1059_v32, %v1059_v32  ;;  %v672_v39 = vpop.f32.mrf.mxu0  ;;  %v802_v40 = vpop.f32.mrf.mxu1 }
 0x257   :  { %v836_v46 = vpack.c.bf16 %v802_v40, %v802_v40  ;;  %v706_v47 = vpack.c.bf16 %v672_v39, %v672_v39 }
 0x258   :  { %v1873_v42 = vunpack.c.l.b16 %v965_v37  ;;  %v1929_v43 = vunpack.c.l.b16 %v1095_v38  ;;  %1191 = vmatmul.bf16.gmra.mxu0 %v9713_v33  ;;  %1321 = vmatmul.bf16.gmra.mxu1 %v9721_v34 }
 0x259   :  { %v1818_v52 = vunpack.c.l.b16 %v836_v46  ;;  %v11289_v55 = vunpack.c.l.b16 %v706_v47 }
 0x25a   :  { %1451 = vmatmul.bf16.gmra.mxu2 %v9729_v41  ;;  %v1887_v44 = vpack.c.b16 %v1873_v42, %v1872_v35  ;;  %v1943_v45 = vpack.c.b16 %v1929_v43, %v1928_v36  ;;  %v9716_v43 = vld [vmem:[#allocation3 + $0x128] sm:$0xff] }
 0x25c   :  { %1896 = vrot.lane.b32.xlu0 %v1887_v44, %s10783_s13  ;;  %1952 = vrot.lane.b32.xlu1 %v1943_v45, %s10801_s29 }
 0x25d   :  { %v932_v48 = vpop.f32.mrf.mxu2  ;;  %v1062_v49 = vpop.f32.mrf.mxu3 }
 0x25e   :  { %v674_v50 = vpop.f32.mrf.mxu0  ;;  %v804_v51 = vpop.f32.mrf.mxu1  ;;  %v966_v60 = vpack.c.bf16 %v932_v48, %v932_v48  ;;  %v1096_v62 = vpack.c.bf16 %v1062_v49, %v1062_v49 }
 0x25f   :  { %v707_v53 = vpack.c.bf16 %v674_v50, %v674_v50  ;;  %v837_v54 = vpack.c.bf16 %v804_v51, %v804_v51 }
 0x260   :  { %v1874_v4 = vunpack.c.l.b16 %v966_v60  ;;  %v1930_v5 = vunpack.c.l.b16 %v1096_v62 }
 0x261   :  { %v11291_v58 = vunpack.c.l.b16 %v707_v53  ;;  %v1819_v59 = vunpack.c.l.b16 %v837_v54  ;;  %v9737_v54 = vld [vmem:[#allocation3 + $0x1d0] sm:$0xff] }
 0x262   :  { %1581 = vmatmul.bf16.gmra.mxu3 %v9737_v54  ;;  %v9731_v54 = vld [vmem:[#allocation3 + $0x1a0] sm:$0xff] }
 0x263   :  { %v1832_v0 = vpack.c.b16 %v1819_v59, %v1818_v52 }
 0x265   :  { %v934_v1 = vpop.f32.mrf.mxu2  ;;  %v1064_v2 = vpop.f32.mrf.mxu3  ;;  %1842 = vrot.lane.b32.xlu1 %v1832_v0, %s10800_s15  ;;  %v9717_v0 = vld [vmem:[#allocation3 + $0x130] sm:$0xff] }
 0x266   :  { %v967_v6 = vpack.c.bf16 %v934_v1, %v934_v1  ;;  %v1097_v7 = vpack.c.bf16 %v1064_v2, %v1064_v2  ;;  %v677_v8 = vpop.f32.mrf.mxu0  ;;  %v11296_v9 = vpop.f32.mrf.mxu1 }
 0x267   :  { %v708_v15 = vpack.c.bf16 %v677_v8, %v677_v8 }
 0x268   :  { %v1875_v11 = vunpack.c.l.b16 %v967_v6  ;;  %v1931_v12 = vunpack.c.l.b16 %v1097_v7  ;;  %1196 = vmatmul.bf16.gmra.mxu0 %v9714_v3 }
 0x269   :  { %v11306_v21 = vunpack.c.l.b16 %v708_v15 }
 0x26a   :  { %1456 = vmatmul.bf16.gmra.mxu2 %v9730_v10  ;;  %v1944_v13 = vpack.c.b16 %v1931_v12, %v1930_v5  ;;  %v1888_v14 = vpack.c.b16 %v1875_v11, %v1874_v4 }
 0x26c   :  { %1954 = vrot.lane.b32.xlu0 %v1944_v13, %s10801_s29  ;;  %1898 = vrot.lane.b32.xlu2 %v1888_v14, %s10783_s13  ;;  %v9738_v13 = vld [vmem:[#allocation3 + $0x1d8] sm:$0xff] }
 0x26d   :  { %v11300_v16 = vpop.f32.mrf.mxu2  ;;  %v11302_v17 = vpop.f32.mrf.mxu3 }
 0x26e   :  { %v679_v18 = vpop.f32.mrf.mxu0  ;;  %v11304_v19 = vpop.f32.mrf.mxu1 }
 0x26f   :  { %v709_v20 = vpack.c.bf16 %v679_v18, %v679_v18  ;;  %v9718_v18 = vld [vmem:[#allocation3 + $0x138] sm:$0xff] }
 0x271   :  { %v11308_v22 = vunpack.c.l.b16 %v709_v20 }
 0x272   :  { %1586 = vmatmul.bf16.gmra.mxu3 %v9738_v13 }
 0x275   :  { %v11312_v26 = vpop.f32.mrf.mxu2  ;;  %v11314_v27 = vpop.f32.mrf.mxu3 }
 0x276   :  { %v682_v30 = vpop.f32.mrf.mxu0  ;;  %v11316_v31 = vpop.f32.mrf.mxu1 }
 0x277   :  { %v710_v32 = vpack.c.bf16 %v682_v30, %v682_v30  ;;  %v9722_v30 = vld [vmem:[#allocation3 + $0x158] sm:$0xff] }
 0x278   :  { %1201 = vmatmul.bf16.gmra.mxu0 %v9715_v28  ;;  %1326 = vmatmul.bf16.gmra.mxu1 %v9722_v30 }
 0x279   :  { %v11324_v38 = vunpack.c.l.b16 %v710_v32 }
 0x27a   :  { %1461 = vmatmul.bf16.gmra.mxu2 %v9731_v54 }
 0x27b   :  { %12649 = vst [vmem:[#allocation73_spill] sm:$0xff] %v11324_v38 }
 0x27d   :  { %v11318_v33 = vpop.f32.mrf.mxu2  ;;  %v11320_v34 = vpop.f32.mrf.mxu3 }
 0x27e   :  { %v684_v35 = vpop.f32.mrf.mxu0  ;;  %v11322_v36 = vpop.f32.mrf.mxu1 }
 0x27f   :  { %v711_v37 = vpack.c.bf16 %v684_v35, %v684_v35 }
 0x281   :  { %v11326_v39 = vunpack.c.l.b16 %v711_v37 }
 0x285   :  { %v11330_v41 = vpop.f32.mrf.mxu2  ;;  %v11332_v42 = vpop.f32.mrf.mxu3 }
 0x286   :  { %v687_v44 = vpop.f32.mrf.mxu0  ;;  %v11334_v45 = vpop.f32.mrf.mxu1 }
 0x287   :  { %v712_v46 = vpack.c.bf16 %v687_v44, %v687_v44 }
 0x288   :  { %1206 = vmatmul.bf16.gmra.mxu0 %v9716_v43 }
 0x289   :  { %v11342_v52 = vunpack.c.l.b16 %v712_v46 }
 0x28b   :  { %12650 = vst [vmem:[#allocation74_spill] sm:$0xff] %v11342_v52 }
 0x28d   :  { %v11336_v47 = vpop.f32.mrf.mxu2  ;;  %v11338_v48 = vpop.f32.mrf.mxu3 }
 0x28e   :  { %v689_v49 = vpop.f32.mrf.mxu0  ;;  %v11340_v50 = vpop.f32.mrf.mxu1 }
 0x28f   :  { %v713_v51 = vpack.c.bf16 %v689_v49, %v689_v49 }
 0x291   :  { %v11344_v53 = vunpack.c.l.b16 %v713_v51 }
 0x293   :  { %12651 = vst [vmem:[#allocation75_spill] sm:$0xff] %v11344_v53 }
 0x295   :  { %v11348_v60 = vpop.f32.mrf.mxu2  ;;  %v11350_v62 = vpop.f32.mrf.mxu3 }
 0x296   :  { %v692_v1 = vpop.f32.mrf.mxu0  ;;  %v11352_v2 = vpop.f32.mrf.mxu1 }
 0x297   :  { %v714_v3 = vpack.c.bf16 %v692_v1, %v692_v1 }
 0x298   :  { %1211 = vmatmul.bf16.gmra.mxu0 %v9717_v0 }
 0x299   :  { %v11360_v10 = vunpack.c.l.b16 %v714_v3 }
 0x29b   :  { %12652 = vst [vmem:[#allocation76_spill] sm:$0xff] %v11360_v10 }
 0x29d   :  { %v11354_v4 = vpop.f32.mrf.mxu2  ;;  %v11356_v5 = vpop.f32.mrf.mxu3 }
 0x29e   :  { %v694_v6 = vpop.f32.mrf.mxu0  ;;  %v11358_v7 = vpop.f32.mrf.mxu1 }
 0x29f   :  { %v715_v8 = vpack.c.bf16 %v694_v6, %v694_v6  ;;  %v9743_v6 = vld [vmem:[#allocation3 + $0x200] sm:$0xff] }
 0x2a1   :  { %v11362_v11 = vunpack.c.l.b16 %v715_v8 }
 0x2a3   :  { %12653 = vst [vmem:[#allocation77_spill] sm:$0xff] %v11362_v11  ;;  %v9745_v11 = vld [vmem:[#allocation3 + $0x210] sm:$0xff] }
 0x2a5   :  { %v11366_v14 = vpop.f32.mrf.mxu2  ;;  %v11368_v15 = vpop.f32.mrf.mxu3 }
 0x2a6   :  { %v697_v20 = vpop.f32.mrf.mxu0  ;;  %v11370_v28 = vpop.f32.mrf.mxu1 }
 0x2a7   :  { %v716_v32 = vpack.c.bf16 %v697_v20, %v697_v20 }
 0x2a8   :  { %1216 = vmatmul.bf16.gmra.mxu0 %v9718_v18  ;;  %v9723_v18 = vld [vmem:[#allocation3 + $0x160] sm:$0xff] }
 0x2a9   :  { %v11378_v49 = vunpack.c.l.b16 %v716_v32  ;;  %1331 = vmatmul.bf16.gmra.mxu1 %v9723_v18 }
 0x2ab   :  { %12654 = vst [vmem:[#allocation78_spill] sm:$0xff] %v11378_v49  ;;  %v9739_v49 = vld [vmem:[#allocation3 + $0x1e0] sm:$0xff] }
 0x2ac   :  { %1591 = vmatmul.bf16.gmra.mxu3 %v9739_v49 }
 0x2ad   :  { %v11372_v35 = vpop.f32.mrf.mxu2  ;;  %v11374_v37 = vpop.f32.mrf.mxu3 }
 0x2ae   :  { %v699_v43 = vpop.f32.mrf.mxu0  ;;  %v11376_v44 = vpop.f32.mrf.mxu1 }
 0x2af   :  { %v717_v46 = vpack.c.bf16 %v699_v43, %v699_v43 }
 0x2b1   :  { %v11380_v51 = vunpack.c.l.b16 %v717_v46 }
 0x2b3   :  { %12655 = vst [vmem:[#allocation79_spill] sm:$0xff] %v11380_v51 }
 0x2b5   :  { %v11384_v1 = vpop.f32.mrf.mxu2  ;;  %v11386_v3 = vpop.f32.mrf.mxu3 }
 0x2b6   :  { %v1182_v8 = vpop.f32.mrf.mxu0  ;;  %v1312_v13 = vpop.f32.mrf.mxu1 }
 0x2b7   :  { %v1352_v20 = vpack.c.bf16 %v1312_v13, %v1312_v13  ;;  %v1222_v30 = vpack.c.bf16 %v1182_v8, %v1182_v8  ;;  %v9744_v8 = vld [vmem:[#allocation3 + $0x208] sm:$0xff] }
 0x2b8   :  { %1701 = vmatmul.bf16.vlgmr.msra.gmra.mxu0 %v9743_v6  ;;  %v9732_v6 = vld [vmem:[#allocation3 + $0x1a8] sm:$0xff] }
 0x2b9   :  { %v2038_v59 = vunpack.c.l.b16 %v1352_v20  ;;  %v1982_v54 = vunpack.c.l.b16 %v1222_v30  ;;  %1466 = vmatmul.bf16.gmra.mxu2 %v9732_v6 }
 0x2bd   :  { %v1442_v32 = vpop.f32.mrf.mxu2  ;;  %v1572_v43 = vpop.f32.mrf.mxu3 }
 0x2be   :  { %v1184_v46 = vpop.f32.mrf.mxu0  ;;  %v1314_v12 = vpop.f32.mrf.mxu1  ;;  %v1482_v29 = vpack.c.bf16 %v1442_v32, %v1442_v32  ;;  %v1612_v61 = vpack.c.bf16 %v1572_v43, %v1572_v43 }
 0x2bf   :  { %v1223_v40 = vpack.c.bf16 %v1184_v46, %v1184_v46  ;;  %v1353_v0 = vpack.c.bf16 %v1314_v12, %v1314_v12 }
 0x2c0   :  { %v2094_v12 = vunpack.c.l.b16 %v1482_v29  ;;  %v2150_v20 = vunpack.c.l.b16 %v1612_v61 }
 0x2c1   :  { %v1983_v23 = vunpack.c.l.b16 %v1223_v40  ;;  %v2039_v63 = vunpack.c.l.b16 %v1353_v0 }
 0x2c3   :  { %v2054_v51 = vpack.c.b16 %v2039_v63, %v2038_v59  ;;  %v1998_v10 = vpack.c.b16 %v1983_v23, %v1982_v54 }
 0x2c5   :  { %v1444_v13 = vpop.f32.mrf.mxu2  ;;  %v1574_v18 = vpop.f32.mrf.mxu3  ;;  %2062 = vrot.lane.b32.xlu2 %v2054_v51, %s10802_s4  ;;  %2006 = vrot.lane.b32.xlu1 %v1998_v10, %s10803_s26 }
 0x2c6   :  { %v1483_v40 = vpack.c.bf16 %v1444_v13, %v1444_v13  ;;  %v1613_v0 = vpack.c.bf16 %v1574_v18, %v1574_v18  ;;  %v1187_v30 = vpop.f32.mrf.mxu0  ;;  %v1317_v32 = vpop.f32.mrf.mxu1 }
 0x2c7   :  { %v1354_v43 = vpack.c.bf16 %v1317_v32, %v1317_v32  ;;  %v1224_v61 = vpack.c.bf16 %v1187_v30, %v1187_v30 }
 0x2c8   :  { %v2095_v63 = vunpack.c.l.b16 %v1483_v40  ;;  %v2151_v23 = vunpack.c.l.b16 %v1613_v0  ;;  %1706 = vmatmul.bf16.gmra.mxu0 %v9744_v8 }
 0x2c9   :  { %v2040_v54 = vunpack.c.l.b16 %v1354_v43  ;;  %v1984_v18 = vunpack.c.l.b16 %v1224_v61 }
 0x2ca   :  { %v2166_v59 = vpack.c.b16 %v2151_v23, %v2150_v20  ;;  %v2110_v49 = vpack.c.b16 %v2095_v63, %v2094_v12  ;;  %v9740_v12 = vld [vmem:[#allocation3 + $0x1e8] sm:$0xff] }
 0x2cb   :  { %1596 = vmatmul.bf16.gmra.mxu3 %v9740_v12 }
 0x2cc   :  { %2174 = vrot.lane.b32.xlu0 %v2166_v59, %s10804_s12 }
 0x2cd   :  { %v1447_v51 = vpop.f32.mrf.mxu2  ;;  %2118 = vrot.lane.b32.xlu2 %v2110_v49, %s10805_s28  ;;  %v1577_v29 = vpop.f32.mrf.mxu3 }
 0x2ce   :  { %v1189_v10 = vpop.f32.mrf.mxu0  ;;  %v1319_v46 = vpop.f32.mrf.mxu1  ;;  %v1484_v40 = vpack.c.bf16 %v1447_v51, %v1447_v51  ;;  %v1614_v0 = vpack.c.bf16 %v1577_v29, %v1577_v29 }
 0x2cf   :  { %v1225_v13 = vpack.c.bf16 %v1189_v10, %v1189_v10  ;;  %v1355_v6 = vpack.c.bf16 %v1319_v46, %v1319_v46 }
 0x2d0   :  { %v2096_v49 = vunpack.c.l.b16 %v1484_v40  ;;  %v2152_v43 = vunpack.c.l.b16 %v1614_v0 }
 0x2d1   :  { %v1985_v8 = vunpack.c.l.b16 %v1225_v13  ;;  %v2041_v20 = vunpack.c.l.b16 %v1355_v6  ;;  %v9724_v13 = vld [vmem:[#allocation3 + $0x168] sm:$0xff] }
 0x2d2   :  { %1336 = vmatmul.bf16.gmra.mxu1 %v9724_v13 }
 0x2d3   :  { %v2055_v32 = vpack.c.b16 %v2041_v20, %v2040_v54  ;;  %v1999_v63 = vpack.c.b16 %v1985_v8, %v1984_v18 }
 0x2d5   :  { %v1449_v23 = vpop.f32.mrf.mxu2  ;;  %v1579_v59 = vpop.f32.mrf.mxu3  ;;  %2064 = vrot.lane.b32.xlu0 %v2055_v32, %s10802_s4  ;;  %2008 = vrot.lane.b32.xlu2 %v1999_v63, %s10803_s26 }
 0x2d6   :  { %v1485_v52 = vpack.c.bf16 %v1449_v23, %v1449_v23  ;;  %v1615_v30 = vpack.c.bf16 %v1579_v59, %v1579_v59  ;;  %v1192_v61 = vpop.f32.mrf.mxu0  ;;  %v1322_v51 = vpop.f32.mrf.mxu1 }
 0x2d7   :  { %v1356_v6 = vpack.c.bf16 %v1322_v51, %v1322_v51  ;;  %v1226_v40 = vpack.c.bf16 %v1192_v61, %v1192_v61  ;;  %v9741_v61 = vld [vmem:[#allocation3 + $0x1f0] sm:$0xff] }
 0x2d8   :  { %v2097_v10 = vunpack.c.l.b16 %v1485_v52  ;;  %v2153_v46 = vunpack.c.l.b16 %v1615_v30  ;;  %1711 = vmatmul.bf16.gmra.mxu0 %v9745_v11  ;;  %v1098_v11 = vpack.c.bf16 %v11302_v17, %v11302_v17  ;;  %v9725_v17 = vld [vmem:[#allocation3 + $0x170] sm:$0xff] }
 0x2d9   :  { %v2042_v12 = vunpack.c.l.b16 %v1356_v6  ;;  %v1986_v63 = vunpack.c.l.b16 %v1226_v40  ;;  %v839_v40 = vpack.c.bf16 %v11304_v19, %v11304_v19 }
 0x2da   :  { %v2111_v29 = vpack.c.b16 %v2097_v10, %v2096_v49  ;;  %v2167_v54 = vpack.c.b16 %v2153_v46, %v2152_v43  ;;  %v1099_v49 = vpack.c.bf16 %v11314_v27, %v11314_v27  ;;  %v9746_v10 = vld [vmem:[#allocation3 + $0x218] sm:$0xff]  ;;  %v838_v27 = vpack.c.bf16 %v11296_v9, %v11296_v9 }
 0x2db   :  { %1601 = vmatmul.bf16.gmra.mxu3 %v9741_v61 }
 0x2dc   :  { %2120 = vrot.lane.b32.xlu1 %v2111_v29, %s10805_s28  ;;  %v1933_v6 = vunpack.c.l.b16 %v1099_v49  ;;  %v9747_v49 = vld [vmem:[#allocation3 + $0x220] sm:$0xff] }
 0x2dd   :  { %v1452_v18 = vpop.f32.mrf.mxu2  ;;  %2176 = vrot.lane.b32.xlu2 %v2167_v54, %s10804_s12  ;;  %v1932_v54 = vunpack.c.l.b16 %v1098_v11 }
 0x2de   :  { %v1194_v8 = vpop.f32.mrf.mxu0  ;;  %v1324_v20 = vpop.f32.mrf.mxu1  ;;  %v1486_v52 = vpack.c.bf16 %v1452_v18, %v1452_v18 }
 0x2df   :  { %v1227_v0 = vpack.c.bf16 %v1194_v8, %v1194_v8  ;;  %v1357_v32 = vpack.c.bf16 %v1324_v20, %v1324_v20  ;;  %v9733_v20 = vld [vmem:[#allocation3 + $0x1b0] sm:$0xff] }
 0x2e0   :  { %v2098_v46 = vunpack.c.l.b16 %v1486_v52  ;;  %1471 = vmatmul.bf16.gmra.mxu2 %v9733_v20 }
 0x2e1   :  { %v1987_v23 = vunpack.c.l.b16 %v1227_v0  ;;  %v2043_v59 = vunpack.c.l.b16 %v1357_v32  ;;  %v1820_v32 = vunpack.c.l.b16 %v838_v27 }
 0x2e2   :  { %1341 = vmatmul.bf16.gmra.mxu1 %v9725_v17  ;;  %v9734_v17 = vld [vmem:[#allocation3 + $0x1b8] sm:$0xff] }
 0x2e3   :  { %v2056_v30 = vpack.c.b16 %v2043_v59, %v2042_v12  ;;  %v2000_v43 = vpack.c.b16 %v1987_v23, %v1986_v63  ;;  %v1945_v12 = vpack.c.b16 %v1933_v6, %v1932_v54  ;;  %v1821_v63 = vunpack.c.l.b16 %v839_v40 }
 0x2e4   :  { %v841_v54 = vpack.c.bf16 %v11322_v36, %v11322_v36 }
 0x2e5   :  { %v1454_v51 = vpop.f32.mrf.mxu2  ;;  %2066 = vrot.lane.b32.xlu2 %v2056_v30, %s10802_s4  ;;  %2010 = vrot.lane.b32.xlu1 %v2000_v43, %s10803_s26  ;;  %v1833_v11 = vpack.c.b16 %v1821_v63, %v1820_v32  ;;  %v9749_v32 = vld [vmem:[#allocation3 + $0x230] sm:$0xff] }
 0x2e6   :  { %v1487_v13 = vpack.c.bf16 %v1454_v51, %v1454_v51  ;;  %v1197_v29 = vpop.f32.mrf.mxu0  ;;  %v1823_v40 = vunpack.c.l.b16 %v841_v54 }
 0x2e7   :  { %v1228_v9 = vpack.c.bf16 %v1197_v29, %v1197_v29 }
 0x2e8   :  { %v2099_v18 = vunpack.c.l.b16 %v1487_v13  ;;  %1716 = vmatmul.bf16.gmra.mxu0 %v9746_v10  ;;  %v840_v13 = vpack.c.bf16 %v11316_v31, %v11316_v31  ;;  %v9748_v31 = vld [vmem:[#allocation3 + $0x228] sm:$0xff] }
 0x2e9   :  { %v1988_v10 = vunpack.c.l.b16 %v1228_v9  ;;  %v1582_v9 = vpop.f32.mrf.mxu3 }
 0x2ea   :  { %v2112_v8 = vpack.c.b16 %v2099_v18, %v2098_v46  ;;  %v9726_v18 = vld [vmem:[#allocation3 + $0x178] sm:$0xff]  ;;  %v1822_v27 = vunpack.c.l.b16 %v840_v13  ;;  %v1616_v13 = vpack.c.bf16 %v1582_v9, %v1582_v9 }
 0x2ec   :  { %2122 = vrot.lane.b32.xlu0 %v2112_v8, %s10805_s28  ;;  %v1834_v20 = vpack.c.b16 %v1823_v40, %v1822_v27  ;;  %v2154_v27 = vunpack.c.l.b16 %v1616_v13 }
 0x2ed   :  { %v1457_v0 = vpop.f32.mrf.mxu2  ;;  %1956 = vrot.lane.b32.xlu2 %v1945_v12, %s10801_s29 }
 0x2ee   :  { %v1199_v52 = vpop.f32.mrf.mxu0  ;;  %v1488_v23 = vpack.c.bf16 %v1457_v0, %v1457_v0  ;;  %v9742_v0 = vld [vmem:[#allocation3 + $0x1f8] sm:$0xff] }
 0x2ef   :  { %v1229_v59 = vpack.c.bf16 %v1199_v52, %v1199_v52  ;;  %1606 = vmatmul.bf16.gmra.mxu3 %v9742_v0 }
 0x2f0   :  { %v2100_v30 = vunpack.c.l.b16 %v1488_v23  ;;  %1476 = vmatmul.bf16.gmra.mxu2 %v9734_v17  ;;  %v9750_v23 = vld [vmem:[#allocation3 + $0x238] sm:$0xff] }
 0x2f1   :  { %v1989_v43 = vunpack.c.l.b16 %v1229_v59 }
 0x2f2   :  { %1346 = vmatmul.bf16.gmra.mxu1 %v9726_v18 }
 0x2f3   :  { %v2001_v29 = vpack.c.b16 %v1989_v43, %v1988_v10 }
 0x2f4   :  { %1844 = vrot.lane.b32.xlu0 %v1833_v11, %s10800_s15 }
 0x2f5   :  { %v1459_v19 = vpop.f32.mrf.mxu2 }
 0x2f6   :  { %v1489_v61 = vpack.c.bf16 %v1459_v19, %v1459_v19  ;;  %v11409_v51 = vpop.f32.mrf.mxu0 }
 0x2f8   :  { %v2101_v46 = vunpack.c.l.b16 %v1489_v61  ;;  %1721 = vmatmul.bf16.gmra.mxu0 %v9747_v49 }
 0x2fa   :  { %v2113_v6 = vpack.c.b16 %v2101_v46, %v2100_v30  ;;  %v1584_v30 = vpop.f32.mrf.mxu3 }
 0x2fb   :  { %v1617_v54 = vpack.c.bf16 %v1584_v30, %v1584_v30 }
 0x2fc   :  { %2124 = vrot.lane.b32.xlu2 %v2113_v6, %s10805_s28  ;;  %2012 = vrot.lane.b32.xlu0 %v2001_v29, %s10803_s26  ;;  %v1327_v29 = vpop.f32.mrf.mxu1 }
 0x2fd   :  { %v2155_v40 = vunpack.c.l.b16 %v1617_v54  ;;  %v1462_v38 = vpop.f32.mrf.mxu2 }
 0x2fe   :  { %v11417_v8 = vpop.f32.mrf.mxu0 }
 0x2ff   :  { %v2168_v0 = vpack.c.b16 %v2155_v40, %v2154_v27 }
 0x302   :  { %v1587_v17 = vpop.f32.mrf.mxu3 }
 0x303   :  { %v1618_v54 = vpack.c.bf16 %v1587_v17, %v1587_v17  ;;  %v971_v17 = vpack.c.bf16 %v11330_v41, %v11330_v41 }
 0x304   :  { %1846 = vrot.lane.b32.xlu2 %v1834_v20, %s10800_s15  ;;  %v968_v20 = vpack.c.bf16 %v11300_v16, %v11300_v16 }
 0x305   :  { %v2156_v40 = vunpack.c.l.b16 %v1618_v54  ;;  %v1490_v54 = vpack.c.bf16 %v1462_v38, %v1462_v38 }
 0x306   :  { %v11420_v12 = vpop.f32.mrf.mxu0 }
 0x308   :  { %1726 = vmatmul.bf16.gmra.mxu0 %v9748_v31  ;;  %v969_v31 = vpack.c.bf16 %v11312_v26, %v11312_v26 }
 0x30a   :  { %v1877_v9 = vunpack.c.l.b16 %v969_v31 }
 0x30e   :  { %v11422_v36 = vpop.f32.mrf.mxu0 }
 0x316   :  { %v11424_v63 = vpop.f32.mrf.mxu0 }
 0x318   :  { %1731 = vmatmul.bf16.gmra.mxu0 %v9749_v32 }
 0x31e   :  { %v11426_v52 = vpop.f32.mrf.mxu0 }
 0x326   :  { %v11428_v59 = vpop.f32.mrf.mxu0 }
 0x328   :  { %1736 = vmatmul.bf16.gmra.mxu0 %v9750_v23  ;;  %v1876_v23 = vunpack.c.l.b16 %v968_v20 }
 0x32a   :  { %v1889_v13 = vpack.c.b16 %v1877_v9, %v1876_v23 }
 0x32e   :  { %v11430_v11 = vpop.f32.mrf.mxu0 }
 0x336   :  { %v1702_v19 = vpop.f32.mrf.mxu0 }
 0x337   :  { %v1742_v49 = vpack.c.bf16 %v1702_v19, %v1702_v19  ;;  %v1329_v19 = vpop.f32.mrf.mxu1 }
 0x339   :  { %v2206_v10 = vunpack.c.l.b16 %v1742_v49 }
 0x33e   :  { %v1704_v43 = vpop.f32.mrf.mxu0 }
 0x33f   :  { %v1743_v61 = vpack.c.bf16 %v1704_v43, %v1704_v43  ;;  %v1589_v43 = vpop.f32.mrf.mxu3 }
 0x340   :  { %v1619_v16 = vpack.c.bf16 %v1589_v43, %v1589_v43 }
 0x341   :  { %v2207_v46 = vunpack.c.l.b16 %v1743_v61 }
 0x342   :  { %v2157_v31 = vunpack.c.l.b16 %v1619_v16 }
 0x343   :  { %v2222_v6 = vpack.c.b16 %v2207_v46, %v2206_v10  ;;  %v1358_v46 = vpack.c.bf16 %v1327_v29, %v1327_v29  ;;  %v1100_v29 = vpack.c.bf16 %v11320_v34, %v11320_v34 }
 0x345   :  { %2230 = vrot.lane.b32.xlu1 %v2222_v6, %s10772_s11  ;;  %v1359_v6 = vpack.c.bf16 %v1329_v19, %v1329_v19  ;;  %v2044_v27 = vunpack.c.l.b16 %v1358_v46 }
 0x346   :  { %v1707_v18 = vpop.f32.mrf.mxu0 }
 0x347   :  { %v1744_v32 = vpack.c.bf16 %v1707_v18, %v1707_v18  ;;  %v1332_v18 = vpop.f32.mrf.mxu1  ;;  %v2045_v20 = vunpack.c.l.b16 %v1359_v6  ;;  %v1592_v19 = vpop.f32.mrf.mxu3 }
 0x348   :  { %v1360_v16 = vpack.c.bf16 %v1332_v18, %v1332_v18 }
 0x349   :  { %v2208_v61 = vunpack.c.l.b16 %v1744_v32  ;;  %v1101_v32 = vpack.c.bf16 %v11332_v42, %v11332_v42  ;;  %v2057_v23 = vpack.c.b16 %v2045_v20, %v2044_v27  ;;  %v1231_v20 = vpack.c.bf16 %v11417_v8, %v11417_v8 }
 0x34b   :  { %v1935_v43 = vunpack.c.l.b16 %v1101_v32 }
 0x34d   :  { %2178 = vrot.lane.b32.xlu1 %v2168_v0, %s10804_s12  ;;  %v970_v0 = vpack.c.bf16 %v11318_v33, %v11318_v33  ;;  %v1879_v33 = vunpack.c.l.b16 %v971_v17  ;;  %v2046_v17 = vunpack.c.l.b16 %v1360_v16 }
 0x34e   :  { %v1709_v49 = vpop.f32.mrf.mxu0 }
 0x34f   :  { %v1745_v30 = vpack.c.bf16 %v1709_v49, %v1709_v49  ;;  %v1878_v49 = vunpack.c.l.b16 %v970_v0  ;;  %v1334_v46 = vpop.f32.mrf.mxu1 }
 0x350   :  { %v1361_v27 = vpack.c.bf16 %v1334_v46, %v1334_v46 }
 0x351   :  { %v2209_v10 = vunpack.c.l.b16 %v1745_v30  ;;  %v1934_v30 = vunpack.c.l.b16 %v1100_v29  ;;  %v1890_v6 = vpack.c.b16 %v1879_v33, %v1878_v49  ;;  %v2102_v29 = vunpack.c.l.b16 %v1490_v54 }
 0x352   :  { %v2047_v32 = vunpack.c.l.b16 %v1361_v27  ;;  %v1620_v49 = vpack.c.bf16 %v1592_v19, %v1592_v19  ;;  %v1102_v33 = vpack.c.bf16 %v11338_v48, %v11338_v48  ;;  %v842_v27 = vpack.c.bf16 %v11334_v45, %v11334_v45 }
 0x353   :  { %v2223_v53 = vpack.c.b16 %v2209_v10, %v2208_v61  ;;  %v1464_v61 = vpop.f32.mrf.mxu2  ;;  %v1946_v42 = vpack.c.b16 %v1935_v43, %v1934_v30 }
 0x354   :  { %v1936_v54 = vunpack.c.l.b16 %v1102_v33 }
 0x355   :  { %1900 = vrot.lane.b32.xlu1 %v1889_v13, %s10783_s13  ;;  %2232 = vrot.lane.b32.xlu0 %v2223_v53, %s10772_s11  ;;  %v2169_v53 = vpack.c.b16 %v2157_v31, %v2156_v40  ;;  %v1230_v31 = vpack.c.bf16 %v11409_v51, %v11409_v51  ;;  %v1103_v51 = vpack.c.bf16 %v11350_v62, %v11350_v62 }
 0x356   :  { %v1712_v26 = vpop.f32.mrf.mxu0 }
 0x357   :  { %v1746_v9 = vpack.c.bf16 %v1712_v26, %v1712_v26  ;;  %v1491_v26 = vpack.c.bf16 %v1464_v61, %v1464_v61  ;;  %v1990_v8 = vunpack.c.l.b16 %v1230_v31  ;;  %v2058_v61 = vpack.c.b16 %v2047_v32, %v2046_v17  ;;  %v1337_v46 = vpop.f32.mrf.mxu1 }
 0x358   :  { %v973_v32 = vpack.c.bf16 %v11348_v60, %v11348_v60  ;;  %v2398_v60 = vld [vmem:[#allocation5 + $0x20] sm:$0xf] }
 0x359   :  { %v2210_v41 = vunpack.c.l.b16 %v1746_v9  ;;  %v2103_v18 = vunpack.c.l.b16 %v1491_v26  ;;  %v11457_v9 = vpop.permute.xlu2 %1840 }
 0x35a   :  { %v1881_v33 = vunpack.c.l.b16 %v973_v32 }
 0x35b   :  { %v1467_v38 = vpop.f32.mrf.mxu2  ;;  %v2114_v43 = vpack.c.b16 %v2103_v18, %v2102_v29  ;;  %v972_v18 = vpack.c.bf16 %v11336_v47, %v11336_v47 }
 0x35c   :  { %v1492_v31 = vpack.c.bf16 %v1467_v38, %v1467_v38 }
 0x35d   :  { %2068 = vrot.lane.b32.xlu1 %v2057_v23, %s10802_s4  ;;  %2180 = vrot.lane.b32.xlu0 %v2169_v53, %s10804_s12  ;;  %v1594_v23 = vpop.f32.mrf.mxu3  ;;  %v1991_v53 = vunpack.c.l.b16 %v1231_v20 }
 0x35e   :  { %v1714_v34 = vpop.f32.mrf.mxu0  ;;  %v1621_v30 = vpack.c.bf16 %v1594_v23, %v1594_v23  ;;  %v2104_v38 = vunpack.c.l.b16 %v1492_v31 }
 0x35f   :  { %v1747_v10 = vpack.c.bf16 %v1714_v34, %v1714_v34  ;;  %v2002_v34 = vpack.c.b16 %v1991_v53, %v1990_v8 }
 0x360   :  { %v2159_v19 = vunpack.c.l.b16 %v1621_v30  ;;  %v1880_v30 = vunpack.c.l.b16 %v972_v18 }
 0x361   :  { %v2211_v13 = vunpack.c.l.b16 %v1747_v10  ;;  %v11466_v16 = vpop.permute.xlu2 %1898 }
 0x363   :  { %v2224_v40 = vpack.c.b16 %v2211_v13, %v2210_v41  ;;  %v2158_v41 = vunpack.c.l.b16 %v1620_v49  ;;  %v1339_v49 = vpop.f32.mrf.mxu1 }
 0x365   :  { %1958 = vrot.lane.b32.xlu1 %v1946_v42, %s10801_s29  ;;  %1902 = vrot.lane.b32.xlu0 %v1890_v6, %s10783_s13  ;;  %v1937_v42 = vunpack.c.l.b16 %v1103_v51  ;;  %v1469_v6 = vpop.f32.mrf.mxu2  ;;  %v2170_v20 = vpack.c.b16 %v2159_v19, %v2158_v41  ;;  %v1597_v23 = vpop.f32.mrf.mxu3 }
 0x366   :  { %2234 = vrot.lane.b32.xlu2 %v2224_v40, %s10772_s11  ;;  %v1717_v0 = vpop.f32.mrf.mxu0  ;;  %v843_v40 = vpack.c.bf16 %v11340_v50, %v11340_v50  ;;  %v1824_v50 = vunpack.c.l.b16 %v842_v27  ;;  %v11479_v51 = vpop.permute.xlu0 %1838 }
 0x367   :  { %v1748_v10 = vpack.c.bf16 %v1717_v0, %v1717_v0  ;;  %v1493_v0 = vpack.c.bf16 %v1469_v6, %v1469_v6  ;;  %v1947_v29 = vpack.c.b16 %v1937_v42, %v1936_v54  ;;  %v1232_v42 = vpack.c.bf16 %v11420_v12, %v11420_v12 }
 0x368   :  { %v1825_v53 = vunpack.c.l.b16 %v843_v40  ;;  %v844_v12 = vpack.c.bf16 %v11352_v2, %v11352_v2  ;;  %v11505_v2 = vpop.permute.xlu1 %1950 }
 0x369   :  { %v2212_v62 = vunpack.c.l.b16 %v1748_v10  ;;  %v2105_v8 = vunpack.c.l.b16 %v1493_v0  ;;  %v11481_v47 = vpop.permute.xlu2 %2062  ;;  %v1233_v10 = vpack.c.bf16 %v11422_v36, %v11422_v36 }
 0x36a   :  { %v1835_v19 = vpack.c.b16 %v1825_v53, %v1824_v50 }
 0x36b   :  { %v2115_v41 = vpack.c.b16 %v2105_v8, %v2104_v38  ;;  %v1993_v27 = vunpack.c.l.b16 %v1233_v10  ;;  %v1104_v8 = vpack.c.bf16 %v11356_v5, %v11356_v5 }
 0x36d   :  { %2126 = vrot.lane.b32.xlu1 %v2114_v43, %s10805_s28  ;;  %2070 = vrot.lane.b32.xlu0 %v2058_v61, %s10802_s4  ;;  %v1362_v43 = vpack.c.bf16 %v1337_v46, %v1337_v46  ;;  %v1363_v61 = vpack.c.bf16 %v1339_v49, %v1339_v49  ;;  %v1105_v49 = vpack.c.bf16 %v11368_v15, %v11368_v15 }
 0x36e   :  { %2014 = vrot.lane.b32.xlu2 %v2002_v34, %s10803_s26  ;;  %v1719_v13 = vpop.f32.mrf.mxu0  ;;  %v2420_v34 = vunpack.c.l.b16 %v2398_v60  ;;  %v11495_v18 = vpop.permute.xlu0 %1894  ;;  %v1826_v60 = vunpack.c.l.b16 %v844_v12  ;;  %v974_v15 = vpack.c.bf16 %v11354_v4, %v11354_v4 }
 0x36f   :  { %v1749_v48 = vpack.c.bf16 %v1719_v13, %v1719_v13  ;;  %v1891_v13 = vpack.c.b16 %v1881_v33, %v1880_v30  ;;  %v2048_v6 = vunpack.c.l.b16 %v1362_v43  ;;  %v2049_v46 = vunpack.c.l.b16 %v1363_v61  ;;  %v11503_v30 = vpop.f32.mrf.mxu1 }
 0x370   :  { %v2425_v54 = vpack.c.b16 %v2420_v34, %v2420_v34  ;;  %v1938_v34 = vunpack.c.l.b16 %v1104_v8  ;;  %v1939_v10 = vunpack.c.l.b16 %v1105_v49 }
 0x371   :  { %v2213_v26 = vunpack.c.l.b16 %v1749_v48  ;;  %v11497_v32 = vpop.permute.xlu2 %2118 }
 0x372   :  { %v2449_v36 = vsel %vm2447_vm0, %v2425_v54, 0 }
 0x373   :  { %v2225_v17 = vpack.c.b16 %v2213_v26, %v2212_v62  ;;  %v1599_v62 = vpop.f32.mrf.mxu3  ;;  %2454 = vmatpush.bf16.msra.mxu1 %v2449_v36  ;;  %v11520_v36 = vpop.permute.xlu1 %1952 }
 0x374   :  { %v1623_v50 = vpack.c.bf16 %v1599_v62, %v1599_v62  ;;  %v1882_v62 = vunpack.c.l.b16 %v974_v15 }
 0x375   :  { %1960 = vrot.lane.b32.xlu0 %v1947_v29, %s10801_s29  ;;  %2236 = vrot.lane.b32.xlu1 %v2225_v17, %s10772_s11  ;;  %v845_v29 = vpack.c.bf16 %v11358_v7, %v11358_v7  ;;  %v2059_v17 = vpack.c.b16 %v2049_v46, %v2048_v6  ;;  %v1472_v7 = vpop.f32.mrf.mxu2  ;;  %v1234_v6 = vpack.c.bf16 %v11424_v63, %v11424_v63 }
 0x376   :  { %2182 = vrot.lane.b32.xlu2 %v2170_v20, %s10804_s12  ;;  %v1722_v45 = vpop.f32.mrf.mxu0  ;;  %v1992_v20 = vunpack.c.l.b16 %v1232_v42  ;;  %v2161_v5 = vunpack.c.l.b16 %v1623_v50  ;;  %v11516_v54 = vpop.permute.xlu0 %1896  ;;  %v1948_v46 = vpack.c.b16 %v1939_v10, %v1938_v34  ;;  %v9752_v50 = vld [vmem:[#allocation5 + $0x8] sm:$0xff]  ;;  %v9751_v34 = vld [vmem:[#allocation5] sm:$0xff] }
 0x377   :  { %v1750_v48 = vpack.c.bf16 %v1722_v45, %v1722_v45  ;;  %v1622_v45 = vpack.c.bf16 %v1597_v23, %v1597_v23  ;;  %v1827_v43 = vunpack.c.l.b16 %v845_v29 }
 0x378   :  { %v2003_v53 = vpack.c.b16 %v1993_v27, %v1992_v20 }
 0x379   :  { %v2214_v31 = vunpack.c.l.b16 %v1750_v48  ;;  %v2160_v61 = vunpack.c.l.b16 %v1622_v45  ;;  %v1836_v48 = vpack.c.b16 %v1827_v43, %v1826_v60  ;;  %v11522_v4 = vpop.permute.xlu2 %2008 }
 0x37b   :  { %v1602_v33 = vpop.f32.mrf.mxu3  ;;  %v2171_v42 = vpack.c.b16 %v2161_v5, %v2160_v61 }
 0x37c   :  { %v1624_v60 = vpack.c.bf16 %v1602_v33, %v1602_v33 }
 0x37d   :  { %2128 = vrot.lane.b32.xlu0 %v2115_v41, %s10805_s28  ;;  %1848 = vrot.lane.b32.xlu1 %v1835_v19, %s10800_s15  ;;  %v975_v41 = vpack.c.bf16 %v11366_v14, %v11366_v14  ;;  %v9754_v19 = vld [vmem:[#allocation5 + $0x18] sm:$0xff]  ;;  %v1474_v63 = vpop.f32.mrf.mxu2 }
 0x37e   :  { %1904 = vrot.lane.b32.xlu2 %v1891_v13, %s10783_s13  ;;  %v1724_v26 = vpop.f32.mrf.mxu0  ;;  %v1235_v13 = vpack.c.bf16 %v11426_v52, %v11426_v52  ;;  %2455 = vmatpush.bf16.msra.mxu1 %v9754_v19  ;;  %v9753_v52 = vld [vmem:[#allocation5 + $0x10] sm:$0xff]  ;;  %v1495_v49 = vpack.c.bf16 %v1474_v63, %v1474_v63 }
 0x37f   :  { %v1751_v40 = vpack.c.bf16 %v1724_v26, %v1724_v26  ;;  %v1883_v26 = vunpack.c.l.b16 %v975_v41  ;;  %v11534_v41 = vpop.permute.xlu1 %1842 }
 0x380   :  { %v1995_v27 = vunpack.c.l.b16 %v1235_v13  ;;  %v2107_v15 = vunpack.c.l.b16 %v1495_v49  ;;  %v2162_v13 = vunpack.c.l.b16 %v1624_v60 }
 0x381   :  { %v2215_v0 = vunpack.c.l.b16 %v1751_v40  ;;  %v1344_v40 = vpop.f32.mrf.mxu1  ;;  %v1892_v45 = vpack.c.b16 %v1883_v26, %v1882_v62  ;;  %v977_v62 = vpack.c.bf16 %v11384_v1, %v11384_v1 }
 0x382   :  { %2456 = vmatpush.bf16.msra.mxu1 %v9753_v52  ;;  %v1365_v43 = vpack.c.bf16 %v1344_v40, %v1344_v40  ;;  %v847_v40 = vpack.c.bf16 %v11376_v44, %v11376_v44  ;;  %v1106_v44 = vpack.c.bf16 %v11374_v37, %v11374_v37  ;;  %v1236_v37 = vpack.c.bf16 %v11428_v59, %v11428_v59 }
 0x383   :  { %v2226_v38 = vpack.c.b16 %v2215_v0, %v2214_v31  ;;  %v1994_v0 = vunpack.c.l.b16 %v1234_v6  ;;  %v1604_v12 = vpop.f32.mrf.mxu3 }
 0x384   :  { %v1625_v61 = vpack.c.bf16 %v1604_v12, %v1604_v12  ;;  %v2051_v33 = vunpack.c.l.b16 %v1365_v43 }
 0x385   :  { %2016 = vrot.lane.b32.xlu1 %v2003_v53, %s10803_s26  ;;  %2238 = vrot.lane.b32.xlu0 %v2226_v38, %s10772_s11  ;;  %v1364_v53 = vpack.c.bf16 %v11503_v30, %v11503_v30  ;;  %v1494_v38 = vpack.c.bf16 %v1472_v7, %v1472_v7  ;;  %v2004_v8 = vpack.c.b16 %v1995_v27, %v1994_v0  ;;  %v1885_v0 = vunpack.c.l.b16 %v977_v62 }
 0x386   :  { %2072 = vrot.lane.b32.xlu2 %v2059_v17, %s10802_s4  ;;  %v1727_v23 = vpop.f32.mrf.mxu0  ;;  %2457 = vmatpush.bf16.msra.mxu1 %v9752_v50  ;;  %v846_v27 = vpack.c.bf16 %v11370_v28, %v11370_v28  ;;  %v1996_v62 = vunpack.c.l.b16 %v1236_v37  ;;  %v12657_v37 = vpack.c.b16 %v11282_v25, %v11280_v24 }
 0x387   :  { %v1752_v14 = vpack.c.bf16 %v1727_v23, %v1727_v23  ;;  %v11529_v23 = vpop.permute.xlu0 %1954  ;;  %v2106_v10 = vunpack.c.l.b16 %v1494_v38  ;;  %v2050_v19 = vunpack.c.l.b16 %v1364_v53  ;;  %v2007_v12 = vpop.permute.xlu1 %2006  ;;  %v1107_v38 = vpack.c.bf16 %v11386_v3, %v11386_v3 }
 0x389   :  { %v2216_v29 = vunpack.c.l.b16 %v1752_v14  ;;  %v1347_v7 = vpop.f32.mrf.mxu1  ;;  %v2116_v6 = vpack.c.b16 %v2107_v15, %v2106_v10  ;;  %v2060_v14 = vpack.c.b16 %v2051_v33, %v2050_v19  ;;  %v1940_v15 = vunpack.c.l.b16 %v1106_v44 }
 0x38a   :  { %2458 = vmatpush.bf16.msra.mxu1 %v9751_v34  ;;  %v1366_v60 = vpack.c.bf16 %v1347_v7, %v1347_v7  ;;  %v1237_v34 = vpack.c.bf16 %v11430_v11, %v11430_v11 }
 0x38c   :  { %v2052_v19 = vunpack.c.l.b16 %v1366_v60  ;;  %v1997_v11 = vunpack.c.l.b16 %v1237_v34 }
 0x38d   :  { %2184 = vrot.lane.b32.xlu1 %v2171_v42, %s10804_s12  ;;  %1850 = vrot.lane.b32.xlu0 %v1836_v48, %s10800_s15  ;;  %v2163_v42 = vunpack.c.l.b16 %v1625_v61  ;;  %v11536_v48 = vpop.permute.xlu2 %2176 }
 0x38e   :  { %1962 = vrot.lane.b32.xlu2 %v1948_v46, %s10801_s29  ;;  %v1729_v20 = vpop.f32.mrf.mxu0  ;;  %v976_v46 = vpack.c.bf16 %v11372_v35, %v11372_v35  ;;  %v1477_v35 = vpop.f32.mrf.mxu2 }
 0x38f   :  { %v1753_v31 = vpack.c.bf16 %v1729_v20, %v1729_v20  ;;  %v11542_v26 = vpop.permute.xlu0 %2174  ;;  %v2172_v52 = vpack.c.b16 %v2163_v42, %v2162_v13  ;;  %v11566_v7 = vpop.permute.xlu1 %2120 }
 0x390   :  { %v1884_v63 = vunpack.c.l.b16 %v976_v46 }
 0x391   :  { %v2217_v17 = vunpack.c.l.b16 %v1753_v31  ;;  %v1607_v31 = vpop.f32.mrf.mxu3  ;;  %v1349_v28 = vpop.f32.mrf.mxu1 }
 0x392   :  { %v1367_v43 = vpack.c.bf16 %v1349_v28, %v1349_v28  ;;  %v1893_v61 = vpack.c.b16 %v1885_v0, %v1884_v63 }
 0x393   :  { %v2227_v5 = vpack.c.b16 %v2217_v17, %v2216_v29  ;;  %v1828_v17 = vunpack.c.l.b16 %v846_v27 }
 0x394   :  { %v2053_v13 = vunpack.c.l.b16 %v1367_v43 }
 0x395   :  { %1906 = vrot.lane.b32.xlu1 %v1892_v45, %s10783_s13  ;;  %2018 = vrot.lane.b32.xlu0 %v2004_v8, %s10803_s26  ;;  %v1829_v45 = vunpack.c.l.b16 %v847_v40  ;;  %v11555_v8 = vpop.permute.xlu2 %2066  ;;  %v1496_v40 = vpack.c.bf16 %v1477_v35, %v1477_v35 }
 0x396   :  { %2240 = vrot.lane.b32.xlu2 %v2227_v5, %s10772_s11  ;;  %v1732_v30 = vpop.f32.mrf.mxu0  ;;  %v1479_v42 = vpop.f32.mrf.mxu2 }
 0x397   :  { %v1754_v20 = vpack.c.bf16 %v1732_v30, %v1732_v30  ;;  %v11557_v49 = vpop.permute.xlu0 %2064  ;;  %v1837_v10 = vpack.c.b16 %v1829_v45, %v1828_v17  ;;  %v1941_v30 = vunpack.c.l.b16 %v1107_v38  ;;  %v2108_v35 = vunpack.c.l.b16 %v1496_v40 }
 0x399   :  { %v2218_v50 = vunpack.c.l.b16 %v1754_v20  ;;  %v1609_v33 = vpop.f32.mrf.mxu3  ;;  %v1497_v20 = vpack.c.bf16 %v1479_v42, %v1479_v42  ;;  %v1949_v63 = vpack.c.b16 %v1941_v30, %v1940_v15 }
 0x39b   :  { %v2109_v45 = vunpack.c.l.b16 %v1497_v20 }
 0x39d   :  { %2074 = vrot.lane.b32.xlu1 %v2060_v14, %s10802_s4  ;;  %2186 = vrot.lane.b32.xlu0 %v2172_v52, %s10804_s12  ;;  %v1626_v14 = vpack.c.bf16 %v1607_v31, %v1607_v31  ;;  %v1627_v52 = vpack.c.bf16 %v1609_v33, %v1609_v33  ;;  %v11577_v0 = vpop.permute.xlu2 %1956  ;;  %v2011_v31 = vpop.permute.xlu1 %2010 }
 0x39e   :  { %2130 = vrot.lane.b32.xlu2 %v2116_v6, %s10805_s28  ;;  %v1734_v1 = vpop.f32.mrf.mxu0  ;;  %v12656_v6 = vpack.c.b16 %v11273_v57, %v11271_v56 }
 0x39f   :  { %v1755_v29 = vpack.c.bf16 %v1734_v1, %v1734_v1  ;;  %v11575_v27 = vpop.permute.xlu0 %2122  ;;  %v2061_v1 = vpack.c.b16 %v2053_v13, %v2052_v19 }
 0x3a0   :  { %v2249_v46 = vsel %vm2246_vm2, %v12656_v6, %v11479_v51  ;;  %v2164_v51 = vunpack.c.l.b16 %v1626_v14 }
 0x3a1   :  { %v2219_v53 = vunpack.c.l.b16 %v1755_v29  ;;  %v2273_v59 = vsel %vm2271_vm1, %v2249_v46, %v11495_v18  ;;  %v2005_v29 = vpack.c.b16 %v1997_v11, %v1996_v62  ;;  %v2165_v18 = vunpack.c.l.b16 %v1627_v52 }
 0x3a2   :  { %v2290_v56 = vsel %vm2288_vm3, %v2273_v59, %v11505_v2  ;;  %v2117_v2 = vpack.c.b16 %v2109_v45, %v2108_v35 }
 0x3a3   :  { %v2228_v5 = vpack.c.b16 %v2219_v53, %v2218_v50  ;;  %v2307_v50 = vsel %vm2305_vm4, %v2290_v56, %v2007_v12  ;;  %v2173_v38 = vpack.c.b16 %v2165_v18, %v2164_v51  ;;  %v12660_v18 = vld [vmem:[#allocation73_spill] sm:$0xff] }
 0x3a4   :  { %v2324_v60 = vsel %vm2322_vm5, %v2307_v50, %v11481_v47 }
 0x3a5   :  { %1908 = vrot.lane.b32.xlu0 %v1893_v61, %s10783_s13  ;;  %2242 = vrot.lane.b32.xlu1 %v2228_v5, %s10772_s11  ;;  %v2125_v61 = vpop.permute.xlu2 %2124  ;;  %v2341_v12 = vsel %vm2339_vm6, %v2324_v60, %v11497_v32 }
 0x3a6   :  { %1852 = vrot.lane.b32.xlu2 %v1837_v10, %s10800_s15  ;;  %v1737_v3 = vpop.f32.mrf.mxu0  ;;  %v2358_v47 = vsel %vm2356_vm7, %v2341_v12, %v11542_v26 }
 0x3a7   :  { %v1756_v17 = vpack.c.bf16 %v1737_v3, %v1737_v3  ;;  %v1845_v5 = vpop.permute.xlu0 %1844  ;;  %v2252_v3 = vsel %vm2246_vm2, %v12657_v37, %v11457_v9 }
 0x3a8   :  { %v2275_v32 = vsel %vm2271_vm1, %v2252_v3, %v11516_v54 }
 0x3a9   :  { %v2220_v53 = vunpack.c.l.b16 %v1756_v17  ;;  %v2292_v26 = vsel %vm2288_vm3, %v2275_v32, %v11520_v36  ;;  %v12658_v36 = vpack.c.b16 %v11291_v58, %v11289_v55 }
 0x3aa   :  { %v2309_v13 = vsel %vm2305_vm4, %v2292_v26, %v11522_v4 }
 0x3ab   :  { %v2326_v33 = vsel %vm2322_vm5, %v2309_v13, %v11557_v49  ;;  %v2255_v4 = vsel %vm2246_vm2, %v12658_v36, %v11534_v41 }
 0x3ac   :  { %v2343_v24 = vsel %vm2339_vm6, %v2326_v33, %v11566_v7  ;;  %v2277_v49 = vsel %vm2271_vm1, %v2255_v4, %v11466_v16 }
 0x3ad   :  { %2076 = vrot.lane.b32.xlu0 %v2061_v1, %s10802_s4  ;;  %1964 = vrot.lane.b32.xlu1 %v1949_v63, %s10801_s29  ;;  %v1847_v15 = vpop.permute.xlu2 %1846  ;;  %v2360_v54 = vsel %vm2356_vm7, %v2343_v24, %v11536_v48  ;;  %v2294_v7 = vsel %vm2288_vm3, %v2277_v49, %v11529_v23  ;;  %v12659_v23 = vpack.c.b16 %v11308_v22, %v11306_v21 }
 0x3ae   :  { %2020 = vrot.lane.b32.xlu2 %v2005_v29, %s10803_s26  ;;  %v1739_v57 = vpop.f32.mrf.mxu0  ;;  %v2311_v48 = vsel %vm2305_vm4, %v2294_v7, %v2011_v31  ;;  %v12661_v31 = vpack.c.b16 %v11326_v39, %v12660_v18 }
 0x3af   :  { %v1757_v28 = vpack.c.bf16 %v1739_v57, %v1739_v57  ;;  %v2013_v30 = vpop.permute.xlu0 %2012  ;;  %v2328_v62 = vsel %vm2322_vm5, %v2311_v48, %v11555_v8  ;;  %v2258_v52 = vsel %vm2246_vm2, %v12659_v23, %v1845_v5  ;;  %v12668_v23 = vld [vmem:[#allocation79_spill] sm:$0xff] }
 0x3b0   :  { %v2345_v14 = vsel %vm2339_vm6, %v2328_v62, %v11575_v27 }
 0x3b1   :  { %v2221_v44 = vunpack.c.l.b16 %v1757_v28 }
 0x3b3   :  { %v2229_v43 = vpack.c.b16 %v2221_v44, %v2220_v53 }
 0x3b5   :  { %2132 = vrot.lane.b32.xlu1 %v2117_v2, %s10805_s28  ;;  %2244 = vrot.lane.b32.xlu0 %v2229_v43, %s10772_s11  ;;  %v12662_v2 = vld [vmem:[#allocation75_spill] sm:$0xff]  ;;  %v12663_v43 = vld [vmem:[#allocation74_spill] sm:$0xff] }
 0x3b6   :  { %2188 = vrot.lane.b32.xlu2 %v2173_v38, %s10804_s12  ;;  %v12664_v39 = vpack.c.b16 %v12662_v2, %v12663_v43 }
 0x3b7   :  { %v2231_v34 = vpop.permute.xlu1 %2230 }
 0x3b8   :  { %v2375_v10 = vsel %vm2373_vm8, %v2358_v47, %v2231_v34 }
 0x3b9   :  { %8510 = vmatmul.msk.bf16.vlgmr.msra.gmra.mxu1 %vm2430_vm9, %v2375_v10 }
 0x3bf   :  { %v2179_v19 = vpop.permute.xlu1 %2178 }
 0x3c0   :  { %v2235_v25 = vpop.permute.xlu2 %2234  ;;  %v2362_v55 = vsel %vm2356_vm7, %v2345_v14, %v2179_v19 }
 0x3c1   :  { %v2379_v16 = vsel %vm2373_vm8, %v2362_v55, %v2235_v25 }
 0x3c7   :  { %v1901_v9 = vpop.permute.xlu1 %1900  ;;  %v2233_v11 = vpop.permute.xlu0 %2232 }
 0x3c8   :  { %v2377_v42 = vsel %vm2373_vm8, %v2360_v54, %v2233_v11  ;;  %v2015_v59 = vpop.permute.xlu2 %2014  ;;  %v2279_v40 = vsel %vm2271_vm1, %v2258_v52, %v1901_v9  ;;  %v12665_v54 = vld [vmem:[#allocation77_spill] sm:$0xff]  ;;  %v12666_v11 = vld [vmem:[#allocation76_spill] sm:$0xff]  ;;  %v12669_v52 = vld [vmem:[#allocation78_spill] sm:$0xff] }
 0x3c9   :  { %8511 = vmatmul.msk.bf16.gmra.mxu1 %vm2430_vm9, %v2377_v42  ;;  %v2296_v8 = vsel %vm2288_vm3, %v2279_v40, %v11577_v0  ;;  %v2261_v0 = vsel %vm2246_vm2, %v12661_v31, %v1847_v15  ;;  %v12667_v42 = vpack.c.b16 %v12665_v54, %v12666_v11  ;;  %v12670_v40 = vpack.c.b16 %v12668_v23, %v12669_v52 }
 0x3ca   :  { %v2313_v63 = vsel %vm2305_vm4, %v2296_v8, %v2013_v30 }
 0x3cf   :  { %v2069_v6 = vpop.permute.xlu1 %2068  ;;  %v2181_v46 = vpop.permute.xlu0 %2180 }
 0x3d0   :  { %v2183_v20 = vpop.permute.xlu2 %2182  ;;  %v2330_v29 = vsel %vm2322_vm5, %v2313_v63, %v2069_v6 }
 0x3d1   :  { %v2347_v17 = vsel %vm2339_vm6, %v2330_v29, %v2125_v61 }
 0x3d2   :  { %v2364_v21 = vsel %vm2356_vm7, %v2347_v17, %v2181_v46 }
 0x3d7   :  { %v1959_v58 = vpop.permute.xlu1 %1958  ;;  %v1903_v41 = vpop.permute.xlu0 %1902 }
 0x3d8   :  { %v1905_v56 = vpop.permute.xlu2 %1904  ;;  %v2281_v35 = vsel %vm2271_vm1, %v2261_v0, %v1903_v41 }
 0x3d9   :  { %8512 = vmatmul.msk.bf16.gmra.mxu1 %vm2430_vm9, %v2379_v16  ;;  %v2298_v45 = vsel %vm2288_vm3, %v2281_v35, %v1959_v58 }
 0x3da   :  { %v2315_v44 = vsel %vm2305_vm4, %v2298_v45, %v2015_v59 }
 0x3df   :  { %v2127_v27 = vpop.permute.xlu1 %2126  ;;  %v2071_v1 = vpop.permute.xlu0 %2070 }
 0x3e0   :  { %v2073_v28 = vpop.permute.xlu2 %2072  ;;  %v2332_v38 = vsel %vm2322_vm5, %v2315_v44, %v2071_v1 }
 0x3e1   :  { %v2349_v60 = vsel %vm2339_vm6, %v2332_v38, %v2127_v27 }
 0x3e2   :  { %v2366_v12 = vsel %vm2356_vm7, %v2349_v60, %v2183_v20 }
 0x3e7   :  { %v1961_v22 = vpop.permute.xlu0 %1960  ;;  %v2237_v57 = vpop.permute.xlu1 %2236 }
 0x3e8   :  { %v2381_v51 = vsel %vm2373_vm8, %v2364_v21, %v2237_v57  ;;  %v1963_v34 = vpop.permute.xlu2 %1962 }
 0x3e9   :  { %8513 = vmatmul.msk.bf16.gmra.mxu1 %vm2430_vm9, %v2381_v51 }
 0x3ef   :  { %v2129_v50 = vpop.permute.xlu0 %2128  ;;  %v1849_v53 = vpop.permute.xlu1 %1848 }
 0x3f0   :  { %v2264_v61 = vsel %vm2246_vm2, %v12664_v39, %v1849_v53  ;;  %v2241_v26 = vpop.permute.xlu2 %2240 }
 0x3f1   :  { %v2283_v37 = vsel %vm2271_vm1, %v2264_v61, %v1905_v56 }
 0x3f2   :  { %v2300_v3 = vsel %vm2288_vm3, %v2283_v37, %v1961_v22 }
 0x3f7   :  { %v2017_v5 = vpop.permute.xlu1 %2016  ;;  %v2239_v47 = vpop.permute.xlu0 %2238 }
 0x3f8   :  { %v2383_v10 = vsel %vm2373_vm8, %v2366_v12, %v2239_v47  ;;  %v2317_v32 = vsel %vm2305_vm4, %v2300_v3, %v2017_v5  ;;  %v2131_v49 = vpop.permute.xlu2 %2130  ;;  %v10094_v47 = vld [vmem:[#allocation7] ss:$0 sm:$0xff] }
 0x3f9   :  { %8514 = vmatmul.msk.bf16.gmra.mxu1 %vm2430_vm9, %v2383_v10  ;;  %v2334_v19 = vsel %vm2322_vm5, %v2317_v32, %v2073_v28 }
 0x3fa   :  { %v2351_v13 = vsel %vm2339_vm6, %v2334_v19, %v2129_v50 }
 0x3ff   :  { %v2185_v15 = vpop.permute.xlu1 %2184  ;;  %v1851_v30 = vpop.permute.xlu0 %1850 }
 0x400   :  { %v2368_v33 = vsel %vm2356_vm7, %v2351_v13, %v2185_v15  ;;  %v2267_v36 = vsel %vm2246_vm2, %v12667_v42, %v1851_v30  ;;  %v1853_v14 = vpop.permute.xlu2 %1852 }
 0x401   :  { %v2385_v9 = vsel %vm2373_vm8, %v2368_v33, %v2241_v26  ;;  %v2270_v20 = vsel %vm2246_vm2, %v12670_v40, %v1853_v14 }
 0x407   :  { %v1907_v24 = vpop.permute.xlu1 %1906  ;;  %v2019_v25 = vpop.permute.xlu0 %2018 }
 0x408   :  { %v2285_v4 = vsel %vm2271_vm1, %v2267_v36, %v1907_v24  ;;  %v2021_v1 = vpop.permute.xlu2 %2020 }
 0x409   :  { %8515 = vmatmul.msk.bf16.gmra.mxu1 %vm2430_vm9, %v2385_v9  ;;  %v2302_v7 = vsel %vm2288_vm3, %v2285_v4, %v1963_v34 }
 0x40a   :  { %v2319_v48 = vsel %vm2305_vm4, %v2302_v7, %v2019_v25 }
 0x40f   :  { %v2075_v6 = vpop.permute.xlu1 %2074  ;;  %v2187_v46 = vpop.permute.xlu0 %2186 }
 0x410   :  { %v2336_v59 = vsel %vm2322_vm5, %v2319_v48, %v2075_v6  ;;  %v2189_v22 = vpop.permute.xlu2 %2188 }
 0x411   :  { %v2353_v62 = vsel %vm2339_vm6, %v2336_v59, %v2131_v49 }
 0x412   :  { %v2370_v55 = vsel %vm2356_vm7, %v2353_v62, %v2187_v46 }
 0x417   :  { %v1909_v58 = vpop.permute.xlu0 %1908  ;;  %v2243_v41 = vpop.permute.xlu1 %2242 }
 0x418   :  { %v2387_v16 = vsel %vm2373_vm8, %v2370_v55, %v2243_v41  ;;  %v2287_v63 = vsel %vm2271_vm1, %v2270_v20, %v1909_v58 }
 0x419   :  { %8516 = vmatmul.msk.bf16.gmra.mxu1 %vm2430_vm9, %v2387_v16 }
 0x41f   :  { %v2077_v8 = vpop.permute.xlu0 %2076  ;;  %v1965_v27 = vpop.permute.xlu1 %1964 }
 0x420   :  { %v2304_v29 = vsel %vm2288_vm3, %v2287_v63, %v1965_v27 }
 0x421   :  { %v2321_v17 = vsel %vm2305_vm4, %v2304_v29, %v2021_v1 }
 0x422   :  { %v2338_v21 = vsel %vm2322_vm5, %v2321_v17, %v2077_v8 }
 0x427   :  { %v2133_v56 = vpop.permute.xlu1 %2132  ;;  %v2245_v51 = vpop.permute.xlu0 %2244 }
 0x428   :  { %v2355_v57 = vsel %vm2339_vm6, %v2338_v21, %v2133_v56  ;;  %v9755_v56 = vld [vmem:[#allocation8] sm:$0xff] }
 0x429   :  { %v2372_v18 = vsel %vm2356_vm7, %v2355_v57, %v2189_v22  ;;  %v9763_v21 = vld [vmem:[#allocation8 + $0x40] sm:$0xff] }
 0x42a   :  { %v2389_v31 = vsel %vm2373_vm8, %v2372_v18, %v2245_v51  ;;  %v9771_v22 = vld [vmem:[#allocation8 + $0x80] sm:$0xff]  ;;  %v9756_v51 = vld [vmem:[#allocation8 + $0x8] sm:$0xff] }
 0x42b   :  { %8517 = vmatmul.msk.bf16.gmra.mxu1 %vm2430_vm9, %v2389_v31  ;;  %v9779_v57 = vld [vmem:[#allocation8 + $0xc0] sm:$0xff]  ;;  %v9764_v18 = vld [vmem:[#allocation8 + $0x48] sm:$0xff] }
 0x42c   :  { %v9772_v31 = vld [vmem:[#allocation8 + $0x88] sm:$0xff] }
 0x436   :  { %v11693_v0 = vpop.f32.mrf.mxu1 }
 0x437   :  { %v2461_v8 = vadd.f32 %v10094_v47, %v11693_v0  ;;  %v9780_v0 = vld [vmem:[#allocation8 + $0xc8] sm:$0xff] }
 0x439   :  { %v2500_v29 = vmax.f32 %v2461_v8, 0.0  ;;  %v9796_v8 = vld [vmem:[#allocation8 + $0x148] sm:$0xff] }
 0x43e   :  { %v11695_v35 = vpop.f32.mrf.mxu1 }
 0x43f   :  { %v2463_v52 = vadd.f32 %v10094_v47, %v11695_v35  ;;  %v9765_v35 = vld [vmem:[#allocation8 + $0x50] sm:$0xff] }
 0x441   :  { %v2501_v1 = vmax.f32 %v2463_v52, 0.0 }
 0x443   :  { %v11741_v17 = vpack.c.bf16 %v2501_v1, %v2500_v29  ;;  %v9812_v1 = vld [vmem:[#allocation8 + $0x1c8] sm:$0xff] }
 0x446   :  { %v2465_v45 = vpop.f32.mrf.mxu1 }
 0x447   :  { %v2466_v16 = vadd.f32 %v10094_v47, %v2465_v45  ;;  %v9757_v45 = vld [vmem:[#allocation8 + $0x10] sm:$0xff] }
 0x449   :  { %v2502_v27 = vmax.f32 %v2466_v16, 0.0 }
 0x44e   :  { %v2467_v28 = vpop.f32.mrf.mxu1 }
 0x44f   :  { %v2468_v55 = vadd.f32 %v10094_v47, %v2467_v28  ;;  %v9781_v28 = vld [vmem:[#allocation8 + $0xd0] sm:$0xff] }
 0x451   :  { %v2503_v40 = vmax.f32 %v2468_v55, 0.0 }
 0x453   :  { %v11735_v63 = vpack.c.bf16 %v2503_v40, %v2502_v27  ;;  %v9788_v27 = vld [vmem:[#allocation8 + $0x108] sm:$0xff] }
 0x456   :  { %v2470_v50 = vpop.f32.mrf.mxu1 }
 0x457   :  { %v2471_v62 = vadd.f32 %v10094_v47, %v2470_v50  ;;  %v9773_v50 = vld [vmem:[#allocation8 + $0x90] sm:$0xff] }
 0x459   :  { %v2504_v23 = vmax.f32 %v2471_v62, 0.0 }
 0x45e   :  { %v2472_v53 = vpop.f32.mrf.mxu1 }
 0x45f   :  { %v2473_v46 = vadd.f32 %v10094_v47, %v2472_v53  ;;  %v9766_v53 = vld [vmem:[#allocation8 + $0x58] sm:$0xff] }
 0x461   :  { %v2505_v58 = vmax.f32 %v2473_v46, 0.0 }
 0x463   :  { %v11728_v20 = vpack.c.bf16 %v2505_v58, %v2504_v23 }
 0x466   :  { %v2475_v44 = vpop.f32.mrf.mxu1 }
 0x467   :  { %v2476_v7 = vadd.f32 %v10094_v47, %v2475_v44  ;;  %v9758_v44 = vld [vmem:[#allocation8 + $0x18] sm:$0xff] }
 0x469   :  { %v2506_v14 = vmax.f32 %v2476_v7, 0.0 }
 0x46e   :  { %v2477_v38 = vpop.f32.mrf.mxu1 }
 0x46f   :  { %v2478_v36 = vadd.f32 %v10094_v47, %v2477_v38  ;;  %v9782_v38 = vld [vmem:[#allocation8 + $0xd8] sm:$0xff] }
 0x471   :  { %v2507_v48 = vmax.f32 %v2478_v36, 0.0 }
 0x473   :  { %v11721_v41 = vpack.c.bf16 %v2507_v48, %v2506_v14 }
 0x476   :  { %v2480_v60 = vpop.f32.mrf.mxu1 }
 0x477   :  { %v2481_v11 = vadd.f32 %v10094_v47, %v2480_v60  ;;  %v9774_v60 = vld [vmem:[#allocation8 + $0x98] sm:$0xff] }
 0x479   :  { %v2508_v6 = vmax.f32 %v2481_v11, 0.0 }
 0x47e   :  { %v2482_v2 = vpop.f32.mrf.mxu1 }
 0x47f   :  { %v2483_v25 = vadd.f32 %v10094_v47, %v2482_v2  ;;  %v9767_v2 = vld [vmem:[#allocation8 + $0x60] sm:$0xff] }
 0x481   :  { %v2509_v4 = vmax.f32 %v2483_v25, 0.0 }
 0x483   :  { %v11715_v59 = vpack.c.bf16 %v2509_v4, %v2508_v6 }
 0x486   :  { %v2485_v43 = vpop.f32.mrf.mxu1 }
 0x487   :  { %v2486_v33 = vadd.f32 %v10094_v47, %v2485_v43  ;;  %v9759_v43 = vld [vmem:[#allocation8 + $0x20] sm:$0xff] }
 0x489   :  { %v2510_v42 = vmax.f32 %v2486_v33, 0.0  ;;  %v9787_v33 = vld [vmem:[#allocation8 + $0x100] sm:$0xff] }
 0x48e   :  { %v2487_v39 = vpop.f32.mrf.mxu1 }
 0x48f   :  { %v2488_v19 = vadd.f32 %v10094_v47, %v2487_v39  ;;  %v9783_v39 = vld [vmem:[#allocation8 + $0xe0] sm:$0xff] }
 0x491   :  { %v2511_v9 = vmax.f32 %v2488_v19, 0.0  ;;  %v9786_v19 = vld [vmem:[#allocation8 + $0xf8] sm:$0xff] }
 0x493   :  { %v11709_v49 = vpack.c.bf16 %v2511_v9, %v2510_v42 }
 0x496   :  { %v2490_v61 = vpop.f32.mrf.mxu1 }
 0x497   :  { %v2491_v32 = vadd.f32 %v10094_v47, %v2490_v61  ;;  %v9775_v61 = vld [vmem:[#allocation8 + $0xa0] sm:$0xff] }
 0x499   :  { %v2512_v24 = vmax.f32 %v2491_v32, 0.0  ;;  %v9777_v32 = vld [vmem:[#allocation8 + $0xb0] sm:$0xff] }
 0x49e   :  { %v2492_v5 = vpop.f32.mrf.mxu1 }
 0x49f   :  { %v2493_v37 = vadd.f32 %v10094_v47, %v2492_v5  ;;  %v9768_v5 = vld [vmem:[#allocation8 + $0x68] sm:$0xff] }
 0x4a1   :  { %v2513_v26 = vmax.f32 %v2493_v37, 0.0  ;;  %v9761_v37 = vld [vmem:[#allocation8 + $0x30] sm:$0xff] }
 0x4a3   :  { %v11703_v54 = vpack.c.bf16 %v2513_v26, %v2512_v24  ;;  %v9778_v26 = vld [vmem:[#allocation8 + $0xb8] sm:$0xff]  ;;  %v9811_v24 = vld [vmem:[#allocation8 + $0x1c0] sm:$0xff] }
 0x4a8   :  { %v2495_v12 = vpop.f32.mrf.mxu1 }
 0x4a9   :  { %v2496_v34 = vadd.f32 %v10094_v47, %v2495_v12  ;;  %v9760_v12 = vld [vmem:[#allocation8 + $0x28] sm:$0xff] }
 0x4ab   :  { %v2514_v15 = vmax.f32 %v2496_v34, 0.0  ;;  %v9776_v34 = vld [vmem:[#allocation8 + $0xa8] sm:$0xff] }
 0x4b0   :  { %v2497_v10 = vpop.f32.mrf.mxu1 }
 0x4b1   :  { %v2498_v3 = vadd.f32 %v10094_v47, %v2497_v10  ;;  %v9784_v47 = vld [vmem:[#allocation8 + $0xe8] sm:$0xff]  ;;  %v9769_v10 = vld [vmem:[#allocation8 + $0x70] sm:$0xff] }
 0x4b3   :  { %v2515_v30 = vmax.f32 %v2498_v3, 0.0  ;;  %v9785_v3 = vld [vmem:[#allocation8 + $0xf0] sm:$0xff] }
 0x4b5   :  { %v11697_v13 = vpack.c.bf16 %v2515_v30, %v2514_v15  ;;  %v9770_v15 = vld [vmem:[#allocation8 + $0x78] sm:$0xff] }
 0x4b6   :  { %v9762_v30 = vld [vmem:[#allocation8 + $0x38] sm:$0xff] }
 0x4b7   :  { %2588 = vmatpush.bf16.msra.mxu2 %v11697_v13  ;;  %2718 = vmatpush.bf16.msra.mxu3 %v11697_v13 }
 0x4b8   :  { %2848 = vmatpush.bf16.msrb.mxu0 %v11697_v13  ;;  %2978 = vmatpush.bf16.msrb.mxu1 %v11697_v13 }
 0x4bb   :  { %2589 = vmatpush.bf16.msra.mxu2 %v11703_v54  ;;  %2719 = vmatpush.bf16.msra.mxu3 %v11703_v54 }
 0x4bc   :  { %2849 = vmatpush.bf16.msrb.mxu0 %v11703_v54  ;;  %2979 = vmatpush.bf16.msrb.mxu1 %v11703_v54 }
 0x4bf   :  { %2590 = vmatpush.bf16.msra.mxu2 %v11709_v49  ;;  %2720 = vmatpush.bf16.msra.mxu3 %v11709_v49 }
 0x4c0   :  { %2850 = vmatpush.bf16.msrb.mxu0 %v11709_v49  ;;  %2980 = vmatpush.bf16.msrb.mxu1 %v11709_v49 }
 0x4c3   :  { %2591 = vmatpush.bf16.msra.mxu2 %v11715_v59  ;;  %2721 = vmatpush.bf16.msra.mxu3 %v11715_v59 }
 0x4c4   :  { %2851 = vmatpush.bf16.msrb.mxu0 %v11715_v59  ;;  %2981 = vmatpush.bf16.msrb.mxu1 %v11715_v59 }
 0x4c7   :  { %2592 = vmatpush.bf16.msra.mxu2 %v11721_v41  ;;  %2722 = vmatpush.bf16.msra.mxu3 %v11721_v41 }
 0x4c8   :  { %2852 = vmatpush.bf16.msrb.mxu0 %v11721_v41  ;;  %2982 = vmatpush.bf16.msrb.mxu1 %v11721_v41 }
 0x4cb   :  { %2593 = vmatpush.bf16.msra.mxu2 %v11728_v20  ;;  %2723 = vmatpush.bf16.msra.mxu3 %v11728_v20 }
 0x4cc   :  { %2853 = vmatpush.bf16.msrb.mxu0 %v11728_v20  ;;  %2983 = vmatpush.bf16.msrb.mxu1 %v11728_v20 }
 0x4cf   :  { %2594 = vmatpush.bf16.msra.mxu2 %v11735_v63  ;;  %2724 = vmatpush.bf16.msra.mxu3 %v11735_v63 }
 0x4d0   :  { %2854 = vmatpush.bf16.msrb.mxu0 %v11735_v63  ;;  %2984 = vmatpush.bf16.msrb.mxu1 %v11735_v63 }
 0x4d3   :  { %2595 = vmatpush.bf16.msra.mxu2 %v11741_v17  ;;  %2725 = vmatpush.bf16.msra.mxu3 %v11741_v17 }
 0x4d4   :  { %2855 = vmatpush.bf16.msrb.mxu0 %v11741_v17  ;;  %2985 = vmatpush.bf16.msrb.mxu1 %v11741_v17 }
 0x4d6   :  { %2596 = vmatmul.bf16.vlgmr.msra.gmra.mxu2 %v9755_v56  ;;  %2726 = vmatmul.bf16.vlgmr.msra.gmra.mxu3 %v9763_v21 }
 0x4d7   :  { %3108 = vmatpush.bf16.msrb.mxu2 %v11697_v13  ;;  %3238 = vmatpush.bf16.msrb.mxu3 %v11697_v13 }
 0x4d8   :  { %3368 = vmatpush.bf16.msra.mxu0 %v11697_v13  ;;  %3498 = vmatpush.bf16.msra.mxu1 %v11697_v13 }
 0x4d9   :  { %2856 = vmatmul.bf16.vlgmr.msrb.gmra.mxu0 %v9771_v22  ;;  %2986 = vmatmul.bf16.vlgmr.msrb.gmra.mxu1 %v9779_v57  ;;  %v9804_v57 = vld [vmem:[#allocation8 + $0x188] sm:$0xff] }
 0x4db   :  { %3109 = vmatpush.bf16.msrb.mxu2 %v11703_v54  ;;  %3239 = vmatpush.bf16.msrb.mxu3 %v11703_v54 }
 0x4dc   :  { %3369 = vmatpush.bf16.msra.mxu0 %v11703_v54  ;;  %3499 = vmatpush.bf16.msra.mxu1 %v11703_v54 }
 0x4df   :  { %3110 = vmatpush.bf16.msrb.mxu2 %v11709_v49  ;;  %3240 = vmatpush.bf16.msrb.mxu3 %v11709_v49 }
 0x4e0   :  { %3370 = vmatpush.bf16.msra.mxu0 %v11709_v49  ;;  %3500 = vmatpush.bf16.msra.mxu1 %v11709_v49 }
 0x4e3   :  { %3111 = vmatpush.bf16.msrb.mxu2 %v11715_v59  ;;  %3241 = vmatpush.bf16.msrb.mxu3 %v11715_v59 }
 0x4e4   :  { %3371 = vmatpush.bf16.msra.mxu0 %v11715_v59  ;;  %3501 = vmatpush.bf16.msra.mxu1 %v11715_v59 }
 0x4e6   :  { %2601 = vmatmul.bf16.gmra.mxu2 %v9756_v51  ;;  %2731 = vmatmul.bf16.gmra.mxu3 %v9764_v18 }
 0x4e7   :  { %3112 = vmatpush.bf16.msrb.mxu2 %v11721_v41  ;;  %3242 = vmatpush.bf16.msrb.mxu3 %v11721_v41 }
 0x4e8   :  { %3372 = vmatpush.bf16.msra.mxu0 %v11721_v41  ;;  %3502 = vmatpush.bf16.msra.mxu1 %v11721_v41 }
 0x4e9   :  { %2861 = vmatmul.bf16.gmra.mxu0 %v9772_v31  ;;  %2991 = vmatmul.bf16.gmra.mxu1 %v9780_v0 }
 0x4eb   :  { %3113 = vmatpush.bf16.msrb.mxu2 %v11728_v20  ;;  %3243 = vmatpush.bf16.msrb.mxu3 %v11728_v20 }
 0x4ec   :  { %3373 = vmatpush.bf16.msra.mxu0 %v11728_v20  ;;  %3503 = vmatpush.bf16.msra.mxu1 %v11728_v20 }
 0x4ef   :  { %3114 = vmatpush.bf16.msrb.mxu2 %v11735_v63  ;;  %3244 = vmatpush.bf16.msrb.mxu3 %v11735_v63 }
 0x4f0   :  { %3374 = vmatpush.bf16.msra.mxu0 %v11735_v63  ;;  %3504 = vmatpush.bf16.msra.mxu1 %v11735_v63 }
 0x4f3   :  { %3115 = vmatpush.bf16.msrb.mxu2 %v11741_v17  ;;  %3245 = vmatpush.bf16.msrb.mxu3 %v11741_v17 }
 0x4f4   :  { %3375 = vmatpush.bf16.msra.mxu0 %v11741_v17  ;;  %3505 = vmatpush.bf16.msra.mxu1 %v11741_v17 }
 0x4f6   :  { %2736 = vmatmul.bf16.gmra.mxu3 %v9765_v35  ;;  %2606 = vmatmul.bf16.gmra.mxu2 %v9757_v45 }
 0x4f7   :  { %3628 = vmatpush.bf16.msra.mxu2 %v11697_v13  ;;  %v9795_v13 = vld [vmem:[#allocation8 + $0x140] sm:$0xff] }
 0x4f9   :  { %2996 = vmatmul.bf16.gmra.mxu1 %v9781_v28  ;;  %2866 = vmatmul.bf16.gmra.mxu0 %v9773_v50 }
 0x4fb   :  { %3629 = vmatpush.bf16.msra.mxu2 %v11703_v54  ;;  %v9803_v54 = vld [vmem:[#allocation8 + $0x180] sm:$0xff] }
 0x4ff   :  { %3630 = vmatpush.bf16.msra.mxu2 %v11709_v49 }
 0x503   :  { %3631 = vmatpush.bf16.msra.mxu2 %v11715_v59 }
 0x506   :  { %2741 = vmatmul.bf16.gmra.mxu3 %v9766_v53  ;;  %2611 = vmatmul.bf16.gmra.mxu2 %v9758_v44 }
 0x507   :  { %3632 = vmatpush.bf16.msra.mxu2 %v11721_v41 }
 0x509   :  { %3001 = vmatmul.bf16.gmra.mxu1 %v9782_v38  ;;  %2871 = vmatmul.bf16.gmra.mxu0 %v9774_v60 }
 0x50b   :  { %3633 = vmatpush.bf16.msra.mxu2 %v11728_v20 }
 0x50f   :  { %3634 = vmatpush.bf16.msra.mxu2 %v11735_v63 }
 0x513   :  { %3635 = vmatpush.bf16.msra.mxu2 %v11741_v17 }
 0x516   :  { %2746 = vmatmul.bf16.gmra.mxu3 %v9767_v2  ;;  %2616 = vmatmul.bf16.gmra.mxu2 %v9759_v43 }
 0x519   :  { %3006 = vmatmul.bf16.gmra.mxu1 %v9783_v39  ;;  %2876 = vmatmul.bf16.gmra.mxu0 %v9775_v61 }
 0x526   :  { %2751 = vmatmul.bf16.gmra.mxu3 %v9768_v5  ;;  %2621 = vmatmul.bf16.gmra.mxu2 %v9760_v12 }
 0x529   :  { %3011 = vmatmul.bf16.gmra.mxu1 %v9784_v47  ;;  %2881 = vmatmul.bf16.gmra.mxu0 %v9776_v34 }
 0x536   :  { %2756 = vmatmul.bf16.gmra.mxu3 %v9769_v10  ;;  %2626 = vmatmul.bf16.gmra.mxu2 %v9761_v37 }
 0x539   :  { %3016 = vmatmul.bf16.gmra.mxu1 %v9785_v3  ;;  %2886 = vmatmul.bf16.gmra.mxu0 %v9777_v32  ;;  %v9797_v3 = vld [vmem:[#allocation8 + $0x150] sm:$0xff] }
 0x53a   :  { %v9789_v32 = vld [vmem:[#allocation8 + $0x110] sm:$0xff] }
 0x546   :  { %2761 = vmatmul.bf16.gmra.mxu3 %v9770_v15  ;;  %2631 = vmatmul.bf16.gmra.mxu2 %v9762_v30  ;;  %v9813_v15 = vld [vmem:[#allocation8 + $0x1d0] sm:$0xff] }
 0x549   :  { %3021 = vmatmul.bf16.gmra.mxu1 %v9786_v19  ;;  %2891 = vmatmul.bf16.gmra.mxu0 %v9778_v26 }
 0x556   :  { %v2857_v25 = vpop.f32.mrf.mxu0  ;;  %v2987_v9 = vpop.f32.mrf.mxu1  ;;  %3246 = vmatmul.bf16.vlgmr.msrb.gmra.mxu3 %v9795_v13  ;;  %3116 = vmatmul.bf16.vlgmr.msrb.gmra.mxu2 %v9787_v33 }
 0x557   :  { %v2897_v11 = vpack.c.bf16 %v2857_v25, %v2857_v25  ;;  %v3027_v4 = vpack.c.bf16 %v2987_v9, %v2987_v9 }
 0x559   :  { %3506 = vmatmul.bf16.vlgmr.msra.gmra.mxu1 %v9811_v24  ;;  %3376 = vmatmul.bf16.vlgmr.msra.gmra.mxu0 %v9803_v54  ;;  %v2597_v42 = vpop.f32.mrf.mxu2  ;;  %v2727_v36 = vpop.f32.mrf.mxu3  ;;  %v3805_v6 = vunpack.c.l.b16 %v2897_v11  ;;  %v3861_v59 = vunpack.c.l.b16 %v3027_v4  ;;  %v9805_v24 = vld [vmem:[#allocation8 + $0x190] sm:$0xff] }
 0x55a   :  { %v2637_v55 = vpack.c.bf16 %v2597_v42, %v2597_v42  ;;  %v2767_v58 = vpack.c.bf16 %v2727_v36, %v2727_v36 }
 0x55c   :  { %v11789_v63 = vunpack.c.l.b16 %v2637_v55  ;;  %v3749_v29 = vunpack.c.l.b16 %v2767_v58 }
 0x55e   :  { %v2859_v49 = vpop.f32.mrf.mxu0  ;;  %v2989_v7 = vpop.f32.mrf.mxu1 }
 0x55f   :  { %v2898_v46 = vpack.c.bf16 %v2859_v49, %v2859_v49  ;;  %v3028_v48 = vpack.c.bf16 %v2989_v7, %v2989_v7 }
 0x561   :  { %v3806_v62 = vunpack.c.l.b16 %v2898_v46  ;;  %v3862_v14 = vunpack.c.l.b16 %v3028_v48  ;;  %v2599_v41 = vpop.f32.mrf.mxu2  ;;  %v2729_v16 = vpop.f32.mrf.mxu3 }
 0x562   :  { %v2638_v40 = vpack.c.bf16 %v2599_v41, %v2599_v41  ;;  %v2768_v20 = vpack.c.bf16 %v2729_v16, %v2729_v16 }
 0x563   :  { %v3877_v23 = vpack.c.b16 %v3862_v14, %v3861_v59  ;;  %v3821_v52 = vpack.c.b16 %v3806_v62, %v3805_v6 }
 0x564   :  { %v11791_v17 = vunpack.c.l.b16 %v2638_v40  ;;  %v3750_v56 = vunpack.c.l.b16 %v2768_v20  ;;  %v9798_v40 = vld [vmem:[#allocation8 + $0x158] sm:$0xff] }
 0x565   :  { %3885 = vrot.lane.b32.xlu0 %v3877_v23, %s10805_s28  ;;  %3829 = vrot.lane.b32.xlu2 %v3821_v52, %s10803_s26 }
 0x566   :  { %v2862_v21 = vpop.f32.mrf.mxu0  ;;  %v2992_v22 = vpop.f32.mrf.mxu1  ;;  %3251 = vmatmul.bf16.gmra.mxu3 %v9796_v8  ;;  %v3765_v18 = vpack.c.b16 %v3750_v56, %v3749_v29  ;;  %3121 = vmatmul.bf16.gmra.mxu2 %v9788_v27  ;;  %v9790_v27 = vld [vmem:[#allocation8 + $0x118] sm:$0xff] }
 0x567   :  { %v2899_v31 = vpack.c.bf16 %v2862_v21, %v2862_v21  ;;  %v3029_v45 = vpack.c.bf16 %v2992_v22, %v2992_v22  ;;  %v9806_v22 = vld [vmem:[#allocation8 + $0x198] sm:$0xff] }
 0x568   :  { %3773 = vrot.lane.b32.xlu1 %v3765_v18, %s10783_s13 }
 0x569   :  { %3511 = vmatmul.bf16.gmra.mxu1 %v9812_v1  ;;  %3381 = vmatmul.bf16.gmra.mxu0 %v9804_v57  ;;  %v2602_v0 = vpop.f32.mrf.mxu2  ;;  %v2732_v35 = vpop.f32.mrf.mxu3  ;;  %v3807_v53 = vunpack.c.l.b16 %v2899_v31  ;;  %v3863_v60 = vunpack.c.l.b16 %v3029_v45  ;;  %v9814_v1 = vld [vmem:[#allocation8 + $0x1d8] sm:$0xff] }
 0x56a   :  { %v2639_v39 = vpack.c.bf16 %v2602_v0, %v2602_v0  ;;  %v2769_v61 = vpack.c.bf16 %v2732_v35, %v2732_v35 }
 0x56c   :  { %v11798_v30 = vunpack.c.l.b16 %v2639_v39  ;;  %v3751_v19 = vunpack.c.l.b16 %v2769_v61 }
 0x56e   :  { %v2864_v28 = vpop.f32.mrf.mxu0  ;;  %v2994_v50 = vpop.f32.mrf.mxu1 }
 0x56f   :  { %v2900_v44 = vpack.c.bf16 %v2864_v28, %v2864_v28  ;;  %v3030_v38 = vpack.c.bf16 %v2994_v50, %v2994_v50 }
 0x571   :  { %v3808_v2 = vunpack.c.l.b16 %v2900_v44  ;;  %v3864_v43 = vunpack.c.l.b16 %v3030_v38  ;;  %v2604_v5 = vpop.f32.mrf.mxu2  ;;  %v2734_v12 = vpop.f32.mrf.mxu3 }
 0x572   :  { %v2640_v10 = vpack.c.bf16 %v2604_v5, %v2604_v5  ;;  %v2770_v37 = vpack.c.bf16 %v2734_v12, %v2734_v12 }
 0x573   :  { %v3822_v47 = vpack.c.b16 %v3808_v2, %v3807_v53  ;;  %v3878_v34 = vpack.c.b16 %v3864_v43, %v3863_v60 }
 0x574   :  { %v11800_v26 = vunpack.c.l.b16 %v2640_v10  ;;  %v3752_v13 = vunpack.c.l.b16 %v2770_v37 }
 0x575   :  { %3831 = vrot.lane.b32.xlu0 %v3822_v47, %s10803_s26  ;;  %3887 = vrot.lane.b32.xlu1 %v3878_v34, %s10805_s28 }
 0x576   :  { %v2997_v33 = vpop.f32.mrf.mxu1  ;;  %v2867_v25 = vpop.f32.mrf.mxu0  ;;  %3256 = vmatmul.bf16.gmra.mxu3 %v9797_v3  ;;  %v3766_v54 = vpack.c.b16 %v3752_v13, %v3751_v19  ;;  %3126 = vmatmul.bf16.gmra.mxu2 %v9789_v32  ;;  %v9799_v32 = vld [vmem:[#allocation8 + $0x160] sm:$0xff] }
 0x577   :  { %v2901_v36 = vpack.c.bf16 %v2867_v25, %v2867_v25  ;;  %v3031_v4 = vpack.c.bf16 %v2997_v33, %v2997_v33  ;;  %v9791_v13 = vld [vmem:[#allocation8 + $0x120] sm:$0xff] }
 0x578   :  { %3775 = vrot.lane.b32.xlu2 %v3766_v54, %s10783_s13  ;;  %v9815_v33 = vld [vmem:[#allocation8 + $0x1e0] sm:$0xff] }
 0x579   :  { %3516 = vmatmul.bf16.gmra.mxu1 %v9813_v15  ;;  %3386 = vmatmul.bf16.gmra.mxu0 %v9805_v24  ;;  %v2737_v11 = vpop.f32.mrf.mxu3  ;;  %v2607_v42 = vpop.f32.mrf.mxu2  ;;  %v11805_v46 = vunpack.c.l.b16 %v2901_v36  ;;  %v3865_v59 = vunpack.c.l.b16 %v3031_v4 }
 0x57a   :  { %v2771_v14 = vpack.c.bf16 %v2737_v11, %v2737_v11  ;;  %v2641_v58 = vpack.c.bf16 %v2607_v42, %v2607_v42  ;;  %v9807_v11 = vld [vmem:[#allocation8 + $0x1a0] sm:$0xff] }
 0x57c   :  { %v3753_v29 = vunpack.c.l.b16 %v2771_v14  ;;  %v11812_v57 = vunpack.c.l.b16 %v2641_v58 }
 0x57e   :  { %v2999_v49 = vpop.f32.mrf.mxu1  ;;  %v2869_v6 = vpop.f32.mrf.mxu0 }
 0x57f   :  { %v3032_v7 = vpack.c.bf16 %v2999_v49, %v2999_v49  ;;  %v2902_v48 = vpack.c.bf16 %v2869_v6, %v2869_v6 }
 0x581   :  { %v3866_v62 = vunpack.c.l.b16 %v3032_v7  ;;  %v11807_v55 = vunpack.c.l.b16 %v2902_v48  ;;  %v2739_v41 = vpop.f32.mrf.mxu3  ;;  %v2609_v23 = vpop.f32.mrf.mxu2 }
 0x582   :  { %v2772_v52 = vpack.c.bf16 %v2739_v41, %v2739_v41  ;;  %v2642_v8 = vpack.c.bf16 %v2609_v23, %v2609_v23 }
 0x583   :  { %v3879_v16 = vpack.c.b16 %v3866_v62, %v3865_v59 }
 0x584   :  { %v3754_v56 = vunpack.c.l.b16 %v2772_v52  ;;  %v11814_v18 = vunpack.c.l.b16 %v2642_v8  ;;  %v9792_v52 = vld [vmem:[#allocation8 + $0x128] sm:$0xff] }
 0x585   :  { %3889 = vrot.lane.b32.xlu2 %v3879_v16, %s10805_s28  ;;  %v9800_v16 = vld [vmem:[#allocation8 + $0x168] sm:$0xff] }
 0x586   :  { %v3002_v21 = vpop.f32.mrf.mxu1  ;;  %v2872_v31 = vpop.f32.mrf.mxu0  ;;  %3261 = vmatmul.bf16.gmra.mxu3 %v9798_v40  ;;  %v3767_v0 = vpack.c.b16 %v3754_v56, %v3753_v29  ;;  %3131 = vmatmul.bf16.gmra.mxu2 %v9790_v27  ;;  %v9816_v40 = vld [vmem:[#allocation8 + $0x1e8] sm:$0xff] }
 0x587   :  { %v2903_v50 = vpack.c.bf16 %v2872_v31, %v2872_v31  ;;  %v3033_v53 = vpack.c.bf16 %v3002_v21, %v3002_v21  ;;  %v9808_v27 = vld [vmem:[#allocation8 + $0x1a8] sm:$0xff] }
 0x588   :  { %3777 = vrot.lane.b32.xlu0 %v3767_v0, %s10783_s13 }
 0x589   :  { %3521 = vmatmul.bf16.gmra.mxu1 %v9814_v1  ;;  %3391 = vmatmul.bf16.gmra.mxu0 %v9806_v22  ;;  %v2742_v45 = vpop.f32.mrf.mxu3  ;;  %v2612_v28 = vpop.f32.mrf.mxu2  ;;  %v11819_v2 = vunpack.c.l.b16 %v2903_v50  ;;  %v11821_v39 = vunpack.c.l.b16 %v3033_v53 }
 0x58a   :  { %v2773_v5 = vpack.c.bf16 %v2742_v45, %v2742_v45  ;;  %v2643_v47 = vpack.c.bf16 %v2612_v28, %v2612_v28 }
 0x58c   :  { %v11831_v24 = vunpack.c.l.b16 %v2773_v5  ;;  %v11837_v42 = vunpack.c.l.b16 %v2643_v47  ;;  %v9809_v47 = vld [vmem:[#allocation8 + $0x1b0] sm:$0xff] }
 0x58e   :  { %v3004_v44 = vpop.f32.mrf.mxu1  ;;  %v2874_v60 = vpop.f32.mrf.mxu0 }
 0x58f   :  { %v3034_v38 = vpack.c.bf16 %v3004_v44, %v3004_v44  ;;  %v2904_v43 = vpack.c.bf16 %v2874_v60, %v2874_v60  ;;  %v9801_v44 = vld [vmem:[#allocation8 + $0x170] sm:$0xff] }
 0x590   :  { %v9793_v60 = vld [vmem:[#allocation8 + $0x130] sm:$0xff] }
 0x591   :  { %v11823_v61 = vunpack.c.l.b16 %v3034_v38  ;;  %v11825_v12 = vunpack.c.l.b16 %v2904_v43  ;;  %v2744_v34 = vpop.f32.mrf.mxu3  ;;  %v2614_v37 = vpop.f32.mrf.mxu2  ;;  %v9817_v43 = vld [vmem:[#allocation8 + $0x1f0] sm:$0xff] }
 0x592   :  { %v2774_v3 = vpack.c.bf16 %v2744_v34, %v2744_v34  ;;  %v2644_v19 = vpack.c.bf16 %v2614_v37, %v2614_v37 }
 0x594   :  { %v11833_v25 = vunpack.c.l.b16 %v2774_v3  ;;  %v11839_v36 = vunpack.c.l.b16 %v2644_v19 }
 0x596   :  { %v11835_v54 = vpop.f32.mrf.mxu1  ;;  %v11841_v4 = vpop.f32.mrf.mxu0  ;;  %3266 = vmatmul.bf16.gmra.mxu3 %v9799_v32  ;;  %3136 = vmatmul.bf16.gmra.mxu2 %v9791_v13 }
 0x599   :  { %3526 = vmatmul.bf16.gmra.mxu1 %v9815_v33  ;;  %3396 = vmatmul.bf16.gmra.mxu0 %v9807_v11  ;;  %v11847_v6 = vpop.f32.mrf.mxu3  ;;  %v2617_v48 = vpop.f32.mrf.mxu2 }
 0x59a   :  { %v2645_v14 = vpack.c.bf16 %v2617_v48, %v2617_v48 }
 0x59c   :  { %v11857_v1 = vunpack.c.l.b16 %v2645_v14 }
 0x59e   :  { %v11849_v59 = vpop.f32.mrf.mxu1  ;;  %v11851_v62 = vpop.f32.mrf.mxu0  ;;  %12671 = vst [vmem:[#allocation73_spill] sm:$0xff] %v11857_v1 }
 0x5a1   :  { %v11853_v58 = vpop.f32.mrf.mxu3  ;;  %v2619_v41 = vpop.f32.mrf.mxu2 }
 0x5a2   :  { %v2646_v23 = vpack.c.bf16 %v2619_v41, %v2619_v41 }
 0x5a4   :  { %v11859_v29 = vunpack.c.l.b16 %v2646_v23 }
 0x5a6   :  { %v11855_v8 = vpop.f32.mrf.mxu1  ;;  %12672 = vst [vmem:[#allocation75_spill] sm:$0xff] %v11859_v29  ;;  %v11861_v56 = vpop.f32.mrf.mxu0  ;;  %3271 = vmatmul.bf16.gmra.mxu3 %v9800_v16  ;;  %3141 = vmatmul.bf16.gmra.mxu2 %v9792_v52  ;;  %v9802_v16 = vld [vmem:[#allocation8 + $0x178] sm:$0xff] }
 0x5a7   :  { %v9794_v52 = vld [vmem:[#allocation8 + $0x138] sm:$0xff] }
 0x5a9   :  { %3531 = vmatmul.bf16.gmra.mxu1 %v9816_v40  ;;  %3401 = vmatmul.bf16.gmra.mxu0 %v9808_v27  ;;  %v11865_v22 = vpop.f32.mrf.mxu3  ;;  %v2622_v31 = vpop.f32.mrf.mxu2  ;;  %v9810_v27 = vld [vmem:[#allocation8 + $0x1b8] sm:$0xff] }
 0x5aa   :  { %v2647_v28 = vpack.c.bf16 %v2622_v31, %v2622_v31 }
 0x5ac   :  { %v11875_v34 = vunpack.c.l.b16 %v2647_v28 }
 0x5ae   :  { %v11867_v0 = vpop.f32.mrf.mxu1  ;;  %v11869_v45 = vpop.f32.mrf.mxu0  ;;  %12673 = vst [vmem:[#allocation74_spill] sm:$0xff] %v11875_v34 }
 0x5b1   :  { %v11871_v50 = vpop.f32.mrf.mxu3  ;;  %v2624_v53 = vpop.f32.mrf.mxu2 }
 0x5b2   :  { %v2648_v38 = vpack.c.bf16 %v2624_v53, %v2624_v53 }
 0x5b4   :  { %v11877_v37 = vunpack.c.l.b16 %v2648_v38  ;;  %v9818_v38 = vld [vmem:[#allocation8 + $0x1f8] sm:$0xff] }
 0x5b6   :  { %v11873_v5 = vpop.f32.mrf.mxu1  ;;  %12674 = vst [vmem:[#allocation77_spill] sm:$0xff] %v11877_v37  ;;  %v11879_v3 = vpop.f32.mrf.mxu0  ;;  %3276 = vmatmul.bf16.gmra.mxu3 %v9801_v44  ;;  %3146 = vmatmul.bf16.gmra.mxu2 %v9793_v60 }
 0x5b9   :  { %3536 = vmatmul.bf16.gmra.mxu1 %v9817_v43  ;;  %3406 = vmatmul.bf16.gmra.mxu0 %v9809_v47  ;;  %v11883_v19 = vpop.f32.mrf.mxu3  ;;  %v2627_v13 = vpop.f32.mrf.mxu2 }
 0x5ba   :  { %v2649_v48 = vpack.c.bf16 %v2627_v13, %v2627_v13 }
 0x5bc   :  { %v11893_v31 = vunpack.c.l.b16 %v2649_v48 }
 0x5be   :  { %v11885_v33 = vpop.f32.mrf.mxu1  ;;  %v11887_v11 = vpop.f32.mrf.mxu0  ;;  %12675 = vst [vmem:[#allocation76_spill] sm:$0xff] %v11893_v31 }
 0x5c1   :  { %v11889_v14 = vpop.f32.mrf.mxu3  ;;  %v2629_v41 = vpop.f32.mrf.mxu2 }
 0x5c2   :  { %v2650_v23 = vpack.c.bf16 %v2629_v41, %v2629_v41 }
 0x5c4   :  { %v11895_v28 = vunpack.c.l.b16 %v2650_v23 }
 0x5c6   :  { %v11891_v40 = vpop.f32.mrf.mxu1  ;;  %12676 = vst [vmem:[#allocation79_spill] sm:$0xff] %v11895_v28  ;;  %v11897_v53 = vpop.f32.mrf.mxu0  ;;  %3281 = vmatmul.bf16.gmra.mxu3 %v9802_v16  ;;  %3151 = vmatmul.bf16.gmra.mxu2 %v9794_v52  ;;  %v9819_v16 = vld [vmem:[#allocation8 + $0x200] sm:$0xff] }
 0x5c9   :  { %3411 = vmatmul.bf16.gmra.mxu0 %v9810_v27  ;;  %v11901_v60 = vpop.f32.mrf.mxu3  ;;  %3541 = vmatmul.bf16.gmra.mxu1 %v9818_v38  ;;  %v2632_v43 = vpop.f32.mrf.mxu2 }
 0x5ca   :  { %v2651_v48 = vpack.c.bf16 %v2632_v43, %v2632_v43 }
 0x5cc   :  { %v11909_v7 = vunpack.c.l.b16 %v2651_v48 }
 0x5ce   :  { %v11903_v47 = vpop.f32.mrf.mxu1  ;;  %v11905_v13 = vpop.f32.mrf.mxu0  ;;  %12677 = vst [vmem:[#allocation78_spill] sm:$0xff] %v11909_v7 }
 0x5d1   :  { %v11907_v41 = vpop.f32.mrf.mxu3  ;;  %v2634_v23 = vpop.f32.mrf.mxu2 }
 0x5d2   :  { %v2652_v32 = vpack.c.bf16 %v2634_v23, %v2634_v23 }
 0x5d4   :  { %v11911_v52 = vunpack.c.l.b16 %v2652_v32 }
 0x5d6   :  { %v3507_v21 = vpop.f32.mrf.mxu1  ;;  %v3377_v27 = vpop.f32.mrf.mxu0  ;;  %3636 = vmatmul.bf16.vlgmr.msra.gmra.mxu2 %v9819_v16 }
 0x5d7   :  { %v3417_v9 = vpack.c.bf16 %v3377_v27, %v3377_v27  ;;  %v3547_v51 = vpack.c.bf16 %v3507_v21, %v3507_v21  ;;  %v9820_v21 = vld [vmem:[#allocation8 + $0x208] sm:$0xff] }
 0x5d9   :  { %v3247_v44 = vpop.f32.mrf.mxu3  ;;  %v3117_v35 = vpop.f32.mrf.mxu2  ;;  %v4029_v49 = vunpack.c.l.b16 %v3417_v9  ;;  %v4085_v20 = vunpack.c.l.b16 %v3547_v51 }
 0x5da   :  { %v3287_v48 = vpack.c.bf16 %v3247_v44, %v3247_v44  ;;  %v3157_v38 = vpack.c.bf16 %v3117_v35, %v3117_v35 }
 0x5dc   :  { %v3973_v27 = vunpack.c.l.b16 %v3287_v48 }
 0x5de   :  { %v3509_v43 = vpop.f32.mrf.mxu1  ;;  %v3379_v15 = vpop.f32.mrf.mxu0 }
 0x5df   :  { %v3548_v10 = vpack.c.bf16 %v3509_v43, %v3509_v43  ;;  %v3418_v23 = vpack.c.bf16 %v3379_v15, %v3379_v15  ;;  %v3917_v15 = vunpack.c.l.b16 %v3157_v38 }
 0x5e1   :  { %v4086_v31 = vunpack.c.l.b16 %v3548_v10  ;;  %v4030_v28 = vunpack.c.l.b16 %v3418_v23  ;;  %v3249_v32 = vpop.f32.mrf.mxu3  ;;  %v3119_v37 = vpop.f32.mrf.mxu2 }
 0x5e2   :  { %v3288_v1 = vpack.c.bf16 %v3249_v32, %v3249_v32  ;;  %v3158_v16 = vpack.c.bf16 %v3119_v37, %v3119_v37 }
 0x5e3   :  { %v4101_v34 = vpack.c.b16 %v4086_v31, %v4085_v20  ;;  %v4045_v29 = vpack.c.b16 %v4030_v28, %v4029_v49 }
 0x5e4   :  { %v3974_v43 = vunpack.c.l.b16 %v3288_v1  ;;  %v3918_v51 = vunpack.c.l.b16 %v3158_v16 }
 0x5e5   :  { %4109 = vrot.lane.b32.xlu1 %v4101_v34, %s10806_s6  ;;  %4053 = vrot.lane.b32.xlu0 %v4045_v29, %s10807_s17 }
 0x5e6   :  { %v3512_v7 = vpop.f32.mrf.mxu1  ;;  %v3989_v9 = vpack.c.b16 %v3974_v43, %v3973_v27  ;;  %v3382_v10 = vpop.f32.mrf.mxu0  ;;  %3641 = vmatmul.bf16.gmra.mxu2 %v9820_v21  ;;  %v3933_v35 = vpack.c.b16 %v3918_v51, %v3917_v15  ;;  %v9821_v27 = vld [vmem:[#allocation8 + $0x210] sm:$0xff] }
 0x5e7   :  { %v3549_v37 = vpack.c.bf16 %v3512_v7, %v3512_v7  ;;  %v12678_v7 = vpack.c.b16 %v11807_v55, %v11805_v46  ;;  %v12679_v46 = vpack.c.b16 %v11833_v25, %v11831_v24  ;;  %v9822_v25 = vld [vmem:[#allocation8 + $0x218] sm:$0xff] }
 0x5e8   :  { %3997 = vrot.lane.b32.xlu2 %v3989_v9, %s10808_s2 }
 0x5e9   :  { %v3252_v20 = vpop.f32.mrf.mxu3  ;;  %v3122_v49 = vpop.f32.mrf.mxu2  ;;  %v4087_v28 = vunpack.c.l.b16 %v3549_v37 }
 0x5ea   :  { %v3289_v29 = vpack.c.bf16 %v3252_v20, %v3252_v20  ;;  %v3159_v16 = vpack.c.bf16 %v3122_v49, %v3122_v49  ;;  %v3419_v49 = vpack.c.bf16 %v3382_v10, %v3382_v10 }
 0x5ec   :  { %v3975_v43 = vunpack.c.l.b16 %v3289_v29  ;;  %v3919_v37 = vunpack.c.l.b16 %v3159_v16  ;;  %v4031_v29 = vunpack.c.l.b16 %v3419_v49  ;;  %v12680_v49 = vpack.c.b16 %v11825_v12, %v11819_v2 }
 0x5ed   :  { %3941 = vrot.lane.b32.xlu1 %v3933_v35, %s10772_s11  ;;  %v2775_v2 = vpack.c.bf16 %v11847_v6, %v11847_v6 }
 0x5ee   :  { %v3514_v34 = vpop.f32.mrf.mxu1  ;;  %v3384_v31 = vpop.f32.mrf.mxu0 }
 0x5ef   :  { %v3550_v1 = vpack.c.bf16 %v3514_v34, %v3514_v34  ;;  %v3420_v34 = vpack.c.bf16 %v3384_v31, %v3384_v31 }
 0x5f1   :  { %v4088_v44 = vunpack.c.l.b16 %v3550_v1  ;;  %v3254_v23 = vpop.f32.mrf.mxu3  ;;  %v3124_v32 = vpop.f32.mrf.mxu2 }
 0x5f2   :  { %v3290_v38 = vpack.c.bf16 %v3254_v23, %v3254_v23  ;;  %v3160_v21 = vpack.c.bf16 %v3124_v32, %v3124_v32 }
 0x5f3   :  { %v4102_v48 = vpack.c.b16 %v4088_v44, %v4087_v28 }
 0x5f4   :  { %v3976_v51 = vunpack.c.l.b16 %v3290_v38  ;;  %v3920_v15 = vunpack.c.l.b16 %v3160_v21 }
 0x5f5   :  { %4111 = vrot.lane.b32.xlu2 %v4102_v48, %s10806_s6  ;;  %3833 = vrot.lane.b32.xlu1 %v12678_v7, %s10803_s26  ;;  %v4032_v48 = vunpack.c.l.b16 %v3420_v34 }
 0x5f6   :  { %v3517_v9 = vpop.f32.mrf.mxu1  ;;  %v3990_v35 = vpack.c.b16 %v3976_v51, %v3975_v43  ;;  %v3387_v20 = vpop.f32.mrf.mxu0  ;;  %3646 = vmatmul.bf16.gmra.mxu2 %v9821_v27  ;;  %v3934_v28 = vpack.c.b16 %v3920_v15, %v3919_v37 }
 0x5f7   :  { %v3551_v23 = vpack.c.bf16 %v3517_v9, %v3517_v9  ;;  %v3421_v10 = vpack.c.bf16 %v3387_v20, %v3387_v20  ;;  %v4046_v43 = vpack.c.b16 %v4032_v48, %v4031_v29 }
 0x5f8   :  { %3999 = vrot.lane.b32.xlu0 %v3990_v35, %s10808_s2 }
 0x5f9   :  { %v3257_v1 = vpop.f32.mrf.mxu3  ;;  %v3127_v44 = vpop.f32.mrf.mxu2  ;;  %v4089_v16 = vunpack.c.l.b16 %v3551_v23  ;;  %v4033_v37 = vunpack.c.l.b16 %v3421_v10 }
 0x5fa   :  { %v3161_v15 = vpack.c.bf16 %v3127_v44, %v3127_v44  ;;  %v3291_v35 = vpack.c.bf16 %v3257_v1, %v3257_v1 }
 0x5fc   :  { %v3977_v44 = vunpack.c.l.b16 %v3291_v35 }
 0x5fd   :  { %3779 = vrot.lane.b32.xlu1 %v12679_v46, %s10783_s13  ;;  %3943 = vrot.lane.b32.xlu2 %v3934_v28, %s10772_s11 }
 0x5fe   :  { %v3519_v55 = vpop.f32.mrf.mxu1  ;;  %v3389_v38 = vpop.f32.mrf.mxu0 }
 0x5ff   :  { %v3552_v32 = vpack.c.bf16 %v3519_v55, %v3519_v55  ;;  %v3422_v31 = vpack.c.bf16 %v3389_v38, %v3389_v38  ;;  %v3921_v55 = vunpack.c.l.b16 %v3161_v15  ;;  %v2776_v38 = vpack.c.bf16 %v11853_v58, %v11853_v58 }
 0x600   :  { %v2905_v58 = vpack.c.bf16 %v11841_v4, %v11841_v4 }
 0x601   :  { %v4090_v21 = vunpack.c.l.b16 %v3552_v32  ;;  %v3259_v7 = vpop.f32.mrf.mxu3  ;;  %v3129_v51 = vpop.f32.mrf.mxu2  ;;  %v4034_v20 = vunpack.c.l.b16 %v3422_v31  ;;  %v3758_v31 = vunpack.c.l.b16 %v2776_v38 }
 0x602   :  { %v3292_v9 = vpack.c.bf16 %v3259_v7, %v3259_v7  ;;  %v3162_v24 = vpack.c.bf16 %v3129_v51, %v3129_v51  ;;  %v3757_v51 = vunpack.c.l.b16 %v2775_v2 }
 0x603   :  { %v4103_v27 = vpack.c.b16 %v4090_v21, %v4089_v16  ;;  %v4047_v1 = vpack.c.b16 %v4034_v20, %v4033_v37  ;;  %v12681_v20 = vpack.c.b16 %v11823_v61, %v11821_v39 }
 0x604   :  { %v3922_v28 = vunpack.c.l.b16 %v3162_v24  ;;  %v3978_v23 = vunpack.c.l.b16 %v3292_v9  ;;  %v2906_v9 = vpack.c.bf16 %v11851_v62, %v11851_v62  ;;  %v3769_v6 = vpack.c.b16 %v3758_v31, %v3757_v51 }
 0x605   :  { %4113 = vrot.lane.b32.xlu0 %v4103_v27, %s10806_s6  ;;  %4055 = vrot.lane.b32.xlu1 %v4046_v43, %s10807_s17  ;;  %v3035_v31 = vpack.c.bf16 %v11835_v54, %v11835_v54  ;;  %v2908_v54 = vpack.c.bf16 %v11869_v45, %v11869_v45 }
 0x606   :  { %3835 = vrot.lane.b32.xlu2 %v12680_v49, %s10803_s26  ;;  %v3522_v34 = vpop.f32.mrf.mxu1  ;;  %v3392_v46 = vpop.f32.mrf.mxu0  ;;  %3651 = vmatmul.bf16.gmra.mxu2 %v9822_v25  ;;  %v3991_v48 = vpack.c.b16 %v3978_v23, %v3977_v44  ;;  %v3935_v32 = vpack.c.b16 %v3922_v28, %v3921_v55  ;;  %v3813_v28 = vunpack.c.l.b16 %v2905_v58  ;;  %v3814_v4 = vunpack.c.l.b16 %v2906_v9 }
 0x607   :  { %v3553_v21 = vpack.c.bf16 %v3522_v34, %v3522_v34  ;;  %v9823_v34 = vld [vmem:[#allocation8 + $0x220] sm:$0xff]  ;;  %v3423_v39 = vpack.c.bf16 %v3392_v46, %v3392_v46  ;;  %v3869_v9 = vunpack.c.l.b16 %v3035_v31  ;;  %v3816_v45 = vunpack.c.l.b16 %v2908_v54 }
 0x609   :  { %v3262_v29 = vpop.f32.mrf.mxu3  ;;  %v3132_v16 = vpop.f32.mrf.mxu2  ;;  %v4091_v27 = vunpack.c.l.b16 %v3553_v21 }
 0x60a   :  { %v3163_v37 = vpack.c.bf16 %v3132_v16, %v3132_v16  ;;  %v3293_v23 = vpack.c.bf16 %v3262_v29, %v3262_v29  ;;  %v3825_v16 = vpack.c.b16 %v3814_v4, %v3813_v28  ;;  %v2777_v28 = vpack.c.bf16 %v11865_v22, %v11865_v22 }
 0x60c   :  { %v3979_v38 = vunpack.c.l.b16 %v3293_v23 }
 0x60d   :  { %4001 = vrot.lane.b32.xlu1 %v3991_v48, %s10808_s2  ;;  %3945 = vrot.lane.b32.xlu0 %v3935_v32, %s10772_s11  ;;  %v3923_v48 = vunpack.c.l.b16 %v3163_v37  ;;  %v3036_v32 = vpack.c.bf16 %v11849_v59, %v11849_v59 }
 0x60e   :  { %4057 = vrot.lane.b32.xlu2 %v4047_v1, %s10807_s17  ;;  %v3524_v12 = vpop.f32.mrf.mxu1  ;;  %v3394_v7 = vpop.f32.mrf.mxu0 }
 0x60f   :  { %v3554_v10 = vpack.c.bf16 %v3524_v12, %v3524_v12  ;;  %v3424_v61 = vpack.c.bf16 %v3394_v7, %v3394_v7 }
 0x611   :  { %v4092_v43 = vunpack.c.l.b16 %v3554_v10  ;;  %v3264_v15 = vpop.f32.mrf.mxu3  ;;  %v3134_v24 = vpop.f32.mrf.mxu2  ;;  %v4036_v46 = vunpack.c.l.b16 %v3424_v61 }
 0x612   :  { %v3294_v25 = vpack.c.bf16 %v3264_v15, %v3264_v15  ;;  %v3164_v49 = vpack.c.bf16 %v3134_v24, %v3134_v24  ;;  %v2778_v24 = vpack.c.bf16 %v11871_v50, %v11871_v50 }
 0x613   :  { %v4104_v35 = vpack.c.b16 %v4092_v43, %v4091_v27  ;;  %v3870_v27 = vunpack.c.l.b16 %v3036_v32  ;;  %v4035_v43 = vunpack.c.l.b16 %v3423_v39  ;;  %v9833_v32 = vld [vmem:[#allocation10 + $0x30] sm:$0xff] }
 0x614   :  { %v3924_v55 = vunpack.c.l.b16 %v3164_v49  ;;  %v3980_v44 = vunpack.c.l.b16 %v3294_v25  ;;  %v3760_v50 = vunpack.c.l.b16 %v2778_v24 }
 0x615   :  { %4115 = vrot.lane.b32.xlu1 %v4104_v35, %s10806_s6  ;;  %3891 = vrot.lane.b32.xlu0 %v12681_v20, %s10805_s28  ;;  %v2907_v35 = vpack.c.bf16 %v11861_v56, %v11861_v56  ;;  %v4048_v37 = vpack.c.b16 %v4036_v46, %v4035_v43  ;;  %v3881_v49 = vpack.c.b16 %v3870_v27, %v3869_v9  ;;  %v9824_v56 = vld [vmem:[#allocation8 + $0x228] sm:$0xff]  ;;  %v11988_v46 = vpop.permute.xlu2 %3829 }
 0x616   :  { %3781 = vrot.lane.b32.xlu2 %v3769_v6, %s10783_s13  ;;  %v3527_v62 = vpop.f32.mrf.mxu1  ;;  %v11953_v1 = vpop.f32.mrf.mxu0  ;;  %3656 = vmatmul.bf16.gmra.mxu2 %v9823_v34  ;;  %v3936_v29 = vpack.c.b16 %v3924_v55, %v3923_v48  ;;  %v3992_v10 = vpack.c.b16 %v3980_v44, %v3979_v38  ;;  %v9834_v34 = vld [vmem:[#allocation10 + $0x38] sm:$0xff]  ;;  %v3759_v38 = vunpack.c.l.b16 %v2777_v28 }
 0x617   :  { %v3555_v21 = vpack.c.bf16 %v3527_v62, %v3527_v62  ;;  %v3815_v23 = vunpack.c.l.b16 %v2907_v35  ;;  %4396 = vmatpush.bf16.msra.mxu3 %v9834_v34  ;;  %v3425_v39 = vpack.c.bf16 %v11953_v1, %v11953_v1  ;;  %v3037_v1 = vpack.c.bf16 %v11855_v8, %v11855_v8  ;;  %v9830_v28 = vld [vmem:[#allocation10 + $0x18] sm:$0xff] }
 0x619   :  { %v11957_v2 = vpop.f32.mrf.mxu3  ;;  %v3137_v12 = vpop.f32.mrf.mxu2  ;;  %v4093_v7 = vunpack.c.l.b16 %v3555_v21  ;;  %v3871_v54 = vunpack.c.l.b16 %v3037_v1  ;;  %v2909_v1 = vpack.c.bf16 %v11879_v3, %v11879_v3 }
 0x61a   :  { %v3165_v62 = vpack.c.bf16 %v3137_v12, %v3137_v12  ;;  %v3770_v12 = vpack.c.b16 %v3760_v50, %v3759_v38  ;;  %v3295_v43 = vpack.c.bf16 %v11957_v2, %v11957_v2  ;;  %v9835_v38 = vld [vmem:[#allocation10 + $0x40] sm:$0xff] }
 0x61b   :  { %4397 = vmatpush.bf16.msra.mxu3 %v9833_v32  ;;  %4452 = vmatpush.bf16.msrb.mxu0 %v9835_v38  ;;  %v12023_v38 = vpop.permute.xlu0 %3885 }
 0x61c   :  { %v3925_v22 = vunpack.c.l.b16 %v3165_v62  ;;  %v3981_v35 = vunpack.c.l.b16 %v3295_v43 }
 0x61d   :  { %3837 = vrot.lane.b32.xlu0 %v3825_v16, %s10803_s26  ;;  %3947 = vrot.lane.b32.xlu1 %v3936_v29, %s10772_s11  ;;  %v3826_v16 = vpack.c.b16 %v3816_v45, %v3815_v23  ;;  %v9825_v45 = vld [vmem:[#allocation8 + $0x230] sm:$0xff] }
 0x61e   :  { %4003 = vrot.lane.b32.xlu2 %v3992_v10, %s10808_s2  ;;  %v3529_v59 = vpop.f32.mrf.mxu1  ;;  %v3399_v58 = vpop.f32.mrf.mxu0  ;;  %v3038_v10 = vpack.c.bf16 %v11867_v0, %v11867_v0 }
 0x61f   :  { %v3556_v51 = vpack.c.bf16 %v3529_v59, %v3529_v59  ;;  %v3426_v21 = vpack.c.bf16 %v3399_v58, %v3399_v58  ;;  %v9832_v59 = vld [vmem:[#allocation10 + $0x28] sm:$0xff]  ;;  %v9831_v58 = vld [vmem:[#allocation10 + $0x20] sm:$0xff] }
 0x620   :  { %4398 = vmatpush.bf16.msra.mxu3 %v9832_v59  ;;  %v3872_v9 = vunpack.c.l.b16 %v3038_v10 }
 0x621   :  { %v4094_v15 = vunpack.c.l.b16 %v3556_v51  ;;  %v3269_v25 = vpop.f32.mrf.mxu3  ;;  %v3139_v20 = vpop.f32.mrf.mxu2  ;;  %v4038_v51 = vunpack.c.l.b16 %v3426_v21  ;;  %v2780_v21 = vpack.c.bf16 %v11889_v14, %v11889_v14  ;;  %v2779_v14 = vpack.c.bf16 %v11883_v19, %v11883_v19 }
 0x622   :  { %v3166_v4 = vpack.c.bf16 %v3139_v20, %v3139_v20  ;;  %v3296_v61 = vpack.c.bf16 %v3269_v25, %v3269_v25  ;;  %v3882_v34 = vpack.c.b16 %v3872_v9, %v3871_v54  ;;  %v3040_v54 = vpack.c.bf16 %v11885_v33, %v11885_v33  ;;  %v9826_v33 = vld [vmem:[#allocation8 + $0x238] sm:$0xff] }
 0x623   :  { %v4105_v6 = vpack.c.b16 %v4094_v15, %v4093_v7  ;;  %v4037_v7 = vunpack.c.l.b16 %v3425_v39 }
 0x624   :  { %v3926_v44 = vunpack.c.l.b16 %v3166_v4  ;;  %v3982_v0 = vunpack.c.l.b16 %v3296_v61  ;;  %4399 = vmatpush.bf16.msra.mxu3 %v9831_v58 }
 0x625   :  { %4059 = vrot.lane.b32.xlu0 %v4048_v37, %s10807_s17  ;;  %3893 = vrot.lane.b32.xlu1 %v3881_v49, %s10805_s28  ;;  %v4049_v8 = vpack.c.b16 %v4038_v51, %v4037_v7  ;;  %v2910_v7 = vpack.c.bf16 %v11887_v11, %v11887_v11  ;;  %v9828_v51 = vld [vmem:[#allocation10 + $0x8] sm:$0xff]  ;;  %v9827_v11 = vld [vmem:[#allocation10] sm:$0xff] }
 0x626   :  { %4117 = vrot.lane.b32.xlu2 %v4105_v6, %s10806_s6  ;;  %v11975_v55 = vpop.f32.mrf.mxu1  ;;  %v3402_v48 = vpop.f32.mrf.mxu0  ;;  %3661 = vmatmul.bf16.gmra.mxu2 %v9824_v56  ;;  %v3937_v27 = vpack.c.b16 %v3926_v44, %v3925_v22  ;;  %v3993_v37 = vpack.c.b16 %v3982_v0, %v3981_v35 }
 0x627   :  { %v3427_v24 = vpack.c.bf16 %v3402_v48, %v3402_v48  ;;  %v11993_v44 = vpop.permute.xlu2 %3775  ;;  %v3818_v35 = vunpack.c.l.b16 %v2910_v7 }
 0x628   :  { %4400 = vmatpush.bf16.msra.mxu3 %v9830_v28 }
 0x629   :  { %v3272_v29 = vpop.f32.mrf.mxu3  ;;  %v3142_v31 = vpop.f32.mrf.mxu2  ;;  %v4039_v62 = vunpack.c.l.b16 %v3427_v24 }
 0x62a   :  { %v3167_v4 = vpack.c.bf16 %v3142_v31, %v3142_v31  ;;  %v3297_v56 = vpack.c.bf16 %v3272_v29, %v3272_v29 }
 0x62c   :  { %v3927_v39 = vunpack.c.l.b16 %v3167_v4  ;;  %v3983_v61 = vunpack.c.l.b16 %v3297_v56 }
 0x62d   :  { %3783 = vrot.lane.b32.xlu0 %v3770_v12, %s10783_s13  ;;  %3839 = vrot.lane.b32.xlu1 %v3826_v16, %s10803_s26  ;;  %v9829_v16 = vld [vmem:[#allocation10 + $0x10] sm:$0xff]  ;;  %v3557_v12 = vpack.c.bf16 %v11975_v55, %v11975_v55  ;;  %v3762_v55 = vunpack.c.l.b16 %v2780_v21 }
 0x62e   :  { %3949 = vrot.lane.b32.xlu2 %v3937_v27, %s10772_s11  ;;  %v3404_v15 = vpop.f32.mrf.mxu0  ;;  %v3534_v2 = vpop.f32.mrf.mxu1  ;;  %4401 = vmatpush.bf16.msra.mxu3 %v9829_v16 }
 0x62f   :  { %v3428_v25 = vpack.c.bf16 %v3404_v15, %v3404_v15  ;;  %v3558_v10 = vpack.c.bf16 %v3534_v2, %v3534_v2  ;;  %v12012_v58 = vpop.permute.xlu2 %3889  ;;  %v4095_v9 = vunpack.c.l.b16 %v3557_v12  ;;  %v3817_v15 = vunpack.c.l.b16 %v2909_v1 }
 0x630   :  { %v3761_v2 = vunpack.c.l.b16 %v2779_v14 }
 0x631   :  { %v3274_v6 = vpop.f32.mrf.mxu3  ;;  %v3144_v49 = vpop.f32.mrf.mxu2  ;;  %v4040_v50 = vunpack.c.l.b16 %v3428_v25  ;;  %v4096_v3 = vunpack.c.l.b16 %v3558_v10 }
 0x632   :  { %v3298_v20 = vpack.c.bf16 %v3274_v6, %v3274_v6  ;;  %v3168_v23 = vpack.c.bf16 %v3144_v49, %v3144_v49  ;;  %4402 = vmatpush.bf16.msra.mxu3 %v9828_v51  ;;  %v3771_v25 = vpack.c.b16 %v3762_v55, %v3761_v2  ;;  %v2912_v2 = vpack.c.bf16 %v11905_v13, %v11905_v13 }
 0x633   :  { %v4050_v29 = vpack.c.b16 %v4040_v50, %v4039_v62  ;;  %v4106_v6 = vpack.c.b16 %v4096_v3, %v4095_v9  ;;  %v3774_v50 = vpop.permute.xlu1 %3773 }
 0x634   :  { %v3928_v48 = vunpack.c.l.b16 %v3168_v23  ;;  %v3984_v32 = vunpack.c.l.b16 %v3298_v20  ;;  %v3827_v20 = vpack.c.b16 %v3818_v35, %v3817_v15  ;;  %v3874_v23 = vunpack.c.l.b16 %v3040_v54  ;;  %v12042_v35 = vpop.permute.xlu0 %3831 }
 0x635   :  { %4005 = vrot.lane.b32.xlu0 %v3993_v37, %s10808_s2  ;;  %4061 = vrot.lane.b32.xlu1 %v4049_v8, %s10807_s17  ;;  %v3039_v8 = vpack.c.bf16 %v11873_v5, %v11873_v5  ;;  %v3042_v15 = vpack.c.bf16 %v11903_v47, %v11903_v47  ;;  %v3041_v54 = vpack.c.bf16 %v11891_v40, %v11891_v40 }
 0x636   :  { %3895 = vrot.lane.b32.xlu2 %v3882_v34, %s10805_s28  ;;  %v11995_v22 = vpop.f32.mrf.mxu0  ;;  %3666 = vmatmul.bf16.gmra.mxu2 %v9825_v45  ;;  %v3994_v31 = vpack.c.b16 %v3984_v32, %v3983_v61  ;;  %v3938_v27 = vpack.c.b16 %v3928_v48, %v3927_v39  ;;  %v12001_v43 = vpop.f32.mrf.mxu1  ;;  %v12682_v40 = vpack.c.b16 %v11791_v17, %v11789_v63 }
 0x637   :  { %4403 = vmatpush.bf16.msra.mxu3 %v9827_v11  ;;  %v3873_v5 = vunpack.c.l.b16 %v3039_v8  ;;  %v3559_v39 = vpack.c.bf16 %v12001_v43, %v12001_v43  ;;  %v2781_v43 = vpack.c.bf16 %v11901_v60, %v11901_v60  ;;  %v2911_v60 = vpack.c.bf16 %v11897_v53, %v11897_v53 }
 0x638   :  { %v3876_v8 = vunpack.c.l.b16 %v3042_v15  ;;  %v3875_v13 = vunpack.c.l.b16 %v3041_v54 }
 0x639   :  { %v3277_v59 = vpop.f32.mrf.mxu3  ;;  %v3147_v0 = vpop.f32.mrf.mxu2  ;;  %v3883_v21 = vpack.c.b16 %v3874_v23, %v3873_v5  ;;  %v4097_v14 = vunpack.c.l.b16 %v3559_v39  ;;  %v3763_v11 = vunpack.c.l.b16 %v2781_v43  ;;  %v3819_v47 = vunpack.c.l.b16 %v2911_v60 }
 0x63a   :  { %v3299_v19 = vpack.c.bf16 %v3277_v59, %v3277_v59  ;;  %v3169_v28 = vpack.c.bf16 %v3147_v0, %v3147_v0 }
 0x63c   :  { %v3985_v45 = vunpack.c.l.b16 %v3299_v19  ;;  %v3929_v16 = vunpack.c.l.b16 %v3169_v28 }
 0x63d   :  { %4007 = vrot.lane.b32.xlu1 %v3994_v31, %s10808_s2  ;;  %3951 = vrot.lane.b32.xlu0 %v3938_v27, %s10772_s11  ;;  %v2782_v27 = vpack.c.bf16 %v11907_v41, %v11907_v41 }
 0x63e   :  { %4063 = vrot.lane.b32.xlu2 %v4050_v29, %s10807_s17  ;;  %v3409_v24 = vpop.f32.mrf.mxu0  ;;  %v3539_v56 = vpop.f32.mrf.mxu1  ;;  %v3429_v29 = vpack.c.bf16 %v11995_v22, %v11995_v22 }
 0x63f   :  { %v3430_v12 = vpack.c.bf16 %v3409_v24, %v3409_v24  ;;  %v3560_v10 = vpack.c.bf16 %v3539_v56, %v3539_v56  ;;  %v12036_v22 = vpop.permute.xlu1 %3887  ;;  %v3764_v3 = vunpack.c.l.b16 %v2782_v27 }
 0x640   :  { %v4041_v51 = vunpack.c.l.b16 %v3429_v29 }
 0x641   :  { %v3279_v37 = vpop.f32.mrf.mxu3  ;;  %v3149_v49 = vpop.f32.mrf.mxu2  ;;  %v4042_v55 = vunpack.c.l.b16 %v3430_v12  ;;  %v4098_v9 = vunpack.c.l.b16 %v3560_v10 }
 0x642   :  { %v3300_v34 = vpack.c.bf16 %v3279_v37, %v3279_v37  ;;  %v3170_v4 = vpack.c.bf16 %v3149_v49, %v3149_v49  ;;  %v12021_v32 = vpop.permute.xlu2 %3997  ;;  %v3772_v37 = vpack.c.b16 %v3764_v3, %v3763_v11 }
 0x643   :  { %v4051_v19 = vpack.c.b16 %v4042_v55, %v4041_v51  ;;  %v4107_v24 = vpack.c.b16 %v4098_v9, %v4097_v14 }
 0x644   :  { %v3986_v62 = vunpack.c.l.b16 %v3300_v34  ;;  %v3930_v48 = vunpack.c.l.b16 %v3170_v4  ;;  %v4167_v34 = vsel %vm2271_vm1, %v12682_v40, %v3774_v50 }
 0x645   :  { %3785 = vrot.lane.b32.xlu1 %v3771_v25, %s10783_s13  ;;  %4119 = vrot.lane.b32.xlu0 %v4106_v6, %s10806_s6  ;;  %v4190_v5 = vsel %vm2305_vm4, %v4167_v34, %v11988_v46 }
 0x646   :  { %3841 = vrot.lane.b32.xlu2 %v3827_v20, %s10803_s26  ;;  %3671 = vmatmul.bf16.gmra.mxu2 %v9826_v33  ;;  %v3995_v61 = vpack.c.b16 %v3986_v62, %v3985_v45  ;;  %v3939_v31 = vpack.c.b16 %v3930_v48, %v3929_v16  ;;  %v3412_v1 = vpop.f32.mrf.mxu0  ;;  %v3542_v7 = vpop.f32.mrf.mxu1  ;;  %v3820_v20 = vunpack.c.l.b16 %v2912_v2  ;;  %v3884_v48 = vpack.c.b16 %v3876_v8, %v3875_v13 }
 0x647   :  { %v12057_v62 = vpop.permute.xlu0 %3777  ;;  %v3561_v39 = vpack.c.bf16 %v3542_v7, %v3542_v7  ;;  %v3431_v29 = vpack.c.bf16 %v3412_v1, %v3412_v1  ;;  %v4206_v10 = vsel %vm2339_vm6, %v4190_v5, %v12023_v38 }
 0x648   :  { %v3828_v16 = vpack.c.b16 %v3820_v20, %v3819_v47  ;;  %v12683_v47 = vpack.c.b16 %v11800_v26, %v11798_v30 }
 0x649   :  { %v3152_v59 = vpop.f32.mrf.mxu2  ;;  %v3282_v0 = vpop.f32.mrf.mxu3  ;;  %v4099_v46 = vunpack.c.l.b16 %v3561_v39 }
 0x64a   :  { %v3171_v25 = vpack.c.bf16 %v3152_v59, %v3152_v59  ;;  %v4043_v59 = vunpack.c.l.b16 %v3431_v29  ;;  %v4170_v20 = vsel %vm2271_vm1, %v12683_v47, %v11993_v44  ;;  %v12686_v47 = vld [vmem:[#allocation75_spill] sm:$0xff] }
 0x64b   :  { %v4192_v13 = vsel %vm2305_vm4, %v4170_v20, %v12042_v35  ;;  %v12687_v20 = vld [vmem:[#allocation73_spill] sm:$0xff] }
 0x64c   :  { %v3931_v56 = vunpack.c.l.b16 %v3171_v25  ;;  %v4208_v34 = vsel %vm2339_vm6, %v4192_v13, %v12036_v22  ;;  %v12684_v22 = vpack.c.b16 %v11814_v18, %v11812_v57 }
 0x64d   :  { %3897 = vrot.lane.b32.xlu0 %v3883_v21, %s10805_s28  ;;  %3953 = vrot.lane.b32.xlu1 %v3939_v31, %s10772_s11  ;;  %v3301_v21 = vpack.c.bf16 %v3282_v0, %v3282_v0 }
 0x64e   :  { %4009 = vrot.lane.b32.xlu2 %v3995_v61, %s10808_s2  ;;  %v3414_v53 = vpop.f32.mrf.mxu0  ;;  %v3544_v4 = vpop.f32.mrf.mxu1 }
 0x64f   :  { %v12038_v41 = vpop.permute.xlu2 %4111  ;;  %v3562_v61 = vpack.c.bf16 %v3544_v4, %v3544_v4  ;;  %v3432_v17 = vpack.c.bf16 %v3414_v53, %v3414_v53  ;;  %v3987_v27 = vunpack.c.l.b16 %v3301_v21 }
 0x651   :  { %v3154_v6 = vpop.f32.mrf.mxu2  ;;  %v3284_v23 = vpop.f32.mrf.mxu3  ;;  %v4100_v31 = vunpack.c.l.b16 %v3562_v61  ;;  %v4044_v7 = vunpack.c.l.b16 %v3432_v17 }
 0x652   :  { %v3172_v49 = vpack.c.bf16 %v3154_v6, %v3154_v6  ;;  %v3302_v63 = vpack.c.bf16 %v3284_v23, %v3284_v23 }
 0x653   :  { %v4108_v3 = vpack.c.b16 %v4100_v31, %v4099_v46  ;;  %v4052_v60 = vpack.c.b16 %v4044_v7, %v4043_v59  ;;  %v12685_v7 = vpack.c.b16 %v11839_v36, %v11837_v42 }
 0x654   :  { %v3932_v33 = vunpack.c.l.b16 %v3172_v49  ;;  %v3988_v1 = vunpack.c.l.b16 %v3302_v63 }
 0x655   :  { %4065 = vrot.lane.b32.xlu0 %v4051_v19, %s10807_s17  ;;  %4121 = vrot.lane.b32.xlu1 %v4107_v24, %s10806_s6 }
 0x656   :  { %3787 = vrot.lane.b32.xlu2 %v3772_v37, %s10783_s13  ;;  %v3940_v12 = vpack.c.b16 %v3932_v33, %v3931_v56  ;;  %v3996_v11 = vpack.c.b16 %v3988_v1, %v3987_v27 }
 0x657   :  { %v4110_v28 = vpop.permute.xlu1 %4109  ;;  %v3944_v45 = vpop.permute.xlu2 %3943 }
 0x658   :  { %v4054_v14 = vpop.permute.xlu0 %4053  ;;  %v4224_v56 = vsel %vm2373_vm8, %v4208_v34, %v3944_v45 }
 0x659   :  { %v3637_v50 = vpop.f32.mrf.mxu2 }
 0x65a   :  { %v3677_v51 = vpack.c.bf16 %v3637_v50, %v3637_v50 }
 0x65c   :  { %v4141_v54 = vunpack.c.l.b16 %v3677_v51 }
 0x65d   :  { %3843 = vrot.lane.b32.xlu0 %v3828_v16, %s10803_s26  ;;  %3899 = vrot.lane.b32.xlu1 %v3884_v48, %s10805_s28  ;;  %v4173_v16 = vsel %vm2271_vm1, %v12684_v22, %v12057_v62 }
 0x65e   :  { %3955 = vrot.lane.b32.xlu2 %v3940_v12, %s10772_s11 }
 0x65f   :  { %v3942_v43 = vpop.permute.xlu1 %3941 }
 0x660   :  { %v4222_v0 = vsel %vm2373_vm8, %v4206_v10, %v3942_v43  ;;  %v12070_v9 = vpop.permute.xlu2 %3835 }
 0x661   :  { %v4239_v55 = vsel %vm4237_vm10, %v4222_v0, %v12021_v32  ;;  %v3639_v2 = vpop.f32.mrf.mxu2 }
 0x662   :  { %v4256_v38 = vsel %vm4254_vm11, %v4239_v55, %v4054_v14  ;;  %v3678_v19 = vpack.c.bf16 %v3639_v2, %v3639_v2 }
 0x663   :  { %v4273_v15 = vsel %vm4271_vm12, %v4256_v38, %v4110_v28 }
 0x664   :  { %4404 = vmatmul.bf16.vlgmr.msra.gmra.mxu3 %v4273_v15  ;;  %v4142_v32 = vunpack.c.l.b16 %v3678_v19 }
 0x665   :  { %4011 = vrot.lane.b32.xlu0 %v3996_v11, %s10808_s2  ;;  %4067 = vrot.lane.b32.xlu1 %v4052_v60, %s10807_s17 }
 0x666   :  { %4123 = vrot.lane.b32.xlu2 %v4108_v3, %s10806_s6  ;;  %v4157_v25 = vpack.c.b16 %v4142_v32, %v4141_v54 }
 0x667   :  { %v3834_v24 = vpop.permute.xlu1 %3833 }
 0x668   :  { %8842 = vmatmul.msk.bf16.vlgmr.msrb.gmra.mxu0 %vm2271_vm1, %v4157_v25  ;;  %v4058_v6 = vpop.permute.xlu2 %4057  ;;  %v4194_v45 = vsel %vm2305_vm4, %v4173_v16, %v3834_v24  ;;  %v12689_v16 = vld [vmem:[#allocation77_spill] sm:$0xff] }
 0x669   :  { %v3642_v37 = vpop.f32.mrf.mxu2  ;;  %v4210_v21 = vsel %vm2339_vm6, %v4194_v45, %v12012_v58  ;;  %v12690_v45 = vld [vmem:[#allocation74_spill] sm:$0xff] }
 0x66a   :  { %v4000_v8 = vpop.permute.xlu0 %3999  ;;  %v3679_v53 = vpack.c.bf16 %v3642_v37, %v3642_v37 }
 0x66b   :  { %v4241_v23 = vsel %vm4237_vm10, %v4224_v56, %v4000_v8 }
 0x66c   :  { %v4143_v28 = vunpack.c.l.b16 %v3679_v53  ;;  %v12688_v53 = vpack.c.b16 %v12686_v47, %v12687_v20 }
 0x66f   :  { %v3780_v49 = vpop.permute.xlu1 %3779 }
 0x670   :  { %v3782_v33 = vpop.permute.xlu2 %3781  ;;  %v4176_v43 = vsel %vm2271_vm1, %v12685_v7, %v3780_v49 }
 0x671   :  { %v3644_v40 = vpop.f32.mrf.mxu2  ;;  %v4196_v55 = vsel %vm2305_vm4, %v4176_v43, %v12070_v9  ;;  %v4179_v13 = vsel %vm2271_vm1, %v12688_v53, %v3782_v33 }
 0x672   :  { %v3680_v4 = vpack.c.bf16 %v3644_v40, %v3644_v40 }
 0x674   :  { %v4144_v48 = vunpack.c.l.b16 %v3680_v4 }
 0x676   :  { %v4158_v44 = vpack.c.b16 %v4144_v48, %v4143_v28 }
 0x677   :  { %v4114_v5 = vpop.permute.xlu0 %4113  ;;  %v4056_v30 = vpop.permute.xlu1 %4055 }
 0x678   :  { %v4258_v26 = vsel %vm4254_vm11, %v4241_v23, %v4056_v30  ;;  %8843 = vmatmul.msk.bf16.gmra.mxu0 %vm2271_vm1, %v4158_v44  ;;  %v4004_v63 = vpop.permute.xlu2 %4003 }
 0x679   :  { %v4276_v35 = vsel %vm4271_vm12, %v4258_v26, %v12038_v41  ;;  %v3647_v39 = vpop.f32.mrf.mxu2 }
 0x67a   :  { %4409 = vmatmul.bf16.gmra.mxu3 %v4276_v35  ;;  %v3681_v17 = vpack.c.bf16 %v3647_v39, %v3647_v39  ;;  %v12691_v39 = vpack.c.b16 %v12689_v16, %v12690_v45 }
 0x67c   :  { %v4145_v57 = vunpack.c.l.b16 %v3681_v17 }
 0x67f   :  { %v4002_v61 = vpop.permute.xlu1 %4001  ;;  %v3946_v29 = vpop.permute.xlu0 %3945 }
 0x680   :  { %v4226_v41 = vsel %vm2373_vm8, %v4210_v21, %v3946_v29  ;;  %v4118_v1 = vpop.permute.xlu2 %4117 }
 0x681   :  { %v4243_v50 = vsel %vm4237_vm10, %v4226_v41, %v4002_v61  ;;  %v3649_v12 = vpop.f32.mrf.mxu2 }
 0x682   :  { %v3682_v18 = vpack.c.bf16 %v3649_v12, %v3649_v12  ;;  %v4260_v62 = vsel %vm4254_vm11, %v4243_v50, %v4058_v6 }
 0x683   :  { %v4279_v59 = vsel %vm4271_vm12, %v4260_v62, %v4114_v5 }
 0x684   :  { %v4146_v10 = vunpack.c.l.b16 %v3682_v18 }
 0x686   :  { %v4159_v27 = vpack.c.b16 %v4146_v10, %v4145_v57 }
 0x687   :  { %v4116_v46 = vpop.permute.xlu1 %4115  ;;  %v3892_v31 = vpop.permute.xlu0 %3891 }
 0x688   :  { %8844 = vmatmul.msk.bf16.gmra.mxu0 %vm2271_vm1, %v4159_v27  ;;  %v4212_v38 = vsel %vm2339_vm6, %v4196_v55, %v3892_v31  ;;  %v3950_v3 = vpop.permute.xlu2 %3949 }
 0x689   :  { %v3652_v58 = vpop.f32.mrf.mxu2 }
 0x68a   :  { %4414 = vmatmul.bf16.gmra.mxu3 %v4279_v59  ;;  %v3683_v14 = vpack.c.bf16 %v3652_v58, %v3652_v58 }
 0x68c   :  { %v4147_v60 = vunpack.c.l.b16 %v3683_v14  ;;  %v12693_v14 = vld [vmem:[#allocation76_spill] sm:$0xff] }
 0x68f   :  { %v3838_v0 = vpop.permute.xlu0 %3837  ;;  %v3948_v51 = vpop.permute.xlu1 %3947 }
 0x690   :  { %v4228_v15 = vsel %vm2373_vm8, %v4212_v38, %v3948_v51  ;;  %v3896_v6 = vpop.permute.xlu2 %3895  ;;  %v4198_v40 = vsel %vm2305_vm4, %v4179_v13, %v3838_v0  ;;  %v12692_v51 = vld [vmem:[#allocation79_spill] sm:$0xff]  ;;  %v12695_v13 = vld [vmem:[#allocation78_spill] sm:$0xff] }
 0x691   :  { %v3654_v11 = vpop.f32.mrf.mxu2  ;;  %v4245_v42 = vsel %vm4237_vm10, %v4228_v15, %v4004_v63  ;;  %v12694_v55 = vpack.c.b16 %v12692_v51, %v12693_v14 }
 0x692   :  { %v3684_v2 = vpack.c.bf16 %v3654_v11, %v3654_v11 }
 0x694   :  { %v4148_v54 = vunpack.c.l.b16 %v3684_v2 }
 0x696   :  { %v4160_v24 = vpack.c.b16 %v4148_v54, %v4147_v60 }
 0x697   :  { %v4060_v19 = vpop.permute.xlu0 %4059  ;;  %v3894_v36 = vpop.permute.xlu1 %3893 }
 0x698   :  { %v4262_v32 = vsel %vm4254_vm11, %v4245_v42, %v4060_v19  ;;  %8845 = vmatmul.msk.bf16.gmra.mxu0 %vm2271_vm1, %v4160_v24  ;;  %v4214_v34 = vsel %vm2339_vm6, %v4198_v40, %v3894_v36  ;;  %v4064_v26 = vpop.permute.xlu2 %4063  ;;  %v12696_v40 = vpack.c.b16 %v11911_v52, %v12695_v13 }
 0x699   :  { %v4282_v25 = vsel %vm4271_vm12, %v4262_v32, %v4116_v46  ;;  %v3657_v9 = vpop.f32.mrf.mxu2  ;;  %v4230_v5 = vsel %vm2373_vm8, %v4214_v34, %v3950_v3 }
 0x69a   :  { %4419 = vmatmul.bf16.gmra.mxu3 %v4282_v25  ;;  %v3685_v49 = vpack.c.bf16 %v3657_v9, %v3657_v9 }
 0x69c   :  { %v4149_v4 = vunpack.c.l.b16 %v3685_v49 }
 0x69f   :  { %v3784_v37 = vpop.permute.xlu0 %3783  ;;  %v3840_v8 = vpop.permute.xlu1 %3839 }
 0x6a0   :  { %v4182_v61 = vsel %vm2271_vm1, %v12691_v39, %v3784_v37  ;;  %v3842_v50 = vpop.permute.xlu2 %3841 }
 0x6a1   :  { %v3659_v28 = vpop.f32.mrf.mxu2  ;;  %v4200_v29 = vsel %vm2305_vm4, %v4182_v61, %v3840_v8  ;;  %v12161_v61 = vld [vmem:[#allocation11] ss:$0 sm:$0xff] }
 0x6a2   :  { %v3686_v56 = vpack.c.bf16 %v3659_v28, %v3659_v28  ;;  %v4216_v12 = vsel %vm2339_vm6, %v4200_v29, %v3896_v6 }
 0x6a4   :  { %v4150_v23 = vunpack.c.l.b16 %v3686_v56 }
 0x6a6   :  { %v4161_v35 = vpack.c.b16 %v4150_v23, %v4149_v4 }
 0x6a7   :  { %v4006_v48 = vpop.permute.xlu0 %4005  ;;  %v4062_v30 = vpop.permute.xlu1 %4061 }
 0x6a8   :  { %v4247_v44 = vsel %vm4237_vm10, %v4230_v5, %v4006_v48  ;;  %8846 = vmatmul.msk.bf16.gmra.mxu0 %vm2271_vm1, %v4161_v35  ;;  %v4010_v43 = vpop.permute.xlu2 %4009 }
 0x6a9   :  { %v4264_v22 = vsel %vm4254_vm11, %v4247_v44, %v4062_v30  ;;  %v3662_v21 = vpop.f32.mrf.mxu2 }
 0x6aa   :  { %v4285_v33 = vsel %vm4271_vm12, %v4264_v22, %v4118_v1  ;;  %v3687_v17 = vpack.c.bf16 %v3662_v21, %v3662_v21 }
 0x6ab   :  { %4424 = vmatmul.bf16.gmra.mxu3 %v4285_v33 }
 0x6ac   :  { %v4151_v62 = vunpack.c.l.b16 %v3687_v17 }
 0x6af   :  { %v4008_v63 = vpop.permute.xlu1 %4007  ;;  %v3952_v41 = vpop.permute.xlu0 %3951 }
 0x6b0   :  { %v4232_v57 = vsel %vm2373_vm8, %v4216_v12, %v3952_v41  ;;  %v3788_v32 = vpop.permute.xlu2 %3787 }
 0x6b1   :  { %v3664_v18 = vpop.f32.mrf.mxu2  ;;  %v4249_v46 = vsel %vm4237_vm10, %v4232_v57, %v4008_v63  ;;  %v4188_v34 = vsel %vm2271_vm1, %v12696_v40, %v3788_v32 }
 0x6b2   :  { %v3688_v10 = vpack.c.bf16 %v3664_v18, %v3664_v18  ;;  %v4266_v58 = vsel %vm4254_vm11, %v4249_v46, %v4064_v26 }
 0x6b4   :  { %v4152_v31 = vunpack.c.l.b16 %v3688_v10 }
 0x6b6   :  { %v4162_v1 = vpack.c.b16 %v4152_v31, %v4151_v62 }
 0x6b7   :  { %v3786_v27 = vpop.permute.xlu1 %3785  ;;  %v4120_v59 = vpop.permute.xlu0 %4119 }
 0x6b8   :  { %v4288_v7 = vsel %vm4271_vm12, %v4266_v58, %v4120_v59  ;;  %8847 = vmatmul.msk.bf16.gmra.mxu0 %vm2271_vm1, %v4162_v1  ;;  %v4185_v38 = vsel %vm2271_vm1, %v12694_v55, %v3786_v27  ;;  %v3956_v28 = vpop.permute.xlu2 %3955 }
 0x6b9   :  { %v3667_v0 = vpop.f32.mrf.mxu2  ;;  %v4202_v11 = vsel %vm2305_vm4, %v4185_v38, %v3842_v50 }
 0x6ba   :  { %v3689_v60 = vpack.c.bf16 %v3667_v0, %v3667_v0 }
 0x6bb   :  { %4429 = vmatmul.bf16.gmra.mxu3 %v4288_v7 }
 0x6bc   :  { %v4153_v42 = vunpack.c.l.b16 %v3689_v60 }
 0x6bf   :  { %v3898_v3 = vpop.permute.xlu0 %3897  ;;  %v3954_v15 = vpop.permute.xlu1 %3953 }
 0x6c0   :  { %v4218_v2 = vsel %vm2339_vm6, %v4202_v11, %v3898_v3  ;;  %v4124_v16 = vpop.permute.xlu2 %4123 }
 0x6c1   :  { %v4234_v54 = vsel %vm2373_vm8, %v4218_v2, %v3954_v15  ;;  %v3669_v19 = vpop.f32.mrf.mxu2 }
 0x6c2   :  { %v3690_v36 = vpack.c.bf16 %v3669_v19, %v3669_v19  ;;  %v4251_v9 = vsel %vm4237_vm10, %v4234_v54, %v4010_v43 }
 0x6c4   :  { %v4154_v24 = vunpack.c.l.b16 %v3690_v36 }
 0x6c6   :  { %v4163_v8 = vpack.c.b16 %v4154_v24, %v4153_v42 }
 0x6c7   :  { %v4066_v25 = vpop.permute.xlu0 %4065  ;;  %v4122_v6 = vpop.permute.xlu1 %4121 }
 0x6c8   :  { %v4268_v37 = vsel %vm4254_vm11, %v4251_v9, %v4066_v25  ;;  %8848 = vmatmul.msk.bf16.gmra.mxu0 %vm2271_vm1, %v4163_v8 }
 0x6c9   :  { %v4291_v49 = vsel %vm4271_vm12, %v4268_v37, %v4122_v6  ;;  %v3672_v47 = vpop.f32.mrf.mxu2 }
 0x6ca   :  { %v3691_v4 = vpack.c.bf16 %v3672_v47, %v3672_v47 }
 0x6cb   :  { %4434 = vmatmul.bf16.gmra.mxu3 %v4291_v49 }
 0x6cc   :  { %v4155_v5 = vunpack.c.l.b16 %v3691_v4 }
 0x6cf   :  { %v3844_v20 = vpop.permute.xlu0 %3843  ;;  %v3900_v53 = vpop.permute.xlu1 %3899 }
 0x6d0   :  { %v4204_v56 = vsel %vm2305_vm4, %v4188_v34, %v3844_v20 }
 0x6d1   :  { %v4220_v23 = vsel %vm2339_vm6, %v4204_v56, %v3900_v53  ;;  %v3674_v48 = vpop.f32.mrf.mxu2 }
 0x6d2   :  { %v3692_v30 = vpack.c.bf16 %v3674_v48, %v3674_v48  ;;  %v4236_v35 = vsel %vm2373_vm8, %v4220_v23, %v3956_v28 }
 0x6d4   :  { %v4156_v26 = vunpack.c.l.b16 %v3692_v30 }
 0x6d6   :  { %v4164_v52 = vpack.c.b16 %v4156_v26, %v4155_v5 }
 0x6d7   :  { %v4012_v44 = vpop.permute.xlu0 %4011  ;;  %v4068_v22 = vpop.permute.xlu1 %4067 }
 0x6d8   :  { %v4253_v33 = vsel %vm4237_vm10, %v4236_v35, %v4012_v44  ;;  %8849 = vmatmul.msk.bf16.gmra.mxu0 %vm2271_vm1, %v4164_v52 }
 0x6d9   :  { %v4270_v45 = vsel %vm4254_vm11, %v4253_v33, %v4068_v22 }
 0x6da   :  { %v4294_v39 = vsel %vm4271_vm12, %v4270_v45, %v4124_v16 }
 0x6db   :  { %4439 = vmatmul.bf16.gmra.mxu3 %v4294_v39 }
 0x6e5   :  { %v4454_v63 = vpop.f32.mrf.mxu0 }
 0x6e7   :  { %v4405_v21 = vpop.f32.mrf.mxu3 }
 0x6e8   :  { %v4406_v29 = vadd.f32 %v12161_v61, %v4405_v21 }
 0x6ea   :  { %v12164_v41 = vadd.f32 %v4454_v63, %v4406_v29 }
 0x6ed   :  { %v12166_v17 = vpop.f32.mrf.mxu0 }
 0x6ef   :  { %v12168_v50 = vpop.f32.mrf.mxu3 }
 0x6f5   :  { %v4459_v12 = vpop.f32.mrf.mxu0 }
 0x6fd   :  { %v4410_v57 = vpop.f32.mrf.mxu3  ;;  %v12173_v10 = vpop.f32.mrf.mxu0 }
 0x6fe   :  { %v4411_v18 = vadd.f32 %v12161_v61, %v4410_v57 }
 0x700   :  { %v12171_v62 = vadd.f32 %v4459_v12, %v4411_v18 }
 0x705   :  { %v12175_v46 = vpop.f32.mrf.mxu3  ;;  %v4464_v31 = vpop.f32.mrf.mxu0 }
 0x70d   :  { %v4415_v27 = vpop.f32.mrf.mxu3  ;;  %v12180_v58 = vpop.f32.mrf.mxu0 }
 0x70e   :  { %v4416_v59 = vadd.f32 %v12161_v61, %v4415_v27  ;;  %v4413_v27 = vadd.f32 %v12161_v61, %v12175_v46 }
 0x710   :  { %v12178_v1 = vadd.f32 %v4464_v31, %v4416_v59 }
 0x715   :  { %v4417_v7 = vpop.f32.mrf.mxu3  ;;  %v4469_v43 = vpop.f32.mrf.mxu0 }
 0x716   :  { %v4418_v63 = vadd.f32 %v12161_v61, %v4417_v7 }
 0x718   :  { %v4467_v59 = vadd.f32 %v12180_v58, %v4418_v63  ;;  %v4498_v58 = vmax.f32 %v12178_v1, 0.0  ;;  %v4494_v1 = vmax.f32 %v12164_v41, 0.0  ;;  %v4520_v41 = vld [vmem:[#allocation13 + $0x8] sm:$0x1] }
 0x71d   :  { %v4420_v0 = vpop.f32.mrf.mxu3  ;;  %v4471_v55 = vpop.f32.mrf.mxu0 }
 0x71e   :  { %v4421_v51 = vadd.f32 %v12161_v61, %v4420_v0 }
 0x720   :  { %v12183_v14 = vadd.f32 %v4469_v43, %v4421_v51  ;;  %v4408_v51 = vadd.f32 %v12161_v61, %v12168_v50 }
 0x722   :  { %v4500_v7 = vmax.f32 %v12183_v14, 0.0  ;;  %v4457_v14 = vadd.f32 %v12166_v17, %v4408_v51 }
 0x724   :  { %v4495_v50 = vmax.f32 %v4457_v14, 0.0 }
 0x725   :  { %v4422_v38 = vpop.f32.mrf.mxu3  ;;  %v4474_v3 = vpop.f32.mrf.mxu0 }
 0x726   :  { %v4423_v52 = vadd.f32 %v12161_v61, %v4422_v38  ;;  %v4499_v38 = vmax.f32 %v4467_v59, 0.0  ;;  %v12241_v17 = vpack.c.bf16 %v4495_v50, %v4494_v1  ;;  %v4800_v1 = vld [vmem:[#allocation13 + $0x68] sm:$0x1] }
 0x728   :  { %v4472_v12 = vadd.f32 %v4471_v55, %v4423_v52  ;;  %v4462_v55 = vadd.f32 %v12173_v10, %v4413_v27 }
 0x72a   :  { %v4501_v43 = vmax.f32 %v4472_v12, 0.0 }
 0x72c   :  { %v12222_v46 = vpack.c.bf16 %v4501_v43, %v4500_v7 }
 0x72d   :  { %v4476_v60 = vpop.f32.mrf.mxu0 }
 0x72e   :  { %v4425_v15 = vpop.f32.mrf.mxu3 }
 0x72f   :  { %v4426_v11 = vadd.f32 %v12161_v61, %v4425_v15  ;;  %v12229_v15 = vpack.c.bf16 %v4499_v38, %v4498_v58 }
 0x731   :  { %v4475_v2 = vadd.f32 %v4474_v3, %v4426_v11  ;;  %v4497_v3 = vmax.f32 %v4462_v55, 0.0  ;;  %v9837_v11 = vld [vmem:[#allocation13 + $0xc] sm:$0xff] }
 0x733   :  { %v4502_v31 = vmax.f32 %v4475_v2, 0.0  ;;  %v4555_v2 = vld [vmem:[#allocation13 + $0x14] sm:$0x1] }
 0x735   :  { %v4479_v19 = vpop.f32.mrf.mxu0 }
 0x736   :  { %v4427_v54 = vpop.f32.mrf.mxu3 }
 0x737   :  { %v4428_v26 = vadd.f32 %v12161_v61, %v4427_v54  ;;  %v4590_v54 = vld [vmem:[#allocation13 + $0x20] sm:$0x1] }
 0x739   :  { %v4477_v45 = vadd.f32 %v4476_v60, %v4428_v26  ;;  %v9838_v60 = vld [vmem:[#allocation13 + $0x18] sm:$0xff] }
 0x73b   :  { %v4503_v57 = vmax.f32 %v4477_v45, 0.0 }
 0x73d   :  { %v4481_v36 = vpop.f32.mrf.mxu0  ;;  %v12213_v0 = vpack.c.bf16 %v4503_v57, %v4502_v31 }
 0x73e   :  { %v4430_v42 = vpop.f32.mrf.mxu3 }
 0x73f   :  { %v4431_v23 = vadd.f32 %v12161_v61, %v4430_v42  ;;  %v4561_v42 = vunpack.c.l.b16 %v4555_v2 }
 0x741   :  { %v4480_v33 = vadd.f32 %v4479_v19, %v4431_v23  ;;  %v4526_v19 = vunpack.c.l.b16 %v4520_v41  ;;  %v4730_v23 = vld [vmem:[#allocation13 + $0x50] sm:$0x1] }
 0x743   :  { %v4504_v29 = vmax.f32 %v4480_v33, 0.0  ;;  %v9844_v33 = vld [vmem:[#allocation13 + $0x60] sm:$0xff] }
 0x745   :  { %v4484_v24 = vpop.f32.mrf.mxu0 }
 0x746   :  { %v4432_v32 = vpop.f32.mrf.mxu3 }
 0x747   :  { %v4433_v28 = vadd.f32 %v12161_v61, %v4432_v32  ;;  %v4528_v32 = vpack.c.b16 %v4526_v19, %v4526_v19 }
 0x749   :  { %v4482_v44 = vadd.f32 %v4481_v36, %v4433_v28  ;;  %v4596_v36 = vunpack.c.l.b16 %v4590_v54 }
 0x74b   :  { %v4505_v39 = vmax.f32 %v4482_v44, 0.0 }
 0x74d   :  { %v4486_v9 = vpop.f32.mrf.mxu0  ;;  %v12205_v18 = vpack.c.bf16 %v4505_v39, %v4504_v29 }
 0x74e   :  { %v4435_v25 = vpop.f32.mrf.mxu3 }
 0x74f   :  { %v4436_v53 = vadd.f32 %v12161_v61, %v4435_v25  ;;  %v4598_v25 = vpack.c.b16 %v4596_v36, %v4596_v36 }
 0x751   :  { %v4485_v48 = vadd.f32 %v4484_v24, %v4436_v53  ;;  %v4563_v24 = vpack.c.b16 %v4561_v42, %v4561_v42 }
 0x753   :  { %v4506_v16 = vmax.f32 %v4485_v48, 0.0  ;;  %v4765_v48 = vld [vmem:[#allocation13 + $0x5c] sm:$0x1] }
 0x755   :  { %v4489_v37 = vpop.f32.mrf.mxu0 }
 0x756   :  { %v4437_v6 = vpop.f32.mrf.mxu3 }
 0x757   :  { %v4438_v47 = vadd.f32 %v12161_v61, %v4437_v6  ;;  %v9840_v6 = vld [vmem:[#allocation13 + $0x30] sm:$0xff] }
 0x759   :  { %v4487_v4 = vadd.f32 %v4486_v9, %v4438_v47  ;;  %v9839_v9 = vld [vmem:[#allocation13 + $0x24] sm:$0xff] }
 0x75a   :  { %v4695_v47 = vld [vmem:[#allocation13 + $0x44] sm:$0x1] }
 0x75b   :  { %v4507_v35 = vmax.f32 %v4487_v4, 0.0  ;;  %v9842_v4 = vld [vmem:[#allocation13 + $0x48] sm:$0xff] }
 0x75d   :  { %v4491_v34 = vpop.f32.mrf.mxu0  ;;  %v12199_v21 = vpack.c.bf16 %v4507_v35, %v4506_v16 }
 0x75e   :  { %v4440_v8 = vpop.f32.mrf.mxu3 }
 0x75f   :  { %v4441_v49 = vadd.f32 %v12161_v61, %v4440_v8  ;;  %v4625_v8 = vld [vmem:[#allocation13 + $0x2c] sm:$0x1] }
 0x761   :  { %v4490_v13 = vadd.f32 %v4489_v37, %v4441_v49  ;;  %v9841_v37 = vld [vmem:[#allocation13 + $0x3c] sm:$0xff]  ;;  %v4660_v49 = vld [vmem:[#allocation13 + $0x38] sm:$0x1] }
 0x762   :  { %v4666_v53 = vunpack.c.l.b16 %v4660_v49 }
 0x763   :  { %v4508_v5 = vmax.f32 %v4490_v13, 0.0  ;;  %v4701_v13 = vunpack.c.l.b16 %v4695_v47 }
 0x765   :  { %v4703_v28 = vpack.c.b16 %v4701_v13, %v4701_v13 }
 0x766   :  { %v4442_v20 = vpop.f32.mrf.mxu3 }
 0x767   :  { %v4443_v40 = vadd.f32 %v12161_v61, %v4442_v20  ;;  %v4496_v61 = vmax.f32 %v12171_v62, 0.0  ;;  %v9836_v62 = vld [vmem:[#allocation13] sm:$0xff]  ;;  %v4631_v20 = vunpack.c.l.b16 %v4625_v8 }
 0x769   :  { %v4492_v56 = vadd.f32 %v4491_v34, %v4443_v40  ;;  %v12235_v10 = vpack.c.bf16 %v4497_v3, %v4496_v61  ;;  %v4633_v40 = vpack.c.b16 %v4631_v20, %v4631_v20  ;;  %v4668_v34 = vpack.c.b16 %v4666_v53, %v4666_v53 }
 0x76b   :  { %v4509_v30 = vmax.f32 %v4492_v56, 0.0  ;;  %v9843_v56 = vld [vmem:[#allocation13 + $0x54] sm:$0xff] }
 0x76d   :  { %v12193_v22 = vpack.c.bf16 %v4509_v30, %v4508_v5  ;;  %v4736_v5 = vunpack.c.l.b16 %v4730_v23  ;;  %v4771_v30 = vunpack.c.l.b16 %v4765_v48 }
 0x76f   :  { %4531 = vmatpush.bf16.msrb.mxu1 %v12193_v22  ;;  %4566 = vmatpush.bf16.msrb.mxu2 %v12193_v22  ;;  %v4738_v26 = vpack.c.b16 %v4736_v5, %v4736_v5  ;;  %v4773_v44 = vpack.c.b16 %v4771_v30, %v4771_v30 }
 0x770   :  { %4601 = vmatpush.bf16.msrb.mxu3 %v12193_v22 }
 0x773   :  { %4532 = vmatpush.bf16.msrb.mxu1 %v12199_v21  ;;  %4567 = vmatpush.bf16.msrb.mxu2 %v12199_v21 }
 0x774   :  { %4602 = vmatpush.bf16.msrb.mxu3 %v12199_v21 }
 0x777   :  { %4533 = vmatpush.bf16.msrb.mxu1 %v12205_v18  ;;  %4568 = vmatpush.bf16.msrb.mxu2 %v12205_v18 }
 0x778   :  { %4603 = vmatpush.bf16.msrb.mxu3 %v12205_v18 }
 0x77b   :  { %4534 = vmatpush.bf16.msrb.mxu1 %v12213_v0  ;;  %4569 = vmatpush.bf16.msrb.mxu2 %v12213_v0 }
 0x77c   :  { %4604 = vmatpush.bf16.msrb.mxu3 %v12213_v0 }
 0x77f   :  { %4535 = vmatpush.bf16.msrb.mxu1 %v12222_v46  ;;  %4570 = vmatpush.bf16.msrb.mxu2 %v12222_v46 }
 0x780   :  { %4605 = vmatpush.bf16.msrb.mxu3 %v12222_v46 }
 0x783   :  { %4536 = vmatpush.bf16.msrb.mxu1 %v12229_v15  ;;  %4571 = vmatpush.bf16.msrb.mxu2 %v12229_v15 }
 0x784   :  { %4606 = vmatpush.bf16.msrb.mxu3 %v12229_v15 }
 0x787   :  { %4537 = vmatpush.bf16.msrb.mxu1 %v12235_v10  ;;  %4572 = vmatpush.bf16.msrb.mxu2 %v12235_v10 }
 0x788   :  { %4607 = vmatpush.bf16.msrb.mxu3 %v12235_v10 }
 0x78b   :  { %4538 = vmatpush.bf16.msrb.mxu1 %v12241_v17  ;;  %4573 = vmatpush.bf16.msrb.mxu2 %v12241_v17 }
 0x78c   :  { %4608 = vmatpush.bf16.msrb.mxu3 %v12241_v17 }
 0x78e   :  { %4539 = vmatmul.bf16.vlgmr.msrb.gmra.mxu1 %v9836_v62  ;;  %4574 = vmatmul.bf16.vlgmr.msrb.gmra.mxu2 %v9837_v11 }
 0x78f   :  { %4636 = vmatpush.bf16.msra.mxu1 %v12193_v22  ;;  %4671 = vmatpush.bf16.msra.mxu2 %v12193_v22 }
 0x790   :  { %4706 = vmatpush.bf16.msra.mxu3 %v12193_v22 }
 0x791   :  { %4609 = vmatmul.bf16.vlgmr.msrb.gmra.mxu3 %v9838_v60 }
 0x793   :  { %4637 = vmatpush.bf16.msra.mxu1 %v12199_v21  ;;  %4672 = vmatpush.bf16.msra.mxu2 %v12199_v21 }
 0x794   :  { %4707 = vmatpush.bf16.msra.mxu3 %v12199_v21 }
 0x797   :  { %4638 = vmatpush.bf16.msra.mxu1 %v12205_v18  ;;  %4673 = vmatpush.bf16.msra.mxu2 %v12205_v18 }
 0x798   :  { %4708 = vmatpush.bf16.msra.mxu3 %v12205_v18 }
 0x79b   :  { %4639 = vmatpush.bf16.msra.mxu1 %v12213_v0  ;;  %4674 = vmatpush.bf16.msra.mxu2 %v12213_v0 }
 0x79c   :  { %4709 = vmatpush.bf16.msra.mxu3 %v12213_v0 }
 0x79e   :  { %4544 = vmatmul.bf16.gmra.mxu1 %v4528_v32  ;;  %4579 = vmatmul.bf16.gmra.mxu2 %v4563_v24 }
 0x79f   :  { %4640 = vmatpush.bf16.msra.mxu1 %v12222_v46  ;;  %4675 = vmatpush.bf16.msra.mxu2 %v12222_v46 }
 0x7a0   :  { %4710 = vmatpush.bf16.msra.mxu3 %v12222_v46 }
 0x7a1   :  { %4614 = vmatmul.bf16.gmra.mxu3 %v4598_v25 }
 0x7a3   :  { %4641 = vmatpush.bf16.msra.mxu1 %v12229_v15  ;;  %4676 = vmatpush.bf16.msra.mxu2 %v12229_v15 }
 0x7a4   :  { %4711 = vmatpush.bf16.msra.mxu3 %v12229_v15 }
 0x7a7   :  { %4642 = vmatpush.bf16.msra.mxu1 %v12235_v10  ;;  %4677 = vmatpush.bf16.msra.mxu2 %v12235_v10 }
 0x7a8   :  { %4712 = vmatpush.bf16.msra.mxu3 %v12235_v10 }
 0x7ab   :  { %4643 = vmatpush.bf16.msra.mxu1 %v12241_v17  ;;  %4678 = vmatpush.bf16.msra.mxu2 %v12241_v17 }
 0x7ac   :  { %4713 = vmatpush.bf16.msra.mxu3 %v12241_v17 }
 0x7ae   :  { %4644 = vmatmul.bf16.vlgmr.msra.gmra.mxu1 %v9839_v9  ;;  %4679 = vmatmul.bf16.vlgmr.msra.gmra.mxu2 %v9840_v6 }
 0x7af   :  { %4741 = vmatpush.bf16.msrb.mxu1 %v12193_v22  ;;  %4776 = vmatpush.bf16.msrb.mxu2 %v12193_v22 }
 0x7b0   :  { %4811 = vmatpush.bf16.msrb.mxu3 %v12193_v22 }
 0x7b1   :  { %4714 = vmatmul.bf16.vlgmr.msra.gmra.mxu3 %v9841_v37 }
 0x7b3   :  { %4742 = vmatpush.bf16.msrb.mxu1 %v12199_v21  ;;  %4777 = vmatpush.bf16.msrb.mxu2 %v12199_v21 }
 0x7b4   :  { %4812 = vmatpush.bf16.msrb.mxu3 %v12199_v21 }
 0x7b7   :  { %4743 = vmatpush.bf16.msrb.mxu1 %v12205_v18  ;;  %4778 = vmatpush.bf16.msrb.mxu2 %v12205_v18 }
 0x7b8   :  { %4813 = vmatpush.bf16.msrb.mxu3 %v12205_v18 }
 0x7bb   :  { %4744 = vmatpush.bf16.msrb.mxu1 %v12213_v0  ;;  %4779 = vmatpush.bf16.msrb.mxu2 %v12213_v0 }
 0x7bc   :  { %4814 = vmatpush.bf16.msrb.mxu3 %v12213_v0 }
 0x7be   :  { %4649 = vmatmul.bf16.gmra.mxu1 %v4633_v40  ;;  %4684 = vmatmul.bf16.gmra.mxu2 %v4668_v34 }
 0x7bf   :  { %4745 = vmatpush.bf16.msrb.mxu1 %v12222_v46  ;;  %4780 = vmatpush.bf16.msrb.mxu2 %v12222_v46 }
 0x7c0   :  { %4815 = vmatpush.bf16.msrb.mxu3 %v12222_v46 }
 0x7c1   :  { %4719 = vmatmul.bf16.gmra.mxu3 %v4703_v28 }
 0x7c3   :  { %4746 = vmatpush.bf16.msrb.mxu1 %v12229_v15  ;;  %4781 = vmatpush.bf16.msrb.mxu2 %v12229_v15 }
 0x7c4   :  { %4816 = vmatpush.bf16.msrb.mxu3 %v12229_v15 }
 0x7c7   :  { %4747 = vmatpush.bf16.msrb.mxu1 %v12235_v10  ;;  %4782 = vmatpush.bf16.msrb.mxu2 %v12235_v10 }
 0x7c8   :  { %4817 = vmatpush.bf16.msrb.mxu3 %v12235_v10 }
 0x7cb   :  { %4748 = vmatpush.bf16.msrb.mxu1 %v12241_v17  ;;  %4783 = vmatpush.bf16.msrb.mxu2 %v12241_v17 }
 0x7cc   :  { %4818 = vmatpush.bf16.msrb.mxu3 %v12241_v17  ;;  %v4806_v17 = vunpack.c.l.b16 %v4800_v1 }
 0x7ce   :  { %4749 = vmatmul.bf16.vlgmr.msrb.gmra.mxu1 %v9842_v4  ;;  %4784 = vmatmul.bf16.vlgmr.msrb.gmra.mxu2 %v9843_v56  ;;  %v4808_v11 = vpack.c.b16 %v4806_v17, %v4806_v17 }
 0x7d1   :  { %4819 = vmatmul.bf16.vlgmr.msrb.gmra.mxu3 %v9844_v33 }
 0x7de   :  { %4754 = vmatmul.bf16.gmra.mxu1 %v4738_v26  ;;  %4789 = vmatmul.bf16.gmra.mxu2 %v4773_v44 }
 0x7e1   :  { %4824 = vmatmul.bf16.gmra.mxu3 %v4808_v11 }
 0x80b   :  { %v12294_v35 = vpop.f32.mrf.mxu1 }
 0x811   :  { %v4575_v22 = vpop.f32.mrf.mxu2 }
 0x812   :  { %v4584_v39 = vpack.c.bf16 %v4575_v22, %v4575_v22 }
 0x813   :  { %v12296_v52 = vpop.f32.mrf.mxu1 }
 0x814   :  { %v4610_v16 = vpop.f32.mrf.mxu3  ;;  %v4843_v31 = vunpack.c.l.b16 %v4584_v39 }
 0x815   :  { %v4619_v45 = vpack.c.bf16 %v4610_v16, %v4610_v16 }
 0x817   :  { %v4855_v12 = vunpack.c.l.b16 %v4619_v45 }
 0x819   :  { %v4577_v21 = vpop.f32.mrf.mxu2 }
 0x81a   :  { %v4585_v29 = vpack.c.bf16 %v4577_v21, %v4577_v21 }
 0x81b   :  { %v12298_v18 = vpop.f32.mrf.mxu1 }
 0x81c   :  { %v4612_v63 = vpop.f32.mrf.mxu3  ;;  %v4844_v27 = vunpack.c.l.b16 %v4585_v29 }
 0x81d   :  { %v4620_v57 = vpack.c.bf16 %v4612_v63, %v4612_v63 }
 0x81e   :  { %v4846_v43 = vpack.c.b16 %v4844_v27, %v4843_v31 }
 0x81f   :  { %v4856_v59 = vunpack.c.l.b16 %v4620_v57 }
 0x820   :  { %4848 = vrot.lane.b32.xlu0 %v4846_v43, %s10783_s13 }
 0x821   :  { %v4858_v0 = vpack.c.b16 %v4856_v59, %v4855_v12  ;;  %v4580_v7 = vpop.f32.mrf.mxu2 }
 0x822   :  { %v4586_v51 = vpack.c.bf16 %v4580_v7, %v4580_v7 }
 0x823   :  { %4860 = vrot.lane.b32.xlu2 %v4858_v0, %s10803_s26  ;;  %v4547_v46 = vpop.f32.mrf.mxu1 }
 0x824   :  { %v4615_v55 = vpop.f32.mrf.mxu3  ;;  %v4845_v58 = vunpack.c.l.b16 %v4586_v51 }
 0x825   :  { %v4621_v38 = vpack.c.bf16 %v4615_v55, %v4615_v55 }
 0x826   :  { %v4847_v3 = vpack.c.b16 %v4845_v58, %v4845_v58 }
 0x827   :  { %v4857_v14 = vunpack.c.l.b16 %v4621_v38 }
 0x828   :  { %4850 = vrot.lane.b32.xlu0 %v4847_v3, %s10783_s13  ;;  %s12697_s13 = sld [smem:[#allocation57_spill]] }
 0x829   :  { %v4859_v15 = vpack.c.b16 %v4857_v14, %v4857_v14  ;;  %v4582_v61 = vpop.f32.mrf.mxu2 }
 0x82b   :  { %4862 = vrot.lane.b32.xlu1 %v4859_v15, %s10803_s26  ;;  %v4645_v10 = vpop.f32.mrf.mxu1 }
 0x82c   :  { %v4617_v50 = vpop.f32.mrf.mxu3  ;;  %v4654_v62 = vpack.c.bf16 %v4645_v10, %v4645_v10 }
 0x82e   :  { %v4867_v54 = vunpack.c.l.b16 %v4654_v62  ;;  %v9852_v62 = vld [vmem:[%s12697_s13 + $0x38] sm:$0xff] }
 0x82f   :  { %10010 = vmatpush.bf16.msra.mxu3 %v9852_v62  ;;  %5046 = vmatpush.bf16.msra.mxu1 %v9852_v62 }
 0x831   :  { %v4680_v60 = vpop.f32.mrf.mxu2 }
 0x832   :  { %v4689_v32 = vpack.c.bf16 %v4680_v60, %v4680_v60 }
 0x833   :  { %v4647_v2 = vpop.f32.mrf.mxu1 }
 0x834   :  { %v4715_v41 = vpop.f32.mrf.mxu3  ;;  %v4655_v19 = vpack.c.bf16 %v4647_v2, %v4647_v2  ;;  %v4879_v8 = vunpack.c.l.b16 %v4689_v32  ;;  %v9850_v32 = vld [vmem:[%s12697_s13 + $0x28] sm:$0xff] }
 0x835   :  { %v4724_v27 = vpack.c.bf16 %v4715_v41, %v4715_v41  ;;  %v9851_v41 = vld [vmem:[%s12697_s13 + $0x30] sm:$0xff] }
 0x836   :  { %v4868_v42 = vunpack.c.l.b16 %v4655_v19  ;;  %10011 = vmatpush.bf16.msra.mxu3 %v9851_v41  ;;  %5047 = vmatpush.bf16.msra.mxu1 %v9851_v41 }
 0x837   :  { %v4891_v55 = vunpack.c.l.b16 %v4724_v27 }
 0x838   :  { %v4870_v36 = vpack.c.b16 %v4868_v42, %v4867_v54  ;;  %v9853_v54 = vld [vmem:[%s12697_s13 + $0x40] sm:$0xff] }
 0x839   :  { %v4682_v24 = vpop.f32.mrf.mxu2  ;;  %5071 = vmatpush.bf16.msra.mxu2 %v9853_v54 }
 0x83a   :  { %4872 = vrot.lane.b32.xlu1 %v4870_v36, %s10805_s28  ;;  %v4690_v9 = vpack.c.bf16 %v4682_v24, %v4682_v24  ;;  %10012 = vmatpush.bf16.msra.mxu3 %v9850_v32  ;;  %v9849_v24 = vld [vmem:[%s12697_s13 + $0x20] sm:$0xff] }
 0x83b   :  { %v4650_v6 = vpop.f32.mrf.mxu1  ;;  %5048 = vmatpush.bf16.msra.mxu1 %v9850_v32  ;;  %v8932_v32 = vld [vmem:[%s12698_s27 + $0x14] sm:$0x1] }
 0x83c   :  { %v4717_v25 = vpop.f32.mrf.mxu3  ;;  %v4656_v37 = vpack.c.bf16 %v4650_v6, %v4650_v6  ;;  %v4880_v49 = vunpack.c.l.b16 %v4690_v9  ;;  %v9847_v9 = vld [vmem:[%s12697_s13 + $0x10] sm:$0xff]  ;;  %v9846_v6 = vld [vmem:[%s12697_s13 + $0x8] sm:$0xff] }
 0x83d   :  { %v4725_v59 = vpack.c.bf16 %v4717_v25, %v4717_v25  ;;  %v9848_v25 = vld [vmem:[%s12697_s13 + $0x18] sm:$0xff] }
 0x83e   :  { %v4869_v47 = vunpack.c.l.b16 %v4656_v37  ;;  %v4882_v20 = vpack.c.b16 %v4880_v49, %v4879_v8  ;;  %10013 = vmatpush.bf16.msra.mxu3 %v9849_v24  ;;  %v9845_v49 = vld [vmem:[%s12697_s13] sm:$0xff] }
 0x83f   :  { %v4892_v38 = vunpack.c.l.b16 %v4725_v59  ;;  %5049 = vmatpush.bf16.msra.mxu1 %v9849_v24 }
 0x840   :  { %v4871_v53 = vpack.c.b16 %v4869_v47, %v4869_v47  ;;  %4884 = vrot.lane.b32.xlu0 %v4882_v20, %s10772_s11 }
 0x841   :  { %v4685_v13 = vpop.f32.mrf.mxu2  ;;  %v4894_v3 = vpack.c.b16 %v4892_v38, %v4891_v55 }
 0x842   :  { %4874 = vrot.lane.b32.xlu2 %v4871_v53, %s10805_s28  ;;  %v4691_v34 = vpack.c.bf16 %v4685_v13, %v4685_v13  ;;  %10014 = vmatpush.bf16.msra.mxu3 %v9848_v25 }
 0x843   :  { %v4652_v4 = vpop.f32.mrf.mxu1  ;;  %5050 = vmatpush.bf16.msra.mxu1 %v9848_v25 }
 0x844   :  { %v4720_v40 = vpop.f32.mrf.mxu3  ;;  %v4881_v56 = vunpack.c.l.b16 %v4691_v34 }
 0x845   :  { %v4726_v28 = vpack.c.bf16 %v4720_v40, %v4720_v40 }
 0x846   :  { %v4883_v5 = vpack.c.b16 %v4881_v56, %v4881_v56  ;;  %10015 = vmatpush.bf16.msra.mxu3 %v9847_v9 }
 0x847   :  { %v4893_v23 = vunpack.c.l.b16 %v4726_v28  ;;  %5051 = vmatpush.bf16.msra.mxu1 %v9847_v9  ;;  %v4551_v28 = vpack.c.bf16 %v12298_v18, %v12298_v18 }
 0x848   :  { %4886 = vrot.lane.b32.xlu1 %v4883_v5, %s10772_s11 }
 0x849   :  { %v4895_v48 = vpack.c.b16 %v4893_v23, %v4893_v23  ;;  %v4687_v30 = vpop.f32.mrf.mxu2  ;;  %v4837_v56 = vunpack.c.l.b16 %v4551_v28  ;;  %v9859_v28 = vld [vmem:[%s12698_s27 + $0x3c] sm:$0xff] }
 0x84a   :  { %10016 = vmatpush.bf16.msra.mxu3 %v9846_v6 }
 0x84b   :  { %4898 = vrot.lane.b32.xlu0 %v4895_v48, %s10808_s2  ;;  %v4750_v44 = vpop.f32.mrf.mxu1  ;;  %5052 = vmatpush.bf16.msra.mxu1 %v9846_v6  ;;  %v4839_v5 = vpack.c.b16 %v4837_v56, %v4837_v56  ;;  %v5139_v6 = vunpack.c.l.b16 %v8932_v32  ;;  %v8968_v56 = vld [vmem:[%s12698_s27 + $0x44] sm:$0x1] }
 0x84c   :  { %v4722_v26 = vpop.f32.mrf.mxu3  ;;  %v4759_v22 = vpack.c.bf16 %v4750_v44, %v4750_v44 }
 0x84e   :  { %v4903_v45 = vunpack.c.l.b16 %v4759_v22  ;;  %10017 = vmatpush.bf16.msra.mxu3 %v9845_v49  ;;  %v4549_v22 = vpack.c.bf16 %v12294_v35, %v12294_v35 }
 0x84f   :  { %5053 = vmatpush.bf16.msra.mxu1 %v9845_v49  ;;  %v9854_v49 = vld [vmem:[%s12698_s27] sm:$0xff] }
 0x851   :  { %v4785_v33 = vpop.f32.mrf.mxu2 }
 0x852   :  { %v4794_v15 = vpack.c.bf16 %v4785_v33, %v4785_v33  ;;  %v4550_v33 = vpack.c.bf16 %v12296_v52, %v12296_v52 }
 0x853   :  { %v4752_v16 = vpop.f32.mrf.mxu1 }
 0x854   :  { %v4760_v39 = vpack.c.bf16 %v4752_v16, %v4752_v16  ;;  %v4915_v10 = vunpack.c.l.b16 %v4794_v15  ;;  %v4820_v17 = vpop.f32.mrf.mxu3 }
 0x855   :  { %v4829_v60 = vpack.c.bf16 %v4820_v17, %v4820_v17 }
 0x856   :  { %v4904_v21 = vunpack.c.l.b16 %v4760_v39 }
 0x857   :  { %v4927_v19 = vunpack.c.l.b16 %v4829_v60 }
 0x858   :  { %v4906_v29 = vpack.c.b16 %v4904_v21, %v4903_v45 }
 0x859   :  { %v4787_v63 = vpop.f32.mrf.mxu2 }
 0x85a   :  { %4908 = vrot.lane.b32.xlu0 %v4906_v29, %s10807_s17  ;;  %v4795_v58 = vpack.c.bf16 %v4787_v63, %v4787_v63  ;;  %v4835_v29 = vunpack.c.l.b16 %v4549_v22  ;;  %v4836_v63 = vunpack.c.l.b16 %v4550_v33 }
 0x85b   :  { %v4755_v12 = vpop.f32.mrf.mxu1 }
 0x85c   :  { %v4761_v57 = vpack.c.bf16 %v4755_v12, %v4755_v12  ;;  %v4916_v50 = vunpack.c.l.b16 %v4795_v58  ;;  %v4822_v11 = vpop.f32.mrf.mxu3 }
 0x85d   :  { %v4830_v2 = vpack.c.bf16 %v4822_v11, %v4822_v11 }
 0x85e   :  { %v4905_v31 = vunpack.c.l.b16 %v4761_v57  ;;  %v4918_v1 = vpack.c.b16 %v4916_v50, %v4915_v10  ;;  %v4838_v57 = vpack.c.b16 %v4836_v63, %v4835_v29  ;;  %v10096_v50 = vld [vmem:[#allocation14] ss:$0 sm:$0xff]  ;;  %v8986_v29 = vld [vmem:[%s12698_s27 + $0x5c] sm:$0x1] }
 0x85f   :  { %v4928_v42 = vunpack.c.l.b16 %v4830_v2  ;;  %v5373_v63 = vunpack.c.l.b16 %v8986_v29 }
 0x860   :  { %v4907_v43 = vpack.c.b16 %v4905_v31, %v4905_v31 }
 0x861   :  { %v4790_v0 = vpop.f32.mrf.mxu2  ;;  %v4930_v36 = vpack.c.b16 %v4928_v42, %v4927_v19 }
 0x862   :  { %4910 = vrot.lane.b32.xlu2 %v4907_v43, %s10807_s17  ;;  %v4796_v7 = vpack.c.bf16 %v4790_v0, %v4790_v0 }
 0x863   :  { %v4757_v51 = vpop.f32.mrf.mxu1  ;;  %8922 = vmatmul.msk.bf16.vlgmr.msra.gmra.mxu2 %vm2271_vm1, %v4930_v36 }
 0x864   :  { %v4917_v46 = vunpack.c.l.b16 %v4796_v7  ;;  %v4825_v37 = vpop.f32.mrf.mxu3 }
 0x865   :  { %v4831_v8 = vpack.c.bf16 %v4825_v37, %v4825_v37 }
 0x866   :  { %v4919_v14 = vpack.c.b16 %v4917_v46, %v4917_v46 }
 0x867   :  { %v4929_v47 = vunpack.c.l.b16 %v4831_v8  ;;  %v5141_v8 = vpack.c.b16 %v5139_v6, %v5139_v6 }
 0x868   :  { %4922 = vrot.lane.b32.xlu1 %v4919_v14, %s10806_s6 }
 0x869   :  { %v4792_v61 = vpop.f32.mrf.mxu2  ;;  %v4931_v53 = vpack.c.b16 %v4929_v47, %v4929_v47  ;;  %v9856_v47 = vld [vmem:[%s12698_s27 + $0x18] sm:$0xff] }
 0x86a   :  { %4896 = vrot.lane.b32.xlu2 %v4894_v3, %s10808_s2 }
 0x86c   :  { %v4827_v13 = vpop.f32.mrf.mxu3 }
 0x870   :  { %4920 = vrot.lane.b32.xlu1 %v4918_v1, %s10806_s6 }
 0x873   :  { %8923 = vmatmul.msk.bf16.gmra.mxu2 %vm2271_vm1, %v4931_v53  ;;  %v8941_v53 = vld [vmem:[%s12698_s27 + $0x20] sm:$0x1] }
 0x874   :  { %v5178_v13 = vunpack.c.l.b16 %v8941_v53 }
 0x87d   :  { %v4861_v4 = vpop.permute.xlu2 %4860 }
 0x892   :  { %v4849_v20 = vpop.permute.xlu0 %4848 }
 0x893   :  { %v4934_v35 = vsel %vm2271_vm1, %v4838_v57, %v4849_v20  ;;  %v9855_v20 = vld [vmem:[%s12698_s27 + $0xc] sm:$0xff]  ;;  %v8959_v57 = vld [vmem:[%s12698_s27 + $0x38] sm:$0x1] }
 0x894   :  { %v4939_v52 = vsel %vm2305_vm4, %v4934_v35, %v4861_v4  ;;  %v8950_v4 = vld [vmem:[%s12698_s27 + $0x2c] sm:$0x1]  ;;  %v9862_v35 = vld [vmem:[%s12698_s27 + $0x60] sm:$0xff] }
 0x89a   :  { %v4851_v34 = vpop.permute.xlu0 %4850 }
 0x89b   :  { %v4937_v26 = vsel %vm2271_vm1, %v4839_v5, %v4851_v34  ;;  %v5180_v34 = vpack.c.b16 %v5178_v13, %v5178_v13 }
 0x89c   :  { %v4875_v30 = vpop.permute.xlu2 %4874 }
 0x89d   :  { %v4863_v40 = vpop.permute.xlu1 %4862 }
 0x89e   :  { %v4941_v44 = vsel %vm2305_vm4, %v4937_v26, %v4863_v40  ;;  %v9857_v40 = vld [vmem:[%s12698_s27 + $0x24] sm:$0xff] }
 0x89f   :  { %v4945_v45 = vsel %vm2339_vm6, %v4941_v44, %v4875_v30  ;;  %v9860_v30 = vld [vmem:[%s12698_s27 + $0x48] sm:$0xff] }
 0x8a0   :  { %v5089_v44 = vld [vmem:[%s12698_s27 + $0x8] sm:$0x1] }
 0x8a1   :  { %v5095_v22 = vunpack.c.l.b16 %v5089_v44 }
 0x8a3   :  { %v5097_v33 = vpack.c.b16 %v5095_v22, %v5095_v22 }
 0x8ac   :  { %v4873_v23 = vpop.permute.xlu1 %4872 }
 0x8ad   :  { %v4943_v0 = vsel %vm2339_vm6, %v4939_v52, %v4873_v23  ;;  %v5217_v23 = vunpack.c.l.b16 %v8950_v4 }
 0x8af   :  { %v5219_v5 = vpack.c.b16 %v5217_v23, %v5217_v23 }
 0x8b2   :  { %v4885_v48 = vpop.permute.xlu0 %4884 }
 0x8b3   :  { %v4947_v51 = vsel %vm2373_vm8, %v4943_v0, %v4885_v48  ;;  %v5295_v48 = vunpack.c.l.b16 %v8968_v56 }
 0x8b5   :  { %v5297_v26 = vpack.c.b16 %v5295_v48, %v5295_v48 }
 0x8ba   :  { %v4887_v16 = vpop.permute.xlu1 %4886 }
 0x8bb   :  { %v4949_v18 = vsel %vm2373_vm8, %v4945_v45, %v4887_v16  ;;  %v8977_v16 = vld [vmem:[%s12698_s27 + $0x50] sm:$0x1] }
 0x8bc   :  { %v4911_v21 = vpop.permute.xlu2 %4910  ;;  %v5334_v45 = vunpack.c.l.b16 %v8977_v16 }
 0x8bd   :  { %v4899_v39 = vpop.permute.xlu0 %4898 }
 0x8be   :  { %v4953_v12 = vsel %vm4237_vm10, %v4949_v18, %v4899_v39  ;;  %v9861_v18 = vld [vmem:[%s12698_s27 + $0x54] sm:$0xff]  ;;  %v5336_v39 = vpack.c.b16 %v5334_v45, %v5334_v45 }
 0x8bf   :  { %v4957_v31 = vsel %vm4254_vm11, %v4953_v12, %v4911_v21  ;;  %v9858_v21 = vld [vmem:[%s12698_s27 + $0x30] sm:$0xff]  ;;  %v5375_v12 = vpack.c.b16 %v5373_v63, %v5373_v63 }
 0x8c4   :  { %v4897_v43 = vpop.permute.xlu2 %4896 }
 0x8c5   :  { %v4951_v55 = vsel %vm4237_vm10, %v4947_v51, %v4897_v43 }
 0x8cc   :  { %v4909_v7 = vpop.permute.xlu0 %4908 }
 0x8cd   :  { %v4955_v38 = vsel %vm4254_vm11, %v4951_v55, %v4909_v7 }
 0x8da   :  { %v4923_v27 = vpop.permute.xlu1 %4922 }
 0x8db   :  { %v4962_v59 = vsel %vm4271_vm12, %v4957_v31, %v4923_v27  ;;  %v5256_v31 = vunpack.c.l.b16 %v8959_v57 }
 0x8dc   :  { %5059 = vmatmul.bf16.vlgmr.msra.gmra.mxu3 %v4962_v59 }
 0x8dd   :  { %v5258_v27 = vpack.c.b16 %v5256_v31, %v5256_v31 }
 0x8e2   :  { %v4921_v46 = vpop.permute.xlu1 %4920 }
 0x8e3   :  { %v4959_v58 = vsel %vm4271_vm12, %v4955_v38, %v4921_v46 }
 0x8e4   :  { %5054 = vmatmul.bf16.vlgmr.msra.gmra.mxu1 %v4959_v58 }
 0x8e6   :  { %v5073_v14 = vpop.f32.mrf.mxu2 }
 0x8ee   :  { %v5075_v3 = vpop.f32.mrf.mxu2 }
 0x8f6   :  { %v5078_v15 = vpop.f32.mrf.mxu2 }
 0x8fe   :  { %v5080_v61 = vpop.f32.mrf.mxu2 }
 0x95f   :  { %v5060_v10 = vpop.f32.mrf.mxu3 }
 0x960   :  { %v5061_v1 = vadd.f32 %v10096_v50, %v5060_v10 }
 0x961   :  { %v5055_v17 = vpop.f32.mrf.mxu1 }
 0x962   :  { %v5079_v62 = vadd.f32 %v5078_v15, %v5061_v1  ;;  %v5056_v60 = vadd.f32 %v10096_v50, %v5055_v17  ;;  %v8995_v1 = vld [vmem:[%s12698_s27 + $0x68] sm:$0x1] }
 0x963   :  { %v5412_v17 = vunpack.c.l.b16 %v8995_v1 }
 0x964   :  { %v5084_v11 = vmax.f32 %v5079_v62, 0.0  ;;  %v5074_v42 = vadd.f32 %v5073_v14, %v5056_v60 }
 0x965   :  { %v5414_v60 = vpack.c.b16 %v5412_v17, %v5412_v17 }
 0x966   :  { %v5086_v41 = vpack.c.bf16 %v5084_v11, %v5084_v11  ;;  %v5082_v25 = vmax.f32 %v5074_v42, 0.0 }
 0x967   :  { %v5062_v2 = vpop.f32.mrf.mxu3 }
 0x968   :  { %v5107_v54 = vsel %vm5105_vm13, %v5086_v41, 0 }
 0x969   :  { %v5057_v19 = vpop.f32.mrf.mxu1  ;;  %5115 = vmatpush.bf16.msrb.mxu3 %v5107_v54  ;;  %5154 = vmatpush.bf16.msra.mxu0 %v5107_v54 }
 0x96a   :  { %v5058_v36 = vadd.f32 %v10096_v50, %v5057_v19  ;;  %10018 = vmatpush.bf16.msrb.mxu2 %v5107_v54  ;;  %5193 = vmatpush.bf16.msrb.mxu1 %v5107_v54 }
 0x96c   :  { %v5076_v24 = vadd.f32 %v5075_v3, %v5058_v36 }
 0x96e   :  { %v5083_v9 = vmax.f32 %v5076_v24, 0.0 }
 0x970   :  { %v5085_v37 = vpack.c.bf16 %v5083_v9, %v5082_v25 }
 0x972   :  { %5116 = vmatpush.bf16.msrb.mxu3 %v5085_v37  ;;  %5155 = vmatpush.bf16.msra.mxu0 %v5085_v37 }
 0x973   :  { %10019 = vmatpush.bf16.msrb.mxu2 %v5085_v37  ;;  %5194 = vmatpush.bf16.msrb.mxu1 %v5085_v37 }
 0x975   :  { %8928 = vmatmul.msk.bf16.vlgmr.msrb.gmra.mxu3 %vm5098_vm14, %v9854_v49  ;;  %8937 = vmatmul.msk.bf16.vlgmr.msra.gmra.mxu0 %vm5098_vm14, %v9855_v20 }
 0x976   :  { %5271 = vmatpush.bf16.msra.mxu3 %v5107_v54  ;;  %5310 = vmatpush.bf16.msrb.mxu0 %v5107_v54 }
 0x977   :  { %5232 = vmatpush.bf16.msra.mxu2 %v5107_v54  ;;  %5349 = vmatpush.bf16.msra.mxu1 %v5107_v54 }
 0x978   :  { %8938 = vmatmul.msk.bf16.vlgmr.msrb.gmra.mxu2 %vm5098_vm14, %v5141_v8  ;;  %8946 = vmatmul.msk.bf16.vlgmr.msrb.gmra.mxu1 %vm5098_vm14, %v9856_v47 }
 0x97a   :  { %5272 = vmatpush.bf16.msra.mxu3 %v5085_v37  ;;  %5311 = vmatpush.bf16.msrb.mxu0 %v5085_v37 }
 0x97b   :  { %5233 = vmatpush.bf16.msra.mxu2 %v5085_v37  ;;  %5350 = vmatpush.bf16.msra.mxu1 %v5085_v37 }
 0x97e   :  { %5427 = vmatpush.bf16.msrb.mxu3 %v5107_v54 }
 0x97f   :  { %5388 = vmatpush.bf16.msrb.mxu2 %v5107_v54 }
 0x982   :  { %5428 = vmatpush.bf16.msrb.mxu3 %v5085_v37 }
 0x983   :  { %5389 = vmatpush.bf16.msrb.mxu2 %v5085_v37 }
 0x985   :  { %8973 = vmatmul.msk.bf16.vlgmr.msrb.gmra.mxu0 %vm5098_vm14, %v9859_v28  ;;  %8929 = vmatmul.msk.bf16.gmra.mxu3 %vm5098_vm14, %v5097_v33 }
 0x988   :  { %8955 = vmatmul.msk.bf16.vlgmr.msra.gmra.mxu2 %vm5098_vm14, %v9857_v40  ;;  %8947 = vmatmul.msk.bf16.gmra.mxu1 %vm5098_vm14, %v5180_v34 }
 0x995   :  { %8974 = vmatmul.msk.bf16.gmra.mxu0 %vm5098_vm14, %v5297_v26  ;;  %8964 = vmatmul.msk.bf16.vlgmr.msra.gmra.mxu3 %vm5098_vm14, %v9858_v21 }
 0x998   :  { %8956 = vmatmul.msk.bf16.gmra.mxu2 %vm5098_vm14, %v5219_v5  ;;  %8982 = vmatmul.msk.bf16.vlgmr.msra.gmra.mxu1 %vm5098_vm14, %v9860_v30 }
 0x9a5   :  { %8965 = vmatmul.msk.bf16.gmra.mxu3 %vm5098_vm14, %v5258_v27 }
 0x9a8   :  { %8991 = vmatmul.msk.bf16.vlgmr.msrb.gmra.mxu2 %vm5098_vm14, %v9861_v18  ;;  %8983 = vmatmul.msk.bf16.gmra.mxu1 %vm5098_vm14, %v5336_v39 }
 0x9b5   :  { %9000 = vmatmul.msk.bf16.vlgmr.msrb.gmra.mxu3 %vm5098_vm14, %v9862_v35 }
 0x9b8   :  { %8992 = vmatmul.msk.bf16.gmra.mxu2 %vm5098_vm14, %v5375_v12 }
 0x9c5   :  { %9001 = vmatmul.msk.bf16.gmra.mxu3 %vm5098_vm14, %v5414_v60 }
 0x9f2   :  { %v5157_v52 = vpop.f32.mrf.mxu0 }
 0x9f3   :  { %v5166_v7 = vpack.c.bf16 %v5157_v52, %v5157_v52 }
 0x9f5   :  { %v5196_v59 = vpop.f32.mrf.mxu1  ;;  %v5453_v58 = vunpack.c.l.b16 %v5166_v7  ;;  %v9870_v7 = vld [vmem:[#allocation16 + $0x38] sm:$0xff] }
 0x9f6   :  { %v5205_v0 = vpack.c.bf16 %v5196_v59, %v5196_v59  ;;  %5724 = vmatpush.bf16.msra.mxu0 %v9870_v7 }
 0x9f8   :  { %v5465_v38 = vunpack.c.l.b16 %v5205_v0  ;;  %v12389_v21 = vpop.f32.mrf.mxu3 }
 0x9fa   :  { %v5159_v55 = vpop.f32.mrf.mxu0 }
 0x9fb   :  { %v5162_v43 = vpop.f32.mrf.mxu2  ;;  %v5167_v14 = vpack.c.bf16 %v5159_v55, %v5159_v55 }
 0x9fc   :  { %v5168_v25 = vpack.c.bf16 %v5162_v43, %v5162_v43 }
 0x9fd   :  { %v5198_v51 = vpop.f32.mrf.mxu1  ;;  %v5454_v15 = vunpack.c.l.b16 %v5167_v14 }
 0x9fe   :  { %v5206_v46 = vpack.c.bf16 %v5198_v51, %v5198_v51  ;;  %v5455_v53 = vunpack.c.l.b16 %v5168_v25  ;;  %v9864_v25 = vld [vmem:[#allocation16 + $0x8] sm:$0xff] }
 0x9ff   :  { %v5456_v10 = vpack.c.b16 %v5454_v15, %v5453_v58 }
 0xa00   :  { %v5466_v3 = vunpack.c.l.b16 %v5206_v46  ;;  %v5457_v34 = vpack.c.b16 %v5455_v53, %v5455_v53  ;;  %v12392_v35 = vpop.f32.mrf.mxu3  ;;  %v9879_v53 = vld [vmem:[#allocation16 + $0x80] sm:$0xff] }
 0xa01   :  { %5458 = vrot.lane.b32.xlu2 %v5456_v10, %s10803_s26 }
 0xa02   :  { %v5468_v50 = vpack.c.b16 %v5466_v3, %v5465_v38  ;;  %v5313_v11 = vpop.f32.mrf.mxu0  ;;  %v9869_v38 = vld [vmem:[#allocation16 + $0x30] sm:$0xff] }
 0xa03   :  { %v5164_v61 = vpop.f32.mrf.mxu2  ;;  %v5322_v2 = vpack.c.bf16 %v5313_v11, %v5313_v11  ;;  %5725 = vmatpush.bf16.msra.mxu0 %v9869_v38  ;;  %v9877_v11 = vld [vmem:[#allocation16 + $0x70] sm:$0xff] }
 0xa04   :  { %5470 = vrot.lane.b32.xlu0 %v5468_v50, %s10772_s11  ;;  %v9868_v61 = vld [vmem:[#allocation16 + $0x28] sm:$0xff]  ;;  %v9878_v50 = vld [vmem:[#allocation16 + $0x78] sm:$0xff] }
 0xa05   :  { %v5201_v62 = vpop.f32.mrf.mxu1  ;;  %v5497_v42 = vunpack.c.l.b16 %v5322_v2  ;;  %5742 = vmatpush.bf16.msrb.mxu1 %v9878_v50 }
 0xa06   :  { %v5207_v22 = vpack.c.bf16 %v5201_v62, %v5201_v62  ;;  %v9867_v62 = vld [vmem:[#allocation16 + $0x20] sm:$0xff] }
 0xa07   :  { %5726 = vmatpush.bf16.msra.mxu0 %v9868_v61 }
 0xa08   :  { %v5467_v18 = vunpack.c.l.b16 %v5207_v22  ;;  %v12396_v46 = vpop.f32.mrf.mxu3 }
 0xa09   :  { %5743 = vmatpush.bf16.msrb.mxu1 %v9877_v11 }
 0xa0a   :  { %v5315_v19 = vpop.f32.mrf.mxu0  ;;  %v5469_v63 = vpack.c.b16 %v5467_v18, %v5467_v18 }
 0xa0b   :  { %v5235_v41 = vpop.f32.mrf.mxu2  ;;  %v5323_v36 = vpack.c.bf16 %v5315_v19, %v5315_v19  ;;  %5727 = vmatpush.bf16.msra.mxu0 %v9867_v62  ;;  %v9876_v19 = vld [vmem:[#allocation16 + $0x68] sm:$0xff] }
 0xa0c   :  { %v5244_v24 = vpack.c.bf16 %v5235_v41, %v5235_v41 }
 0xa0d   :  { %v5203_v54 = vpop.f32.mrf.mxu1  ;;  %v5498_v32 = vunpack.c.l.b16 %v5323_v36  ;;  %5744 = vmatpush.bf16.msrb.mxu1 %v9876_v19  ;;  %v9875_v36 = vld [vmem:[#allocation16 + $0x60] sm:$0xff] }
 0xa0e   :  { %v5477_v8 = vunpack.c.l.b16 %v5244_v24  ;;  %v9866_v54 = vld [vmem:[#allocation16 + $0x18] sm:$0xff] }
 0xa0f   :  { %v5500_v6 = vpack.c.b16 %v5498_v32, %v5497_v42  ;;  %5728 = vmatpush.bf16.msra.mxu0 %v9866_v54  ;;  %v9865_v42 = vld [vmem:[#allocation16 + $0x10] sm:$0xff] }
 0xa10   :  { %v5125_v1 = vpop.f32.mrf.mxu3 }
 0xa11   :  { %5502 = vrot.lane.b32.xlu2 %v5500_v6, %s10803_s26  ;;  %5745 = vmatpush.bf16.msrb.mxu1 %v9875_v36 }
 0xa12   :  { %v5318_v20 = vpop.f32.mrf.mxu0 }
 0xa13   :  { %v5237_v9 = vpop.f32.mrf.mxu2  ;;  %v5324_v40 = vpack.c.bf16 %v5318_v20, %v5318_v20  ;;  %5729 = vmatpush.bf16.msra.mxu0 %v9865_v42 }
 0xa14   :  { %v5245_v37 = vpack.c.bf16 %v5237_v9, %v5237_v9  ;;  %v9863_v9 = vld [vmem:[#allocation16] sm:$0xff] }
 0xa15   :  { %v5352_v47 = vpop.f32.mrf.mxu1  ;;  %v5499_v56 = vunpack.c.l.b16 %v5324_v40  ;;  %v9874_v40 = vld [vmem:[#allocation16 + $0x58] sm:$0xff] }
 0xa16   :  { %v5478_v49 = vunpack.c.l.b16 %v5245_v37  ;;  %v5361_v4 = vpack.c.bf16 %v5352_v47, %v5352_v47  ;;  %5746 = vmatpush.bf16.msrb.mxu1 %v9874_v40 }
 0xa17   :  { %v5501_v44 = vpack.c.b16 %v5499_v56, %v5499_v56  ;;  %5730 = vmatpush.bf16.msra.mxu0 %v9864_v25  ;;  %v5128_v56 = vpack.c.bf16 %v12392_v35, %v12392_v35 }
 0xa18   :  { %v5480_v13 = vpack.c.b16 %v5478_v49, %v5477_v8  ;;  %v5509_v5 = vunpack.c.l.b16 %v5361_v4  ;;  %v5274_v41 = vpop.f32.mrf.mxu3  ;;  %v9880_v8 = vld [vmem:[#allocation16 + $0x88] sm:$0xff]  ;;  %v5127_v4 = vpack.c.bf16 %v12389_v21, %v12389_v21 }
 0xa19   :  { %5460 = vrot.lane.b32.xlu2 %v5457_v34, %s10803_s26  ;;  %5766 = vmatpush.bf16.msra.mxu2 %v9880_v8 }
 0xa1a   :  { %5482 = vrot.lane.b32.xlu1 %v5480_v13, %s10807_s17  ;;  %v5320_v48 = vpop.f32.mrf.mxu0 }
 0xa1b   :  { %v5240_v28 = vpop.f32.mrf.mxu2  ;;  %5731 = vmatpush.bf16.msra.mxu0 %v9863_v9  ;;  %v9871_v48 = vld [vmem:[#allocation16 + $0x40] sm:$0xff] }
 0xa1c   :  { %v5246_v51 = vpack.c.bf16 %v5240_v28, %v5240_v28  ;;  %v9873_v28 = vld [vmem:[#allocation16 + $0x50] sm:$0xff] }
 0xa1d   :  { %v5354_v23 = vpop.f32.mrf.mxu1  ;;  %5767 = vmatpush.bf16.msra.mxu2 %v9879_v53  ;;  %5747 = vmatpush.bf16.msrb.mxu1 %v9873_v28 }
 0xa1e   :  { %v5362_v30 = vpack.c.bf16 %v5354_v23, %v5354_v23  ;;  %v5479_v14 = vunpack.c.l.b16 %v5246_v51  ;;  %v9872_v23 = vld [vmem:[#allocation16 + $0x48] sm:$0xff] }
 0xa20   :  { %v5510_v26 = vunpack.c.l.b16 %v5362_v30  ;;  %v5481_v15 = vpack.c.b16 %v5479_v14, %v5479_v14  ;;  %v5276_v2 = vpop.f32.mrf.mxu3  ;;  %v5446_v30 = vunpack.c.l.b16 %v5128_v56 }
 0xa21   :  { %5504 = vrot.lane.b32.xlu2 %v5501_v44, %s10803_s26  ;;  %5748 = vmatpush.bf16.msrb.mxu1 %v9872_v23 }
 0xa22   :  { %v5512_v16 = vpack.c.b16 %v5510_v26, %v5509_v5  ;;  %v5445_v5 = vunpack.c.l.b16 %v5127_v4 }
 0xa23   :  { %v5242_v33 = vpop.f32.mrf.mxu2 }
 0xa24   :  { %5514 = vrot.lane.b32.xlu0 %v5512_v16, %s10772_s11  ;;  %v5448_v26 = vpack.c.b16 %v5446_v30, %v5445_v5 }
 0xa25   :  { %v5357_v45 = vpop.f32.mrf.mxu1  ;;  %5749 = vmatpush.bf16.msrb.mxu1 %v9871_v48 }
 0xa26   :  { %v5363_v39 = vpack.c.bf16 %v5357_v45, %v5357_v45 }
 0xa28   :  { %v5511_v12 = vunpack.c.l.b16 %v5363_v39  ;;  %v12400_v32 = vpop.f32.mrf.mxu3 }
 0xa29   :  { %v5285_v14 = vpack.c.bf16 %v12400_v32, %v12400_v32 }
 0xa2a   :  { %v5513_v31 = vpack.c.b16 %v5511_v12, %v5511_v12 }
 0xa2b   :  { %v5391_v29 = vpop.f32.mrf.mxu2  ;;  %v5491_v50 = vunpack.c.l.b16 %v5285_v14  ;;  %v9138_v14 = vld [vmem:[%s12699_s14 + $0x5c] sm:$0x1] }
 0xa2c   :  { %5472 = vrot.lane.b32.xlu0 %v5469_v63, %s10772_s11  ;;  %v5400_v27 = vpack.c.bf16 %v5391_v29, %v5391_v29 }
 0xa2d   :  { %v5359_v57 = vpop.f32.mrf.mxu1  ;;  %v5493_v62 = vpack.c.b16 %v5491_v50, %v5491_v50 }
 0xa2e   :  { %v5521_v43 = vunpack.c.l.b16 %v5400_v27  ;;  %v5283_v57 = vpack.c.bf16 %v5274_v41, %v5274_v41 }
 0xa30   :  { %v5281_v24 = vpop.f32.mrf.mxu3  ;;  %v5489_v27 = vunpack.c.l.b16 %v5283_v57 }
 0xa33   :  { %v5393_v59 = vpop.f32.mrf.mxu2 }
 0xa34   :  { %v5401_v52 = vpack.c.bf16 %v5393_v59, %v5393_v59  ;;  %5516 = vrot.lane.b32.xlu0 %v5513_v31, %s10772_s11  ;;  %v5284_v31 = vpack.c.bf16 %v5276_v2, %v5276_v2 }
 0xa36   :  { %v5522_v0 = vunpack.c.l.b16 %v5401_v52  ;;  %v5490_v35 = vunpack.c.l.b16 %v5284_v31 }
 0xa38   :  { %v5524_v55 = vpack.c.b16 %v5522_v0, %v5521_v43  ;;  %v5430_v6 = vpop.f32.mrf.mxu3  ;;  %v5492_v43 = vpack.c.b16 %v5490_v35, %v5489_v27  ;;  %v5129_v0 = vpack.c.bf16 %v12396_v46, %v12396_v46 }
 0xa39   :  { %v5439_v37 = vpack.c.bf16 %v5430_v6, %v5430_v6 }
 0xa3a   :  { %5526 = vrot.lane.b32.xlu1 %v5524_v55, %s10807_s17  ;;  %v5447_v38 = vunpack.c.l.b16 %v5129_v0 }
 0xa3b   :  { %v5396_v58 = vpop.f32.mrf.mxu2  ;;  %v5533_v47 = vunpack.c.l.b16 %v5439_v37 }
 0xa3c   :  { %v5402_v3 = vpack.c.bf16 %v5396_v58, %v5396_v58  ;;  %v5449_v61 = vpack.c.b16 %v5447_v38, %v5447_v38  ;;  %v9886_v38 = vld [vmem:[%s12699_s14 + $0x3c] sm:$0xff] }
 0xa3e   :  { %v5523_v10 = vunpack.c.l.b16 %v5402_v3 }
 0xa40   :  { %v5525_v60 = vpack.c.b16 %v5523_v10, %v5523_v10  ;;  %v5432_v49 = vpop.f32.mrf.mxu3 }
 0xa41   :  { %v5440_v20 = vpack.c.bf16 %v5432_v49, %v5432_v49  ;;  %v10097_v49 = vld [vmem:[#allocation17] ss:$0 sm:$0xff] }
 0xa42   :  { %5484 = vrot.lane.b32.xlu1 %v5481_v15, %s10807_s17 }
 0xa43   :  { %v5398_v17 = vpop.f32.mrf.mxu2  ;;  %v5534_v13 = vunpack.c.l.b16 %v5440_v20 }
 0xa45   :  { %v5536_v34 = vpack.c.b16 %v5534_v13, %v5533_v47 }
 0xa47   :  { %9074 = vmatmul.msk.bf16.vlgmr.msra.gmra.mxu2 %vm2305_vm4, %v5536_v34 }
 0xa48   :  { %v5435_v18 = vpop.f32.mrf.mxu3 }
 0xa49   :  { %v5441_v21 = vpack.c.bf16 %v5435_v18, %v5435_v18  ;;  %v9881_v18 = vld [vmem:[%s12699_s14] sm:$0xff] }
 0xa4a   :  { %5528 = vrot.lane.b32.xlu1 %v5525_v60, %s10807_s17 }
 0xa4b   :  { %v5535_v29 = vunpack.c.l.b16 %v5441_v21  ;;  %v9882_v21 = vld [vmem:[%s12699_s14 + $0xc] sm:$0xff] }
 0xa4d   :  { %v5537_v63 = vpack.c.b16 %v5535_v29, %v5535_v29  ;;  %v9102_v29 = vld [vmem:[%s12699_s14 + $0x2c] sm:$0x1] }
 0xa4e   :  { %v5911_v57 = vunpack.c.l.b16 %v9102_v29 }
 0xa50   :  { %v5437_v12 = vpop.f32.mrf.mxu3  ;;  %v5913_v35 = vpack.c.b16 %v5911_v57, %v5911_v57 }
 0xa51   :  { %v9084_v12 = vld [vmem:[%s12699_s14 + $0x14] sm:$0x1] }
 0xa52   :  { %v5833_v27 = vunpack.c.l.b16 %v9084_v12 }
 0xa57   :  { %9075 = vmatmul.msk.bf16.gmra.mxu2 %vm2305_vm4, %v5537_v63  ;;  %v9093_v63 = vld [vmem:[%s12699_s14 + $0x20] sm:$0x1] }
 0xa58   :  { %v5872_v31 = vunpack.c.l.b16 %v9093_v63 }
 0xa5b   :  { %v5459_v44 = vpop.permute.xlu2 %5458 }
 0xa5c   :  { %v5540_v33 = vsel %vm2305_vm4, %v5448_v26, %v5459_v44 }
 0xa6b   :  { %v5503_v52 = vpop.permute.xlu2 %5502 }
 0xa6c   :  { %v5556_v7 = vsel %vm2305_vm4, %v5492_v43, %v5503_v52  ;;  %v5835_v52 = vpack.c.b16 %v5833_v27, %v5833_v27  ;;  %v5785_v43 = vld [vmem:[%s12699_s14 + $0x8] sm:$0x1] }
 0xa6d   :  { %v5791_v0 = vunpack.c.l.b16 %v5785_v43 }
 0xa73   :  { %v5461_v15 = vpop.permute.xlu2 %5460 }
 0xa74   :  { %v5543_v10 = vsel %vm2305_vm4, %v5449_v61, %v5461_v15  ;;  %v9120_v15 = vld [vmem:[%s12699_s14 + $0x44] sm:$0x1]  ;;  %v6067_v61 = vunpack.c.l.b16 %v9138_v14 }
 0xa76   :  { %v5471_v22 = vpop.permute.xlu0 %5470 }
 0xa77   :  { %v5545_v16 = vsel %vm2373_vm8, %v5540_v33, %v5471_v22 }
 0xa7b   :  { %v5505_v11 = vpop.permute.xlu2 %5504 }
 0xa7c   :  { %v5559_v41 = vsel %vm2305_vm4, %v5493_v62, %v5505_v11 }
 0xa8c   :  { %v5483_v45 = vpop.permute.xlu1 %5482 }
 0xa8d   :  { %v5549_v39 = vsel %vm4254_vm11, %v5545_v16, %v5483_v45  ;;  %v9884_v45 = vld [vmem:[%s12699_s14 + $0x24] sm:$0xff] }
 0xa8e   :  { %5732 = vmatmul.bf16.vlgmr.msra.gmra.mxu0 %v5549_v39  ;;  %v9883_v39 = vld [vmem:[%s12699_s14 + $0x18] sm:$0xff] }
 0xa96   :  { %v5515_v59 = vpop.permute.xlu0 %5514 }
 0xa97   :  { %v5561_v51 = vsel %vm2373_vm8, %v5556_v7, %v5515_v59  ;;  %v5874_v59 = vpack.c.b16 %v5872_v31, %v5872_v31  ;;  %v5793_v7 = vpack.c.b16 %v5791_v0, %v5791_v0 }
 0xa9e   :  { %v5473_v3 = vpop.permute.xlu0 %5472 }
 0xa9f   :  { %v5547_v46 = vsel %vm2373_vm8, %v5543_v10, %v5473_v3  ;;  %v9129_v3 = vld [vmem:[%s12699_s14 + $0x50] sm:$0x1]  ;;  %v5989_v10 = vunpack.c.l.b16 %v9120_v15 }
 0xaa0   :  { %v6028_v50 = vunpack.c.l.b16 %v9129_v3 }
 0xaa1   :  { %v5991_v62 = vpack.c.b16 %v5989_v10, %v5989_v10 }
 0xaa6   :  { %v5517_v60 = vpop.permute.xlu0 %5516 }
 0xaa7   :  { %v5563_v2 = vsel %vm2373_vm8, %v5559_v41, %v5517_v60  ;;  %v9889_v41 = vld [vmem:[%s12699_s14 + $0x60] sm:$0xff] }
 0xaac   :  { %v5527_v55 = vpop.permute.xlu1 %5526 }
 0xaad   :  { %v5565_v58 = vsel %vm4254_vm11, %v5561_v51, %v5527_v55  ;;  %v9888_v51 = vld [vmem:[%s12699_s14 + $0x54] sm:$0xff]  ;;  %v9887_v55 = vld [vmem:[%s12699_s14 + $0x48] sm:$0xff] }
 0xaae   :  { %5750 = vmatmul.bf16.vlgmr.msrb.gmra.mxu1 %v5565_v58  ;;  %v9885_v58 = vld [vmem:[%s12699_s14 + $0x30] sm:$0xff] }
 0xab4   :  { %v5485_v1 = vpop.permute.xlu1 %5484 }
 0xab5   :  { %v5552_v17 = vsel %vm4254_vm11, %v5547_v46, %v5485_v1  ;;  %v9111_v46 = vld [vmem:[%s12699_s14 + $0x38] sm:$0x1]  ;;  %v6069_v1 = vpack.c.b16 %v6067_v61, %v6067_v61 }
 0xab6   :  { %5737 = vmatmul.bf16.gmra.mxu0 %v5552_v17  ;;  %v6030_v17 = vpack.c.b16 %v6028_v50, %v6028_v50  ;;  %v5950_v11 = vunpack.c.l.b16 %v9111_v46 }
 0xab8   :  { %v5952_v60 = vpack.c.b16 %v5950_v11, %v5950_v11 }
 0xabc   :  { %v5529_v54 = vpop.permute.xlu1 %5528 }
 0xabd   :  { %v5568_v19 = vsel %vm4254_vm11, %v5563_v2, %v5529_v54  ;;  %v9147_v2 = vld [vmem:[%s12699_s14 + $0x68] sm:$0x1] }
 0xabe   :  { %5755 = vmatmul.bf16.gmra.mxu1 %v5568_v19  ;;  %v6106_v54 = vunpack.c.l.b16 %v9147_v2  ;;  %v9896_v2 = vld [vmem:[#allocation19 + $0x30] sm:$0xff] }
 0xaca   :  { %v5769_v42 = vpop.f32.mrf.mxu2 }
 0xad2   :  { %v5771_v36 = vpop.f32.mrf.mxu2 }
 0xada   :  { %v5774_v32 = vpop.f32.mrf.mxu2 }
 0xae2   :  { %v5776_v24 = vpop.f32.mrf.mxu2 }
 0xb0b   :  { %v5733_v25 = vpop.f32.mrf.mxu0 }
 0xb0c   :  { %v5734_v53 = vadd.f32 %v10097_v49, %v5733_v25 }
 0xb13   :  { %v5735_v9 = vpop.f32.mrf.mxu0 }
 0xb14   :  { %v5736_v47 = vadd.f32 %v10097_v49, %v5735_v9 }
 0xb2b   :  { %v5751_v6 = vpop.f32.mrf.mxu1 }
 0xb2c   :  { %v5752_v4 = vadd.f32 %v5751_v6, %v5734_v53 }
 0xb2e   :  { %v5770_v5 = vadd.f32 %v5769_v42, %v5752_v4 }
 0xb30   :  { %v5778_v33 = vmax.f32 %v5770_v5, 0.0 }
 0xb33   :  { %v5738_v37 = vpop.f32.mrf.mxu0  ;;  %v5753_v8 = vpop.f32.mrf.mxu1 }
 0xb34   :  { %v5739_v20 = vadd.f32 %v10097_v49, %v5738_v37  ;;  %v5754_v13 = vadd.f32 %v5753_v8, %v5736_v47 }
 0xb36   :  { %v5772_v23 = vadd.f32 %v5771_v36, %v5754_v13  ;;  %v6108_v36 = vpack.c.b16 %v6106_v54, %v6106_v54 }
 0xb38   :  { %v5779_v26 = vmax.f32 %v5772_v23, 0.0 }
 0xb3a   :  { %v5781_v16 = vpack.c.bf16 %v5779_v26, %v5778_v33 }
 0xb3b   :  { %v5740_v40 = vpop.f32.mrf.mxu0  ;;  %v5756_v34 = vpop.f32.mrf.mxu1 }
 0xb3c   :  { %v5757_v28 = vadd.f32 %v5756_v34, %v5739_v20 }
 0xb3e   :  { %v5775_v56 = vadd.f32 %v5774_v32, %v5757_v28 }
 0xb40   :  { %v5780_v48 = vmax.f32 %v5775_v56, 0.0 }
 0xb42   :  { %v5782_v30 = vpack.c.bf16 %v5780_v48, %v5780_v48 }
 0xb43   :  { %v5758_v44 = vpop.f32.mrf.mxu1 }
 0xb44   :  { %v5801_v22 = vsel %vm5105_vm13, %v5782_v30, 0 }
 0xb45   :  { %5809 = vmatpush.bf16.msra.mxu3 %v5801_v22  ;;  %5848 = vmatpush.bf16.msrb.mxu0 %v5801_v22 }
 0xb46   :  { %5887 = vmatpush.bf16.msra.mxu1 %v5801_v22  ;;  %5926 = vmatpush.bf16.msrb.mxu2 %v5801_v22 }
 0xb49   :  { %5810 = vmatpush.bf16.msra.mxu3 %v5781_v16  ;;  %5849 = vmatpush.bf16.msrb.mxu0 %v5781_v16 }
 0xb4a   :  { %5888 = vmatpush.bf16.msra.mxu1 %v5781_v16  ;;  %5927 = vmatpush.bf16.msrb.mxu2 %v5781_v16 }
 0xb4c   :  { %9080 = vmatmul.msk.bf16.vlgmr.msra.gmra.mxu3 %vm5098_vm14, %v9881_v18  ;;  %9089 = vmatmul.msk.bf16.vlgmr.msrb.gmra.mxu0 %vm5098_vm14, %v9882_v21 }
 0xb4d   :  { %5965 = vmatpush.bf16.msrb.mxu3 %v5801_v22  ;;  %6004 = vmatpush.bf16.msra.mxu0 %v5801_v22 }
 0xb4e   :  { %6043 = vmatpush.bf16.msrb.mxu1 %v5801_v22  ;;  %6082 = vmatpush.bf16.msra.mxu2 %v5801_v22 }
 0xb4f   :  { %9107 = vmatmul.msk.bf16.vlgmr.msrb.gmra.mxu2 %vm5098_vm14, %v9884_v45  ;;  %9098 = vmatmul.msk.bf16.vlgmr.msra.gmra.mxu1 %vm5098_vm14, %v9883_v39 }
 0xb51   :  { %5966 = vmatpush.bf16.msrb.mxu3 %v5781_v16  ;;  %6005 = vmatpush.bf16.msra.mxu0 %v5781_v16 }
 0xb52   :  { %6044 = vmatpush.bf16.msrb.mxu1 %v5781_v16  ;;  %6083 = vmatpush.bf16.msra.mxu2 %v5781_v16 }
 0xb55   :  { %6121 = vmatpush.bf16.msra.mxu3 %v5801_v22 }
 0xb59   :  { %6122 = vmatpush.bf16.msra.mxu3 %v5781_v16 }
 0xb5c   :  { %9090 = vmatmul.msk.bf16.gmra.mxu0 %vm5098_vm14, %v5835_v52  ;;  %9081 = vmatmul.msk.bf16.gmra.mxu3 %vm5098_vm14, %v5793_v7 }
 0xb5f   :  { %9108 = vmatmul.msk.bf16.gmra.mxu2 %vm5098_vm14, %v5913_v35  ;;  %9099 = vmatmul.msk.bf16.gmra.mxu1 %vm5098_vm14, %v5874_v59 }
 0xb6c   :  { %9125 = vmatmul.msk.bf16.vlgmr.msra.gmra.mxu0 %vm5098_vm14, %v9886_v38  ;;  %9116 = vmatmul.msk.bf16.vlgmr.msrb.gmra.mxu3 %vm5098_vm14, %v9885_v58 }
 0xb6f   :  { %9143 = vmatmul.msk.bf16.vlgmr.msra.gmra.mxu2 %vm5098_vm14, %v9888_v51  ;;  %9134 = vmatmul.msk.bf16.vlgmr.msrb.gmra.mxu1 %vm5098_vm14, %v9887_v55 }
 0xb7c   :  { %9126 = vmatmul.msk.bf16.gmra.mxu0 %vm5098_vm14, %v5991_v62  ;;  %9117 = vmatmul.msk.bf16.gmra.mxu3 %vm5098_vm14, %v5952_v60 }
 0xb7f   :  { %9144 = vmatmul.msk.bf16.gmra.mxu2 %vm5098_vm14, %v6069_v1  ;;  %9135 = vmatmul.msk.bf16.gmra.mxu1 %vm5098_vm14, %v6030_v17  ;;  %v9897_v1 = vld [vmem:[#allocation19 + $0x38] sm:$0xff] }
 0xb80   :  { %6418 = vmatpush.bf16.msrb.mxu0 %v9897_v1 }
 0xb84   :  { %6419 = vmatpush.bf16.msrb.mxu0 %v9896_v2 }
 0xb8c   :  { %9152 = vmatmul.msk.bf16.vlgmr.msra.gmra.mxu3 %vm5098_vm14, %v9889_v41 }
 0xb9c   :  { %9153 = vmatmul.msk.bf16.gmra.mxu3 %vm5098_vm14, %v6108_v36 }
 0xbc9   :  { %v5851_v42 = vpop.f32.mrf.mxu0 }
 0xbca   :  { %v5860_v24 = vpack.c.bf16 %v5851_v42, %v5851_v42 }
 0xbcc   :  { %v5890_v19 = vpop.f32.mrf.mxu1  ;;  %v6147_v8 = vunpack.c.l.b16 %v5860_v24 }
 0xbcd   :  { %v5899_v25 = vpack.c.bf16 %v5890_v19, %v5890_v19 }
 0xbcf   :  { %v6159_v47 = vunpack.c.l.b16 %v5899_v25  ;;  %v12464_v18 = vpop.f32.mrf.mxu3 }
 0xbd1   :  { %v5853_v6 = vpop.f32.mrf.mxu0 }
 0xbd2   :  { %v5929_v32 = vpop.f32.mrf.mxu2  ;;  %v5861_v49 = vpack.c.bf16 %v5853_v6, %v5853_v6 }
 0xbd3   :  { %v5938_v13 = vpack.c.bf16 %v5929_v32, %v5929_v32 }
 0xbd4   :  { %v5892_v9 = vpop.f32.mrf.mxu1  ;;  %v6148_v53 = vunpack.c.l.b16 %v5861_v49 }
 0xbd5   :  { %v5900_v37 = vpack.c.bf16 %v5892_v9, %v5892_v9  ;;  %v6171_v56 = vunpack.c.l.b16 %v5938_v13 }
 0xbd6   :  { %v6150_v28 = vpack.c.b16 %v6148_v53, %v6147_v8  ;;  %v9905_v8 = vld [vmem:[#allocation19 + $0x78] sm:$0xff] }
 0xbd7   :  { %v6160_v20 = vunpack.c.l.b16 %v5900_v37  ;;  %v12466_v0 = vpop.f32.mrf.mxu3  ;;  %v9895_v37 = vld [vmem:[#allocation19 + $0x28] sm:$0xff]  ;;  %6436 = vmatpush.bf16.msra.mxu1 %v9905_v8 }
 0xbd8   :  { %6152 = vrot.lane.b32.xlu2 %v6150_v28, %s10803_s26  ;;  %6420 = vmatpush.bf16.msrb.mxu0 %v9895_v37 }
 0xbd9   :  { %v6162_v34 = vpack.c.b16 %v6160_v20, %v6159_v47  ;;  %v5856_v5 = vpop.f32.mrf.mxu0 }
 0xbda   :  { %v5931_v40 = vpop.f32.mrf.mxu2  ;;  %v5862_v51 = vpack.c.bf16 %v5856_v5, %v5856_v5  ;;  %v9892_v5 = vld [vmem:[#allocation19 + $0x10] sm:$0xff] }
 0xbdb   :  { %v5939_v4 = vpack.c.bf16 %v5931_v40, %v5931_v40  ;;  %6164 = vrot.lane.b32.xlu0 %v6162_v34, %s10772_s11  ;;  %v9894_v40 = vld [vmem:[#allocation19 + $0x20] sm:$0xff]  ;;  %v9904_v34 = vld [vmem:[#allocation19 + $0x70] sm:$0xff] }
 0xbdc   :  { %v5895_v48 = vpop.f32.mrf.mxu1  ;;  %v6149_v46 = vunpack.c.l.b16 %v5862_v51  ;;  %6421 = vmatpush.bf16.msrb.mxu0 %v9894_v40  ;;  %6437 = vmatpush.bf16.msra.mxu1 %v9904_v34  ;;  %v5822_v51 = vpack.c.bf16 %v12466_v0, %v12466_v0 }
 0xbdd   :  { %v6172_v23 = vunpack.c.l.b16 %v5939_v4  ;;  %v5901_v7 = vpack.c.bf16 %v5895_v48, %v5895_v48 }
 0xbde   :  { %v6151_v19 = vpack.c.b16 %v6149_v46, %v6149_v46 }
 0xbdf   :  { %v6174_v30 = vpack.c.b16 %v6172_v23, %v6171_v56  ;;  %v6161_v10 = vunpack.c.l.b16 %v5901_v7  ;;  %v12471_v41 = vpop.f32.mrf.mxu3  ;;  %v9893_v56 = vld [vmem:[#allocation19 + $0x18] sm:$0xff]  ;;  %v9903_v23 = vld [vmem:[#allocation19 + $0x68] sm:$0xff]  ;;  %v5821_v7 = vpack.c.bf16 %v12464_v18, %v12464_v18 }
 0xbe0   :  { %6422 = vmatpush.bf16.msrb.mxu0 %v9893_v56  ;;  %6438 = vmatpush.bf16.msra.mxu1 %v9903_v23 }
 0xbe1   :  { %6176 = vrot.lane.b32.xlu1 %v6174_v30, %s10807_s17  ;;  %v5858_v22 = vpop.f32.mrf.mxu0  ;;  %v6163_v54 = vpack.c.b16 %v6161_v10, %v6161_v10  ;;  %v9902_v30 = vld [vmem:[#allocation19 + $0x60] sm:$0xff] }
 0xbe2   :  { %v5934_v26 = vpop.f32.mrf.mxu2 }
 0xbe3   :  { %v5940_v17 = vpack.c.bf16 %v5934_v26, %v5934_v26  ;;  %v9891_v26 = vld [vmem:[#allocation19 + $0x8] sm:$0xff] }
 0xbe4   :  { %v5897_v44 = vpop.f32.mrf.mxu1  ;;  %6423 = vmatpush.bf16.msrb.mxu0 %v9892_v5  ;;  %6439 = vmatpush.bf16.msra.mxu1 %v9902_v30 }
 0xbe5   :  { %v6173_v36 = vunpack.c.l.b16 %v5940_v17  ;;  %v9901_v44 = vld [vmem:[#allocation19 + $0x58] sm:$0xff] }
 0xbe7   :  { %v6175_v49 = vpack.c.b16 %v6173_v36, %v6173_v36  ;;  %v5819_v13 = vpop.f32.mrf.mxu3 }
 0xbe8   :  { %6424 = vmatpush.bf16.msrb.mxu0 %v9891_v26  ;;  %6440 = vmatpush.bf16.msra.mxu1 %v9901_v44 }
 0xbe9   :  { %v6007_v45 = vpop.f32.mrf.mxu0 }
 0xbea   :  { %v5936_v33 = vpop.f32.mrf.mxu2  ;;  %v6016_v21 = vpack.c.bf16 %v6007_v45, %v6007_v45  ;;  %v9890_v45 = vld [vmem:[#allocation19] sm:$0xff] }
 0xbec   :  { %v6046_v16 = vpop.f32.mrf.mxu1  ;;  %v6191_v31 = vunpack.c.l.b16 %v6016_v21  ;;  %6425 = vmatpush.bf16.msrb.mxu0 %v9890_v45 }
 0xbed   :  { %v6055_v29 = vpack.c.bf16 %v6046_v16, %v6046_v16 }
 0xbef   :  { %v6203_v35 = vunpack.c.l.b16 %v6055_v29  ;;  %v5968_v48 = vpop.f32.mrf.mxu3  ;;  %v9900_v29 = vld [vmem:[#allocation19 + $0x50] sm:$0xff] }
 0xbf0   :  { %6441 = vmatpush.bf16.msra.mxu1 %v9900_v29  ;;  %v10098_v29 = vld [vmem:[#allocation20] ss:$0 sm:$0xff] }
 0xbf1   :  { %v6009_v12 = vpop.f32.mrf.mxu0 }
 0xbf2   :  { %v6085_v39 = vpop.f32.mrf.mxu2  ;;  %v6017_v27 = vpack.c.bf16 %v6009_v12, %v6009_v12  ;;  %v9899_v12 = vld [vmem:[#allocation19 + $0x48] sm:$0xff] }
 0xbf3   :  { %v6094_v43 = vpack.c.bf16 %v6085_v39, %v6085_v39  ;;  %v9907_v39 = vld [vmem:[#allocation19 + $0x88] sm:$0xff] }
 0xbf4   :  { %v6048_v63 = vpop.f32.mrf.mxu1  ;;  %v6192_v52 = vunpack.c.l.b16 %v6017_v27  ;;  %6460 = vmatpush.bf16.msrb.mxu2 %v9907_v39  ;;  %6442 = vmatpush.bf16.msra.mxu1 %v9899_v12 }
 0xbf5   :  { %v6056_v57 = vpack.c.bf16 %v6048_v63, %v6048_v63  ;;  %v6215_v3 = vunpack.c.l.b16 %v6094_v43  ;;  %v9906_v63 = vld [vmem:[#allocation19 + $0x80] sm:$0xff] }
 0xbf6   :  { %v6194_v58 = vpack.c.b16 %v6192_v52, %v6191_v31  ;;  %v9898_v31 = vld [vmem:[#allocation19 + $0x40] sm:$0xff] }
 0xbf7   :  { %v6204_v59 = vunpack.c.l.b16 %v6056_v57  ;;  %v5970_v22 = vpop.f32.mrf.mxu3 }
 0xbf8   :  { %6196 = vrot.lane.b32.xlu2 %v6194_v58, %s10803_s26  ;;  %6461 = vmatpush.bf16.msrb.mxu2 %v9906_v63 }
 0xbf9   :  { %v6206_v38 = vpack.c.b16 %v6204_v59, %v6203_v35  ;;  %v6012_v50 = vpop.f32.mrf.mxu0  ;;  %6443 = vmatpush.bf16.msra.mxu1 %v9898_v31 }
 0xbfa   :  { %v6087_v55 = vpop.f32.mrf.mxu2  ;;  %v6018_v60 = vpack.c.bf16 %v6012_v50, %v6012_v50 }
 0xbfb   :  { %v6095_v14 = vpack.c.bf16 %v6087_v55, %v6087_v55  ;;  %6208 = vrot.lane.b32.xlu0 %v6206_v38, %s10772_s11  ;;  %v6139_v55 = vunpack.c.l.b16 %v5821_v7  ;;  %v6140_v38 = vunpack.c.l.b16 %v5822_v51 }
 0xbfc   :  { %v6051_v61 = vpop.f32.mrf.mxu1  ;;  %v6193_v24 = vunpack.c.l.b16 %v6018_v60 }
 0xbfd   :  { %v6216_v15 = vunpack.c.l.b16 %v6095_v14  ;;  %v6057_v11 = vpack.c.bf16 %v6051_v61, %v6051_v61  ;;  %v6142_v14 = vpack.c.b16 %v6140_v38, %v6139_v55 }
 0xbfe   :  { %v6195_v20 = vpack.c.b16 %v6193_v24, %v6193_v24 }
 0xbff   :  { %v6218_v62 = vpack.c.b16 %v6216_v15, %v6215_v3  ;;  %v6205_v32 = vunpack.c.l.b16 %v6057_v11  ;;  %v5973_v33 = vpop.f32.mrf.mxu3  ;;  %v5978_v11 = vpack.c.bf16 %v5970_v22, %v5970_v22 }
 0xc00   :  { %6154 = vrot.lane.b32.xlu2 %v6151_v19, %s10803_s26 }
 0xc01   :  { %6220 = vrot.lane.b32.xlu1 %v6218_v62, %s10807_s17  ;;  %v6014_v6 = vpop.f32.mrf.mxu0  ;;  %v6207_v47 = vpack.c.b16 %v6205_v32, %v6205_v32  ;;  %v5977_v62 = vpack.c.bf16 %v5968_v48, %v5968_v48 }
 0xc02   :  { %v6090_v42 = vpop.f32.mrf.mxu2 }
 0xc03   :  { %6166 = vrot.lane.b32.xlu0 %v6163_v54, %s10772_s11  ;;  %v6096_v25 = vpack.c.bf16 %v6090_v42, %v6090_v42  ;;  %v6183_v2 = vunpack.c.l.b16 %v5977_v62  ;;  %v6184_v54 = vunpack.c.l.b16 %v5978_v11  ;;  %v5823_v42 = vpack.c.bf16 %v12471_v41, %v12471_v41  ;;  %v6575_v62 = vld [vmem:[#allocation22 + $0x5] sm:$0x1]  ;;  %v6632_v11 = vld [vmem:[#allocation22 + $0x8] sm:$0x1] }
 0xc04   :  { %v6053_v9 = vpop.f32.mrf.mxu1 }
 0xc05   :  { %v6217_v53 = vunpack.c.l.b16 %v6096_v25  ;;  %v6186_v36 = vpack.c.b16 %v6184_v54, %v6183_v2  ;;  %v6141_v9 = vunpack.c.l.b16 %v5823_v42 }
 0xc07   :  { %v6219_v4 = vpack.c.b16 %v6217_v53, %v6217_v53  ;;  %v5975_v16 = vpop.f32.mrf.mxu3 }
 0xc08   :  { %6198 = vrot.lane.b32.xlu2 %v6195_v20, %s10803_s26 }
 0xc09   :  { %6178 = vrot.lane.b32.xlu1 %v6175_v49, %s10807_s17  ;;  %v6143_v49 = vpack.c.b16 %v6141_v9, %v6141_v9 }
 0xc0a   :  { %v6092_v28 = vpop.f32.mrf.mxu2 }
 0xc0b   :  { %6210 = vrot.lane.b32.xlu0 %v6207_v47, %s10772_s11  ;;  %v5979_v47 = vpack.c.bf16 %v5973_v33, %v5973_v33 }
 0xc0d   :  { %v6185_v41 = vunpack.c.l.b16 %v5979_v47  ;;  %v9914_v47 = vld [vmem:[%s12700_s0 + $0x30] sm:$0xff] }
 0xc0f   :  { %v6124_v21 = vpop.f32.mrf.mxu3  ;;  %v6187_v28 = vpack.c.b16 %v6185_v41, %v6185_v41 }
 0xc10   :  { %v6133_v57 = vpack.c.bf16 %v6124_v21, %v6124_v21 }
 0xc11   :  { %6222 = vrot.lane.b32.xlu1 %v6219_v4, %s10807_s17 }
 0xc12   :  { %v6227_v35 = vunpack.c.l.b16 %v6133_v57 }
 0xc17   :  { %v6126_v27 = vpop.f32.mrf.mxu3 }
 0xc18   :  { %v6134_v59 = vpack.c.bf16 %v6126_v27, %v6126_v27 }
 0xc1a   :  { %v6228_v52 = vunpack.c.l.b16 %v6134_v59 }
 0xc1c   :  { %v6230_v43 = vpack.c.b16 %v6228_v52, %v6227_v35 }
 0xc1e   :  { %9226 = vmatmul.msk.bf16.vlgmr.msrb.gmra.mxu2 %vm2305_vm4, %v6230_v43 }
 0xc1f   :  { %v6129_v10 = vpop.f32.mrf.mxu3 }
 0xc20   :  { %v6135_v1 = vpack.c.bf16 %v6129_v10, %v6129_v10  ;;  %v6518_v10 = vld [vmem:[#allocation22 + $0x2] sm:$0x1] }
 0xc22   :  { %v6229_v17 = vunpack.c.l.b16 %v6135_v1  ;;  %v6556_v1 = vld [vmem:[#allocation22 + $0x4] sm:$0x1] }
 0xc24   :  { %v6231_v18 = vpack.c.b16 %v6229_v17, %v6229_v17  ;;  %v6499_v17 = vld [vmem:[#allocation22 + $0x1] sm:$0x1] }
 0xc27   :  { %v6131_v0 = vpop.f32.mrf.mxu3 }
 0xc28   :  { %v6613_v0 = vld [vmem:[#allocation22 + $0x7] sm:$0x1] }
 0xc2e   :  { %9227 = vmatmul.msk.bf16.gmra.mxu2 %vm2305_vm4, %v6231_v18  ;;  %v6594_v18 = vld [vmem:[#allocation22 + $0x6] sm:$0x1] }
 0xc32   :  { %v6153_v58 = vpop.permute.xlu2 %6152 }
 0xc33   :  { %v6234_v15 = vsel %vm2305_vm4, %v6142_v14, %v6153_v58 }
 0xc4d   :  { %v6165_v3 = vpop.permute.xlu0 %6164 }
 0xc4e   :  { %v6239_v61 = vsel %vm2373_vm8, %v6234_v15, %v6165_v3 }
 0xc52   :  { %v6197_v60 = vpop.permute.xlu2 %6196 }
 0xc53   :  { %v6177_v50 = vpop.permute.xlu1 %6176  ;;  %v6250_v32 = vsel %vm2305_vm4, %v6186_v36, %v6197_v60 }
 0xc54   :  { %v6243_v46 = vsel %vm4254_vm11, %v6239_v61, %v6177_v50  ;;  %v6477_v50 = vld [vmem:[#allocation22] sm:$0x1] }
 0xc55   :  { %6426 = vmatmul.bf16.vlgmr.msrb.gmra.mxu0 %v6243_v46  ;;  %v6537_v46 = vld [vmem:[#allocation22 + $0x3] sm:$0x1] }
 0xc5a   :  { %v6155_v37 = vpop.permute.xlu2 %6154 }
 0xc5b   :  { %v6237_v20 = vsel %vm2305_vm4, %v6143_v49, %v6155_v37  ;;  %v9915_v37 = vld [vmem:[%s12700_s0 + $0x38] sm:$0xff] }
 0xc5c   :  { %v9923_v49 = vld [vmem:[%s12700_s0 + $0x78] sm:$0xff] }
 0xc62   :  { %v6199_v34 = vpop.permute.xlu2 %6198 }
 0xc63   :  { %v6253_v56 = vsel %vm2305_vm4, %v6187_v28, %v6199_v34  ;;  %v9913_v28 = vld [vmem:[%s12700_s0 + $0x28] sm:$0xff] }
 0xc6d   :  { %v6209_v19 = vpop.permute.xlu0 %6208 }
 0xc6e   :  { %v6255_v24 = vsel %vm2373_vm8, %v6250_v32, %v6209_v19 }
 0xc73   :  { %v6221_v25 = vpop.permute.xlu1 %6220 }
 0xc74   :  { %v6259_v6 = vsel %vm4254_vm11, %v6255_v24, %v6221_v25 }
 0xc75   :  { %6444 = vmatmul.bf16.vlgmr.msra.gmra.mxu1 %v6259_v6  ;;  %v6167_v8 = vpop.permute.xlu0 %6166 }
 0xc76   :  { %v6241_v53 = vsel %vm2373_vm8, %v6237_v20, %v6167_v8 }
 0xc7b   :  { %v6179_v13 = vpop.permute.xlu1 %6178 }
 0xc7c   :  { %v6246_v40 = vsel %vm4254_vm11, %v6241_v53, %v6179_v13  ;;  %v9922_v53 = vld [vmem:[%s12700_s0 + $0x70] sm:$0xff] }
 0xc7d   :  { %6431 = vmatmul.bf16.gmra.mxu0 %v6246_v40  ;;  %v6211_v4 = vpop.permute.xlu0 %6210 }
 0xc7e   :  { %v6257_v23 = vsel %vm2373_vm8, %v6253_v56, %v6211_v4  ;;  %v9921_v56 = vld [vmem:[%s12700_s0 + $0x68] sm:$0xff] }
 0xc83   :  { %v6223_v48 = vpop.permute.xlu1 %6222 }
 0xc84   :  { %v6262_v5 = vsel %vm4254_vm11, %v6257_v23, %v6223_v48 }
 0xc85   :  { %6449 = vmatmul.bf16.gmra.mxu1 %v6262_v5 }
 0xca1   :  { %v6463_v30 = vpop.f32.mrf.mxu2 }
 0xca9   :  { %v6465_v26 = vpop.f32.mrf.mxu2 }
 0xcb1   :  { %v6468_v44 = vpop.f32.mrf.mxu2 }
 0xcb9   :  { %v6470_v22 = vpop.f32.mrf.mxu2 }
 0xcd2   :  { %v6427_v33 = vpop.f32.mrf.mxu0 }
 0xcd3   :  { %v6428_v57 = vadd.f32 %v10098_v29, %v6427_v33 }
 0xcda   :  { %v6429_v16 = vpop.f32.mrf.mxu0 }
 0xcdb   :  { %v6430_v63 = vadd.f32 %v10098_v29, %v6429_v16 }
 0xcf2   :  { %v6445_v45 = vpop.f32.mrf.mxu1 }
 0xcf3   :  { %v6446_v52 = vadd.f32 %v6445_v45, %v6428_v57  ;;  %v9911_v45 = vld [vmem:[%s12700_s0 + $0x18] sm:$0xff] }
 0xcf5   :  { %v6464_v55 = vadd.f32 %v6463_v30, %v6446_v52  ;;  %v9908_v52 = vld [vmem:[%s12700_s0] sm:$0xff] }
 0xcf7   :  { %v6472_v15 = vmax.f32 %v6464_v55, 0.0  ;;  %v9918_v55 = vld [vmem:[%s12700_s0 + $0x50] sm:$0xff] }
 0xcfa   :  { %v6432_v39 = vpop.f32.mrf.mxu0  ;;  %v6447_v21 = vpop.f32.mrf.mxu1 }
 0xcfb   :  { %v6433_v12 = vadd.f32 %v10098_v29, %v6432_v39  ;;  %v6448_v31 = vadd.f32 %v6447_v21, %v6430_v63  ;;  %v9910_v21 = vld [vmem:[%s12700_s0 + $0x10] sm:$0xff]  ;;  %v9909_v29 = vld [vmem:[%s12700_s0 + $0x8] sm:$0xff] }
 0xcfd   :  { %v6466_v7 = vadd.f32 %v6465_v26, %v6448_v31  ;;  %v9912_v26 = vld [vmem:[%s12700_s0 + $0x20] sm:$0xff] }
 0xcff   :  { %v6473_v58 = vmax.f32 %v6466_v7, 0.0 }
 0xd01   :  { %v6475_v61 = vpack.c.bf16 %v6473_v58, %v6472_v15  ;;  %v9924_v58 = vld [vmem:[%s12700_s0 + $0x80] sm:$0xff] }
 0xd02   :  { %v6434_v27 = vpop.f32.mrf.mxu0  ;;  %v6450_v35 = vpop.f32.mrf.mxu1  ;;  %v9916_v15 = vld [vmem:[%s12700_s0 + $0x40] sm:$0xff] }
 0xd03   :  { %v6451_v59 = vadd.f32 %v6450_v35, %v6433_v12 }
 0xd05   :  { %v6469_v43 = vadd.f32 %v6468_v44, %v6451_v59  ;;  %v9920_v59 = vld [vmem:[%s12700_s0 + $0x60] sm:$0xff] }
 0xd07   :  { %v6474_v51 = vmax.f32 %v6469_v43, 0.0  ;;  %v9919_v43 = vld [vmem:[%s12700_s0 + $0x58] sm:$0xff] }
 0xd09   :  { %v6476_v38 = vpack.c.bf16 %v6474_v51, %v6474_v51  ;;  %v9925_v51 = vld [vmem:[%s12700_s0 + $0x88] sm:$0xff] }
 0xd0a   :  { %v6452_v14 = vpop.f32.mrf.mxu1 }
 0xd0b   :  { %v6482_v3 = vsel %vm5105_vm13, %v6476_v38, 0  ;;  %v9917_v38 = vld [vmem:[%s12700_s0 + $0x48] sm:$0xff] }
 0xd0c   :  { %6490 = vmatpush.bf16.msrb.mxu3 %v6482_v3  ;;  %6528 = vmatpush.bf16.msra.mxu0 %v6482_v3 }
 0xd0d   :  { %6547 = vmatpush.bf16.msrb.mxu1 %v6482_v3  ;;  %6566 = vmatpush.bf16.msra.mxu2 %v6482_v3 }
 0xd10   :  { %6491 = vmatpush.bf16.msrb.mxu3 %v6475_v61  ;;  %6529 = vmatpush.bf16.msra.mxu0 %v6475_v61 }
 0xd11   :  { %6548 = vmatpush.bf16.msrb.mxu1 %v6475_v61  ;;  %6567 = vmatpush.bf16.msra.mxu2 %v6475_v61 }
 0xd13   :  { %9228 = vmatmul.msk.bf16.vlgmr.msrb.gmra.mxu3 %vm5098_vm14, %v6477_v50  ;;  %9230 = vmatmul.msk.bf16.vlgmr.msra.gmra.mxu0 %vm5098_vm14, %v6518_v10 }
 0xd14   :  { %6509 = vmatpush.bf16.msra.mxu3 %v6482_v3  ;;  %6604 = vmatpush.bf16.msrb.mxu0 %v6482_v3 }
 0xd15   :  { %6623 = vmatpush.bf16.msra.mxu1 %v6482_v3  ;;  %6642 = vmatpush.bf16.msrb.mxu2 %v6482_v3 }
 0xd16   :  { %9231 = vmatmul.msk.bf16.vlgmr.msrb.gmra.mxu1 %vm5098_vm14, %v6537_v46  ;;  %9232 = vmatmul.msk.bf16.vlgmr.msra.gmra.mxu2 %vm5098_vm14, %v6556_v1 }
 0xd18   :  { %6510 = vmatpush.bf16.msra.mxu3 %v6475_v61  ;;  %6605 = vmatpush.bf16.msrb.mxu0 %v6475_v61 }
 0xd19   :  { %6624 = vmatpush.bf16.msra.mxu1 %v6475_v61  ;;  %6643 = vmatpush.bf16.msrb.mxu2 %v6475_v61 }
 0xd1c   :  { %6585 = vmatpush.bf16.msrb.mxu3 %v6482_v3  ;;  %6860 = vmatpush.bf16.msra.mxu0 %v9923_v49 }
 0xd1d   :  { %6879 = vmatpush.bf16.msrb.mxu1 %v9925_v51 }
 0xd20   :  { %6586 = vmatpush.bf16.msrb.mxu3 %v6475_v61  ;;  %6861 = vmatpush.bf16.msra.mxu0 %v9922_v53 }
 0xd21   :  { %6880 = vmatpush.bf16.msrb.mxu1 %v9924_v58  ;;  %v9934_v58 = vld [vmem:[#allocation26 + $0x40] sm:$0xff] }
 0xd23   :  { %9229 = vmatmul.msk.bf16.vlgmr.msra.gmra.mxu3 %vm5098_vm14, %v6499_v17  ;;  %9234 = vmatmul.msk.bf16.vlgmr.msrb.gmra.mxu0 %vm5098_vm14, %v6594_v18 }
 0xd24   :  { %6847 = vmatpush.bf16.msra.mxu3 %v9915_v37  ;;  %6862 = vmatpush.bf16.msra.mxu0 %v9921_v56  ;;  %v9941_v56 = vld [vmem:[#allocation26 + $0x78] sm:$0xff] }
 0xd26   :  { %9235 = vmatmul.msk.bf16.vlgmr.msra.gmra.mxu1 %vm5098_vm14, %v6613_v0  ;;  %9236 = vmatmul.msk.bf16.vlgmr.msrb.gmra.mxu2 %vm5098_vm14, %v6632_v11 }
 0xd28   :  { %6848 = vmatpush.bf16.msra.mxu3 %v9914_v47  ;;  %6863 = vmatpush.bf16.msra.mxu0 %v9920_v59 }
 0xd2c   :  { %6849 = vmatpush.bf16.msra.mxu3 %v9913_v28  ;;  %6864 = vmatpush.bf16.msra.mxu0 %v9919_v43  ;;  %v6930_v28 = vld [vmem:[#allocation25 + $0x8] sm:$0xf] }
 0xd30   :  { %6850 = vmatpush.bf16.msra.mxu3 %v9912_v26  ;;  %6865 = vmatpush.bf16.msra.mxu0 %v9918_v55  ;;  %v9930_v26 = vld [vmem:[#allocation26 + $0x20] sm:$0xff] }
 0xd33   :  { %9233 = vmatmul.msk.bf16.vlgmr.msrb.gmra.mxu3 %vm5098_vm14, %v6575_v62 }
 0xd34   :  { %6851 = vmatpush.bf16.msra.mxu3 %v9911_v45  ;;  %6866 = vmatpush.bf16.msra.mxu0 %v9917_v38 }
 0xd38   :  { %6852 = vmatpush.bf16.msra.mxu3 %v9910_v21  ;;  %6867 = vmatpush.bf16.msra.mxu0 %v9916_v15  ;;  %v9936_v21 = vld [vmem:[#allocation26 + $0x50] sm:$0xff] }
 0xd3c   :  { %6853 = vmatpush.bf16.msra.mxu3 %v9909_v29 }
 0xd40   :  { %6854 = vmatpush.bf16.msra.mxu3 %v9908_v52  ;;  %v9926_v52 = vld [vmem:[#allocation26] sm:$0xff] }
 0xd90   :  { %v6531_v60 = vpop.f32.mrf.mxu0 }
 0xd91   :  { %v6535_v2 = vpack.c.bf16 %v6531_v60, %v6531_v60 }
 0xd93   :  { %v6550_v54 = vpop.f32.mrf.mxu1  ;;  %v6656_v42 = vunpack.c.l.b16 %v6535_v2 }
 0xd94   :  { %v6554_v19 = vpack.c.bf16 %v6550_v54, %v6550_v54 }
 0xd95   :  { %v6657_v32 = vpack.c.b16 %v6656_v42, %v6656_v42 }
 0xd96   :  { %v6661_v36 = vunpack.c.l.b16 %v6554_v19  ;;  %v12509_v25 = vpop.f32.mrf.mxu3 }
 0xd97   :  { %6658 = vrot.lane.b32.xlu0 %v6657_v32, %s10772_s11  ;;  %v6497_v50 = vpack.c.bf16 %v12509_v25, %v12509_v25  ;;  %v10099_v25 = vld [vmem:[#allocation23] ss:$0 sm:$0xff] }
 0xd98   :  { %v6662_v24 = vpack.c.b16 %v6661_v36, %v6661_v36  ;;  %v6533_v9 = vpop.f32.mrf.mxu0 }
 0xd99   :  { %v6569_v35 = vpop.f32.mrf.mxu2 }
 0xd9a   :  { %6663 = vrot.lane.b32.xlu1 %v6662_v24, %s10807_s17  ;;  %v6573_v62 = vpack.c.bf16 %v6569_v35, %v6569_v35 }
 0xd9b   :  { %v6552_v6 = vpop.f32.mrf.mxu1 }
 0xd9e   :  { %v6495_v8 = vpop.f32.mrf.mxu3 }
 0xda0   :  { %v6607_v20 = vpop.f32.mrf.mxu0 }
 0xda1   :  { %v6611_v13 = vpack.c.bf16 %v6607_v20, %v6607_v20  ;;  %v6571_v7 = vpop.f32.mrf.mxu2 }
 0xda3   :  { %v6626_v41 = vpop.f32.mrf.mxu1  ;;  %v6671_v34 = vunpack.c.l.b16 %v6611_v13 }
 0xda4   :  { %v6630_v40 = vpack.c.bf16 %v6626_v41, %v6626_v41  ;;  %v6911_v41 = vld [vmem:[#allocation25 + $0x4] sm:$0xf] }
 0xda5   :  { %v6672_v23 = vpack.c.b16 %v6671_v34, %v6671_v34  ;;  %v6949_v34 = vld [vmem:[#allocation25 + $0xc] sm:$0xf] }
 0xda6   :  { %v6676_v4 = vunpack.c.l.b16 %v6630_v40  ;;  %v6512_v5 = vpop.f32.mrf.mxu3  ;;  %v6888_v40 = vld [vmem:[#allocation25] sm:$0xf] }
 0xda7   :  { %v6516_v30 = vpack.c.bf16 %v6512_v5, %v6512_v5  ;;  %6673 = vrot.lane.b32.xlu0 %v6672_v23, %s10772_s11  ;;  %v9932_v23 = vld [vmem:[#allocation26 + $0x30] sm:$0xff]  ;;  %v9931_v5 = vld [vmem:[#allocation26 + $0x28] sm:$0xff] }
 0xda8   :  { %v6677_v48 = vpack.c.b16 %v6676_v4, %v6676_v4  ;;  %v6609_v44 = vpop.f32.mrf.mxu0  ;;  %v9933_v4 = vld [vmem:[#allocation26 + $0x38] sm:$0xff] }
 0xda9   :  { %v6651_v22 = vunpack.c.l.b16 %v6516_v30  ;;  %v6645_v14 = vpop.f32.mrf.mxu2  ;;  %7117 = vmatpush.bf16.msrb.mxu0 %v9933_v4  ;;  %v9939_v30 = vld [vmem:[#allocation26 + $0x68] sm:$0xff]  ;;  %v9938_v44 = vld [vmem:[#allocation26 + $0x60] sm:$0xff] }
 0xdaa   :  { %6678 = vrot.lane.b32.xlu1 %v6677_v48, %s10807_s17  ;;  %v6649_v3 = vpack.c.bf16 %v6645_v14, %v6645_v14  ;;  %v9940_v48 = vld [vmem:[#allocation26 + $0x70] sm:$0xff] }
 0xdab   :  { %v6628_v33 = vpop.f32.mrf.mxu1  ;;  %v6652_v16 = vpack.c.b16 %v6651_v22, %v6651_v22  ;;  %v9929_v22 = vld [vmem:[#allocation26 + $0x18] sm:$0xff] }
 0xdac   :  { %9309 = vmatmul.msk.bf16.vlgmr.msrb.gmra.mxu1 %vm2305_vm4, %v6649_v3  ;;  %v9937_v33 = vld [vmem:[#allocation26 + $0x58] sm:$0xff] }
 0xdad   :  { %6653 = vrot.lane.b32.xlu2 %v6652_v16, %s10803_s26  ;;  %7118 = vmatpush.bf16.msrb.mxu0 %v9932_v23  ;;  %v9960_v23 = vld [vmem:[#allocation29 + $0x70] sm:$0xff] }
 0xdae   :  { %v6514_v39 = vpop.f32.mrf.mxu3 }
 0xdaf   :  { %v9928_v39 = vld [vmem:[#allocation26 + $0x10] sm:$0xff] }
 0xdb1   :  { %v6647_v61 = vpop.f32.mrf.mxu2  ;;  %7119 = vmatpush.bf16.msrb.mxu0 %v9931_v5  ;;  %v9959_v5 = vld [vmem:[#allocation29 + $0x68] sm:$0xff] }
 0xdb5   :  { %7120 = vmatpush.bf16.msrb.mxu0 %v9930_v26 }
 0xdb6   :  { %v6588_v63 = vpop.f32.mrf.mxu3 }
 0xdb7   :  { %v6592_v12 = vpack.c.bf16 %v6588_v63, %v6588_v63 }
 0xdb9   :  { %v6666_v57 = vunpack.c.l.b16 %v6592_v12  ;;  %7121 = vmatpush.bf16.msrb.mxu0 %v9929_v22  ;;  %v9927_v12 = vld [vmem:[#allocation26 + $0x8] sm:$0xff] }
 0xdba   :  { %v9950_v22 = vld [vmem:[#allocation29 + $0x20] sm:$0xff] }
 0xdbb   :  { %v6667_v31 = vpack.c.b16 %v6666_v57, %v6666_v57  ;;  %v9935_v57 = vld [vmem:[#allocation26 + $0x48] sm:$0xff] }
 0xdbd   :  { %6668 = vrot.lane.b32.xlu2 %v6667_v31, %s10803_s26  ;;  %7122 = vmatpush.bf16.msrb.mxu0 %v9928_v39 }
 0xdbe   :  { %v6590_v27 = vpop.f32.mrf.mxu3 }
 0xdc1   :  { %7123 = vmatpush.bf16.msrb.mxu0 %v9927_v12 }
 0xdc5   :  { %7124 = vmatpush.bf16.msrb.mxu0 %v9926_v52 }
 0xe07   :  { %v6654_v10 = vpop.permute.xlu2 %6653 }
 0xe08   :  { %v6682_v46 = vsel %vm2305_vm4, %v6497_v50, %v6654_v10 }
 0xe09   :  { %v6659_v1 = vpop.permute.xlu0 %6658 }
 0xe0a   :  { %v6684_v17 = vsel %vm2373_vm8, %v6682_v46, %v6659_v1 }
 0xe0c   :  { %v6664_v18 = vpop.permute.xlu1 %6663 }
 0xe0d   :  { %v6686_v0 = vsel %vm4254_vm11, %v6684_v17, %v6664_v18  ;;  %v10100_v18 = vld [vmem:[#allocation28] ss:$0 sm:$0xff] }
 0xe0e   :  { %6855 = vmatmul.bf16.vlgmr.msra.gmra.mxu3 %v6686_v0 }
 0xe17   :  { %v6669_v11 = vpop.permute.xlu2 %6668 }
 0xe18   :  { %v6690_v60 = vsel %vm2305_vm4, %v6573_v62, %v6669_v11 }
 0xe19   :  { %v6674_v2 = vpop.permute.xlu0 %6673 }
 0xe1a   :  { %v6692_v54 = vsel %vm2373_vm8, %v6690_v60, %v6674_v2 }
 0xe1c   :  { %v6679_v19 = vpop.permute.xlu1 %6678 }
 0xe1d   :  { %v6694_v42 = vsel %vm4254_vm11, %v6692_v54, %v6679_v19  ;;  %v9943_v19 = vld [vmem:[%s12701_s7 + $0xc] sm:$0xff] }
 0xe1e   :  { %6868 = vmatmul.bf16.vlgmr.msra.gmra.mxu0 %v6694_v42  ;;  %v9945_v42 = vld [vmem:[%s12701_s7 + $0x24] sm:$0xff] }
 0xe29   :  { %v6882_v36 = vpop.f32.mrf.mxu1 }
 0xe31   :  { %v6884_v32 = vpop.f32.mrf.mxu1 }
 0xe32   :  { %v9942_v32 = vld [vmem:[%s12701_s7] sm:$0xff] }
 0xe91   :  { %v6856_v24 = vpop.f32.mrf.mxu3 }
 0xe92   :  { %v6857_v6 = vadd.f32 %v10099_v25, %v6856_v24  ;;  %v9944_v24 = vld [vmem:[%s12701_s7 + $0x18] sm:$0xff]  ;;  %v9386_v25 = vld [vmem:[%s12701_s7 + $0x14] sm:$0x1] }
 0xe99   :  { %v6858_v9 = vpop.f32.mrf.mxu3 }
 0xe9a   :  { %v9404_v9 = vld [vmem:[%s12701_s7 + $0x2c] sm:$0x1] }
 0xe9b   :  { %v6869_v37 = vpop.f32.mrf.mxu0 }
 0xe9c   :  { %v6870_v8 = vadd.f32 %v6869_v37, %v6857_v6  ;;  %v7195_v6 = vunpack.c.l.b16 %v9386_v25  ;;  %v7273_v37 = vunpack.c.l.b16 %v9404_v9 }
 0xe9e   :  { %v6883_v49 = vadd.f32 %v6882_v36, %v6870_v8  ;;  %v7197_v8 = vpack.c.b16 %v7195_v6, %v7195_v6 }
 0xea0   :  { %v6886_v47 = vmax.f32 %v6883_v49, 0.0  ;;  %v7275_v49 = vpack.c.b16 %v7273_v37, %v7273_v37 }
 0xea2   :  { %v6887_v20 = vpack.c.bf16 %v6886_v47, %v6886_v47  ;;  %v7147_v47 = vld [vmem:[%s12701_s7 + $0x8] sm:$0x1] }
 0xea3   :  { %v6871_v53 = vpop.f32.mrf.mxu0 }
 0xea4   :  { %v6894_v13 = vsel %vm5105_vm13, %v6887_v20, 0  ;;  %v7153_v20 = vunpack.c.l.b16 %v7147_v47 }
 0xea5   :  { %6903 = vmatpush.bf16.msra.mxu2 %v6894_v13  ;;  %6922 = vmatpush.bf16.msra.mxu1 %v6894_v13 }
 0xea6   :  { %6960 = vmatpush.bf16.msrb.mxu3 %v6894_v13  ;;  %v7155_v53 = vpack.c.b16 %v7153_v20, %v7153_v20 }
 0xea8   :  { %9311 = vmatmul.msk.bf16.vlgmr.msra.gmra.mxu1 %vm6889_vm15, %v6911_v41  ;;  %9310 = vmatmul.msk.bf16.vlgmr.msra.gmra.mxu2 %vm6889_vm15, %v6888_v40 }
 0xea9   :  { %6941 = vmatpush.bf16.msrb.mxu2 %v6894_v13  ;;  %9313 = vmatmul.msk.bf16.vlgmr.msrb.gmra.mxu3 %vm6889_vm15, %v6949_v34  ;;  %v9395_v13 = vld [vmem:[%s12701_s7 + $0x20] sm:$0x1] }
 0xeaa   :  { %7130 = vmatpush.bf16.msrb.mxu1 %v9941_v56  ;;  %v7234_v41 = vunpack.c.l.b16 %v9395_v13  ;;  %v9953_v34 = vld [vmem:[#allocation29 + $0x38] sm:$0xff]  ;;  %v9952_v56 = vld [vmem:[#allocation29 + $0x30] sm:$0xff] }
 0xeac   :  { %v7236_v40 = vpack.c.b16 %v7234_v41, %v7234_v41 }
 0xeae   :  { %7131 = vmatpush.bf16.msrb.mxu1 %v9940_v48  ;;  %v9951_v48 = vld [vmem:[#allocation29 + $0x28] sm:$0xff] }
 0xeb2   :  { %7132 = vmatpush.bf16.msrb.mxu1 %v9939_v30 }
 0xeb6   :  { %7133 = vmatpush.bf16.msrb.mxu1 %v9938_v44 }
 0xeb8   :  { %9312 = vmatmul.msk.bf16.vlgmr.msrb.gmra.mxu2 %vm6889_vm15, %v6930_v28  ;;  %v9961_v28 = vld [vmem:[#allocation29 + $0x78] sm:$0xff] }
 0xeba   :  { %7134 = vmatpush.bf16.msrb.mxu1 %v9937_v33  ;;  %v9958_v33 = vld [vmem:[#allocation29 + $0x60] sm:$0xff] }
 0xebe   :  { %7135 = vmatpush.bf16.msrb.mxu1 %v9936_v21  ;;  %v9949_v21 = vld [vmem:[#allocation29 + $0x18] sm:$0xff] }
 0xec2   :  { %7136 = vmatpush.bf16.msrb.mxu1 %v9935_v57 }
 0xec6   :  { %7137 = vmatpush.bf16.msrb.mxu1 %v9934_v58 }
 0xf25   :  { %v6924_v16 = vpop.f32.mrf.mxu1 }
 0xf26   :  { %v6928_v45 = vpack.c.bf16 %v6924_v16, %v6924_v16 }
 0xf28   :  { %v6968_v29 = vunpack.c.l.b16 %v6928_v45 }
 0xf2a   :  { %v6969_v63 = vpack.c.b16 %v6968_v29, %v6968_v29  ;;  %v9957_v29 = vld [vmem:[#allocation29 + $0x58] sm:$0xff] }
 0xf2b   :  { %v6905_v31 = vpop.f32.mrf.mxu2 }
 0xf2c   :  { %v6962_v27 = vpop.f32.mrf.mxu3  ;;  %6970 = vrot.lane.b32.xlu2 %v6969_v63, %s10772_s11  ;;  %v6909_v3 = vpack.c.bf16 %v6905_v31, %v6905_v31 }
 0xf2d   :  { %v6966_v35 = vpack.c.bf16 %v6962_v27, %v6962_v27  ;;  %v6926_v59 = vpop.f32.mrf.mxu1 }
 0xf2e   :  { %v9956_v59 = vld [vmem:[#allocation29 + $0x50] sm:$0xff] }
 0xf2f   :  { %v6973_v43 = vunpack.c.l.b16 %v6966_v35  ;;  %v9948_v35 = vld [vmem:[#allocation29 + $0x10] sm:$0xff] }
 0xf31   :  { %v6974_v7 = vpack.c.b16 %v6973_v43, %v6973_v43 }
 0xf33   :  { %6975 = vrot.lane.b32.xlu0 %v6974_v7, %s10772_s11  ;;  %v6907_v51 = vpop.f32.mrf.mxu2 }
 0xf34   :  { %v6964_v55 = vpop.f32.mrf.mxu3 }
 0xf35   :  { %v9947_v55 = vld [vmem:[#allocation29 + $0x8] sm:$0xff] }
 0xf3b   :  { %v6943_v38 = vpop.f32.mrf.mxu2 }
 0xf3c   :  { %v6947_v50 = vpack.c.bf16 %v6943_v38, %v6943_v38  ;;  %v9955_v38 = vld [vmem:[#allocation29 + $0x48] sm:$0xff] }
 0xf43   :  { %v6945_v14 = vpop.f32.mrf.mxu2 }
 0xf86   :  { %v6971_v15 = vpop.permute.xlu2 %6970 }
 0xf87   :  { %v6979_v61 = vsel %vm2373_vm8, %v6909_v3, %v6971_v15 }
 0xf88   :  { %7125 = vmatmul.bf16.vlgmr.msrb.gmra.mxu0 %v6979_v61  ;;  %v9946_v61 = vld [vmem:[#allocation29] sm:$0xff] }
 0xfa5   :  { %v6976_v10 = vpop.permute.xlu0 %6975 }
 0xfa6   :  { %v6983_v46 = vsel %vm2373_vm8, %v6947_v50, %v6976_v10 }
 0xfa7   :  { %7138 = vmatmul.bf16.vlgmr.msrb.gmra.mxu1 %v6983_v46 }
0x1005   :  { %v7126_v1 = vpop.f32.mrf.mxu0 }
0x1006   :  { %v7127_v0 = vadd.f32 %v10100_v18, %v7126_v1 }
0x100d   :  { %v7128_v17 = vpop.f32.mrf.mxu0 }
0x100e   :  { %v9954_v17 = vld [vmem:[#allocation29 + $0x40] sm:$0xff] }
0x1024   :  { %v7139_v62 = vpop.f32.mrf.mxu1 }
0x1025   :  { %v7140_v11 = vadd.f32 %v7139_v62, %v7127_v0 }
0x1027   :  { %v7143_v60 = vmax.f32 %v7140_v11, 0.0 }
0x1029   :  { %v7144_v2 = vpack.c.bf16 %v7143_v60, %v7143_v60 }
0x102b   :  { %v7163_v54 = vsel %vm2447_vm0, %v7144_v2, 0  ;;  %vm8119_vm0 = vcmask 1024  }
0x102c   :  { %7211 = vmatpush.bf16.msra.mxu3 %v7163_v54  ;;  %7289 = vmatpush.bf16.msra.mxu1 %v7163_v54  ;;  %v7141_v36 = vpop.f32.mrf.mxu1 }
0x102d   :  { %7172 = vmatpush.bf16.msra.mxu2 %v7163_v54  ;;  %7250 = vmatpush.bf16.msra.mxu0 %v7163_v54 }
0x102f   :  { %9391 = vmatmul.msk.bf16.vlgmr.msra.gmra.mxu3 %vm2246_vm2, %v9943_v19  ;;  %9409 = vmatmul.msk.bf16.vlgmr.msra.gmra.mxu1 %vm2246_vm2, %v9945_v42 }
0x1030   :  { %9382 = vmatmul.msk.bf16.vlgmr.msra.gmra.mxu2 %vm2246_vm2, %v9942_v32  ;;  %9400 = vmatmul.msk.bf16.vlgmr.msra.gmra.mxu0 %vm2246_vm2, %v9944_v24 }
0x1031   :  { %7491 = vmatpush.bf16.msrb.mxu2 %v9953_v34  ;;  %7509 = vmatpush.bf16.msrb.mxu3 %v9961_v28 }
0x1035   :  { %7492 = vmatpush.bf16.msrb.mxu2 %v9952_v56  ;;  %7510 = vmatpush.bf16.msrb.mxu3 %v9960_v23 }
0x1039   :  { %7493 = vmatpush.bf16.msrb.mxu2 %v9951_v48  ;;  %7511 = vmatpush.bf16.msrb.mxu3 %v9959_v5 }
0x103d   :  { %7494 = vmatpush.bf16.msrb.mxu2 %v9950_v22  ;;  %7512 = vmatpush.bf16.msrb.mxu3 %v9958_v33 }
0x103f   :  { %9392 = vmatmul.msk.bf16.gmra.mxu3 %vm2246_vm2, %v7197_v8  ;;  %9410 = vmatmul.msk.bf16.gmra.mxu1 %vm2246_vm2, %v7275_v49 }
0x1040   :  { %9383 = vmatmul.msk.bf16.gmra.mxu2 %vm2246_vm2, %v7155_v53  ;;  %9401 = vmatmul.msk.bf16.gmra.mxu0 %vm2246_vm2, %v7236_v40 }
0x1041   :  { %7495 = vmatpush.bf16.msrb.mxu2 %v9949_v21  ;;  %7513 = vmatpush.bf16.msrb.mxu3 %v9957_v29 }
0x1045   :  { %7496 = vmatpush.bf16.msrb.mxu2 %v9948_v35  ;;  %7514 = vmatpush.bf16.msrb.mxu3 %v9956_v59 }
0x1049   :  { %7497 = vmatpush.bf16.msrb.mxu2 %v9947_v55  ;;  %7515 = vmatpush.bf16.msrb.mxu3 %v9955_v38  ;;  %v7554_v38 = vld [vmem:[#allocation32 + $0x1] sm:$0x1] }
0x104d   :  { %7498 = vmatpush.bf16.msrb.mxu2 %v9946_v61  ;;  %7516 = vmatpush.bf16.msrb.mxu3 %v9954_v17  ;;  %v9977_v61 = vld [vmem:[#allocation34 + $0x78] sm:$0xff]  ;;  %v9966_v17 = vld [vmem:[#allocation34 + $0x20] sm:$0xff] }
0x10ac   :  { %v7291_v4 = vpop.f32.mrf.mxu1 }
0x10ad   :  { %v7300_v30 = vpack.c.bf16 %v7291_v4, %v7291_v4  ;;  %v7252_v18 = vpop.f32.mrf.mxu0 }
0x10ae   :  { %v7261_v11 = vpack.c.bf16 %v7252_v18, %v7252_v18  ;;  %v9974_v18 = vld [vmem:[#allocation34 + $0x60] sm:$0xff] }
0x10af   :  { %v7334_v16 = vunpack.c.l.b16 %v7300_v30 }
0x10b0   :  { %v7326_v2 = vunpack.c.l.b16 %v7261_v11 }
0x10b2   :  { %v7213_v26 = vpop.f32.mrf.mxu3 }
0x10b3   :  { %v7222_v63 = vpack.c.bf16 %v7213_v26, %v7213_v26  ;;  %v7174_v0 = vpop.f32.mrf.mxu2 }
0x10b4   :  { %v7293_v44 = vpop.f32.mrf.mxu1  ;;  %v7183_v37 = vpack.c.bf16 %v7174_v0, %v7174_v0  ;;  %v9965_v0 = vld [vmem:[#allocation34 + $0x18] sm:$0xff] }
0x10b5   :  { %v7301_v45 = vpack.c.bf16 %v7293_v44, %v7293_v44  ;;  %v7314_v52 = vunpack.c.l.b16 %v7222_v63  ;;  %v7254_v62 = vpop.f32.mrf.mxu0 }
0x10b6   :  { %v7262_v60 = vpack.c.bf16 %v7254_v62, %v7254_v62  ;;  %v7306_v49 = vunpack.c.l.b16 %v7183_v37  ;;  %v9973_v62 = vld [vmem:[#allocation34 + $0x58] sm:$0xff] }
0x10b7   :  { %v7335_v39 = vunpack.c.l.b16 %v7301_v45  ;;  %v10101_v45 = vld [vmem:[#allocation31] ss:$0 sm:$0xff] }
0x10b8   :  { %v7327_v19 = vunpack.c.l.b16 %v7262_v60 }
0x10b9   :  { %v7337_v12 = vpack.c.b16 %v7335_v39, %v7334_v16 }
0x10ba   :  { %v7215_v57 = vpop.f32.mrf.mxu3  ;;  %v7329_v42 = vpack.c.b16 %v7327_v19, %v7326_v2  ;;  %v9972_v19 = vld [vmem:[#allocation34 + $0x50] sm:$0xff] }
0x10bb   :  { %v7223_v31 = vpack.c.bf16 %v7215_v57, %v7215_v57  ;;  %7339 = vrot.lane.b32.xlu2 %v7337_v12, %s10772_s11  ;;  %v7176_v54 = vpop.f32.mrf.mxu2 }
0x10bc   :  { %v7296_v27 = vpop.f32.mrf.mxu1  ;;  %v7184_v8 = vpack.c.bf16 %v7176_v54, %v7176_v54  ;;  %v9964_v54 = vld [vmem:[#allocation34 + $0x10] sm:$0xff] }
0x10bd   :  { %v7315_v43 = vunpack.c.l.b16 %v7223_v31  ;;  %v7302_v7 = vpack.c.bf16 %v7296_v27, %v7296_v27  ;;  %v7257_v25 = vpop.f32.mrf.mxu0 }
0x10be   :  { %v7307_v47 = vunpack.c.l.b16 %v7184_v8  ;;  %v7263_v20 = vpack.c.bf16 %v7257_v25, %v7257_v25 }
0x10bf   :  { %v7317_v51 = vpack.c.b16 %v7315_v43, %v7314_v52  ;;  %v7336_v58 = vunpack.c.l.b16 %v7302_v7 }
0x10c0   :  { %v7309_v53 = vpack.c.b16 %v7307_v47, %v7306_v49  ;;  %v7328_v40 = vunpack.c.l.b16 %v7263_v20  ;;  %v9962_v49 = vld [vmem:[#allocation34] sm:$0xff] }
0x10c1   :  { %7319 = vrot.lane.b32.xlu1 %v7317_v51, %s10772_s11  ;;  %v7338_v10 = vpack.c.b16 %v7336_v58, %v7336_v58  ;;  %v7532_v58 = vld [vmem:[#allocation32] sm:$0x1] }
0x10c2   :  { %v7218_v14 = vpop.f32.mrf.mxu3  ;;  %v7330_v28 = vpack.c.b16 %v7328_v40, %v7328_v40 }
0x10c3   :  { %v7224_v3 = vpack.c.bf16 %v7218_v14, %v7218_v14  ;;  %v7179_v24 = vpop.f32.mrf.mxu2  ;;  %v7592_v14 = vld [vmem:[#allocation32 + $0x3] sm:$0x1] }
0x10c4   :  { %v7298_v15 = vpop.f32.mrf.mxu1  ;;  %v7185_v34 = vpack.c.bf16 %v7179_v24, %v7179_v24  ;;  %v9971_v24 = vld [vmem:[#allocation34 + $0x48] sm:$0xff] }
0x10c5   :  { %v7316_v50 = vunpack.c.l.b16 %v7224_v3  ;;  %v7259_v6 = vpop.f32.mrf.mxu0  ;;  %v7573_v3 = vld [vmem:[#allocation32 + $0x2] sm:$0x1] }
0x10c6   :  { %v7308_v4 = vunpack.c.l.b16 %v7185_v34  ;;  %v9969_v15 = vld [vmem:[#allocation34 + $0x38] sm:$0xff] }
0x10c7   :  { %v7318_v46 = vpack.c.b16 %v7316_v50, %v7316_v50  ;;  %v9968_v50 = vld [vmem:[#allocation34 + $0x30] sm:$0xff] }
0x10c8   :  { %v7310_v48 = vpack.c.b16 %v7308_v4, %v7308_v4  ;;  %v9985_v4 = vld [vmem:[#allocation35 + $0x38] sm:$0xff] }
0x10c9   :  { %7321 = vrot.lane.b32.xlu0 %v7318_v46, %s10772_s11  ;;  %7341 = vrot.lane.b32.xlu1 %v7338_v10, %s10772_s11  ;;  %v9976_v10 = vld [vmem:[#allocation34 + $0x70] sm:$0xff]  ;;  %v9967_v46 = vld [vmem:[#allocation34 + $0x28] sm:$0xff] }
0x10ca   :  { %v7220_v1 = vpop.f32.mrf.mxu3 }
0x10cb   :  { %v7181_v9 = vpop.f32.mrf.mxu2  ;;  %v9975_v1 = vld [vmem:[#allocation34 + $0x68] sm:$0xff] }
0x1115   :  { %v7340_v36 = vpop.permute.xlu2 %7339 }
0x1116   :  { %v7353_v32 = vsel %vm2373_vm8, %v7329_v42, %v7340_v36 }
0x1117   :  { %7517 = vmatmul.bf16.vlgmr.msrb.gmra.mxu3 %v7353_v32  ;;  %v9963_v32 = vld [vmem:[#allocation34 + $0x8] sm:$0xff] }
0x1133   :  { %v7320_v13 = vpop.permute.xlu1 %7319 }
0x1134   :  { %v7345_v41 = vsel %vm2373_vm8, %v7309_v53, %v7320_v13 }
0x1135   :  { %7499 = vmatmul.bf16.vlgmr.msrb.gmra.mxu2 %v7345_v41  ;;  %v9970_v41 = vld [vmem:[#allocation34 + $0x40] sm:$0xff] }
0x113b   :  { %v7342_v56 = vpop.permute.xlu1 %7341  ;;  %v7322_v5 = vpop.permute.xlu0 %7321 }
0x113c   :  { %v7357_v23 = vsel %vm2373_vm8, %v7330_v28, %v7342_v56  ;;  %v7349_v30 = vsel %vm2373_vm8, %v7310_v48, %v7322_v5  ;;  %v9984_v56 = vld [vmem:[#allocation35 + $0x30] sm:$0xff]  ;;  %v9982_v48 = vld [vmem:[#allocation35 + $0x20] sm:$0xff]  ;;  %v9981_v5 = vld [vmem:[#allocation35 + $0x18] sm:$0xff] }
0x113d   :  { %7522 = vmatmul.bf16.gmra.mxu3 %v7357_v23  ;;  %v9983_v23 = vld [vmem:[#allocation35 + $0x28] sm:$0xff] }
0x1145   :  { %7504 = vmatmul.bf16.gmra.mxu2 %v7349_v30  ;;  %v9980_v30 = vld [vmem:[#allocation35 + $0x10] sm:$0xff] }
0x119a   :  { %v7518_v26 = vpop.f32.mrf.mxu3 }
0x11a2   :  { %v7520_v22 = vpop.f32.mrf.mxu3 }
0x11b8   :  { %v7500_v44 = vpop.f32.mrf.mxu2 }
0x11b9   :  { %v7501_v12 = vadd.f32 %v10101_v45, %v7500_v44 }
0x11bb   :  { %v7519_v35 = vadd.f32 %v7518_v26, %v7501_v12  ;;  %v9990_v12 = vld [vmem:[#allocation37 + $0x20] sm:$0xff] }
0x11bd   :  { %v7527_v51 = vmax.f32 %v7519_v35, 0.0 }
0x11c0   :  { %v7502_v33 = vpop.f32.mrf.mxu2  ;;  %v7523_v16 = vpop.f32.mrf.mxu3 }
0x11c1   :  { %v7503_v39 = vadd.f32 %v10101_v45, %v7502_v33  ;;  %v9979_v33 = vld [vmem:[#allocation35 + $0x8] sm:$0xff] }
0x11c3   :  { %v7521_v31 = vadd.f32 %v7520_v22, %v7503_v39  ;;  %v9993_v39 = vld [vmem:[#allocation37 + $0x38] sm:$0xff] }
0x11c5   :  { %v7528_v52 = vmax.f32 %v7521_v31, 0.0 }
0x11c7   :  { %v7530_v55 = vpack.c.bf16 %v7528_v52, %v7527_v51 }
0x11c8   :  { %v7505_v21 = vpop.f32.mrf.mxu2  ;;  %v7525_v29 = vpop.f32.mrf.mxu3 }
0x11c9   :  { %v7506_v63 = vadd.f32 %v10101_v45, %v7505_v21  ;;  %v9978_v45 = vld [vmem:[#allocation35] sm:$0xff]  ;;  %v9992_v29 = vld [vmem:[#allocation37 + $0x30] sm:$0xff] }
0x11cb   :  { %v7524_v57 = vadd.f32 %v7523_v16, %v7506_v63  ;;  %v9991_v63 = vld [vmem:[#allocation37 + $0x28] sm:$0xff] }
0x11cd   :  { %v7529_v27 = vmax.f32 %v7524_v57, 0.0  ;;  %v9989_v57 = vld [vmem:[#allocation37 + $0x18] sm:$0xff] }
0x11cf   :  { %v7531_v59 = vpack.c.bf16 %v7529_v27, %v7529_v27  ;;  %v9988_v27 = vld [vmem:[#allocation37 + $0x10] sm:$0xff] }
0x11d0   :  { %v7507_v43 = vpop.f32.mrf.mxu2 }
0x11d1   :  { %v7537_v7 = vsel %vm5105_vm13, %v7531_v59, 0 }
0x11d2   :  { %7545 = vmatpush.bf16.msrb.mxu0 %v7537_v7  ;;  %7564 = vmatpush.bf16.msrb.mxu1 %v7537_v7 }
0x11d3   :  { %7583 = vmatpush.bf16.msra.mxu2 %v7537_v7  ;;  %7602 = vmatpush.bf16.msra.mxu3 %v7537_v7 }
0x11d6   :  { %7546 = vmatpush.bf16.msrb.mxu0 %v7530_v55  ;;  %7565 = vmatpush.bf16.msrb.mxu1 %v7530_v55 }
0x11d7   :  { %7584 = vmatpush.bf16.msra.mxu2 %v7530_v55  ;;  %7603 = vmatpush.bf16.msra.mxu3 %v7530_v55  ;;  %v9987_v55 = vld [vmem:[#allocation37 + $0x8] sm:$0xff] }
0x11d9   :  { %9476 = vmatmul.msk.bf16.vlgmr.msrb.gmra.mxu1 %vm5098_vm14, %v7554_v38  ;;  %9475 = vmatmul.msk.bf16.vlgmr.msrb.gmra.mxu0 %vm5098_vm14, %v7532_v58  ;;  %v9986_v38 = vld [vmem:[#allocation37] sm:$0xff]  ;;  %v10001_v58 = vld [vmem:[#allocation38 + $0x38] sm:$0xff] }
0x11da   :  { %9478 = vmatmul.msk.bf16.vlgmr.msra.gmra.mxu3 %vm5098_vm14, %v7592_v14  ;;  %9477 = vmatmul.msk.bf16.vlgmr.msra.gmra.mxu2 %vm5098_vm14, %v7573_v3  ;;  %v10000_v14 = vld [vmem:[#allocation38 + $0x30] sm:$0xff]  ;;  %v9999_v3 = vld [vmem:[#allocation38 + $0x28] sm:$0xff] }
0x11db   :  { %7760 = vmatpush.bf16.msra.mxu0 %v9969_v15  ;;  %7773 = vmatpush.bf16.msra.mxu1 %v9977_v61  ;;  %v9998_v15 = vld [vmem:[#allocation38 + $0x20] sm:$0xff]  ;;  %v9997_v61 = vld [vmem:[#allocation38 + $0x18] sm:$0xff] }
0x11dc   :  { %7856 = vmatpush.bf16.msrb.mxu2 %v9985_v4  ;;  %7939 = vmatpush.bf16.msrb.mxu3 %v9993_v39 }
0x11df   :  { %7761 = vmatpush.bf16.msra.mxu0 %v9968_v50  ;;  %7774 = vmatpush.bf16.msra.mxu1 %v9976_v10  ;;  %v9996_v50 = vld [vmem:[#allocation38 + $0x10] sm:$0xff]  ;;  %v10103_v10 = vld [vmem:[%s12703_s8] ss:$0 sm:$0xff] }
0x11e0   :  { %7857 = vmatpush.bf16.msrb.mxu2 %v9984_v56  ;;  %7940 = vmatpush.bf16.msrb.mxu3 %v9992_v29 }
0x11e3   :  { %7762 = vmatpush.bf16.msra.mxu0 %v9967_v46  ;;  %7775 = vmatpush.bf16.msra.mxu1 %v9975_v1 }
0x11e4   :  { %7858 = vmatpush.bf16.msrb.mxu2 %v9983_v23  ;;  %7941 = vmatpush.bf16.msrb.mxu3 %v9991_v63 }
0x11e7   :  { %7763 = vmatpush.bf16.msra.mxu0 %v9966_v17  ;;  %7776 = vmatpush.bf16.msra.mxu1 %v9974_v18 }
0x11e8   :  { %7859 = vmatpush.bf16.msrb.mxu2 %v9982_v48  ;;  %7942 = vmatpush.bf16.msrb.mxu3 %v9990_v12 }
0x11eb   :  { %7764 = vmatpush.bf16.msra.mxu0 %v9965_v0  ;;  %7777 = vmatpush.bf16.msra.mxu1 %v9973_v62  ;;  %v9995_v62 = vld [vmem:[#allocation38 + $0x8] sm:$0xff] }
0x11ec   :  { %7860 = vmatpush.bf16.msrb.mxu2 %v9981_v5  ;;  %7943 = vmatpush.bf16.msrb.mxu3 %v9989_v57 }
0x11ef   :  { %7765 = vmatpush.bf16.msra.mxu0 %v9964_v54  ;;  %7778 = vmatpush.bf16.msra.mxu1 %v9972_v19  ;;  %v10007_v54 = vld [vmem:[#allocation40 + $0x28] sm:$0xff]  ;;  %v10006_v19 = vld [vmem:[#allocation40 + $0x20] sm:$0xff] }
0x11f0   :  { %7861 = vmatpush.bf16.msrb.mxu2 %v9980_v30  ;;  %7944 = vmatpush.bf16.msrb.mxu3 %v9988_v27 }
0x11f3   :  { %7766 = vmatpush.bf16.msra.mxu0 %v9963_v32  ;;  %7779 = vmatpush.bf16.msra.mxu1 %v9971_v24  ;;  %v10104_v32 = vld [vmem:[%s12704_s21] ss:$0 sm:$0xff] }
0x11f4   :  { %7862 = vmatpush.bf16.msrb.mxu2 %v9979_v33  ;;  %7945 = vmatpush.bf16.msrb.mxu3 %v9987_v55 }
0x11f7   :  { %7767 = vmatpush.bf16.msra.mxu0 %v9962_v49  ;;  %7780 = vmatpush.bf16.msra.mxu1 %v9970_v41  ;;  %v10002_v49 = vld [vmem:[#allocation40] sm:$0xff] }
0x11f8   :  { %7863 = vmatpush.bf16.msrb.mxu2 %v9978_v45  ;;  %7946 = vmatpush.bf16.msrb.mxu3 %v9986_v38 }
0x11fb   :  { %8022 = vmatpush.bf16.msrb.mxu0 %v10001_v58 }
0x11ff   :  { %8023 = vmatpush.bf16.msrb.mxu0 %v10000_v14 }
0x1203   :  { %8024 = vmatpush.bf16.msrb.mxu0 %v9999_v3 }
0x1207   :  { %8025 = vmatpush.bf16.msrb.mxu0 %v9998_v15 }
0x120b   :  { %8026 = vmatpush.bf16.msrb.mxu0 %v9997_v61 }
0x120f   :  { %8027 = vmatpush.bf16.msrb.mxu0 %v9996_v50 }
0x1213   :  { %8028 = vmatpush.bf16.msrb.mxu0 %v9995_v62 }
0x1256   :  { %v7567_v11 = vpop.f32.mrf.mxu1  ;;  %v7548_v60 = vpop.f32.mrf.mxu0 }
0x1257   :  { %v7571_v2 = vpack.c.bf16 %v7567_v11, %v7567_v11  ;;  %v7552_v40 = vpack.c.bf16 %v7548_v60, %v7548_v60  ;;  %v9994_v11 = vld [vmem:[#allocation38] sm:$0xff]  ;;  %v10009_v60 = vld [vmem:[#allocation40 + $0x38] sm:$0xff] }
0x1258   :  { %8029 = vmatpush.bf16.msrb.mxu0 %v9994_v11  ;;  %8105 = vmatpush.bf16.msrb.mxu1 %v10009_v60 }
0x1259   :  { %v7611_v42 = vunpack.c.l.b16 %v7571_v2  ;;  %v10008_v2 = vld [vmem:[#allocation40 + $0x30] sm:$0xff] }
0x125b   :  { %v7612_v36 = vpack.c.b16 %v7611_v42, %v7611_v42  ;;  %v10005_v42 = vld [vmem:[#allocation40 + $0x18] sm:$0xff] }
0x125c   :  { %8106 = vmatpush.bf16.msrb.mxu1 %v10008_v2 }
0x125d   :  { %v7605_v25 = vpop.f32.mrf.mxu3  ;;  %7613 = vrot.lane.b32.xlu2 %v7612_v36, %s10772_s11  ;;  %v7586_v9 = vpop.f32.mrf.mxu2  ;;  %v10004_v36 = vld [vmem:[#allocation40 + $0x10] sm:$0xff] }
0x125e   :  { %v7609_v6 = vpack.c.bf16 %v7605_v25, %v7605_v25  ;;  %v7569_v37 = vpop.f32.mrf.mxu1  ;;  %v7550_v8 = vpop.f32.mrf.mxu0  ;;  %v7590_v26 = vpack.c.bf16 %v7586_v9, %v7586_v9 }
0x125f   :  { %v10003_v8 = vld [vmem:[#allocation40 + $0x8] sm:$0xff] }
0x1260   :  { %v7616_v47 = vunpack.c.l.b16 %v7609_v6  ;;  %8107 = vmatpush.bf16.msrb.mxu1 %v10007_v54 }
0x1262   :  { %v7617_v20 = vpack.c.b16 %v7616_v47, %v7616_v47  ;;  %v10105_v47 = vld [vmem:[%s10982_s24] ss:$0 sm:$0xff] }
0x1264   :  { %7618 = vrot.lane.b32.xlu0 %v7617_v20, %s10772_s11  ;;  %s12702_s11 = sld [smem:[#allocation69_spill]]  ;;  %8108 = vmatpush.bf16.msrb.mxu1 %v10006_v19 }
0x1265   :  { %v7607_v53 = vpop.f32.mrf.mxu3  ;;  %v7588_v13 = vpop.f32.mrf.mxu2 }
0x1268   :  { %8109 = vmatpush.bf16.msrb.mxu1 %v10005_v42 }
0x126a   :  { %v10102_v31 = vld [vmem:[%s12702_s11] ss:$0 sm:$0xff] }
0x126c   :  { %8110 = vmatpush.bf16.msrb.mxu1 %v10004_v36 }
0x1270   :  { %8111 = vmatpush.bf16.msrb.mxu1 %v10003_v8 }
0x1274   :  { %8112 = vmatpush.bf16.msrb.mxu1 %v10002_v49 }
0x12b7   :  { %v7614_v34 = vpop.permute.xlu2 %7613 }
0x12b8   :  { %v7622_v28 = vsel %vm2373_vm8, %v7552_v40, %v7614_v34  ;;  %v10106_v34 = vld [vmem:[#allocation2] ss:$0 sm:$0xff] }
0x12b9   :  { %7768 = vmatmul.bf16.vlgmr.msra.gmra.mxu0 %v7622_v28 }
0x12d6   :  { %v7619_v44 = vpop.permute.xlu0 %7618 }
0x12d7   :  { %v7626_v22 = vsel %vm2373_vm8, %v7590_v26, %v7619_v44 }
0x12d8   :  { %7781 = vmatmul.bf16.vlgmr.msra.gmra.mxu1 %v7626_v22 }
0x1336   :  { %v7769_v16 = vpop.f32.mrf.mxu0 }
0x1337   :  { %v7770_v35 = vadd.f32 %v10102_v31, %v7769_v16 }
0x133e   :  { %v7771_v21 = vpop.f32.mrf.mxu0 }
0x1355   :  { %v7782_v59 = vpop.f32.mrf.mxu1 }
0x1356   :  { %v7783_v52 = vadd.f32 %v7782_v59, %v7770_v35 }
0x1358   :  { %v7786_v43 = vmax.f32 %v7783_v52, 0.0 }
0x135a   :  { %v7787_v7 = vpack.c.bf16 %v7786_v43, %v7786_v43 }
0x135c   :  { %7864 = vmatmul.bf16.vlgmr.msrb.gmra.mxu2 %v7787_v7 }
0x135d   :  { %v7784_v51 = vpop.f32.mrf.mxu1 }
0x13df   :  { %v7865_v46 = vpop.f32.mrf.mxu2 }
0x13e0   :  { %v7866_v1 = vadd.f32 %v10103_v10, %v7865_v46 }
0x13e2   :  { %v7869_v17 = vmax.f32 %v7866_v1, 0.0 }
0x13e4   :  { %v7870_v18 = vpack.c.bf16 %v7869_v17, %v7869_v17 }
0x13e6   :  { %7947 = vmatmul.bf16.vlgmr.msrb.gmra.mxu3 %v7870_v18 }
0x13e7   :  { %v7867_v0 = vpop.f32.mrf.mxu2 }
0x1469   :  { %v7948_v24 = vpop.f32.mrf.mxu3 }
0x146a   :  { %v7949_v25 = vadd.f32 %v10104_v32, %v7948_v24 }
0x146c   :  { %v7952_v9 = vmax.f32 %v7949_v25, 0.0 }
0x146e   :  { %v7953_v6 = vpack.c.bf16 %v7952_v9, %v7952_v9 }
0x1470   :  { %8030 = vmatmul.bf16.vlgmr.msrb.gmra.mxu0 %v7953_v6 }
0x1471   :  { %v7950_v37 = vpop.f32.mrf.mxu3 }
0x14ed   :  { %v8031_v20 = vpop.f32.mrf.mxu0 }
0x14ee   :  { %v8032_v53 = vadd.f32 %v10105_v47, %v8031_v20 }
0x14f0   :  { %v8035_v13 = vmax.f32 %v8032_v53, 0.0 }
0x14f2   :  { %v8036_v41 = vpack.c.bf16 %v8035_v13, %v8035_v13 }
0x14f4   :  { %8113 = vmatmul.bf16.vlgmr.msrb.gmra.mxu1 %v8036_v41 }
0x14f5   :  { %v8033_v40 = vpop.f32.mrf.mxu0 }
0x1571   :  { %v8114_v28 = vpop.f32.mrf.mxu1 }
0x1572   :  { %v8115_v4 = vadd.f32 %v10106_v34, %v8114_v28 }
0x1574   :  { %10107 = vtanh.f32 %v8115_v4 }
0x1579   :  { %v8116_v56 = vpop.f32.mrf.mxu1 }
0x157a   :  { %v10108_v23 = vpop.eup %10107 }
0x157b   :  { %8120 = vst.msk [vmem:[%s10995_s25] sm:$0x3] %vm8119_vm0, %v10108_v23 }
0x157c   :  { %8125 = vsyncpa [#allocation4], 1 }
0x157d   :  { %8126 = vsyncpa [#allocation6], 1 }
0x157e   :  { %8127 = vsyncpa [#allocation9], 1 }
0x157f   :  { %8128 = vsyncpa [#allocation12], 1 }
0x1580   :  { %8129 = vsyncpa [#allocation15], 1 }
0x1581   :  { %8130 = vsyncpa [#allocation18], 1 }
0x1582   :  { %8131 = vsyncpa [#allocation21], 1 }
0x1583   :  { %8132 = vsyncpa [#allocation24], 1 }
0x1584   :  { %8133 = vsyncpa [#allocation27], 1 }
0x1585   :  { %8134 = vsyncpa [#allocation30], 1 }
0x1586   :  { %8135 = vsyncpa [#allocation33], 1 }
0x1587   :  { %8136 = vsyncpa [#allocation36], 1 }
0x1588   :  { %8137 = vsyncpa [#allocation39], 1 }

</bundles_post_ra>
